<compile_context>
chip_gen: v6e
topology: v6e:2x2x1
jax: 0.10.0
libtpu: 0.0.40
codegen_flags: <defaults>
</compile_context>

<pallas_src>
import math
from functools import partial

import jax
import jax.numpy as jnp
from jax.experimental import pallas as pl
from jax.experimental.pallas import tpu as pltpu


_LOG_2PI = math.log(2.0 * math.pi)


def _pick_tile(m):
    for t in (1024, 512, 256, 128):
        if m % t == 0:
            return t
    return m


# ----------------------------------------------------------------------------
# Pallas kernels
# ----------------------------------------------------------------------------

def _mm_kernel(x_ref, w_ref, b_ref, o_ref, *, act):
    acc = jnp.dot(x_ref[...], w_ref[...], preferred_element_type=jnp.float32)
    acc = acc + b_ref[...]
    if act == "relu":
        acc = jnp.maximum(acc, 0.0)
    o_ref[...] = acc.astype(o_ref.dtype)


def matmul_bias(x, w, b, act="none", out_dtype=jnp.float32):
    """(M, K) @ (K, N) + b, optional ReLU.  bf16 MXU inputs, f32 accumulate."""
    M, K = x.shape
    K2, N = w.shape
    assert K == K2
    tm = _pick_tile(M)
    grid = (M // tm,)
    return pl.pallas_call(
        partial(_mm_kernel, act=act),
        out_shape=jax.ShapeDtypeStruct((M, N), out_dtype),
        grid=grid,
        in_specs=[
            pl.BlockSpec((tm, K), lambda i: (i, 0)),
            pl.BlockSpec((K, N), lambda i: (0, 0)),
            pl.BlockSpec((1, N), lambda i: (0, 0)),
        ],
        out_specs=pl.BlockSpec((tm, N), lambda i: (i, 0)),
        compiler_params=pltpu.CompilerParams(dimension_semantics=("parallel",)),
    )(x.astype(jnp.bfloat16), w.astype(jnp.bfloat16),
      b.reshape(1, N).astype(jnp.float32))


def _attn_tail_kernel(p_ref, w2_ref, b2_ref, wd_ref, bd_ref, s_ref,
                      m_ref, ns_ref):
    # conv2 (as matmul) + relu
    h = jnp.dot(p_ref[...], w2_ref[...], preferred_element_type=jnp.float32)
    h = jnp.maximum(h + b2_ref[...], 0.0)
    # softmax over the 2 attention logits == sigmoid of their difference
    diff = jnp.sum(h * wd_ref[...], axis=-1, keepdims=True) + bd_ref[...]
    a0 = jax.nn.sigmoid(diff)
    s = s_ref[...]
    mask = s * a0
    m_ref[...] = mask
    ns_ref[...] = s - mask


def attn_conv2_tail(patches, w2, b2, w3, b3, scope_flat):
    M, K = patches.shape
    base = w2.shape[1]
    wd = (w3[:, 0] - w3[:, 1]).reshape(1, base).astype(jnp.float32)
    bd = (b3[0] - b3[1]).reshape(1, 1).astype(jnp.float32)
    tm = _pick_tile(M)
    grid = (M // tm,)
    return pl.pallas_call(
        _attn_tail_kernel,
        out_shape=(jax.ShapeDtypeStruct((M, 1), jnp.float32),
                   jax.ShapeDtypeStruct((M, 1), jnp.float32)),
        grid=grid,
        in_specs=[
            pl.BlockSpec((tm, K), lambda i: (i, 0)),
            pl.BlockSpec((K, base), lambda i: (0, 0)),
            pl.BlockSpec((1, base), lambda i: (0, 0)),
            pl.BlockSpec((1, base), lambda i: (0, 0)),
            pl.BlockSpec((1, 1), lambda i: (0, 0)),
            pl.BlockSpec((tm, 1), lambda i: (i, 0)),
        ],
        out_specs=(pl.BlockSpec((tm, 1), lambda i: (i, 0)),
                   pl.BlockSpec((tm, 1), lambda i: (i, 0))),
        compiler_params=pltpu.CompilerParams(dimension_semantics=("parallel",)),
    )(patches.astype(jnp.bfloat16), w2.astype(jnp.bfloat16),
      b2.reshape(1, base).astype(jnp.float32), wd, bd,
      scope_flat.astype(jnp.float32))


def _enc_tail_kernel(h_ref, w1_ref, b1_ref, wm_ref, bm_ref, ws_ref, bs_ref,
                     e_ref, z_ref, kl_ref):
    h = jnp.dot(h_ref[...], w1_ref[...], preferred_element_type=jnp.float32)
    h = jnp.maximum(h + b1_ref[...], 0.0).astype(jnp.bfloat16)
    qm = jnp.dot(h, wm_ref[...], preferred_element_type=jnp.float32) + bm_ref[...]
    qs = jnp.dot(h, ws_ref[...], preferred_element_type=jnp.float32) + bs_ref[...]
    means = jax.nn.sigmoid(qm) * 6.0 - 3.0
    # clamp keeps log finite if sigmoid underflows (matches torch except in
    # that degenerate case)
    sig = jnp.maximum(jax.nn.sigmoid(qs) * 3.0, 1e-6)
    z_ref[...] = means + sig * e_ref[...]
    kl = -jnp.log(sig) + 0.5 * (sig * sig + means * means) - 0.5
    kl_ref[...] = jnp.sum(kl, axis=1, keepdims=True)


def enc_tail(h_flat, wl1, bl1, wl2, bl2, eps, base):
    N, K1 = h_flat.shape
    N1 = wl1.shape[1]
    wm, ws = wl2[:, :base], wl2[:, base:]
    bm, bs = bl2[:base], bl2[base:]
    return pl.pallas_call(
        _enc_tail_kernel,
        out_shape=(jax.ShapeDtypeStruct((N, base), jnp.float32),
                   jax.ShapeDtypeStruct((N, 1), jnp.float32)),
        grid=(1,),
        in_specs=[
            pl.BlockSpec((N, K1), lambda i: (0, 0)),
            pl.BlockSpec((K1, N1), lambda i: (0, 0)),
            pl.BlockSpec((1, N1), lambda i: (0, 0)),
            pl.BlockSpec((N1, base), lambda i: (0, 0)),
            pl.BlockSpec((1, base), lambda i: (0, 0)),
            pl.BlockSpec((N1, base), lambda i: (0, 0)),
            pl.BlockSpec((1, base), lambda i: (0, 0)),
            pl.BlockSpec((N, base), lambda i: (0, 0)),
        ],
        out_specs=(pl.BlockSpec((N, base), lambda i: (0, 0)),
                   pl.BlockSpec((N, 1), lambda i: (0, 0))),
    )(h_flat.astype(jnp.bfloat16), wl1.astype(jnp.bfloat16),
      bl1.reshape(1, N1).astype(jnp.float32),
      wm.astype(jnp.bfloat16), bm.reshape(1, base).astype(jnp.float32),
      ws.astype(jnp.bfloat16), bs.reshape(1, base).astype(jnp.float32),
      eps.astype(jnp.float32))


def _dec_px_kernel(p_ref, w2_ref, b2_ref, w3_ref, b3_ref, x_ref, m_ref, s_ref,
                   pxr_ref, rec_ref, mp_ref, *, channel):
    h = jnp.dot(p_ref[...], w2_ref[...], preferred_element_type=jnp.float32)
    h = jnp.maximum(h + b2_ref[...], 0.0).astype(jnp.bfloat16)
    dec = jnp.dot(h, w3_ref[...], preferred_element_type=jnp.float32) + b3_ref[...]
    xr = jax.nn.sigmoid(dec)                       # x_recon
    m = m_ref[...]
    inv_s = s_ref[:, 0:1]
    log_s = s_ref[:, 1:2]
    d = (x_ref[...] - xr) * inv_s
    logp = -0.5 * d * d - log_s - 0.5 * _LOG_2PI
    pxr_ref[...] = jnp.sum(m * logp, axis=1, keepdims=True)   # per-pixel
    rec_ref[...] = m * xr                                     # mask * recon
    mp_ref[...] = dec[:, channel - 1:channel]                 # mask logits


def dec_px(patches, w2, b2, w3, b3, x_rep, mask_rep, sig_rep, n, hw, channel):
    M, K = patches.shape
    assert M == n * hw
    base = w2.shape[1]
    return pl.pallas_call(
        partial(_dec_px_kernel, channel=channel),
        out_shape=(jax.ShapeDtypeStruct((M, 1), jnp.float32),
                   jax.ShapeDtypeStruct((M, channel), jnp.float32),
                   jax.ShapeDtypeStruct((M, 1), jnp.float32)),
        grid=(n,),
        in_specs=[
            pl.BlockSpec((hw, K), lambda i: (i, 0)),
            pl.BlockSpec((K, base), lambda i: (0, 0)),
            pl.BlockSpec((1, base), lambda i: (0, 0)),
            pl.BlockSpec((base, channel), lambda i: (0, 0)),
            pl.BlockSpec((1, channel), lambda i: (0, 0)),
            pl.BlockSpec((hw, channel), lambda i: (i, 0)),
            pl.BlockSpec((hw, 1), lambda i: (i, 0)),
            pl.BlockSpec((hw, 2), lambda i: (i, 0)),
        ],
        out_specs=(pl.BlockSpec((hw, 1), lambda i: (i, 0)),
                   pl.BlockSpec((hw, channel), lambda i: (i, 0)),
                   pl.BlockSpec((hw, 1), lambda i: (i, 0))),
        compiler_params=pltpu.CompilerParams(dimension_semantics=("parallel",)),
    )(patches.astype(jnp.bfloat16), w2.astype(jnp.bfloat16),
      b2.reshape(1, base).astype(jnp.float32),
      w3.astype(jnp.bfloat16), b3.reshape(1, channel).astype(jnp.float32),
      x_rep.astype(jnp.float32), mask_rep.astype(jnp.float32),
      sig_rep.astype(jnp.float32))


def _klcat_kernel(p_ref, l_ref, o_ref):
    p = p_ref[...]                                       # (K, HW): HW on lanes
    pn = p * pl.reciprocal(jnp.sum(p, axis=0, keepdims=True), approx=True)
    l = l_ref[...]
    mx = jnp.max(l, axis=0, keepdims=True)
    lse = jnp.log(jnp.sum(jnp.exp(l - mx), axis=0, keepdims=True)) + mx
    logq = l - lse
    logp = jnp.log(jnp.where(pn > 0.0, pn, 1.0))
    t = jnp.where(pn > 0.0, pn * (logp - logq), 0.0)
    o_ref[...] = jnp.sum(jnp.sum(t, axis=0, keepdims=True), axis=1, keepdims=True)


def kl_cat(p_probs, q_logits):
    B, K, P = p_probs.shape
    out = pl.pallas_call(
        _klcat_kernel,
        out_shape=jax.ShapeDtypeStruct((B, 1, 1), jnp.float32),
        grid=(B,),
        in_specs=[pl.BlockSpec((None, K, P), lambda b: (b, 0, 0)),
                  pl.BlockSpec((None, K, P), lambda b: (b, 0, 0))],
        out_specs=pl.BlockSpec((None, 1, 1), lambda b: (b, 0, 0)),
        compiler_params=pltpu.CompilerParams(dimension_semantics=("parallel",)),
    )(p_probs.astype(jnp.float32), q_logits.astype(jnp.float32))
    return out[:, 0, 0]


# ----------------------------------------------------------------------------
# JAX glue: im2col, parameters, sub-network forwards
# ----------------------------------------------------------------------------

def im2col(x_nhwc, kh, kw, stride, pad):
    """Extract conv patches (JAX glue); returns (B*Ho*Wo, kh*kw*C), Ho, Wo."""
    B, H, W, C = x_nhwc.shape
    xp = jnp.pad(x_nhwc, ((0, 0), (pad, pad), (pad, pad), (0, 0)))
    Ho = (H + 2 * pad - kh) // stride + 1
    Wo = (W + 2 * pad - kw) // stride + 1
    cols = []
    for i in range(kh):
        for j in range(kw):
            cols.append(xp[:, i:i + stride * Ho:stride, j:j + stride * Wo:stride, :])
    patches = jnp.concatenate(cols, axis=-1)  # (B, Ho, Wo, kh*kw*C)
    return patches.reshape(B * Ho * Wo, kh * kw * C), Ho, Wo


def _dense(key, k_in, k_out):
    w = jax.random.normal(key, (k_in, k_out), jnp.float32) / math.sqrt(k_in)
    b = jnp.zeros((k_out,), jnp.float32)
    return w, b


def init_params(key, H, W, channel, base):
    ks = jax.random.split(key, 10)
    p = {}
    # AttentionNet(3, base): input = cat(x, scope) -> channel+1 maps, 2 logits out
    p["att_w1"], p["att_b1"] = _dense(ks[0], 9 * (channel + 1), base)
    p["att_w2"], p["att_b2"] = _dense(ks[1], 9 * base, base)
    p["att_w3"], p["att_b3"] = _dense(ks[2], base, 2)
    # EncoderNet(H, W, channel+1, 2*base)
    p["enc_w1"], p["enc_b1"] = _dense(ks[3], 9 * (channel + 1), base)
    p["enc_w2"], p["enc_b2"] = _dense(ks[4], 9 * base, 2 * base)
    p["enc_wl1"], p["enc_bl1"] = _dense(ks[5], (H // 4) * (W // 4) * 2 * base, 256)
    p["enc_wl2"], p["enc_bl2"] = _dense(ks[6], 256, 2 * base)
    # DecoderNet(H, W, base, channel): spatial-broadcast decoder
    p["dec_w1"], p["dec_b1"] = _dense(ks[7], 9 * (base + 2), base)
    p["dec_w2"], p["dec_b2"] = _dense(ks[8], 9 * base, base)
    p["dec_w3"], p["dec_b3"] = _dense(ks[9], base, channel)
    return p


def attention_fwd(p, x_bf, scope):
    B, H, W, _ = x_bf.shape
    inp = jnp.concatenate([x_bf, scope.astype(jnp.bfloat16)], axis=-1)
    h, Ho, Wo = im2col(inp, 3, 3, 1, 1)
    h = matmul_bias(h, p["att_w1"], p["att_b1"], "relu", out_dtype=jnp.bfloat16)
    h = h.reshape(B, Ho, Wo, -1)
    p2, _, _ = im2col(h, 3, 3, 1, 1)
    mask, nscope = attn_conv2_tail(p2, p["att_w2"], p["att_b2"],
                                   p["att_w3"], p["att_b3"],
                                   scope.reshape(B * H * W, 1))
    return mask.reshape(B, H, W, 1), nscope.reshape(B, H, W, 1)


def encoder_conv(p, enc_in_bf):
    n = enc_in_bf.shape[0]
    h, Ho, Wo = im2col(enc_in_bf, 3, 3, 2, 1)
    h = matmul_bias(h, p["enc_w1"], p["enc_b1"], "relu", out_dtype=jnp.bfloat16)
    h = h.reshape(n, Ho, Wo, -1)
    h, Ho, Wo = im2col(h, 3, 3, 2, 1)
    h = matmul_bias(h, p["enc_w2"], p["enc_b2"], "relu", out_dtype=jnp.bfloat16)
    return h.reshape(n, -1)


def decoder_conv1(p, z, H, W, coords):
    n, base = z.shape
    zb = jnp.broadcast_to(z.astype(jnp.bfloat16)[:, None, None, :], (n, H, W, base))
    cb = jnp.broadcast_to(coords.astype(jnp.bfloat16)[None], (n, H, W, 2))
    hin = jnp.concatenate([zb, cb], axis=-1)
    h, _, _ = im2col(hin, 3, 3, 1, 1)
    h = matmul_bias(h, p["dec_w1"], p["dec_b1"], "relu", out_dtype=jnp.bfloat16)
    h = h.reshape(n, H, W, -1)
    patches, _, _ = im2col(h, 3, 3, 1, 1)
    return patches


# ----------------------------------------------------------------------------
# Monet forward
# ----------------------------------------------------------------------------

def monet_forward(params, x_nchw, noise_key, *, base, channel,
                  beta=0.5, gamma=0.25, num_slots=7):
    x = jnp.transpose(x_nchw, (0, 2, 3, 1)).astype(jnp.float32)   # NHWC
    B, H, W, C = x.shape
    assert H == W, "categorical-KL transpose in the reference assumes H == W"
    K = num_slots
    HW = H * W
    x_bf = x.astype(jnp.bfloat16)

    # ---- attention: sequential scope recurrence over slots
    scope = jnp.ones((B, H, W, 1), jnp.float32)
    masks_list = []
    for _ in range(K - 1):
        mask, scope = attention_fwd(params, x_bf, scope)
        masks_list.append(mask)
    masks_list.append(scope)
    masks_kb = jnp.stack(masks_list, axis=0)                 # (K, B, H, W, 1)

    # ---- all slots batched: encoder convs + MLP + reparam sample + KL(z)
    mask_rep = masks_kb.reshape(K * B, H, W, 1)
    x_rep_bf = jnp.broadcast_to(x_bf[None], (K, B, H, W, C)).reshape(K * B, H, W, C)
    enc_in = jnp.concatenate([x_rep_bf, mask_rep.astype(jnp.bfloat16)], axis=-1)
    h_enc = encoder_conv(params, enc_in)                     # (K*B, hidden)
    eps = jax.random.normal(noise_key, (K * B, base), jnp.float32)
    z, kl_z = enc_tail(h_enc, params["enc_wl1"], params["enc_bl1"],
                       params["enc_wl2"], params["enc_bl2"], eps, base)

    # ---- all slots batched: decoder + masked Gaussian log-likelihood
    ys = jnp.linspace(-1.0, 1.0, H)
    xs = jnp.linspace(-1.0, 1.0, W)
    gy, gx = jnp.meshgrid(ys, xs, indexing="ij")
    coords = jnp.stack([gy, gx], axis=-1).astype(jnp.float32)
    patches = decoder_conv1(params, z, H, W, coords)         # (K*B*HW, 9*base)

    x_flat_rep = jnp.broadcast_to(x[None], (K, B, H, W, C)).reshape(K * B * HW, C)
    mask_flat = mask_rep.reshape(K * B * HW, 1)
    slot_idx = jnp.arange(K * B) // B
    sigma = jnp.where(slot_idx == 0, 0.2, 0.8).astype(jnp.float32)
    sig_rows = jnp.stack([1.0 / sigma, jnp.log(sigma)], axis=1)   # (K*B, 2)
    sig_rep = jnp.broadcast_to(sig_rows[:, None, :],
                               (K * B, HW, 2)).reshape(K * B * HW, 2)

    px_row, rec, mpred = dec_px(patches, params["dec_w2"], params["dec_b2"],
                                params["dec_w3"], params["dec_b3"],
                                x_flat_rep, mask_flat, sig_rep,
                                K * B, HW, channel)

    p_x = jnp.sum(px_row.reshape(K, B, HW), axis=-1)         # (K, B)
    kl_z = kl_z.reshape(K, B)
    loss = jnp.sum(-p_x + beta * kl_z, axis=0)               # (B,)

    full_recon = jnp.sum(rec.reshape(K, B, H, W, C), axis=0)      # (B,H,W,C)
    masks_bkhw = jnp.transpose(masks_kb[..., 0], (1, 0, 2, 3))    # (B,K,H,W)

    # categorical mask-KL; torch transposes H/W on the probs side
    p_probs = jnp.swapaxes(masks_bkhw, 2, 3).reshape(B, K, HW)
    q_logits = jnp.transpose(mpred.reshape(K, B, HW), (1, 0, 2))
    kl_masks = kl_cat(p_probs, q_logits)
    loss = loss + gamma * kl_masks

    return {
        "loss": loss,
        "masks": masks_bkhw,                                       # (B,K,H,W)
        "reconstructions": jnp.transpose(full_recon, (0, 3, 1, 2)),  # (B,C,H,W)
    }


# ----------------------------------------------------------------------------
# Driver
# ----------------------------------------------------------------------------

if __name__ == "__main__":
    B, CH, H, W = 2, 3, 16, 16     # AttentionNet(3, base) implies 3-channel input
    BASE = 32

    root = jax.random.PRNGKey(0)
    k_param, k_input, k_noise = jax.random.split(root, 3)
    params = init_params(k_param, H, W, CH, BASE)
    x = jax.random.uniform(k_input, (B, CH, H, W), jnp.float32)

    fwd = jax.jit(partial(monet_forward, base=BASE, channel=CH))
    out = fwd(params, x, k_noise)
    jax.block_until_ready(out)

    assert out["loss"].shape == (B,)
    assert out["masks"].shape == (B, 7, H, W)
    assert out["reconstructions"].shape == (B, CH, H, W)
    assert bool(jnp.all(jnp.isfinite(out["loss"])))
    print("KERNEL_OK")
</pallas_src>

<mosaic_0001>
module attributes {stable_mosaic.version = 11 : i64} {
  func.func @_mm_kernel(%arg0: i32, %arg1: memref<512x36xbf16, #tpu.memory_space<vmem>>, %arg2: memref<36x32xbf16, #tpu.memory_space<vmem>>, %arg3: memref<1x32xf32, #tpu.memory_space<vmem>>, %arg4: memref<512x32xbf16, #tpu.memory_space<vmem>>) attributes {dimension_semantics = [#tpu.dimension_semantics<parallel>], iteration_bounds = array<i64: 1>, scalar_prefetch = 0 : i64, scratch_operands = 0 : i64, tpu.core_type = #tpu.core_type<tc>, window_params = [{transform_indices = @transform_0, window_bounds = array<i64: 512, 36>}, {pipeline_mode = #tpu.pipeline_mode<synchronous>, transform_indices = @transform_1, window_bounds = array<i64: 36, 32>}, {pipeline_mode = #tpu.pipeline_mode<synchronous>, transform_indices = @transform_2, window_bounds = array<i64: 1, 32>}, {transform_indices = @transform_3, window_bounds = array<i64: 512, 32>}]} {
    %c0 = arith.constant 0 : index
    %c0_0 = arith.constant 0 : index
    %0 = vector.load %arg1[%c0, %c0_0] : memref<512x36xbf16, #tpu.memory_space<vmem>>, vector<512x36xbf16>
    %c0_1 = arith.constant 0 : index
    %c0_2 = arith.constant 0 : index
    %1 = vector.load %arg2[%c0_1, %c0_2] : memref<36x32xbf16, #tpu.memory_space<vmem>>, vector<36x32xbf16>
    %cst = arith.constant dense<0.000000e+00> : vector<512x32xf32>
    %2 = tpu.matmul %0, %1, %cst {dimension_numbers = #tpu.dot_dimension_numbers<[1], [0], [0], [1], [0, 0, 1, 1], [], []>} : vector<512x36xbf16>, vector<36x32xbf16>, vector<512x32xf32> -> vector<512x32xf32>
    %c0_3 = arith.constant 0 : index
    %c0_4 = arith.constant 0 : index
    %3 = vector.load %arg3[%c0_3, %c0_4] : memref<1x32xf32, #tpu.memory_space<vmem>>, vector<1x32xf32>
    %4 = vector.broadcast %3 : vector<1x32xf32> to vector<512x32xf32>
    %5 = arith.addf %2, %4 : vector<512x32xf32>
    %cst_5 = arith.constant 0.000000e+00 : f32
    %6 = vector.broadcast %cst_5 : f32 to vector<512x32xf32>
    %7 = arith.maximumf %5, %6 : vector<512x32xf32>
    %8 = arith.truncf %7 : vector<512x32xf32> to vector<512x32xbf16>
    %c0_6 = arith.constant 0 : index
    %c0_7 = arith.constant 0 : index
    %9 = vector.load %arg4[%c0_6, %c0_7] : memref<512x32xbf16, #tpu.memory_space<vmem>>, vector<512x32xbf16>
    tpu.vector_store %arg4[%c0_6, %c0_7], %8 {strides = array<i32>} : memref<512x32xbf16, #tpu.memory_space<vmem>>, vector<512x32xbf16>,
    return
  }
  func.func @transform_0(%arg0: i32) -> (i32, i32) {
    %c0_i32 = arith.constant 0 : i32
    %c0_i32_0 = arith.constant 0 : i32
    return %arg0, %c0_i32 : i32, i32
  }
  func.func @transform_1(%arg0: i32) -> (i32, i32) {
    %c0_i32 = arith.constant 0 : i32
    %c0_i32_0 = arith.constant 0 : i32
    %c0_i32_1 = arith.constant 0 : i32
    return %c0_i32, %c0_i32_0 : i32, i32
  }
  func.func @transform_2(%arg0: i32) -> (i32, i32) {
    %c0_i32 = arith.constant 0 : i32
    %c0_i32_0 = arith.constant 0 : i32
    %c0_i32_1 = arith.constant 0 : i32
    return %c0_i32, %c0_i32_0 : i32, i32
  }
  func.func @transform_3(%arg0: i32) -> (i32, i32) {
    %c0_i32 = arith.constant 0 : i32
    %c0_i32_0 = arith.constant 0 : i32
    return %arg0, %c0_i32 : i32, i32
  }
}

module attributes {stable_mosaic.version = 11 : i64} {
  func.func @_attn_tail_kernel(%arg0: i32, %arg1: memref<512x288xbf16, #tpu.memory_space<vmem>>, %arg2: memref<288x32xbf16, #tpu.memory_space<vmem>>, %arg3: memref<1x32xf32, #tpu.memory_space<vmem>>, %arg4: memref<1x32xf32, #tpu.memory_space<vmem>>, %arg5: memref<1x1xf32, #tpu.memory_space<vmem>>, %arg6: memref<512x1xf32, #tpu.memory_space<vmem>>, %arg7: memref<512x1xf32, #tpu.memory_space<vmem>>, %arg8: memref<512x1xf32, #tpu.memory_space<vmem>>) attributes {dimension_semantics = [#tpu.dimension_semantics<parallel>], iteration_bounds = array<i64: 1>, scalar_prefetch = 0 : i64, scratch_operands = 0 : i64, tpu.core_type = #tpu.core_type<tc>, window_params = [{transform_indices = @transform_0, window_bounds = array<i64: 512, 288>}, {pipeline_mode = #tpu.pipeline_mode<synchronous>, transform_indices = @transform_1, window_bounds = array<i64: 288, 32>}, {pipeline_mode = #tpu.pipeline_mode<synchronous>, transform_indices = @transform_2, window_bounds = array<i64: 1, 32>}, {pipeline_mode = #tpu.pipeline_mode<synchronous>, transform_indices = @transform_3, window_bounds = array<i64: 1, 32>}, {pipeline_mode = #tpu.pipeline_mode<synchronous>, transform_indices = @transform_4, window_bounds = array<i64: 1, 1>}, {transform_indices = @transform_5, window_bounds = array<i64: 512, 1>}, {transform_indices = @transform_6, window_bounds = array<i64: 512, 1>}, {transform_indices = @transform_7, window_bounds = array<i64: 512, 1>}]} {
    %c0 = arith.constant 0 : index
    %c0_0 = arith.constant 0 : index
    %0 = vector.load %arg1[%c0, %c0_0] : memref<512x288xbf16, #tpu.memory_space<vmem>>, vector<512x288xbf16>
    %c0_1 = arith.constant 0 : index
    %c0_2 = arith.constant 0 : index
    %1 = vector.load %arg2[%c0_1, %c0_2] : memref<288x32xbf16, #tpu.memory_space<vmem>>, vector<288x32xbf16>
    %cst = arith.constant dense<0.000000e+00> : vector<512x32xf32>
    %2 = tpu.matmul %0, %1, %cst {dimension_numbers = #tpu.dot_dimension_numbers<[1], [0], [0], [1], [0, 0, 1, 1], [], []>} : vector<512x288xbf16>, vector<288x32xbf16>, vector<512x32xf32> -> vector<512x32xf32>
    %c0_3 = arith.constant 0 : index
    %c0_4 = arith.constant 0 : index
    %3 = vector.load %arg3[%c0_3, %c0_4] : memref<1x32xf32, #tpu.memory_space<vmem>>, vector<1x32xf32>
    %4 = vector.broadcast %3 : vector<1x32xf32> to vector<512x32xf32>
    %5 = arith.addf %2, %4 : vector<512x32xf32>
    %cst_5 = arith.constant 0.000000e+00 : f32
    %6 = vector.broadcast %cst_5 : f32 to vector<512x32xf32>
    %7 = arith.maximumf %5, %6 : vector<512x32xf32>
    %c0_6 = arith.constant 0 : index
    %c0_7 = arith.constant 0 : index
    %8 = vector.load %arg4[%c0_6, %c0_7] : memref<1x32xf32, #tpu.memory_space<vmem>>, vector<1x32xf32>
    %9 = vector.broadcast %8 : vector<1x32xf32> to vector<512x32xf32>
    %10 = arith.mulf %7, %9 : vector<512x32xf32>
    %cst_8 = arith.constant dense<0.000000e+00> : vector<512xf32>
    %11 = vector.multi_reduction <add>, %10, %cst_8 [1] : vector<512x32xf32> to vector<512xf32>
    %12 = vector.shape_cast %11 : vector<512xf32> to vector<512x1xf32>
    %c0_9 = arith.constant 0 : index
    %c0_10 = arith.constant 0 : index
    %13 = vector.load %arg5[%c0_9, %c0_10] : memref<1x1xf32, #tpu.memory_space<vmem>>, vector<1x1xf32>
    %14 = vector.broadcast %13 : vector<1x1xf32> to vector<512x1xf32>
    %15 = arith.addf %12, %14 : vector<512x1xf32>
    %16 = arith.negf %15 : vector<512x1xf32>
    %17 = math.exp %16 : vector<512x1xf32>
    %cst_11 = arith.constant 1.000000e+00 : f32
    %18 = vector.broadcast %cst_11 : f32 to vector<512x1xf32>
    %19 = arith.addf %18, %17 : vector<512x1xf32>
    %20 = arith.divf %18, %19 : vector<512x1xf32>
    %c0_12 = arith.constant 0 : index
    %c0_13 = arith.constant 0 : index
    %21 = vector.load %arg6[%c0_12, %c0_13] : memref<512x1xf32, #tpu.memory_space<vmem>>, vector<512x1xf32>
    %22 = arith.mulf %21, %20 : vector<512x1xf32>
    %c0_14 = arith.constant 0 : index
    %c0_15 = arith.constant 0 : index
    %23 = vector.load %arg7[%c0_14, %c0_15] : memref<512x1xf32, #tpu.memory_space<vmem>>, vector<512x1xf32>
    tpu.vector_store %arg7[%c0_14, %c0_15], %22 {strides = array<i32>} : memref<512x1xf32, #tpu.memory_space<vmem>>, vector<512x1xf32>,
    %24 = arith.subf %21, %22 : vector<512x1xf32>
    %c0_16 = arith.constant 0 : index
    %c0_17 = arith.constant 0 : index
    %25 = vector.load %arg8[%c0_16, %c0_17] : memref<512x1xf32, #tpu.memory_space<vmem>>, vector<512x1xf32>
    tpu.vector_store %arg8[%c0_16, %c0_17], %24 {strides = array<i32>} : memref<512x1xf32, #tpu.memory_space<vmem>>, vector<512x1xf32>,
    return
  }
  func.func @transform_0(%arg0: i32) -> (i32, i32) {
    %c0_i32 = arith.constant 0 : i32
    %c0_i32_0 = arith.constant 0 : i32
    return %arg0, %c0_i32 : i32, i32
  }
  func.func @transform_1(%arg0: i32) -> (i32, i32) {
    %c0_i32 = arith.constant 0 : i32
    %c0_i32_0 = arith.constant 0 : i32
    %c0_i32_1 = arith.constant 0 : i32
    return %c0_i32, %c0_i32_0 : i32, i32
  }
  func.func @transform_2(%arg0: i32) -> (i32, i32) {
    %c0_i32 = arith.constant 0 : i32
    %c0_i32_0 = arith.constant 0 : i32
    %c0_i32_1 = arith.constant 0 : i32
    return %c0_i32, %c0_i32_0 : i32, i32
  }
  func.func @transform_3(%arg0: i32) -> (i32, i32) {
    %c0_i32 = arith.constant 0 : i32
    %c0_i32_0 = arith.constant 0 : i32
    %c0_i32_1 = arith.constant 0 : i32
    return %c0_i32, %c0_i32_0 : i32, i32
  }
  func.func @transform_4(%arg0: i32) -> (i32, i32) {
    %c0_i32 = arith.constant 0 : i32
    %c0_i32_0 = arith.constant 0 : i32
    %c0_i32_1 = arith.constant 0 : i32
    return %c0_i32, %c0_i32_0 : i32, i32
  }
  func.func @transform_5(%arg0: i32) -> (i32, i32) {
    %c0_i32 = arith.constant 0 : i32
    %c0_i32_0 = arith.constant 0 : i32
    return %arg0, %c0_i32 : i32, i32
  }
  func.func @transform_6(%arg0: i32) -> (i32, i32) {
    %c0_i32 = arith.constant 0 : i32
    %c0_i32_0 = arith.constant 0 : i32
    return %arg0, %c0_i32 : i32, i32
  }
  func.func @transform_7(%arg0: i32) -> (i32, i32) {
    %c0_i32 = arith.constant 0 : i32
    %c0_i32_0 = arith.constant 0 : i32
    return %arg0, %c0_i32 : i32, i32
  }
}

module attributes {stable_mosaic.version = 11 : i64} {
  func.func @_mm_kernel(%arg0: i32, %arg1: memref<128x36xbf16, #tpu.memory_space<vmem>>, %arg2: memref<36x32xbf16, #tpu.memory_space<vmem>>, %arg3: memref<1x32xf32, #tpu.memory_space<vmem>>, %arg4: memref<128x32xbf16, #tpu.memory_space<vmem>>) attributes {dimension_semantics = [#tpu.dimension_semantics<parallel>], iteration_bounds = array<i64: 7>, scalar_prefetch = 0 : i64, scratch_operands = 0 : i64, tpu.core_type = #tpu.core_type<tc>, window_params = [{transform_indices = @transform_0, window_bounds = array<i64: 128, 36>}, {pipeline_mode = #tpu.pipeline_mode<synchronous>, transform_indices = @transform_1, window_bounds = array<i64: 36, 32>}, {pipeline_mode = #tpu.pipeline_mode<synchronous>, transform_indices = @transform_2, window_bounds = array<i64: 1, 32>}, {transform_indices = @transform_3, window_bounds = array<i64: 128, 32>}]} {
    %c0 = arith.constant 0 : index
    %c0_0 = arith.constant 0 : index
    %0 = vector.load %arg1[%c0, %c0_0] : memref<128x36xbf16, #tpu.memory_space<vmem>>, vector<128x36xbf16>
    %c0_1 = arith.constant 0 : index
    %c0_2 = arith.constant 0 : index
    %1 = vector.load %arg2[%c0_1, %c0_2] : memref<36x32xbf16, #tpu.memory_space<vmem>>, vector<36x32xbf16>
    %cst = arith.constant dense<0.000000e+00> : vector<128x32xf32>
    %2 = tpu.matmul %0, %1, %cst {dimension_numbers = #tpu.dot_dimension_numbers<[1], [0], [0], [1], [0, 0, 1, 1], [], []>} : vector<128x36xbf16>, vector<36x32xbf16>, vector<128x32xf32> -> vector<128x32xf32>
    %c0_3 = arith.constant 0 : index
    %c0_4 = arith.constant 0 : index
    %3 = vector.load %arg3[%c0_3, %c0_4] : memref<1x32xf32, #tpu.memory_space<vmem>>, vector<1x32xf32>
    %4 = vector.broadcast %3 : vector<1x32xf32> to vector<128x32xf32>
    %5 = arith.addf %2, %4 : vector<128x32xf32>
    %cst_5 = arith.constant 0.000000e+00 : f32
    %6 = vector.broadcast %cst_5 : f32 to vector<128x32xf32>
    %7 = arith.maximumf %5, %6 : vector<128x32xf32>
    %8 = arith.truncf %7 : vector<128x32xf32> to vector<128x32xbf16>
    %c0_6 = arith.constant 0 : index
    %c0_7 = arith.constant 0 : index
    %9 = vector.load %arg4[%c0_6, %c0_7] : memref<128x32xbf16, #tpu.memory_space<vmem>>, vector<128x32xbf16>
    tpu.vector_store %arg4[%c0_6, %c0_7], %8 {strides = array<i32>} : memref<128x32xbf16, #tpu.memory_space<vmem>>, vector<128x32xbf16>,
    return
  }
  func.func @transform_0(%arg0: i32) -> (i32, i32) {
    %c0_i32 = arith.constant 0 : i32
    %c0_i32_0 = arith.constant 0 : i32
    return %arg0, %c0_i32 : i32, i32
  }
  func.func @transform_1(%arg0: i32) -> (i32, i32) {
    %c0_i32 = arith.constant 0 : i32
    %c0_i32_0 = arith.constant 0 : i32
    %c0_i32_1 = arith.constant 0 : i32
    return %c0_i32, %c0_i32_0 : i32, i32
  }
  func.func @transform_2(%arg0: i32) -> (i32, i32) {
    %c0_i32 = arith.constant 0 : i32
    %c0_i32_0 = arith.constant 0 : i32
    %c0_i32_1 = arith.constant 0 : i32
    return %c0_i32, %c0_i32_0 : i32, i32
  }
  func.func @transform_3(%arg0: i32) -> (i32, i32) {
    %c0_i32 = arith.constant 0 : i32
    %c0_i32_0 = arith.constant 0 : i32
    return %arg0, %c0_i32 : i32, i32
  }
}

module attributes {stable_mosaic.version = 11 : i64} {
  func.func @_mm_kernel(%arg0: i32, %arg1: memref<224x288xbf16, #tpu.memory_space<vmem>>, %arg2: memref<288x64xbf16, #tpu.memory_space<vmem>>, %arg3: memref<1x64xf32, #tpu.memory_space<vmem>>, %arg4: memref<224x64xbf16, #tpu.memory_space<vmem>>) attributes {dimension_semantics = [#tpu.dimension_semantics<parallel>], iteration_bounds = array<i64: 1>, scalar_prefetch = 0 : i64, scratch_operands = 0 : i64, tpu.core_type = #tpu.core_type<tc>, window_params = [{transform_indices = @transform_0, window_bounds = array<i64: 224, 288>}, {pipeline_mode = #tpu.pipeline_mode<synchronous>, transform_indices = @transform_1, window_bounds = array<i64: 288, 64>}, {pipeline_mode = #tpu.pipeline_mode<synchronous>, transform_indices = @transform_2, window_bounds = array<i64: 1, 64>}, {transform_indices = @transform_3, window_bounds = array<i64: 224, 64>}]} {
    %c0 = arith.constant 0 : index
    %c0_0 = arith.constant 0 : index
    %0 = vector.load %arg1[%c0, %c0_0] : memref<224x288xbf16, #tpu.memory_space<vmem>>, vector<224x288xbf16>
    %c0_1 = arith.constant 0 : index
    %c0_2 = arith.constant 0 : index
    %1 = vector.load %arg2[%c0_1, %c0_2] : memref<288x64xbf16, #tpu.memory_space<vmem>>, vector<288x64xbf16>
    %cst = arith.constant dense<0.000000e+00> : vector<224x64xf32>
    %2 = tpu.matmul %0, %1, %cst {dimension_numbers = #tpu.dot_dimension_numbers<[1], [0], [0], [1], [0, 0, 1, 1], [], []>} : vector<224x288xbf16>, vector<288x64xbf16>, vector<224x64xf32> -> vector<224x64xf32>
    %c0_3 = arith.constant 0 : index
    %c0_4 = arith.constant 0 : index
    %3 = vector.load %arg3[%c0_3, %c0_4] : memref<1x64xf32, #tpu.memory_space<vmem>>, vector<1x64xf32>
    %4 = vector.broadcast %3 : vector<1x64xf32> to vector<224x64xf32>
    %5 = arith.addf %2, %4 : vector<224x64xf32>
    %cst_5 = arith.constant 0.000000e+00 : f32
    %6 = vector.broadcast %cst_5 : f32 to vector<224x64xf32>
    %7 = arith.maximumf %5, %6 : vector<224x64xf32>
    %8 = arith.truncf %7 : vector<224x64xf32> to vector<224x64xbf16>
    %c0_6 = arith.constant 0 : index
    %c0_7 = arith.constant 0 : index
    %9 = vector.load %arg4[%c0_6, %c0_7] : memref<224x64xbf16, #tpu.memory_space<vmem>>, vector<224x64xbf16>
    tpu.vector_store %arg4[%c0_6, %c0_7], %8 {strides = array<i32>} : memref<224x64xbf16, #tpu.memory_space<vmem>>, vector<224x64xbf16>,
    return
  }
  func.func @transform_0(%arg0: i32) -> (i32, i32) {
    %c0_i32 = arith.constant 0 : i32
    %c0_i32_0 = arith.constant 0 : i32
    return %arg0, %c0_i32 : i32, i32
  }
  func.func @transform_1(%arg0: i32) -> (i32, i32) {
    %c0_i32 = arith.constant 0 : i32
    %c0_i32_0 = arith.constant 0 : i32
    %c0_i32_1 = arith.constant 0 : i32
    return %c0_i32, %c0_i32_0 : i32, i32
  }
  func.func @transform_2(%arg0: i32) -> (i32, i32) {
    %c0_i32 = arith.constant 0 : i32
    %c0_i32_0 = arith.constant 0 : i32
    %c0_i32_1 = arith.constant 0 : i32
    return %c0_i32, %c0_i32_0 : i32, i32
  }
  func.func @transform_3(%arg0: i32) -> (i32, i32) {
    %c0_i32 = arith.constant 0 : i32
    %c0_i32_0 = arith.constant 0 : i32
    return %arg0, %c0_i32 : i32, i32
  }
}

module attributes {stable_mosaic.version = 11 : i64} {
  func.func @_enc_tail_kernel(%arg0: i32, %arg1: memref<14x1024xbf16, #tpu.memory_space<vmem>>, %arg2: memref<1024x256xbf16, #tpu.memory_space<vmem>>, %arg3: memref<1x256xf32, #tpu.memory_space<vmem>>, %arg4: memref<256x32xbf16, #tpu.memory_space<vmem>>, %arg5: memref<1x32xf32, #tpu.memory_space<vmem>>, %arg6: memref<256x32xbf16, #tpu.memory_space<vmem>>, %arg7: memref<1x32xf32, #tpu.memory_space<vmem>>, %arg8: memref<14x32xf32, #tpu.memory_space<vmem>>, %arg9: memref<14x32xf32, #tpu.memory_space<vmem>>, %arg10: memref<14x1xf32, #tpu.memory_space<vmem>>) attributes {dimension_semantics = [#tpu.dimension_semantics<arbitrary>], iteration_bounds = array<i64: 1>, scalar_prefetch = 0 : i64, scratch_operands = 0 : i64, tpu.core_type = #tpu.core_type<tc>, window_params = [{pipeline_mode = #tpu.pipeline_mode<synchronous>, transform_indices = @transform_0, window_bounds = array<i64: 14, 1024>}, {pipeline_mode = #tpu.pipeline_mode<synchronous>, transform_indices = @transform_1, window_bounds = array<i64: 1024, 256>}, {pipeline_mode = #tpu.pipeline_mode<synchronous>, transform_indices = @transform_2, window_bounds = array<i64: 1, 256>}, {pipeline_mode = #tpu.pipeline_mode<synchronous>, transform_indices = @transform_3, window_bounds = array<i64: 256, 32>}, {pipeline_mode = #tpu.pipeline_mode<synchronous>, transform_indices = @transform_4, window_bounds = array<i64: 1, 32>}, {pipeline_mode = #tpu.pipeline_mode<synchronous>, transform_indices = @transform_5, window_bounds = array<i64: 256, 32>}, {pipeline_mode = #tpu.pipeline_mode<synchronous>, transform_indices = @transform_6, window_bounds = array<i64: 1, 32>}, {pipeline_mode = #tpu.pipeline_mode<synchronous>, transform_indices = @transform_7, window_bounds = array<i64: 14, 32>}, {pipeline_mode = #tpu.pipeline_mode<synchronous>, transform_indices = @transform_8, window_bounds = array<i64: 14, 32>}, {pipeline_mode = #tpu.pipeline_mode<synchronous>, transform_indices = @transform_9, window_bounds = array<i64: 14, 1>}]} {
    %c0 = arith.constant 0 : index
    %c0_0 = arith.constant 0 : index
    %0 = vector.load %arg1[%c0, %c0_0] : memref<14x1024xbf16, #tpu.memory_space<vmem>>, vector<14x1024xbf16>
    %c0_1 = arith.constant 0 : index
    %c0_2 = arith.constant 0 : index
    %1 = vector.load %arg2[%c0_1, %c0_2] : memref<1024x256xbf16, #tpu.memory_space<vmem>>, vector<1024x256xbf16>
    %cst = arith.constant dense<0.000000e+00> : vector<14x256xf32>
    %2 = tpu.matmul %0, %1, %cst {dimension_numbers = #tpu.dot_dimension_numbers<[1], [0], [0], [1], [0, 0, 1, 1], [], []>} : vector<14x1024xbf16>, vector<1024x256xbf16>, vector<14x256xf32> -> vector<14x256xf32>
    %c0_3 = arith.constant 0 : index
    %c0_4 = arith.constant 0 : index
    %3 = vector.load %arg3[%c0_3, %c0_4] : memref<1x256xf32, #tpu.memory_space<vmem>>, vector<1x256xf32>
    %4 = vector.broadcast %3 : vector<1x256xf32> to vector<14x256xf32>
    %5 = arith.addf %2, %4 : vector<14x256xf32>
    %cst_5 = arith.constant 0.000000e+00 : f32
    %6 = vector.broadcast %cst_5 : f32 to vector<14x256xf32>
    %7 = arith.maximumf %5, %6 : vector<14x256xf32>
    %8 = arith.truncf %7 : vector<14x256xf32> to vector<14x256xbf16>
    %c0_6 = arith.constant 0 : index
    %c0_7 = arith.constant 0 : index
    %9 = vector.load %arg4[%c0_6, %c0_7] : memref<256x32xbf16, #tpu.memory_space<vmem>>, vector<256x32xbf16>
    %cst_8 = arith.constant dense<0.000000e+00> : vector<14x32xf32>
    %10 = tpu.matmul %8, %9, %cst_8 {dimension_numbers = #tpu.dot_dimension_numbers<[1], [0], [0], [1], [0, 0, 1, 1], [], []>} : vector<14x256xbf16>, vector<256x32xbf16>, vector<14x32xf32> -> vector<14x32xf32>
    %c0_9 = arith.constant 0 : index
    %c0_10 = arith.constant 0 : index
    %11 = vector.load %arg5[%c0_9, %c0_10] : memref<1x32xf32, #tpu.memory_space<vmem>>, vector<1x32xf32>
    %12 = vector.broadcast %11 : vector<1x32xf32> to vector<14x32xf32>
    %13 = arith.addf %10, %12 : vector<14x32xf32>
    %c0_11 = arith.constant 0 : index
    %c0_12 = arith.constant 0 : index
    %14 = vector.load %arg6[%c0_11, %c0_12] : memref<256x32xbf16, #tpu.memory_space<vmem>>, vector<256x32xbf16>
    %cst_13 = arith.constant dense<0.000000e+00> : vector<14x32xf32>
    %15 = tpu.matmul %8, %14, %cst_13 {dimension_numbers = #tpu.dot_dimension_numbers<[1], [0], [0], [1], [0, 0, 1, 1], [], []>} : vector<14x256xbf16>, vector<256x32xbf16>, vector<14x32xf32> -> vector<14x32xf32>
    %c0_14 = arith.constant 0 : index
    %c0_15 = arith.constant 0 : index
    %16 = vector.load %arg7[%c0_14, %c0_15] : memref<1x32xf32, #tpu.memory_space<vmem>>, vector<1x32xf32>
    %17 = vector.broadcast %16 : vector<1x32xf32> to vector<14x32xf32>
    %18 = arith.addf %15, %17 : vector<14x32xf32>
    %19 = arith.negf %13 : vector<14x32xf32>
    %20 = math.exp %19 : vector<14x32xf32>
    %cst_16 = arith.constant 1.000000e+00 : f32
    %21 = vector.broadcast %cst_16 : f32 to vector<14x32xf32>
    %22 = arith.addf %21, %20 : vector<14x32xf32>
    %23 = arith.divf %21, %22 : vector<14x32xf32>
    %cst_17 = arith.constant 6.000000e+00 : f32
    %24 = vector.broadcast %cst_17 : f32 to vector<14x32xf32>
    %25 = arith.mulf %23, %24 : vector<14x32xf32>
    %cst_18 = arith.constant 3.000000e+00 : f32
    %26 = vector.broadcast %cst_18 : f32 to vector<14x32xf32>
    %27 = arith.subf %25, %26 : vector<14x32xf32>
    %28 = arith.negf %18 : vector<14x32xf32>
    %29 = math.exp %28 : vector<14x32xf32>
    %cst_19 = arith.constant 1.000000e+00 : f32
    %30 = vector.broadcast %cst_19 : f32 to vector<14x32xf32>
    %31 = arith.addf %30, %29 : vector<14x32xf32>
    %32 = arith.divf %30, %31 : vector<14x32xf32>
    %cst_20 = arith.constant 3.000000e+00 : f32
    %33 = vector.broadcast %cst_20 : f32 to vector<14x32xf32>
    %34 = arith.mulf %32, %33 : vector<14x32xf32>
    %cst_21 = arith.constant 9.99999997E-7 : f32
    %35 = vector.broadcast %cst_21 : f32 to vector<14x32xf32>
    %36 = arith.maximumf %34, %35 : vector<14x32xf32>
    %c0_22 = arith.constant 0 : index
    %c0_23 = arith.constant 0 : index
    %37 = vector.load %arg8[%c0_22, %c0_23] : memref<14x32xf32, #tpu.memory_space<vmem>>, vector<14x32xf32>
    %38 = arith.mulf %36, %37 : vector<14x32xf32>
    %39 = arith.addf %27, %38 : vector<14x32xf32>
    %c0_24 = arith.constant 0 : index
    %c0_25 = arith.constant 0 : index
    %40 = vector.load %arg9[%c0_24, %c0_25] : memref<14x32xf32, #tpu.memory_space<vmem>>, vector<14x32xf32>
    tpu.vector_store %arg9[%c0_24, %c0_25], %39 {strides = array<i32>} : memref<14x32xf32, #tpu.memory_space<vmem>>, vector<14x32xf32>,
    %41 = math.log %36 : vector<14x32xf32>
    %cst_26 = arith.constant 0.000000e+00 : f32
    %42 = vector.broadcast %cst_26 : f32 to vector<14x32xf32>
    %43 = arith.subf %42, %41 : vector<14x32xf32>
    %44 = arith.mulf %36, %36 : vector<14x32xf32>
    %45 = arith.mulf %27, %27 : vector<14x32xf32>
    %46 = arith.addf %44, %45 : vector<14x32xf32>
    %cst_27 = arith.constant 5.000000e-01 : f32
    %47 = vector.broadcast %cst_27 : f32 to vector<14x32xf32>
    %48 = arith.mulf %47, %46 : vector<14x32xf32>
    %49 = arith.addf %43, %48 : vector<14x32xf32>
    %cst_28 = arith.constant 5.000000e-01 : f32
    %50 = vector.broadcast %cst_28 : f32 to vector<14x32xf32>
    %51 = arith.subf %49, %50 : vector<14x32xf32>
    %cst_29 = arith.constant dense<0.000000e+00> : vector<14xf32>
    %52 = vector.multi_reduction <add>, %51, %cst_29 [1] : vector<14x32xf32> to vector<14xf32>
    %53 = vector.shape_cast %52 : vector<14xf32> to vector<14x1xf32>
    %c0_30 = arith.constant 0 : index
    %c0_31 = arith.constant 0 : index
    %54 = vector.load %arg10[%c0_30, %c0_31] : memref<14x1xf32, #tpu.memory_space<vmem>>, vector<14x1xf32>
    tpu.vector_store %arg10[%c0_30, %c0_31], %53 {strides = array<i32>} : memref<14x1xf32, #tpu.memory_space<vmem>>, vector<14x1xf32>,
    return
  }
  func.func @transform_0(%arg0: i32) -> (i32, i32) {
    %c0_i32 = arith.constant 0 : i32
    %c0_i32_0 = arith.constant 0 : i32
    %c0_i32_1 = arith.constant 0 : i32
    return %c0_i32, %c0_i32_0 : i32, i32
  }
  func.func @transform_1(%arg0: i32) -> (i32, i32) {
    %c0_i32 = arith.constant 0 : i32
    %c0_i32_0 = arith.constant 0 : i32
    %c0_i32_1 = arith.constant 0 : i32
    return %c0_i32, %c0_i32_0 : i32, i32
  }
  func.func @transform_2(%arg0: i32) -> (i32, i32) {
    %c0_i32 = arith.constant 0 : i32
    %c0_i32_0 = arith.constant 0 : i32
    %c0_i32_1 = arith.constant 0 : i32
    return %c0_i32, %c0_i32_0 : i32, i32
  }
  func.func @transform_3(%arg0: i32) -> (i32, i32) {
    %c0_i32 = arith.constant 0 : i32
    %c0_i32_0 = arith.constant 0 : i32
    %c0_i32_1 = arith.constant 0 : i32
    return %c0_i32, %c0_i32_0 : i32, i32
  }
  func.func @transform_4(%arg0: i32) -> (i32, i32) {
    %c0_i32 = arith.constant 0 : i32
    %c0_i32_0 = arith.constant 0 : i32
    %c0_i32_1 = arith.constant 0 : i32
    return %c0_i32, %c0_i32_0 : i32, i32
  }
  func.func @transform_5(%arg0: i32) -> (i32, i32) {
    %c0_i32 = arith.constant 0 : i32
    %c0_i32_0 = arith.constant 0 : i32
    %c0_i32_1 = arith.constant 0 : i32
    return %c0_i32, %c0_i32_0 : i32, i32
  }
  func.func @transform_6(%arg0: i32) -> (i32, i32) {
    %c0_i32 = arith.constant 0 : i32
    %c0_i32_0 = arith.constant 0 : i32
    %c0_i32_1 = arith.constant 0 : i32
    return %c0_i32, %c0_i32_0 : i32, i32
  }
  func.func @transform_7(%arg0: i32) -> (i32, i32) {
    %c0_i32 = arith.constant 0 : i32
    %c0_i32_0 = arith.constant 0 : i32
    %c0_i32_1 = arith.constant 0 : i32
    return %c0_i32, %c0_i32_0 : i32, i32
  }
  func.func @transform_8(%arg0: i32) -> (i32, i32) {
    %c0_i32 = arith.constant 0 : i32
    %c0_i32_0 = arith.constant 0 : i32
    %c0_i32_1 = arith.constant 0 : i32
    return %c0_i32, %c0_i32_0 : i32, i32
  }
  func.func @transform_9(%arg0: i32) -> (i32, i32) {
    %c0_i32 = arith.constant 0 : i32
    %c0_i32_0 = arith.constant 0 : i32
    %c0_i32_1 = arith.constant 0 : i32
    return %c0_i32, %c0_i32_0 : i32, i32
  }
}

module attributes {stable_mosaic.version = 11 : i64} {
  func.func @_mm_kernel(%arg0: i32, %arg1: memref<512x306xbf16, #tpu.memory_space<vmem>>, %arg2: memref<306x32xbf16, #tpu.memory_space<vmem>>, %arg3: memref<1x32xf32, #tpu.memory_space<vmem>>, %arg4: memref<512x32xbf16, #tpu.memory_space<vmem>>) attributes {dimension_semantics = [#tpu.dimension_semantics<parallel>], iteration_bounds = array<i64: 7>, scalar_prefetch = 0 : i64, scratch_operands = 0 : i64, tpu.core_type = #tpu.core_type<tc>, window_params = [{transform_indices = @transform_0, window_bounds = array<i64: 512, 306>}, {pipeline_mode = #tpu.pipeline_mode<synchronous>, transform_indices = @transform_1, window_bounds = array<i64: 306, 32>}, {pipeline_mode = #tpu.pipeline_mode<synchronous>, transform_indices = @transform_2, window_bounds = array<i64: 1, 32>}, {transform_indices = @transform_3, window_bounds = array<i64: 512, 32>}]} {
    %c0 = arith.constant 0 : index
    %c0_0 = arith.constant 0 : index
    %0 = vector.load %arg1[%c0, %c0_0] : memref<512x306xbf16, #tpu.memory_space<vmem>>, vector<512x306xbf16>
    %c0_1 = arith.constant 0 : index
    %c0_2 = arith.constant 0 : index
    %1 = vector.load %arg2[%c0_1, %c0_2] : memref<306x32xbf16, #tpu.memory_space<vmem>>, vector<306x32xbf16>
    %cst = arith.constant dense<0.000000e+00> : vector<512x32xf32>
    %2 = tpu.matmul %0, %1, %cst {dimension_numbers = #tpu.dot_dimension_numbers<[1], [0], [0], [1], [0, 0, 1, 1], [], []>} : vector<512x306xbf16>, vector<306x32xbf16>, vector<512x32xf32> -> vector<512x32xf32>
    %c0_3 = arith.constant 0 : index
    %c0_4 = arith.constant 0 : index
    %3 = vector.load %arg3[%c0_3, %c0_4] : memref<1x32xf32, #tpu.memory_space<vmem>>, vector<1x32xf32>
    %4 = vector.broadcast %3 : vector<1x32xf32> to vector<512x32xf32>
    %5 = arith.addf %2, %4 : vector<512x32xf32>
    %cst_5 = arith.constant 0.000000e+00 : f32
    %6 = vector.broadcast %cst_5 : f32 to vector<512x32xf32>
    %7 = arith.maximumf %5, %6 : vector<512x32xf32>
    %8 = arith.truncf %7 : vector<512x32xf32> to vector<512x32xbf16>
    %c0_6 = arith.constant 0 : index
    %c0_7 = arith.constant 0 : index
    %9 = vector.load %arg4[%c0_6, %c0_7] : memref<512x32xbf16, #tpu.memory_space<vmem>>, vector<512x32xbf16>
    tpu.vector_store %arg4[%c0_6, %c0_7], %8 {strides = array<i32>} : memref<512x32xbf16, #tpu.memory_space<vmem>>, vector<512x32xbf16>,
    return
  }
  func.func @transform_0(%arg0: i32) -> (i32, i32) {
    %c0_i32 = arith.constant 0 : i32
    %c0_i32_0 = arith.constant 0 : i32
    return %arg0, %c0_i32 : i32, i32
  }
  func.func @transform_1(%arg0: i32) -> (i32, i32) {
    %c0_i32 = arith.constant 0 : i32
    %c0_i32_0 = arith.constant 0 : i32
    %c0_i32_1 = arith.constant 0 : i32
    return %c0_i32, %c0_i32_0 : i32, i32
  }
  func.func @transform_2(%arg0: i32) -> (i32, i32) {
    %c0_i32 = arith.constant 0 : i32
    %c0_i32_0 = arith.constant 0 : i32
    %c0_i32_1 = arith.constant 0 : i32
    return %c0_i32, %c0_i32_0 : i32, i32
  }
  func.func @transform_3(%arg0: i32) -> (i32, i32) {
    %c0_i32 = arith.constant 0 : i32
    %c0_i32_0 = arith.constant 0 : i32
    return %arg0, %c0_i32 : i32, i32
  }
}

module attributes {stable_mosaic.version = 11 : i64} {
  func.func @_dec_px_kernel(%arg0: i32, %arg1: memref<256x288xbf16, #tpu.memory_space<vmem>>, %arg2: memref<288x32xbf16, #tpu.memory_space<vmem>>, %arg3: memref<1x32xf32, #tpu.memory_space<vmem>>, %arg4: memref<32x3xbf16, #tpu.memory_space<vmem>>, %arg5: memref<1x3xf32, #tpu.memory_space<vmem>>, %arg6: memref<256x3xf32, #tpu.memory_space<vmem>>, %arg7: memref<256x1xf32, #tpu.memory_space<vmem>>, %arg8: memref<256x2xf32, #tpu.memory_space<vmem>>, %arg9: memref<256x1xf32, #tpu.memory_space<vmem>>, %arg10: memref<256x3xf32, #tpu.memory_space<vmem>>, %arg11: memref<256x1xf32, #tpu.memory_space<vmem>>) attributes {dimension_semantics = [#tpu.dimension_semantics<parallel>], iteration_bounds = array<i64: 14>, scalar_prefetch = 0 : i64, scratch_operands = 0 : i64, tpu.core_type = #tpu.core_type<tc>, window_params = [{transform_indices = @transform_0, window_bounds = array<i64: 256, 288>}, {pipeline_mode = #tpu.pipeline_mode<synchronous>, transform_indices = @transform_1, window_bounds = array<i64: 288, 32>}, {pipeline_mode = #tpu.pipeline_mode<synchronous>, transform_indices = @transform_2, window_bounds = array<i64: 1, 32>}, {pipeline_mode = #tpu.pipeline_mode<synchronous>, transform_indices = @transform_3, window_bounds = array<i64: 32, 3>}, {pipeline_mode = #tpu.pipeline_mode<synchronous>, transform_indices = @transform_4, window_bounds = array<i64: 1, 3>}, {transform_indices = @transform_5, window_bounds = array<i64: 256, 3>}, {transform_indices = @transform_6, window_bounds = array<i64: 256, 1>}, {transform_indices = @transform_7, window_bounds = array<i64: 256, 2>}, {transform_indices = @transform_8, window_bounds = array<i64: 256, 1>}, {transform_indices = @transform_9, window_bounds = array<i64: 256, 3>}, {transform_indices = @transform_10, window_bounds = array<i64: 256, 1>}]} {
    %c0 = arith.constant 0 : index
    %c0_0 = arith.constant 0 : index
    %0 = vector.load %arg1[%c0, %c0_0] : memref<256x288xbf16, #tpu.memory_space<vmem>>, vector<256x288xbf16>
    %c0_1 = arith.constant 0 : index
    %c0_2 = arith.constant 0 : index
    %1 = vector.load %arg2[%c0_1, %c0_2] : memref<288x32xbf16, #tpu.memory_space<vmem>>, vector<288x32xbf16>
    %cst = arith.constant dense<0.000000e+00> : vector<256x32xf32>
    %2 = tpu.matmul %0, %1, %cst {dimension_numbers = #tpu.dot_dimension_numbers<[1], [0], [0], [1], [0, 0, 1, 1], [], []>} : vector<256x288xbf16>, vector<288x32xbf16>, vector<256x32xf32> -> vector<256x32xf32>
    %c0_3 = arith.constant 0 : index
    %c0_4 = arith.constant 0 : index
    %3 = vector.load %arg3[%c0_3, %c0_4] : memref<1x32xf32, #tpu.memory_space<vmem>>, vector<1x32xf32>
    %4 = vector.broadcast %3 : vector<1x32xf32> to vector<256x32xf32>
    %5 = arith.addf %2, %4 : vector<256x32xf32>
    %cst_5 = arith.constant 0.000000e+00 : f32
    %6 = vector.broadcast %cst_5 : f32 to vector<256x32xf32>
    %7 = arith.maximumf %5, %6 : vector<256x32xf32>
    %8 = arith.truncf %7 : vector<256x32xf32> to vector<256x32xbf16>
    %c0_6 = arith.constant 0 : index
    %c0_7 = arith.constant 0 : index
    %9 = vector.load %arg4[%c0_6, %c0_7] : memref<32x3xbf16, #tpu.memory_space<vmem>>, vector<32x3xbf16>
    %cst_8 = arith.constant dense<0.000000e+00> : vector<256x3xf32>
    %10 = tpu.matmul %8, %9, %cst_8 {dimension_numbers = #tpu.dot_dimension_numbers<[1], [0], [0], [1], [0, 0, 1, 1], [], []>} : vector<256x32xbf16>, vector<32x3xbf16>, vector<256x3xf32> -> vector<256x3xf32>
    %c0_9 = arith.constant 0 : index
    %c0_10 = arith.constant 0 : index
    %11 = vector.load %arg5[%c0_9, %c0_10] : memref<1x3xf32, #tpu.memory_space<vmem>>, vector<1x3xf32>
    %12 = vector.broadcast %11 : vector<1x3xf32> to vector<256x3xf32>
    %13 = arith.addf %10, %12 : vector<256x3xf32>
    %14 = arith.negf %13 : vector<256x3xf32>
    %15 = math.exp %14 : vector<256x3xf32>
    %cst_11 = arith.constant 1.000000e+00 : f32
    %16 = vector.broadcast %cst_11 : f32 to vector<256x3xf32>
    %17 = arith.addf %16, %15 : vector<256x3xf32>
    %18 = arith.divf %16, %17 : vector<256x3xf32>
    %c0_12 = arith.constant 0 : index
    %c0_13 = arith.constant 0 : index
    %19 = vector.load %arg7[%c0_12, %c0_13] : memref<256x1xf32, #tpu.memory_space<vmem>>, vector<256x1xf32>
    %c0_14 = arith.constant 0 : index
    %c0_15 = arith.constant 0 : index
    %20 = vector.load %arg8[%c0_14, %c0_15] : memref<256x2xf32, #tpu.memory_space<vmem>>, vector<256x1xf32>
    %c0_16 = arith.constant 0 : index
    %c1 = arith.constant 1 : index
    %21 = vector.load %arg8[%c0_16, %c1] : memref<256x2xf32, #tpu.memory_space<vmem>>, vector<256x1xf32>
    %c0_17 = arith.constant 0 : index
    %c0_18 = arith.constant 0 : index
    %22 = vector.load %arg6[%c0_17, %c0_18] : memref<256x3xf32, #tpu.memory_space<vmem>>, vector<256x3xf32>
    %23 = arith.subf %22, %18 : vector<256x3xf32>
    %24 = vector.broadcast %20 : vector<256x1xf32> to vector<256x3xf32>
    %25 = arith.mulf %23, %24 : vector<256x3xf32>
    %cst_19 = arith.constant -5.000000e-01 : f32
    %26 = vector.broadcast %cst_19 : f32 to vector<256x3xf32>
    %27 = arith.mulf %26, %25 : vector<256x3xf32>
    %28 = arith.mulf %27, %25 : vector<256x3xf32>
    %29 = vector.broadcast %21 : vector<256x1xf32> to vector<256x3xf32>
    %30 = arith.subf %28, %29 : vector<256x3xf32>
    %cst_20 = arith.constant 0.918938517 : f32
    %31 = vector.broadcast %cst_20 : f32 to vector<256x3xf32>
    %32 = arith.subf %30, %31 : vector<256x3xf32>
    %33 = vector.broadcast %19 : vector<256x1xf32> to vector<256x3xf32>
    %34 = arith.mulf %33, %32 : vector<256x3xf32>
    %cst_21 = arith.constant dense<0.000000e+00> : vector<256xf32>
    %35 = vector.multi_reduction <add>, %34, %cst_21 [1] : vector<256x3xf32> to vector<256xf32>
    %36 = vector.shape_cast %35 : vector<256xf32> to vector<256x1xf32>
    %c0_22 = arith.constant 0 : index
    %c0_23 = arith.constant 0 : index
    %37 = vector.load %arg9[%c0_22, %c0_23] : memref<256x1xf32, #tpu.memory_space<vmem>>, vector<256x1xf32>
    tpu.vector_store %arg9[%c0_22, %c0_23], %36 {strides = array<i32>} : memref<256x1xf32, #tpu.memory_space<vmem>>, vector<256x1xf32>,
    %38 = vector.broadcast %19 : vector<256x1xf32> to vector<256x3xf32>
    %39 = arith.mulf %38, %18 : vector<256x3xf32>
    %c0_24 = arith.constant 0 : index
    %c0_25 = arith.constant 0 : index
    %40 = vector.load %arg10[%c0_24, %c0_25] : memref<256x3xf32, #tpu.memory_space<vmem>>, vector<256x3xf32>
    tpu.vector_store %arg10[%c0_24, %c0_25], %39 {strides = array<i32>} : memref<256x3xf32, #tpu.memory_space<vmem>>, vector<256x3xf32>,
    %41 = vector.extract_strided_slice %13 {offsets = [0, 2], sizes = [256, 1], strides = [1, 1]} : vector<256x3xf32> to vector<256x1xf32>
    %c0_26 = arith.constant 0 : index
    %c0_27 = arith.constant 0 : index
    %42 = vector.load %arg11[%c0_26, %c0_27] : memref<256x1xf32, #tpu.memory_space<vmem>>, vector<256x1xf32>
    tpu.vector_store %arg11[%c0_26, %c0_27], %41 {strides = array<i32>} : memref<256x1xf32, #tpu.memory_space<vmem>>, vector<256x1xf32>,
    return
  }
  func.func @transform_0(%arg0: i32) -> (i32, i32) {
    %c0_i32 = arith.constant 0 : i32
    %c0_i32_0 = arith.constant 0 : i32
    return %arg0, %c0_i32 : i32, i32
  }
  func.func @transform_1(%arg0: i32) -> (i32, i32) {
    %c0_i32 = arith.constant 0 : i32
    %c0_i32_0 = arith.constant 0 : i32
    %c0_i32_1 = arith.constant 0 : i32
    return %c0_i32, %c0_i32_0 : i32, i32
  }
  func.func @transform_2(%arg0: i32) -> (i32, i32) {
    %c0_i32 = arith.constant 0 : i32
    %c0_i32_0 = arith.constant 0 : i32
    %c0_i32_1 = arith.constant 0 : i32
    return %c0_i32, %c0_i32_0 : i32, i32
  }
  func.func @transform_3(%arg0: i32) -> (i32, i32) {
    %c0_i32 = arith.constant 0 : i32
    %c0_i32_0 = arith.constant 0 : i32
    %c0_i32_1 = arith.constant 0 : i32
    return %c0_i32, %c0_i32_0 : i32, i32
  }
  func.func @transform_4(%arg0: i32) -> (i32, i32) {
    %c0_i32 = arith.constant 0 : i32
    %c0_i32_0 = arith.constant 0 : i32
    %c0_i32_1 = arith.constant 0 : i32
    return %c0_i32, %c0_i32_0 : i32, i32
  }
  func.func @transform_5(%arg0: i32) -> (i32, i32) {
    %c0_i32 = arith.constant 0 : i32
    %c0_i32_0 = arith.constant 0 : i32
    return %arg0, %c0_i32 : i32, i32
  }
  func.func @transform_6(%arg0: i32) -> (i32, i32) {
    %c0_i32 = arith.constant 0 : i32
    %c0_i32_0 = arith.constant 0 : i32
    return %arg0, %c0_i32 : i32, i32
  }
  func.func @transform_7(%arg0: i32) -> (i32, i32) {
    %c0_i32 = arith.constant 0 : i32
    %c0_i32_0 = arith.constant 0 : i32
    return %arg0, %c0_i32 : i32, i32
  }
  func.func @transform_8(%arg0: i32) -> (i32, i32) {
    %c0_i32 = arith.constant 0 : i32
    %c0_i32_0 = arith.constant 0 : i32
    return %arg0, %c0_i32 : i32, i32
  }
  func.func @transform_9(%arg0: i32) -> (i32, i32) {
    %c0_i32 = arith.constant 0 : i32
    %c0_i32_0 = arith.constant 0 : i32
    return %arg0, %c0_i32 : i32, i32
  }
  func.func @transform_10(%arg0: i32) -> (i32, i32) {
    %c0_i32 = arith.constant 0 : i32
    %c0_i32_0 = arith.constant 0 : i32
    return %arg0, %c0_i32 : i32, i32
  }
}

module attributes {stable_mosaic.version = 11 : i64} {
  func.func @_klcat_kernel(%arg0: i32, %arg1: memref<1x7x256xf32, #tpu.memory_space<vmem>>, %arg2: memref<1x7x256xf32, #tpu.memory_space<vmem>>, %arg3: memref<1x1x1xf32, #tpu.memory_space<vmem>>) attributes {dimension_semantics = [#tpu.dimension_semantics<parallel>], iteration_bounds = array<i64: 2>, scalar_prefetch = 0 : i64, scratch_operands = 0 : i64, tpu.core_type = #tpu.core_type<tc>, window_params = [{transform_indices = @transform_0, window_bounds = array<i64: 1, 7, 256>}, {transform_indices = @transform_1, window_bounds = array<i64: 1, 7, 256>}, {transform_indices = @transform_2, window_bounds = array<i64: 1, 1, 1>}]} {
    %c0 = arith.constant 0 : index
    %c0_0 = arith.constant 0 : index
    %c0_1 = arith.constant 0 : index
    %0 = vector.load %arg1[%c0, %c0_0, %c0_1] : memref<1x7x256xf32, #tpu.memory_space<vmem>>, vector<1x7x256xf32>
    %1 = vector.shape_cast %0 : vector<1x7x256xf32> to vector<7x256xf32>
    %cst = arith.constant dense<0.000000e+00> : vector<256xf32>
    %2 = vector.multi_reduction <add>, %1, %cst [0] : vector<7x256xf32> to vector<256xf32>
    %3 = vector.shape_cast %2 : vector<256xf32> to vector<1x256xf32>
    %4 = tpu.reciprocal %3 {approx = true} : vector<1x256xf32> -> vector<1x256xf32>
    %5 = vector.broadcast %4 : vector<1x256xf32> to vector<7x256xf32>
    %6 = arith.mulf %1, %5 : vector<7x256xf32>
    %c0_2 = arith.constant 0 : index
    %c0_3 = arith.constant 0 : index
    %c0_4 = arith.constant 0 : index
    %7 = vector.load %arg2[%c0_2, %c0_3, %c0_4] : memref<1x7x256xf32, #tpu.memory_space<vmem>>, vector<1x7x256xf32>
    %8 = vector.shape_cast %7 : vector<1x7x256xf32> to vector<7x256xf32>
    %cst_5 = arith.constant dense<0xFF800000> : vector<256xf32>
    %9 = vector.multi_reduction <maximumf>, %8, %cst_5 [0] : vector<7x256xf32> to vector<256xf32>
    %10 = vector.shape_cast %9 : vector<256xf32> to vector<1x256xf32>
    %11 = vector.broadcast %10 : vector<1x256xf32> to vector<7x256xf32>
    %12 = arith.subf %8, %11 : vector<7x256xf32>
    %13 = math.exp %12 : vector<7x256xf32>
    %cst_6 = arith.constant dense<0.000000e+00> : vector<256xf32>
    %14 = vector.multi_reduction <add>, %13, %cst_6 [0] : vector<7x256xf32> to vector<256xf32>
    %15 = vector.shape_cast %14 : vector<256xf32> to vector<1x256xf32>
    %16 = math.log %15 : vector<1x256xf32>
    %17 = arith.addf %16, %10 : vector<1x256xf32>
    %18 = vector.broadcast %17 : vector<1x256xf32> to vector<7x256xf32>
    %19 = arith.subf %8, %18 : vector<7x256xf32>
    %cst_7 = arith.constant 0.000000e+00 : f32
    %20 = vector.broadcast %cst_7 : f32 to vector<7x256xf32>
    %21 = arith.cmpf ogt, %6, %20 : vector<7x256xf32>
    %cst_8 = arith.constant 1.000000e+00 : f32
    %22 = vector.broadcast %cst_8 : f32 to vector<7x256xf32>
    %23 = arith.select %21, %6, %22 : vector<7x256xi1>, vector<7x256xf32>
    %24 = math.log %23 : vector<7x256xf32>
    %cst_9 = arith.constant 0.000000e+00 : f32
    %25 = vector.broadcast %cst_9 : f32 to vector<7x256xf32>
    %26 = arith.cmpf ogt, %6, %25 : vector<7x256xf32>
    %27 = arith.subf %24, %19 : vector<7x256xf32>
    %28 = arith.mulf %6, %27 : vector<7x256xf32>
    %cst_10 = arith.constant 0.000000e+00 : f32
    %29 = vector.broadcast %cst_10 : f32 to vector<7x256xf32>
    %30 = arith.select %26, %28, %29 : vector<7x256xi1>, vector<7x256xf32>
    %cst_11 = arith.constant dense<0.000000e+00> : vector<256xf32>
    %31 = vector.multi_reduction <add>, %30, %cst_11 [0] : vector<7x256xf32> to vector<256xf32>
    %32 = vector.shape_cast %31 : vector<256xf32> to vector<1x256xf32>
    %cst_12 = arith.constant dense<0.000000e+00> : vector<1xf32>
    %33 = vector.multi_reduction <add>, %32, %cst_12 [1] : vector<1x256xf32> to vector<1xf32>
    %34 = vector.shape_cast %33 : vector<1xf32> to vector<1x1xf32>
    %c0_13 = arith.constant 0 : index
    %c0_14 = arith.constant 0 : index
    %c0_15 = arith.constant 0 : index
    %35 = vector.load %arg3[%c0_13, %c0_14, %c0_15] : memref<1x1x1xf32, #tpu.memory_space<vmem>>, vector<1x1x1xf32>
    %36 = vector.shape_cast %35 : vector<1x1x1xf32> to vector<1x1xf32>
    %37 = vector.shape_cast %34 : vector<1x1xf32> to vector<1x1x1xf32>
    tpu.vector_store %arg3[%c0_13, %c0_14, %c0_15], %37 {strides = array<i32>} : memref<1x1x1xf32, #tpu.memory_space<vmem>>, vector<1x1x1xf32>,
    return
  }
  func.func @transform_0(%arg0: i32) -> (i32, i32, i32) {
    %c0_i32 = arith.constant 0 : i32
    %c0_i32_0 = arith.constant 0 : i32
    %c0_i32_1 = arith.constant 0 : i32
    return %arg0, %c0_i32, %c0_i32_0 : i32, i32, i32
  }
  func.func @transform_1(%arg0: i32) -> (i32, i32, i32) {
    %c0_i32 = arith.constant 0 : i32
    %c0_i32_0 = arith.constant 0 : i32
    %c0_i32_1 = arith.constant 0 : i32
    return %arg0, %c0_i32, %c0_i32_0 : i32, i32, i32
  }
  func.func @transform_2(%arg0: i32) -> (i32, i32, i32) {
    %c0_i32 = arith.constant 0 : i32
    %c0_i32_0 = arith.constant 0 : i32
    %c0_i32_1 = arith.constant 0 : i32
    return %arg0, %c0_i32, %c0_i32_0 : i32, i32, i32
  }
}

</mosaic_0001>

<bundles_post_ra>
// kernel: monet_forward.18
= control target key start
LH: loop header
LB: loop body
LE: loop exit
PB: predicated region body
PF: predicated region fallthrough
CT: control target
= control target key end

     0   :  { %vm363_vm0 = vcmask 1041408   ;;  %vm266_vm1 = vcmask 293888   ;;  %vm976_vm2 = vcmask 257024   ;;  %s1871_s1 = inlined_call_operand.vmem [shape: bf16[36,32], index: 1, kind: input, shape index: {}]   ;;  %s1872_s0 = inlined_call_operand.vmem [shape: bf16[512,36], index: 0, kind: input, shape index: {}]   ;;  %s1873_s2 = inlined_call_operand.vmem [shape: f32[1,32], index: 2, kind: input, shape index: {}]   ;;  %s1874_s3 = inlined_call_operand.vmem [shape: bf16[512,32], index: 3, kind: output, shape index: {}]  }
   0x1   :  { %v1354_v0 = vld [vmem:[%s1871_s1 + $0x10] ss:$0 sps:$4 sm:$0x33]   ;;  %v1355_v1 = vld [vmem:[%s1871_s1 + $0x8] sm:$0xff]   ;;  %v1356_v3 = vld [vmem:[%s1871_s1] sm:$0xff]  }
   0x2   :  { %1352 = vmatprep.subr.msk.bf16.mxu0 %vm363_vm0, %v1354_v0  ;;  %1353 = vmatprep.subr.msk.bf16.mxu1 %vm363_vm0, %v1354_v0  ;;  %v365_v2 = vsel %vm363_vm0, %v1354_v0, 0  ;;  %v1357_v4 = vld [vmem:[%s1872_s0] sm:$0xff]   ;;  %v1359_v6 = vld [vmem:[%s1872_s0 + $0x8] sm:$0xff]   ;;  %v1361_v8 = vld [vmem:[%s1872_s0 + $0x10] sm:$0xff]  }
   0x3   :  { %1277 = vmatpush3.bf16.msra.mxu0 %v365_v2  ;;  %1349 = vmatpush3.bf16.msra.mxu1 %v365_v2  ;;  %v1358_v5 = vld [vmem:[%s1872_s0 + $0x80] sm:$0xff]   ;;  %v1360_v7 = vld [vmem:[%s1872_s0 + $0x88] sm:$0xff]   ;;  %v1362_v9 = vld [vmem:[%s1872_s0 + $0x90] sm:$0xff]  }
   0x4   :  { %1278 = vmatprep.subr.bf16.mxu0 %v1355_v1  ;;  %1347 = vmatprep.subr.bf16.mxu1 %v1355_v1  ;;  %v1363_v10 = vld [vmem:[%s1872_s0 + $0x18] sm:$0xff]   ;;  %v1365_v12 = vld [vmem:[%s1872_s0 + $0x20] sm:$0xff]   ;;  %v1367_v14 = vld [vmem:[%s1872_s0 + $0x28] sm:$0xff]  }
   0x5   :  { %1282 = vmatprep.mubr.msk.bf16.mxu0 %vm266_vm1, %v1357_v4  ;;  %1314 = vmatprep.mubr.msk.bf16.mxu1 %vm266_vm1, %v1358_v5  ;;  %v1364_v11 = vld [vmem:[%s1872_s0 + $0x98] sm:$0xff]   ;;  %v1366_v13 = vld [vmem:[%s1872_s0 + $0xa0] sm:$0xff]   ;;  %v1368_v15 = vld [vmem:[%s1872_s0 + $0xa8] sm:$0xff]  }
   0x6   :  { %v1369_v16 = vld [vmem:[%s1872_s0 + $0x30] sm:$0xff]   ;;  %v1371_v18 = vld [vmem:[%s1872_s0 + $0x38] sm:$0xff]   ;;  %v1373_v20 = vld [vmem:[%s1872_s0 + $0x40] sm:$0xff]  }
   0x7   :  { %1279 = vmatpush3.bf16.msra.mxu0 %v1355_v1  ;;  %1350 = vmatpush3.bf16.msra.mxu1 %v1355_v1  ;;  %v1370_v17 = vld [vmem:[%s1872_s0 + $0xb0] sm:$0xff]   ;;  %v1372_v19 = vld [vmem:[%s1872_s0 + $0xb8] sm:$0xff]   ;;  %v1374_v21 = vld [vmem:[%s1872_s0 + $0xc0] sm:$0xff]  }
   0x8   :  { %1280 = vmatprep.subr.bf16.mxu0 %v1356_v3  ;;  %1348 = vmatprep.subr.bf16.mxu1 %v1356_v3  ;;  %v1375_v22 = vld [vmem:[%s1872_s0 + $0x48] sm:$0xff]   ;;  %v1377_v24 = vld [vmem:[%s1872_s0 + $0x50] sm:$0xff]   ;;  %v1379_v26 = vld [vmem:[%s1872_s0 + $0x58] sm:$0xff]  }
   0x9   :  { %v1376_v23 = vld [vmem:[%s1872_s0 + $0xc8] sm:$0xff]   ;;  %v1378_v25 = vld [vmem:[%s1872_s0 + $0xd0] sm:$0xff]   ;;  %v1380_v27 = vld [vmem:[%s1872_s0 + $0xd8] sm:$0xff]  }
   0xa   :  { %v1381_v28 = vld [vmem:[%s1872_s0 + $0x60] sm:$0xff]   ;;  %v1383_v30 = vld [vmem:[%s1872_s0 + $0x68] sm:$0xff]   ;;  %v1385_v32 = vld [vmem:[%s1872_s0 + $0x70] sm:$0xff]  }
   0xb   :  { %1281 = vmatpush3.bf16.msra.mxu0 %v1356_v3  ;;  %1351 = vmatpush3.bf16.msra.mxu1 %v1356_v3  ;;  %v1382_v29 = vld [vmem:[%s1872_s0 + $0xe0] sm:$0xff]   ;;  %v1384_v31 = vld [vmem:[%s1872_s0 + $0xe8] sm:$0xff]   ;;  %v1386_v33 = vld [vmem:[%s1872_s0 + $0xf0] sm:$0xff]  }
   0xc   :  { %v1387_v34 = vld [vmem:[%s1872_s0 + $0x78] sm:$0xff]   ;;  %v1549_v36 = vld [vmem:[%s1873_s2] ss:$0 sm:$0xff] }
   0xd   :  { %v1388_v35 = vld [vmem:[%s1872_s0 + $0xf8] sm:$0xff]  }
   0xe   :  { %1283 = vmatmul.mubr.msk.bf16.vlgmr.msra.gmra.mxu0 %vm266_vm1, %v1359_v6  ;;  %1315 = vmatmul.mubr.msk.bf16.vlgmr.msra.gmra.mxu1 %vm266_vm1, %v1360_v7 }
   0xf   :  { %1286 = vmatprep.mubr.msk.bf16.mxu0 %vm266_vm1, %v1361_v8  ;;  %1318 = vmatprep.mubr.msk.bf16.mxu1 %vm266_vm1, %v1362_v9 }
  0x16   :  { %1287 = vmatmul.mubr.msk.bf16.gmra.mxu0 %vm266_vm1, %v1363_v10  ;;  %1319 = vmatmul.mubr.msk.bf16.gmra.mxu1 %vm266_vm1, %v1364_v11 }
  0x17   :  { %1290 = vmatprep.mubr.msk.bf16.mxu0 %vm266_vm1, %v1365_v12  ;;  %1322 = vmatprep.mubr.msk.bf16.mxu1 %vm266_vm1, %v1366_v13 }
  0x1e   :  { %1291 = vmatmul.mubr.msk.bf16.gmra.mxu0 %vm266_vm1, %v1367_v14  ;;  %1323 = vmatmul.mubr.msk.bf16.gmra.mxu1 %vm266_vm1, %v1368_v15 }
  0x1f   :  { %1294 = vmatprep.mubr.msk.bf16.mxu0 %vm266_vm1, %v1369_v16  ;;  %1326 = vmatprep.mubr.msk.bf16.mxu1 %vm266_vm1, %v1370_v17 }
  0x26   :  { %1295 = vmatmul.mubr.msk.bf16.gmra.mxu0 %vm266_vm1, %v1371_v18  ;;  %1327 = vmatmul.mubr.msk.bf16.gmra.mxu1 %vm266_vm1, %v1372_v19 }
  0x27   :  { %1298 = vmatprep.mubr.msk.bf16.mxu0 %vm266_vm1, %v1373_v20  ;;  %1330 = vmatprep.mubr.msk.bf16.mxu1 %vm266_vm1, %v1374_v21 }
  0x2e   :  { %1299 = vmatmul.mubr.msk.bf16.gmra.mxu0 %vm266_vm1, %v1375_v22  ;;  %1331 = vmatmul.mubr.msk.bf16.gmra.mxu1 %vm266_vm1, %v1376_v23 }
  0x2f   :  { %1302 = vmatprep.mubr.msk.bf16.mxu0 %vm266_vm1, %v1377_v24  ;;  %1334 = vmatprep.mubr.msk.bf16.mxu1 %vm266_vm1, %v1378_v25 }
  0x36   :  { %1303 = vmatmul.mubr.msk.bf16.gmra.mxu0 %vm266_vm1, %v1379_v26  ;;  %1335 = vmatmul.mubr.msk.bf16.gmra.mxu1 %vm266_vm1, %v1380_v27 }
  0x37   :  { %1306 = vmatprep.mubr.msk.bf16.mxu0 %vm266_vm1, %v1381_v28  ;;  %1338 = vmatprep.mubr.msk.bf16.mxu1 %vm266_vm1, %v1382_v29 }
  0x3e   :  { %1307 = vmatmul.mubr.msk.bf16.gmra.mxu0 %vm266_vm1, %v1383_v30  ;;  %1339 = vmatmul.mubr.msk.bf16.gmra.mxu1 %vm266_vm1, %v1384_v31 }
  0x3f   :  { %1310 = vmatprep.mubr.msk.bf16.mxu0 %vm266_vm1, %v1385_v32  ;;  %1342 = vmatprep.mubr.msk.bf16.mxu1 %vm266_vm1, %v1386_v33 }
  0x46   :  { %1311 = vmatmul.mubr.msk.bf16.gmra.mxu0 %vm266_vm1, %v1387_v34  ;;  %1343 = vmatmul.mubr.msk.bf16.gmra.mxu1 %vm266_vm1, %v1388_v35 }
  0xce   :  { %v1284_v37 = vpop.f32.mrf.mxu0  ;;  %v1316_v38 = vpop.f32.mrf.mxu1 }
  0xcf   :  { %v410_v39 = vadd.f32 %v1284_v37, %v1549_v36  ;;  %v538_v40 = vadd.f32 %v1316_v38, %v1549_v36 }
  0xd0   :  { %v401_v41 = vpop.f32.mrf.mxu0  ;;  %v529_v42 = vpop.f32.mrf.mxu1 }
  0xd1   :  { %v658_v43 = vmax.f32 %v410_v39, 0.0  ;;  %v690_v44 = vmax.f32 %v538_v40, 0.0  ;;  %v402_v45 = vadd.f32 %v1549_v36, %v401_v41  ;;  %v530_v46 = vadd.f32 %v1549_v36, %v529_v42 }
  0xd2   :  { %v1285_v47 = vpop.f32.mrf.mxu0  ;;  %v1317_v48 = vpop.f32.mrf.mxu1 }
  0xd3   :  { %v1179_v49 = vpack.c.bf16 %v658_v43, %v658_v43  ;;  %v1211_v50 = vpack.c.bf16 %v690_v44, %v690_v44  ;;  %v656_v51 = vmax.f32 %v402_v45, 0.0  ;;  %v688_v52 = vmax.f32 %v530_v46, 0.0 }
  0xd4   :  { %v413_v53 = vadd.f32 %v1285_v47, %v1549_v36  ;;  %v541_v54 = vadd.f32 %v1317_v48, %v1549_v36  ;;  %v404_v55 = vpop.f32.mrf.mxu0  ;;  %v532_v56 = vpop.f32.mrf.mxu1 }
  0xd5   :  { %979 = vst.msk [vmem:[%s1874_s3 + $0x8] sm:$0xf] %vm976_vm2, %v1179_v49  ;;  %1011 = vst.msk [vmem:[%s1874_s3 + $0x88] sm:$0xf] %vm976_vm2, %v1211_v50  ;;  %v1177_v57 = vpack.c.bf16 %v656_v51, %v656_v51  ;;  %v1209_v58 = vpack.c.bf16 %v688_v52, %v688_v52  ;;  %v405_v59 = vadd.f32 %v1549_v36, %v404_v55 }
  0xd6   :  { %v533_v60 = vadd.f32 %v1549_v36, %v532_v56  ;;  %v659_v61 = vmax.f32 %v413_v53, 0.0  ;;  %v691_v62 = vmax.f32 %v541_v54, 0.0  ;;  %v1288_v63 = vpop.f32.mrf.mxu0  ;;  %v1320_v0 = vpop.f32.mrf.mxu1 }
  0xd7   :  { %977 = vst.msk [vmem:[%s1874_s3] sm:$0xf] %vm976_vm2, %v1177_v57  ;;  %1009 = vst.msk [vmem:[%s1874_s3 + $0x80] sm:$0xf] %vm976_vm2, %v1209_v58  ;;  %v657_v1 = vmax.f32 %v405_v59, 0.0  ;;  %v426_v3 = vadd.f32 %v1288_v63, %v1549_v36  ;;  %v554_v4 = vadd.f32 %v1320_v0, %v1549_v36 }
  0xd8   :  { %v689_v2 = vmax.f32 %v533_v60, 0.0  ;;  %v1180_v5 = vpack.c.bf16 %v659_v61, %v659_v61  ;;  %v1212_v6 = vpack.c.bf16 %v691_v62, %v691_v62  ;;  %v417_v7 = vpop.f32.mrf.mxu0  ;;  %v545_v8 = vpop.f32.mrf.mxu1 }
  0xd9   :  { %v1178_v9 = vpack.c.bf16 %v657_v1, %v657_v1  ;;  %v662_v11 = vmax.f32 %v426_v3, 0.0  ;;  %v694_v12 = vmax.f32 %v554_v4, 0.0  ;;  %v418_v13 = vadd.f32 %v1549_v36, %v417_v7 }
  0xda   :  { %v1210_v10 = vpack.c.bf16 %v689_v2, %v689_v2  ;;  %980 = vst.msk [vmem:[%s1874_s3 + $0xc] sm:$0xf] %vm976_vm2, %v1180_v5  ;;  %1012 = vst.msk [vmem:[%s1874_s3 + $0x8c] sm:$0xf] %vm976_vm2, %v1212_v6  ;;  %v546_v14 = vadd.f32 %v1549_v36, %v545_v8  ;;  %v1289_v15 = vpop.f32.mrf.mxu0  ;;  %v1321_v16 = vpop.f32.mrf.mxu1 }
  0xdb   :  { %978 = vst.msk [vmem:[%s1874_s3 + $0x4] sm:$0xf] %vm976_vm2, %v1178_v9  ;;  %v1183_v17 = vpack.c.bf16 %v662_v11, %v662_v11  ;;  %v1215_v18 = vpack.c.bf16 %v694_v12, %v694_v12  ;;  %v429_v19 = vadd.f32 %v1289_v15, %v1549_v36  ;;  %v557_v20 = vadd.f32 %v1321_v16, %v1549_v36 }
  0xdc   :  { %1010 = vst.msk [vmem:[%s1874_s3 + $0x84] sm:$0xf] %vm976_vm2, %v1210_v10  ;;  %v660_v21 = vmax.f32 %v418_v13, 0.0  ;;  %v692_v22 = vmax.f32 %v546_v14, 0.0  ;;  %v420_v23 = vpop.f32.mrf.mxu0  ;;  %v548_v24 = vpop.f32.mrf.mxu1 }
  0xdd   :  { %983 = vst.msk [vmem:[%s1874_s3 + $0x18] sm:$0xf] %vm976_vm2, %v1183_v17  ;;  %1015 = vst.msk [vmem:[%s1874_s3 + $0x98] sm:$0xf] %vm976_vm2, %v1215_v18  ;;  %v663_v25 = vmax.f32 %v429_v19, 0.0  ;;  %v695_v26 = vmax.f32 %v557_v20, 0.0  ;;  %v421_v27 = vadd.f32 %v1549_v36, %v420_v23  ;;  %v549_v28 = vadd.f32 %v1549_v36, %v548_v24 }
  0xde   :  { %v1181_v29 = vpack.c.bf16 %v660_v21, %v660_v21  ;;  %v1213_v30 = vpack.c.bf16 %v692_v22, %v692_v22  ;;  %v1292_v31 = vpop.f32.mrf.mxu0  ;;  %v1324_v32 = vpop.f32.mrf.mxu1 }
  0xdf   :  { %v1184_v33 = vpack.c.bf16 %v663_v25, %v663_v25  ;;  %v1216_v34 = vpack.c.bf16 %v695_v26, %v695_v26  ;;  %v661_v35 = vmax.f32 %v421_v27, 0.0  ;;  %v693_v37 = vmax.f32 %v549_v28, 0.0 }
  0xe0   :  { %981 = vst.msk [vmem:[%s1874_s3 + $0x10] sm:$0xf] %vm976_vm2, %v1181_v29  ;;  %1013 = vst.msk [vmem:[%s1874_s3 + $0x90] sm:$0xf] %vm976_vm2, %v1213_v30  ;;  %v442_v38 = vadd.f32 %v1292_v31, %v1549_v36  ;;  %v570_v39 = vadd.f32 %v1324_v32, %v1549_v36  ;;  %v433_v40 = vpop.f32.mrf.mxu0  ;;  %v561_v41 = vpop.f32.mrf.mxu1 }
  0xe1   :  { %984 = vst.msk [vmem:[%s1874_s3 + $0x1c] sm:$0xf] %vm976_vm2, %v1184_v33  ;;  %1016 = vst.msk [vmem:[%s1874_s3 + $0x9c] sm:$0xf] %vm976_vm2, %v1216_v34  ;;  %v1182_v42 = vpack.c.bf16 %v661_v35, %v661_v35  ;;  %v1214_v43 = vpack.c.bf16 %v693_v37, %v693_v37  ;;  %v434_v44 = vadd.f32 %v1549_v36, %v433_v40 }
  0xe2   :  { %v562_v45 = vadd.f32 %v1549_v36, %v561_v41  ;;  %v666_v46 = vmax.f32 %v442_v38, 0.0  ;;  %v698_v47 = vmax.f32 %v570_v39, 0.0  ;;  %v1293_v48 = vpop.f32.mrf.mxu0  ;;  %v1325_v49 = vpop.f32.mrf.mxu1 }
  0xe3   :  { %982 = vst.msk [vmem:[%s1874_s3 + $0x14] sm:$0xf] %vm976_vm2, %v1182_v42  ;;  %1014 = vst.msk [vmem:[%s1874_s3 + $0x94] sm:$0xf] %vm976_vm2, %v1214_v43  ;;  %v664_v50 = vmax.f32 %v434_v44, 0.0  ;;  %v445_v52 = vadd.f32 %v1293_v48, %v1549_v36  ;;  %v573_v53 = vadd.f32 %v1325_v49, %v1549_v36 }
  0xe4   :  { %v696_v51 = vmax.f32 %v562_v45, 0.0  ;;  %v1187_v54 = vpack.c.bf16 %v666_v46, %v666_v46  ;;  %v1219_v55 = vpack.c.bf16 %v698_v47, %v698_v47  ;;  %v436_v56 = vpop.f32.mrf.mxu0  ;;  %v564_v57 = vpop.f32.mrf.mxu1 }
  0xe5   :  { %v1185_v58 = vpack.c.bf16 %v664_v50, %v664_v50  ;;  %v667_v60 = vmax.f32 %v445_v52, 0.0  ;;  %v699_v61 = vmax.f32 %v573_v53, 0.0  ;;  %v437_v62 = vadd.f32 %v1549_v36, %v436_v56 }
  0xe6   :  { %v1217_v59 = vpack.c.bf16 %v696_v51, %v696_v51  ;;  %987 = vst.msk [vmem:[%s1874_s3 + $0x28] sm:$0xf] %vm976_vm2, %v1187_v54  ;;  %1019 = vst.msk [vmem:[%s1874_s3 + $0xa8] sm:$0xf] %vm976_vm2, %v1219_v55  ;;  %v565_v63 = vadd.f32 %v1549_v36, %v564_v57  ;;  %v1296_v0 = vpop.f32.mrf.mxu0  ;;  %v1328_v1 = vpop.f32.mrf.mxu1 }
  0xe7   :  { %985 = vst.msk [vmem:[%s1874_s3 + $0x20] sm:$0xf] %vm976_vm2, %v1185_v58  ;;  %v1188_v2 = vpack.c.bf16 %v667_v60, %v667_v60  ;;  %v1220_v3 = vpack.c.bf16 %v699_v61, %v699_v61  ;;  %v458_v4 = vadd.f32 %v1296_v0, %v1549_v36  ;;  %v586_v5 = vadd.f32 %v1328_v1, %v1549_v36 }
  0xe8   :  { %1017 = vst.msk [vmem:[%s1874_s3 + $0xa0] sm:$0xf] %vm976_vm2, %v1217_v59  ;;  %v665_v6 = vmax.f32 %v437_v62, 0.0  ;;  %v697_v7 = vmax.f32 %v565_v63, 0.0  ;;  %v449_v8 = vpop.f32.mrf.mxu0  ;;  %v577_v9 = vpop.f32.mrf.mxu1 }
  0xe9   :  { %988 = vst.msk [vmem:[%s1874_s3 + $0x2c] sm:$0xf] %vm976_vm2, %v1188_v2  ;;  %1020 = vst.msk [vmem:[%s1874_s3 + $0xac] sm:$0xf] %vm976_vm2, %v1220_v3  ;;  %v670_v10 = vmax.f32 %v458_v4, 0.0  ;;  %v702_v11 = vmax.f32 %v586_v5, 0.0  ;;  %v450_v12 = vadd.f32 %v1549_v36, %v449_v8  ;;  %v578_v13 = vadd.f32 %v1549_v36, %v577_v9 }
  0xea   :  { %v1186_v14 = vpack.c.bf16 %v665_v6, %v665_v6  ;;  %v1218_v15 = vpack.c.bf16 %v697_v7, %v697_v7  ;;  %v1297_v16 = vpop.f32.mrf.mxu0  ;;  %v1329_v17 = vpop.f32.mrf.mxu1 }
  0xeb   :  { %v1191_v18 = vpack.c.bf16 %v670_v10, %v670_v10  ;;  %v1223_v19 = vpack.c.bf16 %v702_v11, %v702_v11  ;;  %v668_v20 = vmax.f32 %v450_v12, 0.0  ;;  %v700_v21 = vmax.f32 %v578_v13, 0.0 }
  0xec   :  { %986 = vst.msk [vmem:[%s1874_s3 + $0x24] sm:$0xf] %vm976_vm2, %v1186_v14  ;;  %1018 = vst.msk [vmem:[%s1874_s3 + $0xa4] sm:$0xf] %vm976_vm2, %v1218_v15  ;;  %v461_v22 = vadd.f32 %v1297_v16, %v1549_v36  ;;  %v589_v23 = vadd.f32 %v1329_v17, %v1549_v36  ;;  %v452_v24 = vpop.f32.mrf.mxu0  ;;  %v580_v25 = vpop.f32.mrf.mxu1 }
  0xed   :  { %991 = vst.msk [vmem:[%s1874_s3 + $0x38] sm:$0xf] %vm976_vm2, %v1191_v18  ;;  %1023 = vst.msk [vmem:[%s1874_s3 + $0xb8] sm:$0xf] %vm976_vm2, %v1223_v19  ;;  %v1189_v26 = vpack.c.bf16 %v668_v20, %v668_v20  ;;  %v1221_v27 = vpack.c.bf16 %v700_v21, %v700_v21  ;;  %v453_v28 = vadd.f32 %v1549_v36, %v452_v24 }
  0xee   :  { %v581_v29 = vadd.f32 %v1549_v36, %v580_v25  ;;  %v671_v30 = vmax.f32 %v461_v22, 0.0  ;;  %v703_v31 = vmax.f32 %v589_v23, 0.0  ;;  %v1300_v32 = vpop.f32.mrf.mxu0  ;;  %v1332_v33 = vpop.f32.mrf.mxu1 }
  0xef   :  { %989 = vst.msk [vmem:[%s1874_s3 + $0x30] sm:$0xf] %vm976_vm2, %v1189_v26  ;;  %1021 = vst.msk [vmem:[%s1874_s3 + $0xb0] sm:$0xf] %vm976_vm2, %v1221_v27  ;;  %v669_v34 = vmax.f32 %v453_v28, 0.0  ;;  %v474_v37 = vadd.f32 %v1300_v32, %v1549_v36  ;;  %v602_v38 = vadd.f32 %v1332_v33, %v1549_v36 }
  0xf0   :  { %v701_v35 = vmax.f32 %v581_v29, 0.0  ;;  %v1192_v39 = vpack.c.bf16 %v671_v30, %v671_v30  ;;  %v1224_v40 = vpack.c.bf16 %v703_v31, %v703_v31  ;;  %v465_v41 = vpop.f32.mrf.mxu0  ;;  %v593_v42 = vpop.f32.mrf.mxu1 }
  0xf1   :  { %v1190_v43 = vpack.c.bf16 %v669_v34, %v669_v34  ;;  %v674_v45 = vmax.f32 %v474_v37, 0.0  ;;  %v706_v46 = vmax.f32 %v602_v38, 0.0  ;;  %v466_v47 = vadd.f32 %v1549_v36, %v465_v41 }
  0xf2   :  { %v1222_v44 = vpack.c.bf16 %v701_v35, %v701_v35  ;;  %992 = vst.msk [vmem:[%s1874_s3 + $0x3c] sm:$0xf] %vm976_vm2, %v1192_v39  ;;  %1024 = vst.msk [vmem:[%s1874_s3 + $0xbc] sm:$0xf] %vm976_vm2, %v1224_v40  ;;  %v594_v48 = vadd.f32 %v1549_v36, %v593_v42  ;;  %v1301_v49 = vpop.f32.mrf.mxu0  ;;  %v1333_v50 = vpop.f32.mrf.mxu1 }
  0xf3   :  { %990 = vst.msk [vmem:[%s1874_s3 + $0x34] sm:$0xf] %vm976_vm2, %v1190_v43  ;;  %v1195_v51 = vpack.c.bf16 %v674_v45, %v674_v45  ;;  %v1227_v52 = vpack.c.bf16 %v706_v46, %v706_v46  ;;  %v477_v53 = vadd.f32 %v1301_v49, %v1549_v36  ;;  %v605_v54 = vadd.f32 %v1333_v50, %v1549_v36 }
  0xf4   :  { %1022 = vst.msk [vmem:[%s1874_s3 + $0xb4] sm:$0xf] %vm976_vm2, %v1222_v44  ;;  %v672_v55 = vmax.f32 %v466_v47, 0.0  ;;  %v704_v56 = vmax.f32 %v594_v48, 0.0  ;;  %v468_v57 = vpop.f32.mrf.mxu0  ;;  %v596_v58 = vpop.f32.mrf.mxu1 }
  0xf5   :  { %995 = vst.msk [vmem:[%s1874_s3 + $0x48] sm:$0xf] %vm976_vm2, %v1195_v51  ;;  %1027 = vst.msk [vmem:[%s1874_s3 + $0xc8] sm:$0xf] %vm976_vm2, %v1227_v52  ;;  %v675_v59 = vmax.f32 %v477_v53, 0.0  ;;  %v707_v60 = vmax.f32 %v605_v54, 0.0  ;;  %v469_v61 = vadd.f32 %v1549_v36, %v468_v57  ;;  %v597_v62 = vadd.f32 %v1549_v36, %v596_v58 }
  0xf6   :  { %v1193_v63 = vpack.c.bf16 %v672_v55, %v672_v55  ;;  %v1225_v0 = vpack.c.bf16 %v704_v56, %v704_v56  ;;  %v1304_v1 = vpop.f32.mrf.mxu0  ;;  %v1336_v2 = vpop.f32.mrf.mxu1 }
  0xf7   :  { %v1196_v3 = vpack.c.bf16 %v675_v59, %v675_v59  ;;  %v1228_v4 = vpack.c.bf16 %v707_v60, %v707_v60  ;;  %v673_v5 = vmax.f32 %v469_v61, 0.0  ;;  %v705_v6 = vmax.f32 %v597_v62, 0.0 }
  0xf8   :  { %993 = vst.msk [vmem:[%s1874_s3 + $0x40] sm:$0xf] %vm976_vm2, %v1193_v63  ;;  %1025 = vst.msk [vmem:[%s1874_s3 + $0xc0] sm:$0xf] %vm976_vm2, %v1225_v0  ;;  %v490_v7 = vadd.f32 %v1304_v1, %v1549_v36  ;;  %v618_v8 = vadd.f32 %v1336_v2, %v1549_v36  ;;  %v481_v9 = vpop.f32.mrf.mxu0  ;;  %v609_v10 = vpop.f32.mrf.mxu1 }
  0xf9   :  { %996 = vst.msk [vmem:[%s1874_s3 + $0x4c] sm:$0xf] %vm976_vm2, %v1196_v3  ;;  %1028 = vst.msk [vmem:[%s1874_s3 + $0xcc] sm:$0xf] %vm976_vm2, %v1228_v4  ;;  %v1194_v11 = vpack.c.bf16 %v673_v5, %v673_v5  ;;  %v1226_v12 = vpack.c.bf16 %v705_v6, %v705_v6  ;;  %v482_v13 = vadd.f32 %v1549_v36, %v481_v9 }
  0xfa   :  { %v610_v14 = vadd.f32 %v1549_v36, %v609_v10  ;;  %v678_v15 = vmax.f32 %v490_v7, 0.0  ;;  %v710_v16 = vmax.f32 %v618_v8, 0.0  ;;  %v1305_v17 = vpop.f32.mrf.mxu0  ;;  %v1337_v18 = vpop.f32.mrf.mxu1 }
  0xfb   :  { %994 = vst.msk [vmem:[%s1874_s3 + $0x44] sm:$0xf] %vm976_vm2, %v1194_v11  ;;  %1026 = vst.msk [vmem:[%s1874_s3 + $0xc4] sm:$0xf] %vm976_vm2, %v1226_v12  ;;  %v676_v19 = vmax.f32 %v482_v13, 0.0  ;;  %v493_v21 = vadd.f32 %v1305_v17, %v1549_v36  ;;  %v621_v22 = vadd.f32 %v1337_v18, %v1549_v36 }
  0xfc   :  { %v708_v20 = vmax.f32 %v610_v14, 0.0  ;;  %v1199_v23 = vpack.c.bf16 %v678_v15, %v678_v15  ;;  %v1231_v24 = vpack.c.bf16 %v710_v16, %v710_v16  ;;  %v484_v25 = vpop.f32.mrf.mxu0  ;;  %v612_v26 = vpop.f32.mrf.mxu1 }
  0xfd   :  { %v1197_v27 = vpack.c.bf16 %v676_v19, %v676_v19  ;;  %v679_v29 = vmax.f32 %v493_v21, 0.0  ;;  %v711_v30 = vmax.f32 %v621_v22, 0.0  ;;  %v485_v31 = vadd.f32 %v1549_v36, %v484_v25 }
  0xfe   :  { %v1229_v28 = vpack.c.bf16 %v708_v20, %v708_v20  ;;  %999 = vst.msk [vmem:[%s1874_s3 + $0x58] sm:$0xf] %vm976_vm2, %v1199_v23  ;;  %1031 = vst.msk [vmem:[%s1874_s3 + $0xd8] sm:$0xf] %vm976_vm2, %v1231_v24  ;;  %v613_v32 = vadd.f32 %v1549_v36, %v612_v26  ;;  %v1308_v33 = vpop.f32.mrf.mxu0  ;;  %v1340_v34 = vpop.f32.mrf.mxu1 }
  0xff   :  { %997 = vst.msk [vmem:[%s1874_s3 + $0x50] sm:$0xf] %vm976_vm2, %v1197_v27  ;;  %v1200_v35 = vpack.c.bf16 %v679_v29, %v679_v29  ;;  %v1232_v37 = vpack.c.bf16 %v711_v30, %v711_v30  ;;  %v506_v38 = vadd.f32 %v1308_v33, %v1549_v36  ;;  %v634_v39 = vadd.f32 %v1340_v34, %v1549_v36 }
 0x100   :  { %1029 = vst.msk [vmem:[%s1874_s3 + $0xd0] sm:$0xf] %vm976_vm2, %v1229_v28  ;;  %v677_v40 = vmax.f32 %v485_v31, 0.0  ;;  %v709_v41 = vmax.f32 %v613_v32, 0.0  ;;  %v497_v42 = vpop.f32.mrf.mxu0  ;;  %v625_v43 = vpop.f32.mrf.mxu1 }
 0x101   :  { %1000 = vst.msk [vmem:[%s1874_s3 + $0x5c] sm:$0xf] %vm976_vm2, %v1200_v35  ;;  %1032 = vst.msk [vmem:[%s1874_s3 + $0xdc] sm:$0xf] %vm976_vm2, %v1232_v37  ;;  %v682_v44 = vmax.f32 %v506_v38, 0.0  ;;  %v714_v45 = vmax.f32 %v634_v39, 0.0  ;;  %v498_v46 = vadd.f32 %v1549_v36, %v497_v42  ;;  %v626_v47 = vadd.f32 %v1549_v36, %v625_v43 }
 0x102   :  { %v1198_v48 = vpack.c.bf16 %v677_v40, %v677_v40  ;;  %v1230_v49 = vpack.c.bf16 %v709_v41, %v709_v41  ;;  %v1309_v50 = vpop.f32.mrf.mxu0  ;;  %v1341_v51 = vpop.f32.mrf.mxu1 }
 0x103   :  { %v1203_v52 = vpack.c.bf16 %v682_v44, %v682_v44  ;;  %v1235_v53 = vpack.c.bf16 %v714_v45, %v714_v45  ;;  %v680_v54 = vmax.f32 %v498_v46, 0.0  ;;  %v712_v55 = vmax.f32 %v626_v47, 0.0 }
 0x104   :  { %998 = vst.msk [vmem:[%s1874_s3 + $0x54] sm:$0xf] %vm976_vm2, %v1198_v48  ;;  %1030 = vst.msk [vmem:[%s1874_s3 + $0xd4] sm:$0xf] %vm976_vm2, %v1230_v49  ;;  %v509_v56 = vadd.f32 %v1309_v50, %v1549_v36  ;;  %v637_v57 = vadd.f32 %v1341_v51, %v1549_v36  ;;  %v500_v58 = vpop.f32.mrf.mxu0  ;;  %v628_v59 = vpop.f32.mrf.mxu1 }
 0x105   :  { %1003 = vst.msk [vmem:[%s1874_s3 + $0x68] sm:$0xf] %vm976_vm2, %v1203_v52  ;;  %1035 = vst.msk [vmem:[%s1874_s3 + $0xe8] sm:$0xf] %vm976_vm2, %v1235_v53  ;;  %v1201_v60 = vpack.c.bf16 %v680_v54, %v680_v54  ;;  %v1233_v61 = vpack.c.bf16 %v712_v55, %v712_v55  ;;  %v501_v62 = vadd.f32 %v1549_v36, %v500_v58 }
 0x106   :  { %v629_v63 = vadd.f32 %v1549_v36, %v628_v59  ;;  %v683_v0 = vmax.f32 %v509_v56, 0.0  ;;  %v715_v1 = vmax.f32 %v637_v57, 0.0  ;;  %v1312_v2 = vpop.f32.mrf.mxu0  ;;  %v1344_v3 = vpop.f32.mrf.mxu1 }
 0x107   :  { %1001 = vst.msk [vmem:[%s1874_s3 + $0x60] sm:$0xf] %vm976_vm2, %v1201_v60  ;;  %1033 = vst.msk [vmem:[%s1874_s3 + $0xe0] sm:$0xf] %vm976_vm2, %v1233_v61  ;;  %v681_v4 = vmax.f32 %v501_v62, 0.0  ;;  %v522_v6 = vadd.f32 %v1312_v2, %v1549_v36  ;;  %v650_v7 = vadd.f32 %v1344_v3, %v1549_v36 }
 0x108   :  { %v713_v5 = vmax.f32 %v629_v63, 0.0  ;;  %v1204_v8 = vpack.c.bf16 %v683_v0, %v683_v0  ;;  %v1236_v9 = vpack.c.bf16 %v715_v1, %v715_v1  ;;  %v513_v10 = vpop.f32.mrf.mxu0  ;;  %v641_v11 = vpop.f32.mrf.mxu1 }
 0x109   :  { %v1202_v12 = vpack.c.bf16 %v681_v4, %v681_v4  ;;  %v686_v14 = vmax.f32 %v522_v6, 0.0  ;;  %v718_v15 = vmax.f32 %v650_v7, 0.0  ;;  %v514_v16 = vadd.f32 %v1549_v36, %v513_v10 }
 0x10a   :  { %v1234_v13 = vpack.c.bf16 %v713_v5, %v713_v5  ;;  %1004 = vst.msk [vmem:[%s1874_s3 + $0x6c] sm:$0xf] %vm976_vm2, %v1204_v8  ;;  %1036 = vst.msk [vmem:[%s1874_s3 + $0xec] sm:$0xf] %vm976_vm2, %v1236_v9  ;;  %v642_v17 = vadd.f32 %v1549_v36, %v641_v11  ;;  %v1313_v18 = vpop.f32.mrf.mxu0  ;;  %v1345_v19 = vpop.f32.mrf.mxu1 }
 0x10b   :  { %1002 = vst.msk [vmem:[%s1874_s3 + $0x64] sm:$0xf] %vm976_vm2, %v1202_v12  ;;  %v1207_v20 = vpack.c.bf16 %v686_v14, %v686_v14  ;;  %v1239_v21 = vpack.c.bf16 %v718_v15, %v718_v15  ;;  %v525_v22 = vadd.f32 %v1313_v18, %v1549_v36  ;;  %v653_v23 = vadd.f32 %v1345_v19, %v1549_v36 }
 0x10c   :  { %1034 = vst.msk [vmem:[%s1874_s3 + $0xe4] sm:$0xf] %vm976_vm2, %v1234_v13  ;;  %v684_v24 = vmax.f32 %v514_v16, 0.0  ;;  %v716_v25 = vmax.f32 %v642_v17, 0.0  ;;  %v516_v26 = vpop.f32.mrf.mxu0  ;;  %v644_v27 = vpop.f32.mrf.mxu1 }
 0x10d   :  { %1007 = vst.msk [vmem:[%s1874_s3 + $0x78] sm:$0xf] %vm976_vm2, %v1207_v20  ;;  %1039 = vst.msk [vmem:[%s1874_s3 + $0xf8] sm:$0xf] %vm976_vm2, %v1239_v21  ;;  %v687_v28 = vmax.f32 %v525_v22, 0.0  ;;  %v719_v29 = vmax.f32 %v653_v23, 0.0  ;;  %v517_v30 = vadd.f32 %v1549_v36, %v516_v26  ;;  %v645_v31 = vadd.f32 %v1549_v36, %v644_v27 }
 0x10e   :  { %v1205_v32 = vpack.c.bf16 %v684_v24, %v684_v24  ;;  %v1237_v33 = vpack.c.bf16 %v716_v25, %v716_v25 }
 0x10f   :  { %v1208_v34 = vpack.c.bf16 %v687_v28, %v687_v28  ;;  %v1240_v35 = vpack.c.bf16 %v719_v29, %v719_v29  ;;  %v685_v37 = vmax.f32 %v517_v30, 0.0  ;;  %v717_v38 = vmax.f32 %v645_v31, 0.0 }
 0x110   :  { %1005 = vst.msk [vmem:[%s1874_s3 + $0x70] sm:$0xf] %vm976_vm2, %v1205_v32  ;;  %1037 = vst.msk [vmem:[%s1874_s3 + $0xf0] sm:$0xf] %vm976_vm2, %v1237_v33 }
 0x111   :  { %1008 = vst.msk [vmem:[%s1874_s3 + $0x7c] sm:$0xf] %vm976_vm2, %v1208_v34  ;;  %1040 = vst.msk [vmem:[%s1874_s3 + $0xfc] sm:$0xf] %vm976_vm2, %v1240_v35  ;;  %v1206_v36 = vpack.c.bf16 %v685_v37, %v685_v37  ;;  %v1238_v39 = vpack.c.bf16 %v717_v38, %v717_v38 }
 0x113   :  { %1006 = vst.msk [vmem:[%s1874_s3 + $0x74] sm:$0xf] %vm976_vm2, %v1206_v36  ;;  %1038 = vst.msk [vmem:[%s1874_s3 + $0xf4] sm:$0xf] %vm976_vm2, %v1238_v39 }

// kernel: monet_forward.19
= control target key start
LH: loop header
LB: loop body
LE: loop exit
PB: predicated region body
PF: predicated region fallthrough
CT: control target
= control target key end

     0   :  { %v3324_v0 = vmov 0   ;;  %vm787_vm0 = vcmask 261120   ;;  %vm2372_vm1 = vcmask 7168   ;;  %s4880_s1 = inlined_call_operand.vmem [shape: bf16[288,32], index: 1, kind: input, shape index: {}]   ;;  %s4881_s0 = inlined_call_operand.vmem [shape: bf16[512,288], index: 0, kind: input, shape index: {}]   ;;  %s4882_s2 = inlined_call_operand.vmem [shape: f32[1,32], index: 2, kind: input, shape index: {}]   ;;  %s4883_s3 = inlined_call_operand.vmem [shape: f32[1,32], index: 3, kind: input, shape index: {}]   ;;  %s4884_s4 = inlined_call_operand.<no memory space> [shape: f32[1,1], index: 4, kind: input, shape index: {}]   ;;  %s4885_s5 = inlined_call_operand.vmem [shape: f32[512,1], index: 5, kind: input, shape index: {}]   ;;  %s4886_s6 = inlined_call_operand.vmem [shape: f32[512,1], index: 6, kind: output, shape index: {0}]   ;;  %s4887_s7 = inlined_call_operand.vmem [shape: f32[512,1], index: 7, kind: output, shape index: {1}]  }
   0x1   :  { %884 = vmatprep.subr.bf16.mxu0 %v3324_v0  ;;  %2888 = vmatprep.subr.bf16.mxu1 %v3324_v0  ;;  %v2921_v1 = vld [vmem:[%s4880_s1 + $0x38] sm:$0xff]   ;;  %v2922_v2 = vld [vmem:[%s4880_s1 + $0x30] sm:$0xff]   ;;  %v2923_v3 = vld [vmem:[%s4880_s1 + $0x28] sm:$0xff]  }
   0x2   :  { %885 = vmatpush1.bf16.msra.mxu0 %v2921_v1  ;;  %2904 = vmatpush1.bf16.msra.mxu1 %v2921_v1  ;;  %v2924_v4 = vld [vmem:[%s4880_s1 + $0x20] sm:$0xff]   ;;  %v2925_v5 = vld [vmem:[%s4880_s1 + $0x18] sm:$0xff]   ;;  %v2926_v7 = vld [vmem:[%s4880_s1 + $0x10] sm:$0xff]  }
   0x3   :  { %886 = vmatprep.subr.bf16.mxu0 %v3324_v0  ;;  %2889 = vmatprep.subr.bf16.mxu1 %v3324_v0  ;;  %v2939_v6 = vld [vmem:[%s4881_s0 + $0x4] ss:$12 sps:$4 sm:$0xff]   ;;  %v2927_v9 = vld [vmem:[%s4880_s1 + $0x8] sm:$0xff]   ;;  %v2929_v11 = vld [vmem:[%s4880_s1 + $0x78] sm:$0xff]  }
   0x4   :  { %v2942_v8 = vld [vmem:[%s4881_s0 + $0x244] ss:$12 sps:$4 sm:$0xff]   ;;  %916 = vmatprep.mubr.bf16.mxu0 %v2939_v6  ;;  %v2931_v13 = vld [vmem:[%s4880_s1 + $0x68] sm:$0xff]   ;;  %v2933_v15 = vld [vmem:[%s4880_s1 + $0x58] sm:$0xff]  }
   0x5   :  { %1108 = vmatprep.mubr.bf16.mxu1 %v2942_v8  ;;  %v2928_v10 = vld [vmem:[%s4880_s1] sm:$0xff]   ;;  %v2930_v12 = vld [vmem:[%s4880_s1 + $0x70] sm:$0xff]   ;;  %v2935_v17 = vld [vmem:[%s4880_s1 + $0x48] sm:$0xff]  }
   0x6   :  { %887 = vmatpush1.bf16.msra.mxu0 %v2922_v2  ;;  %2905 = vmatpush1.bf16.msra.mxu1 %v2922_v2  ;;  %v2932_v14 = vld [vmem:[%s4880_s1 + $0x60] sm:$0xff]   ;;  %v2934_v16 = vld [vmem:[%s4880_s1 + $0x50] sm:$0xff]   ;;  %v2943_v19 = vld [vmem:[%s4880_s1 + $0x88] sm:$0xff]  }
   0x7   :  { %888 = vmatprep.subr.bf16.mxu0 %v3324_v0  ;;  %2890 = vmatprep.subr.bf16.mxu1 %v3324_v0  ;;  %v2936_v18 = vld [vmem:[%s4880_s1 + $0x40] sm:$0xff]   ;;  %v2944_v22 = vld [vmem:[%s4881_s0 + $0x1c] ss:$12 sps:$4 sm:$0xff]   ;;  %v2956_v31 = vld [vmem:[%s4881_s0 + $0x4c] ss:$12 sps:$4 sm:$0xff]  }
   0x8   :  { %v2937_v20 = vld [vmem:[%s4881_s0] ss:$12 sps:$4 sm:$0xff]   ;;  %v2946_v23 = vld [vmem:[%s4881_s0 + $0x25c] ss:$12 sps:$4 sm:$0xff]   ;;  %v2948_v25 = vld [vmem:[%s4881_s0 + $0x18] ss:$12 sps:$4 sm:$0xff]  }
   0x9   :  { %v2940_v21 = vld [vmem:[%s4881_s0 + $0x240] ss:$12 sps:$4 sm:$0xff]   ;;  %v2949_v26 = vld [vmem:[%s4881_s0 + $0x258] ss:$12 sps:$4 sm:$0xff]   ;;  %v2954_v29 = vld [vmem:[%s4881_s0 + $0x30] ss:$12 sps:$4 sm:$0xff]  }
   0xa   :  { %889 = vmatpush1.bf16.msra.mxu0 %v2923_v3  ;;  %2906 = vmatpush1.bf16.msra.mxu1 %v2923_v3  ;;  %v2968_v24 = vld [vmem:[%s4880_s1 + $0x80] sm:$0xff]   ;;  %v2955_v30 = vld [vmem:[%s4881_s0 + $0x270] ss:$12 sps:$4 sm:$0xff]   ;;  %v2958_v32 = vld [vmem:[%s4881_s0 + $0x28c] ss:$12 sps:$4 sm:$0xff]  }
   0xb   :  { %890 = vmatprep.subr.bf16.mxu0 %v3324_v0  ;;  %2891 = vmatprep.subr.bf16.mxu1 %v3324_v0  ;;  %v2950_v27 = vld [vmem:[%s4881_s0 + $0x34] ss:$12 sps:$4 sm:$0xff]   ;;  %v2962_v35 = vld [vmem:[%s4881_s0 + $0x64] ss:$12 sps:$4 sm:$0xff]   ;;  %v2969_v39 = vld [vmem:[%s4881_s0 + $0x7c] ss:$12 sps:$4 sm:$0xff]  }
   0xc   :  { %v2952_v28 = vld [vmem:[%s4881_s0 + $0x274] ss:$12 sps:$4 sm:$0xff]   ;;  %v2964_v36 = vld [vmem:[%s4881_s0 + $0x2a4] ss:$12 sps:$4 sm:$0xff]   ;;  %v2971_v40 = vld [vmem:[%s4881_s0 + $0x2bc] ss:$12 sps:$4 sm:$0xff]  }
   0xd   :  { %v2960_v33 = vld [vmem:[%s4881_s0 + $0x48] ss:$12 sps:$4 sm:$0xff]   ;;  %v2966_v37 = vld [vmem:[%s4881_s0 + $0x60] ss:$12 sps:$4 sm:$0xff]   ;;  %v2973_v41 = vld [vmem:[%s4881_s0 + $0x78] ss:$12 sps:$4 sm:$0xff]  }
   0xe   :  { %891 = vmatpush1.bf16.msra.mxu0 %v2924_v4  ;;  %2907 = vmatpush1.bf16.msra.mxu1 %v2924_v4  ;;  %v2961_v34 = vld [vmem:[%s4881_s0 + $0x288] ss:$12 sps:$4 sm:$0xff]   ;;  %v2967_v38 = vld [vmem:[%s4881_s0 + $0x2a0] ss:$12 sps:$4 sm:$0xff]   ;;  %v2974_v42 = vld [vmem:[%s4881_s0 + $0x2b8] ss:$12 sps:$4 sm:$0xff]  }
   0xf   :  { %892 = vmatprep.subr.bf16.mxu0 %v3324_v0  ;;  %2892 = vmatprep.subr.bf16.mxu1 %v3324_v0  ;;  %v2975_v43 = vld [vmem:[%s4881_s0 + $0x94] ss:$12 sps:$4 sm:$0xff]   ;;  %v2979_v45 = vld [vmem:[%s4881_s0 + $0x90] ss:$12 sps:$4 sm:$0xff]   ;;  %v2981_v47 = vld [vmem:[%s4881_s0 + $0xac] ss:$12 sps:$4 sm:$0xff]  }
  0x10   :  { %v2977_v44 = vld [vmem:[%s4881_s0 + $0x2d4] ss:$12 sps:$4 sm:$0xff]   ;;  %v2980_v46 = vld [vmem:[%s4881_s0 + $0x2d0] ss:$12 sps:$4 sm:$0xff]   ;;  %v2983_v48 = vld [vmem:[%s4881_s0 + $0x2ec] ss:$12 sps:$4 sm:$0xff]  }
  0x11   :  { %v2985_v49 = vld [vmem:[%s4881_s0 + $0xa8] ss:$12 sps:$4 sm:$0xff]   ;;  %v2987_v51 = vld [vmem:[%s4881_s0 + $0xc4] ss:$12 sps:$4 sm:$0xff]   ;;  %v2990_v53 = vld [vmem:[%s4881_s0 + $0xc0] ss:$12 sps:$4 sm:$0xff]  }
  0x12   :  { %893 = vmatpush1.bf16.msra.mxu0 %v2925_v5  ;;  %2908 = vmatpush1.bf16.msra.mxu1 %v2925_v5  ;;  %v2986_v50 = vld [vmem:[%s4881_s0 + $0x2e8] ss:$12 sps:$4 sm:$0xff]   ;;  %v2991_v54 = vld [vmem:[%s4881_s0 + $0x20] ss:$12 sps:$4 sm:$0xff]   ;;  %v2994_v56 = vld [vmem:[%s4881_s0 + $0x38] ss:$12 sps:$4 sm:$0xff]  }
  0x13   :  { %894 = vmatprep.subr.bf16.mxu0 %v3324_v0  ;;  %2893 = vmatprep.subr.bf16.mxu1 %v3324_v0  ;;  %v2989_v52 = vld [vmem:[%s4881_s0 + $0x8] ss:$12 sps:$4 sm:$0xff]   ;;  %v2995_v57 = vld [vmem:[%s4881_s0 + $0xd8] ss:$12 sps:$4 sm:$0xff]   ;;  %v2996_v58 = vld [vmem:[%s4881_s0 + $0x50] ss:$12 sps:$4 sm:$0xff]  }
  0x14   :  { %v2992_v55 = vld [vmem:[%s4881_s0 + $0xdc] ss:$12 sps:$4 sm:$0xff]   ;;  %v2997_v59 = vld [vmem:[%s4881_s0 + $0xf4] ss:$12 sps:$4 sm:$0xff]   ;;  %v3002_v63 = vld [vmem:[%s4881_s0 + $0x10c] ss:$12 sps:$4 sm:$0xff]  }
  0x15   :  { %v2999_v60 = vld [vmem:[%s4881_s0 + $0x68] ss:$12 sps:$4 sm:$0xff]   ;;  %v3000_v61 = vld [vmem:[%s4881_s0 + $0xf0] ss:$12 sps:$4 sm:$0xff]   ;;  %v3001_v62 = vld [vmem:[%s4881_s0 + $0x80] ss:$12 sps:$4 sm:$0xff]  }
  0x16   :  { %895 = vmatpush1.bf16.msra.mxu0 %v2926_v7  ;;  %2909 = vmatpush1.bf16.msra.mxu1 %v2926_v7  ;;  %v3005_v1 = vld [vmem:[%s4881_s0 + $0x108] ss:$12 sps:$4 sm:$0xff]   ;;  %v3006_v2 = vld [vmem:[%s4881_s0 + $0xb0] ss:$12 sps:$4 sm:$0xff]   ;;  %v3010_v5 = vld [vmem:[%s4881_s0 + $0x120] ss:$12 sps:$4 sm:$0xff]  }
  0x17   :  { %896 = vmatprep.subr.bf16.mxu0 %v3324_v0  ;;  %2894 = vmatprep.subr.bf16.mxu1 %v3324_v0  ;;  %v3007_v3 = vld [vmem:[%s4881_s0 + $0x124] ss:$12 sps:$4 sm:$0xff]   ;;  %v3009_v4 = vld [vmem:[%s4881_s0 + $0xc8] ss:$12 sps:$4 sm:$0xff]   ;;  %v3011_v6 = vld [vmem:[%s4881_s0 + $0xe0] ss:$12 sps:$4 sm:$0xff]  }
  0x18   :  { %v3012_v7 = vld [vmem:[%s4881_s0 + $0x13c] ss:$12 sps:$4 sm:$0xff]   ;;  %v3014_v8 = vld [vmem:[%s4881_s0 + $0xf8] ss:$12 sps:$4 sm:$0xff]  }
  0x1a   :  { %897 = vmatpush1.bf16.msra.mxu0 %v2927_v9  ;;  %2910 = vmatpush1.bf16.msra.mxu1 %v2927_v9  ;;  %v3015_v9 = vld [vmem:[%s4881_s0 + $0x138] ss:$12 sps:$4 sm:$0xff]  }
  0x1b   :  { %898 = vmatprep.subr.bf16.mxu0 %v3324_v0  ;;  %2895 = vmatprep.subr.bf16.mxu1 %v3324_v0 }
  0x1e   :  { %899 = vmatpush1.bf16.msra.mxu0 %v2928_v10  ;;  %2911 = vmatpush1.bf16.msra.mxu1 %v2928_v10  ;;  %v3016_v10 = vld [vmem:[%s4881_s0 + $0x110] ss:$12 sps:$4 sm:$0xff]  }
  0x1f   :  { %900 = vmatprep.subr.bf16.mxu0 %v3324_v0  ;;  %2896 = vmatprep.subr.bf16.mxu1 %v3324_v0 }
  0x22   :  { %901 = vmatpush2.bf16.msra.mxu0 %v2929_v11  ;;  %2912 = vmatpush2.bf16.msra.mxu1 %v2929_v11  ;;  %v3017_v11 = vld [vmem:[%s4881_s0 + $0x154] ss:$12 sps:$4 sm:$0xff]  }
  0x23   :  { %902 = vmatprep.subr.bf16.mxu0 %v3324_v0  ;;  %2897 = vmatprep.subr.bf16.mxu1 %v3324_v0 }
  0x26   :  { %903 = vmatpush2.bf16.msra.mxu0 %v2930_v12  ;;  %2913 = vmatpush2.bf16.msra.mxu1 %v2930_v12  ;;  %v3019_v12 = vld [vmem:[%s4881_s0 + $0x128] ss:$12 sps:$4 sm:$0xff]  }
  0x27   :  { %904 = vmatprep.subr.bf16.mxu0 %v3324_v0  ;;  %2898 = vmatprep.subr.bf16.mxu1 %v3324_v0 }
  0x2a   :  { %905 = vmatpush2.bf16.msra.mxu0 %v2931_v13  ;;  %2914 = vmatpush2.bf16.msra.mxu1 %v2931_v13  ;;  %v3020_v13 = vld [vmem:[%s4881_s0 + $0x150] ss:$12 sps:$4 sm:$0xff]  }
  0x2b   :  { %906 = vmatprep.subr.bf16.mxu0 %v3324_v0  ;;  %2899 = vmatprep.subr.bf16.mxu1 %v3324_v0 }
  0x2e   :  { %907 = vmatpush2.bf16.msra.mxu0 %v2932_v14  ;;  %2915 = vmatpush2.bf16.msra.mxu1 %v2932_v14  ;;  %v3021_v14 = vld [vmem:[%s4881_s0 + $0x140] ss:$12 sps:$4 sm:$0xff]  }
  0x2f   :  { %908 = vmatprep.subr.bf16.mxu0 %v3324_v0  ;;  %2900 = vmatprep.subr.bf16.mxu1 %v3324_v0 }
  0x32   :  { %909 = vmatpush2.bf16.msra.mxu0 %v2933_v15  ;;  %2916 = vmatpush2.bf16.msra.mxu1 %v2933_v15  ;;  %v3022_v15 = vld [vmem:[%s4881_s0 + $0x16c] ss:$12 sps:$4 sm:$0xff]  }
  0x33   :  { %910 = vmatprep.subr.bf16.mxu0 %v3324_v0  ;;  %2901 = vmatprep.subr.bf16.mxu1 %v3324_v0 }
  0x36   :  { %911 = vmatpush2.bf16.msra.mxu0 %v2934_v16  ;;  %2917 = vmatpush2.bf16.msra.mxu1 %v2934_v16  ;;  %v3024_v16 = vld [vmem:[%s4881_s0 + $0x158] ss:$12 sps:$4 sm:$0xff]  }
  0x37   :  { %912 = vmatprep.subr.bf16.mxu0 %v3324_v0  ;;  %2902 = vmatprep.subr.bf16.mxu1 %v3324_v0 }
  0x3a   :  { %913 = vmatpush2.bf16.msra.mxu0 %v2935_v17  ;;  %2918 = vmatpush2.bf16.msra.mxu1 %v2935_v17  ;;  %v3025_v17 = vld [vmem:[%s4881_s0 + $0x168] ss:$12 sps:$4 sm:$0xff]  }
  0x3b   :  { %914 = vmatprep.subr.bf16.mxu0 %v3324_v0  ;;  %2903 = vmatprep.subr.bf16.mxu1 %v3324_v0  ;;  %v3004_v0 = vld [vmem:[%s4881_s0 + $0x98] ss:$12 sps:$4 sm:$0xff]  }
  0x3e   :  { %915 = vmatpush2.bf16.msra.mxu0 %v2936_v18  ;;  %2919 = vmatpush2.bf16.msra.mxu1 %v2936_v18  ;;  %v3026_v18 = vld [vmem:[%s4881_s0 + $0x170] ss:$12 sps:$4 sm:$0xff]  }
  0x3f   :  { %2820 = vmatprep.subr.bf16.mxu1 %v2943_v19 }
  0x41   :  { %917 = vmatmul.mubr.bf16.vlgmr.msra.gmra.mxu0 %v2937_v20  ;;  %1109 = vmatmul.mubr.bf16.vlgmr.msra.gmra.mxu1 %v2940_v21  ;;  %v3029_v20 = vld [vmem:[%s4881_s0 + $0x188] ss:$12 sps:$4 sm:$0xff]   ;;  %v3030_v21 = vld [vmem:[%s4881_s0 + $0x180] ss:$12 sps:$4 sm:$0xff]  }
  0x42   :  { %2821 = vmatpush3.bf16.msra.mxu1 %v2943_v19  ;;  %924 = vmatprep.mubr.bf16.mxu0 %v2944_v22  ;;  %v3027_v19 = vld [vmem:[%s4881_s0 + $0x184] ss:$12 sps:$4 sm:$0xff]   ;;  %v3031_v22 = vld [vmem:[%s4881_s0 + $0x1a0] ss:$12 sps:$4 sm:$0xff]  }
  0x43   :  { %1116 = vmatprep.mubr.bf16.mxu1 %v2946_v23  ;;  %2822 = vmatprep.subr.bf16.mxu1 %v2968_v24  ;;  %v3032_v23 = vld [vmem:[%s4881_s0 + $0x19c] ss:$12 sps:$4 sm:$0xff]  }
  0x46   :  { %2823 = vmatpush3.bf16.msra.mxu1 %v2968_v24  ;;  %v3034_v24 = vld [vmem:[%s4881_s0 + $0x1b8] ss:$12 sps:$4 sm:$0xff]  }
  0x49   :  { %925 = vmatmul.mubr.bf16.gmra.mxu0 %v2948_v25  ;;  %1117 = vmatmul.mubr.bf16.gmra.mxu1 %v2949_v26  ;;  %v3035_v25 = vld [vmem:[%s4881_s0 + $0x198] ss:$12 sps:$4 sm:$0xff]   ;;  %v3036_v26 = vld [vmem:[%s4881_s0 + $0x1d0] ss:$12 sps:$4 sm:$0xff]  }
  0x4a   :  { %932 = vmatprep.mubr.bf16.mxu0 %v2950_v27  ;;  %1124 = vmatprep.mubr.bf16.mxu1 %v2952_v28  ;;  %v3037_v27 = vld [vmem:[%s4881_s0 + $0x1b4] ss:$12 sps:$4 sm:$0xff]  }
  0x4b   :  { %v3039_v28 = vld [vmem:[%s4881_s0 + $0x1e8] ss:$12 sps:$4 sm:$0xff]  }
  0x51   :  { %933 = vmatmul.mubr.bf16.gmra.mxu0 %v2954_v29  ;;  %1125 = vmatmul.mubr.bf16.gmra.mxu1 %v2955_v30  ;;  %v3040_v29 = vld [vmem:[%s4881_s0 + $0x1b0] ss:$12 sps:$4 sm:$0xff]   ;;  %v3041_v30 = vld [vmem:[%s4881_s0 + $0x200] ss:$12 sps:$4 sm:$0xff]  }
  0x52   :  { %940 = vmatprep.mubr.bf16.mxu0 %v2956_v31  ;;  %1132 = vmatprep.mubr.bf16.mxu1 %v2958_v32  ;;  %v3042_v31 = vld [vmem:[%s4881_s0 + $0x1cc] ss:$12 sps:$4 sm:$0xff]  }
  0x53   :  { %v3044_v32 = vld [vmem:[%s4881_s0 + $0x218] ss:$12 sps:$4 sm:$0xff]  }
  0x59   :  { %941 = vmatmul.mubr.bf16.gmra.mxu0 %v2960_v33  ;;  %1133 = vmatmul.mubr.bf16.gmra.mxu1 %v2961_v34  ;;  %v3045_v33 = vld [vmem:[%s4881_s0 + $0x1c8] ss:$12 sps:$4 sm:$0xff]   ;;  %v3046_v34 = vld [vmem:[%s4881_s0 + $0x230] ss:$12 sps:$4 sm:$0xff]  }
  0x5a   :  { %948 = vmatprep.mubr.bf16.mxu0 %v2962_v35  ;;  %1140 = vmatprep.mubr.bf16.mxu1 %v2964_v36  ;;  %v3047_v35 = vld [vmem:[%s4881_s0 + $0x1e4] ss:$12 sps:$4 sm:$0xff]   ;;  %v3049_v36 = vld [vmem:[%s4881_s0 + $0x248] ss:$12 sps:$4 sm:$0xff]  }
  0x61   :  { %949 = vmatmul.mubr.bf16.gmra.mxu0 %v2966_v37  ;;  %1141 = vmatmul.mubr.bf16.gmra.mxu1 %v2967_v38  ;;  %v3050_v37 = vld [vmem:[%s4881_s0 + $0x1e0] ss:$12 sps:$4 sm:$0xff]  }
  0x62   :  { %956 = vmatprep.mubr.bf16.mxu0 %v2969_v39  ;;  %1148 = vmatprep.mubr.bf16.mxu1 %v2971_v40  ;;  %v3051_v38 = vld [vmem:[%s4881_s0 + $0x260] ss:$12 sps:$4 sm:$0xff]   ;;  %v3052_v39 = vld [vmem:[%s4881_s0 + $0x1fc] ss:$12 sps:$4 sm:$0xff]   ;;  %v3054_v40 = vld [vmem:[%s4881_s0 + $0x278] ss:$12 sps:$4 sm:$0xff]  }
  0x69   :  { %957 = vmatmul.mubr.bf16.gmra.mxu0 %v2973_v41  ;;  %1149 = vmatmul.mubr.bf16.gmra.mxu1 %v2974_v42  ;;  %v3055_v41 = vld [vmem:[%s4881_s0 + $0x1f8] ss:$12 sps:$4 sm:$0xff]   ;;  %v3056_v42 = vld [vmem:[%s4881_s0 + $0x290] ss:$12 sps:$4 sm:$0xff]  }
  0x6a   :  { %964 = vmatprep.mubr.bf16.mxu0 %v2975_v43  ;;  %1156 = vmatprep.mubr.bf16.mxu1 %v2977_v44  ;;  %v3057_v43 = vld [vmem:[%s4881_s0 + $0x214] ss:$12 sps:$4 sm:$0xff]  }
  0x6b   :  { %v3059_v44 = vld [vmem:[%s4881_s0 + $0x2a8] ss:$12 sps:$4 sm:$0xff]  }
  0x71   :  { %965 = vmatmul.mubr.bf16.gmra.mxu0 %v2979_v45  ;;  %1157 = vmatmul.mubr.bf16.gmra.mxu1 %v2980_v46  ;;  %v3060_v45 = vld [vmem:[%s4881_s0 + $0x210] ss:$12 sps:$4 sm:$0xff]   ;;  %v3061_v46 = vld [vmem:[%s4881_s0 + $0x2c0] ss:$12 sps:$4 sm:$0xff]  }
  0x72   :  { %972 = vmatprep.mubr.bf16.mxu0 %v2981_v47  ;;  %1164 = vmatprep.mubr.bf16.mxu1 %v2983_v48  ;;  %v3062_v47 = vld [vmem:[%s4881_s0 + $0x22c] ss:$12 sps:$4 sm:$0xff]  }
  0x73   :  { %v3064_v48 = vld [vmem:[%s4881_s0 + $0x2d8] ss:$12 sps:$4 sm:$0xff]  }
  0x79   :  { %973 = vmatmul.mubr.bf16.gmra.mxu0 %v2985_v49  ;;  %1165 = vmatmul.mubr.bf16.gmra.mxu1 %v2986_v50  ;;  %v3065_v49 = vld [vmem:[%s4881_s0 + $0x228] ss:$12 sps:$4 sm:$0xff]   ;;  %v3066_v50 = vld [vmem:[%s4881_s0 + $0x2f0] ss:$12 sps:$4 sm:$0xff]  }
  0x7a   :  { %980 = vmatprep.mubr.bf16.mxu0 %v2987_v51  ;;  %2824 = vmatprep.mubr.msk.bf16.mxu1 %vm787_vm0, %v2989_v52 }
  0x81   :  { %981 = vmatmul.mubr.bf16.gmra.mxu0 %v2990_v53  ;;  %2825 = vmatmul.mubr.msk.bf16.vlgmr.msra.gmra.mxu1 %vm787_vm0, %v2991_v54 }
  0x82   :  { %988 = vmatprep.mubr.bf16.mxu0 %v2992_v55  ;;  %2828 = vmatprep.mubr.msk.bf16.mxu1 %vm787_vm0, %v2994_v56 }
  0x89   :  { %989 = vmatmul.mubr.bf16.gmra.mxu0 %v2995_v57  ;;  %2829 = vmatmul.mubr.msk.bf16.gmra.mxu1 %vm787_vm0, %v2996_v58 }
  0x8a   :  { %996 = vmatprep.mubr.bf16.mxu0 %v2997_v59  ;;  %2832 = vmatprep.mubr.msk.bf16.mxu1 %vm787_vm0, %v2999_v60 }
  0x91   :  { %997 = vmatmul.mubr.bf16.gmra.mxu0 %v3000_v61  ;;  %2833 = vmatmul.mubr.msk.bf16.gmra.mxu1 %vm787_vm0, %v3001_v62 }
  0x92   :  { %1004 = vmatprep.mubr.bf16.mxu0 %v3002_v63  ;;  %2836 = vmatprep.mubr.msk.bf16.mxu1 %vm787_vm0, %v3004_v0 }
  0x99   :  { %1005 = vmatmul.mubr.bf16.gmra.mxu0 %v3005_v1  ;;  %2837 = vmatmul.mubr.msk.bf16.gmra.mxu1 %vm787_vm0, %v3006_v2 }
  0x9a   :  { %1012 = vmatprep.mubr.bf16.mxu0 %v3007_v3  ;;  %2840 = vmatprep.mubr.msk.bf16.mxu1 %vm787_vm0, %v3009_v4 }
  0xa1   :  { %1013 = vmatmul.mubr.bf16.gmra.mxu0 %v3010_v5  ;;  %2841 = vmatmul.mubr.msk.bf16.gmra.mxu1 %vm787_vm0, %v3011_v6 }
  0xa2   :  { %1020 = vmatprep.mubr.bf16.mxu0 %v3012_v7  ;;  %2844 = vmatprep.mubr.msk.bf16.mxu1 %vm787_vm0, %v3014_v8 }
  0xa9   :  { %1021 = vmatmul.mubr.bf16.gmra.mxu0 %v3015_v9  ;;  %2845 = vmatmul.mubr.msk.bf16.gmra.mxu1 %vm787_vm0, %v3016_v10 }
  0xaa   :  { %1028 = vmatprep.mubr.bf16.mxu0 %v3017_v11  ;;  %2848 = vmatprep.mubr.msk.bf16.mxu1 %vm787_vm0, %v3019_v12 }
  0xb1   :  { %1029 = vmatmul.mubr.bf16.gmra.mxu0 %v3020_v13  ;;  %2849 = vmatmul.mubr.msk.bf16.gmra.mxu1 %vm787_vm0, %v3021_v14 }
  0xb2   :  { %1036 = vmatprep.mubr.bf16.mxu0 %v3022_v15  ;;  %2852 = vmatprep.mubr.msk.bf16.mxu1 %vm787_vm0, %v3024_v16 }
  0xb9   :  { %1037 = vmatmul.mubr.bf16.gmra.mxu0 %v3025_v17  ;;  %2853 = vmatmul.mubr.msk.bf16.gmra.mxu1 %vm787_vm0, %v3026_v18 }
  0xba   :  { %1044 = vmatprep.mubr.bf16.mxu0 %v3027_v19  ;;  %2856 = vmatprep.mubr.msk.bf16.mxu1 %vm787_vm0, %v3029_v20 }
  0xc1   :  { %1045 = vmatmul.mubr.bf16.gmra.mxu0 %v3030_v21  ;;  %2857 = vmatmul.mubr.msk.bf16.gmra.mxu1 %vm787_vm0, %v3031_v22 }
  0xc2   :  { %1052 = vmatprep.mubr.bf16.mxu0 %v3032_v23  ;;  %2860 = vmatprep.mubr.msk.bf16.mxu1 %vm787_vm0, %v3034_v24 }
  0xc9   :  { %1053 = vmatmul.mubr.bf16.gmra.mxu0 %v3035_v25  ;;  %2861 = vmatmul.mubr.msk.bf16.gmra.mxu1 %vm787_vm0, %v3036_v26 }
  0xca   :  { %1060 = vmatprep.mubr.bf16.mxu0 %v3037_v27  ;;  %2864 = vmatprep.mubr.msk.bf16.mxu1 %vm787_vm0, %v3039_v28 }
  0xd1   :  { %1061 = vmatmul.mubr.bf16.gmra.mxu0 %v3040_v29  ;;  %2865 = vmatmul.mubr.msk.bf16.gmra.mxu1 %vm787_vm0, %v3041_v30 }
  0xd2   :  { %1068 = vmatprep.mubr.bf16.mxu0 %v3042_v31  ;;  %2868 = vmatprep.mubr.msk.bf16.mxu1 %vm787_vm0, %v3044_v32 }
  0xd9   :  { %1069 = vmatmul.mubr.bf16.gmra.mxu0 %v3045_v33  ;;  %2869 = vmatmul.mubr.msk.bf16.gmra.mxu1 %vm787_vm0, %v3046_v34 }
  0xda   :  { %1076 = vmatprep.mubr.bf16.mxu0 %v3047_v35  ;;  %2872 = vmatprep.mubr.msk.bf16.mxu1 %vm787_vm0, %v3049_v36 }
  0xe1   :  { %1077 = vmatmul.mubr.bf16.gmra.mxu0 %v3050_v37  ;;  %2873 = vmatmul.mubr.msk.bf16.gmra.mxu1 %vm787_vm0, %v3051_v38 }
  0xe2   :  { %1084 = vmatprep.mubr.bf16.mxu0 %v3052_v39  ;;  %2876 = vmatprep.mubr.msk.bf16.mxu1 %vm787_vm0, %v3054_v40 }
  0xe9   :  { %1085 = vmatmul.mubr.bf16.gmra.mxu0 %v3055_v41  ;;  %2877 = vmatmul.mubr.msk.bf16.gmra.mxu1 %vm787_vm0, %v3056_v42 }
  0xea   :  { %1092 = vmatprep.mubr.bf16.mxu0 %v3057_v43  ;;  %2880 = vmatprep.mubr.msk.bf16.mxu1 %vm787_vm0, %v3059_v44 }
  0xf1   :  { %1093 = vmatmul.mubr.bf16.gmra.mxu0 %v3060_v45  ;;  %2881 = vmatmul.mubr.msk.bf16.gmra.mxu1 %vm787_vm0, %v3061_v46 }
  0xf2   :  { %1100 = vmatprep.mubr.bf16.mxu0 %v3062_v47  ;;  %2884 = vmatprep.mubr.msk.bf16.mxu1 %vm787_vm0, %v3064_v48 }
  0xf9   :  { %1101 = vmatmul.mubr.bf16.gmra.mxu0 %v3065_v49  ;;  %2885 = vmatmul.mubr.msk.bf16.gmra.mxu1 %vm787_vm0, %v3066_v50  ;;  %v3834_v49 = vld [vmem:[%s4882_s2] ss:$0 sm:$0xff] }
 0x101   :  { %v3771_v51 = vpop.f32.mrf.mxu0  ;;  %v3773_v52 = vpop.f32.mrf.mxu1 }
 0x103   :  { %v920_v53 = vpop.f32.mrf.mxu0  ;;  %v1112_v54 = vpop.f32.mrf.mxu1 }
 0x105   :  { %v3775_v55 = vpop.f32.mrf.mxu0  ;;  %v3777_v56 = vpop.f32.mrf.mxu1 }
 0x107   :  { %v923_v57 = vpop.f32.mrf.mxu0  ;;  %v1115_v58 = vpop.f32.mrf.mxu1 }
 0x109   :  { %v926_v59 = vpop.f32.mrf.mxu0  ;;  %v3779_v60 = vpop.f32.mrf.mxu1 }
 0x10a   :  { %v927_v54 = vadd.f32 %v3834_v49, %v926_v59 }
 0x10b   :  { %v928_v61 = vpop.f32.mrf.mxu0  ;;  %v1120_v62 = vpop.f32.mrf.mxu1 }
 0x10c   :  { %v919_v61 = vadd.f32 %v3834_v49, %v3771_v51 }
 0x10d   :  { %v3781_v63 = vpop.f32.mrf.mxu0  ;;  %v3783_v0 = vpop.f32.mrf.mxu1 }
 0x10f   :  { %v931_v1 = vpop.f32.mrf.mxu0  ;;  %v1123_v2 = vpop.f32.mrf.mxu1 }
 0x111   :  { %v3785_v3 = vpop.f32.mrf.mxu0  ;;  %v3787_v4 = vpop.f32.mrf.mxu1 }
 0x113   :  { %v936_v5 = vpop.f32.mrf.mxu0  ;;  %v1128_v6 = vpop.f32.mrf.mxu1 }
 0x114   :  { %v3844_v5 = vld [vmem:[%s4883_s3] ss:$0 sm:$0xff]  ;;  %v930_v6 = vadd.f32 %v3834_v49, %v3781_v63 }
 0x115   :  { %v3789_v7 = vpop.f32.mrf.mxu0  ;;  %v3791_v8 = vpop.f32.mrf.mxu1 }
 0x117   :  { %v939_v9 = vpop.f32.mrf.mxu0  ;;  %v1131_v10 = vpop.f32.mrf.mxu1 }
 0x119   :  { %v942_v11 = vpop.f32.mrf.mxu0  ;;  %v3793_v12 = vpop.f32.mrf.mxu1 }
 0x11b   :  { %v944_v13 = vpop.f32.mrf.mxu0  ;;  %v1136_v14 = vpop.f32.mrf.mxu1 }
 0x11c   :  { %v922_v14 = vadd.f32 %v3834_v49, %v3775_v55  ;;  %v935_v55 = vadd.f32 %v3834_v49, %v3785_v3 }
 0x11d   :  { %v3795_v15 = vpop.f32.mrf.mxu0  ;;  %v3797_v16 = vpop.f32.mrf.mxu1 }
 0x11f   :  { %v947_v17 = vpop.f32.mrf.mxu0  ;;  %v1139_v18 = vpop.f32.mrf.mxu1 }
 0x121   :  { %v3799_v19 = vpop.f32.mrf.mxu0  ;;  %v3801_v20 = vpop.f32.mrf.mxu1 }
 0x123   :  { %v952_v21 = vpop.f32.mrf.mxu0  ;;  %v1144_v22 = vpop.f32.mrf.mxu1 }
 0x124   :  { %v943_v21 = vadd.f32 %v3834_v49, %v942_v11 }
 0x125   :  { %v3803_v23 = vpop.f32.mrf.mxu0  ;;  %v3805_v24 = vpop.f32.mrf.mxu1 }
 0x127   :  { %v955_v25 = vpop.f32.mrf.mxu0  ;;  %v1147_v26 = vpop.f32.mrf.mxu1 }
 0x129   :  { %v3807_v27 = vpop.f32.mrf.mxu0  ;;  %v3809_v28 = vpop.f32.mrf.mxu1 }
 0x12b   :  { %v960_v29 = vpop.f32.mrf.mxu0  ;;  %v1152_v30 = vpop.f32.mrf.mxu1 }
 0x12d   :  { %v3811_v31 = vpop.f32.mrf.mxu0  ;;  %v3813_v32 = vpop.f32.mrf.mxu1 }
 0x12f   :  { %v963_v33 = vpop.f32.mrf.mxu0  ;;  %v1155_v34 = vpop.f32.mrf.mxu1 }
 0x131   :  { %v3815_v35 = vpop.f32.mrf.mxu0  ;;  %v3817_v36 = vpop.f32.mrf.mxu1 }
 0x133   :  { %v968_v37 = vpop.f32.mrf.mxu0  ;;  %v1160_v38 = vpop.f32.mrf.mxu1 }
 0x135   :  { %v3819_v39 = vpop.f32.mrf.mxu0  ;;  %v3821_v40 = vpop.f32.mrf.mxu1 }
 0x137   :  { %v971_v41 = vpop.f32.mrf.mxu0  ;;  %v1163_v42 = vpop.f32.mrf.mxu1 }
 0x139   :  { %v3823_v43 = vpop.f32.mrf.mxu0  ;;  %v3825_v44 = vpop.f32.mrf.mxu1 }
 0x13b   :  { %v976_v45 = vpop.f32.mrf.mxu0  ;;  %v1168_v46 = vpop.f32.mrf.mxu1 }
 0x13c   :  { %v13_v46 = vstv %s4884_s4 }
 0x13d   :  { %v3827_v47 = vpop.f32.mrf.mxu0  ;;  %v3829_v48 = vpop.f32.mrf.mxu1  ;;  %14 = vst [vmem:[#allocation2] sm:$0x1] %v13_v46 }
 0x13f   :  { %v979_v50 = vpop.f32.mrf.mxu0  ;;  %v1171_v53 = vpop.f32.mrf.mxu1 }
 0x140   :  { %v946_v50 = vadd.f32 %v3834_v49, %v3795_v15 }
 0x141   :  { %v3837_v57 = vpop.f32.mrf.mxu0  ;;  %v2826_v58 = vpop.f32.mrf.mxu1 }
 0x142   :  { %v1216_v62 = vadd.f32 %v2826_v58, %v927_v54 }
 0x143   :  { %v984_v1 = vpop.f32.mrf.mxu0  ;;  %v1207_v2 = vpop.f32.mrf.mxu1 }
 0x144   :  { %v1464_v9 = vmax.f32 %v1216_v62, 0.0  ;;  %v1208_v10 = vadd.f32 %v1207_v2, %v919_v61  ;;  %v938_v1 = vadd.f32 %v3834_v49, %v3789_v7 }
 0x145   :  { %v3848_v59 = vpop.f32.mrf.mxu0  ;;  %v2827_v13 = vpop.f32.mrf.mxu1 }
 0x146   :  { %v1462_v51 = vmax.f32 %v1208_v10, 0.0  ;;  %v1219_v17 = vadd.f32 %v2827_v13, %v930_v6  ;;  %v1535_v18 = vmul.f32 %v3844_v5, %v1464_v9 }
 0x147   :  { %v987_v22 = vpop.f32.mrf.mxu0  ;;  %v1210_v25 = vpop.f32.mrf.mxu1 }
 0x148   :  { %v1465_v26 = vmax.f32 %v1219_v17, 0.0  ;;  %v1211_v29 = vadd.f32 %v1210_v25, %v922_v14  ;;  %v1603_v63 = vsel %vm787_vm0, %v1535_v18, 0.0  ;;  %v1533_v30 = vmul.f32 %v3844_v5, %v1462_v51 }
 0x149   :  { %v3856_v33 = vpop.f32.mrf.mxu0  ;;  %v2830_v34 = vpop.f32.mrf.mxu1  ;;  %1604 = vadd.xlane.f32.xlu1 %v1603_v63  ;;  %v959_v14 = vadd.f32 %v3834_v49, %v3807_v27  ;;  %v951_v18 = vadd.f32 %v3834_v49, %v3799_v19 }
 0x14a   :  { %v1463_v37 = vmax.f32 %v1211_v29, 0.0  ;;  %v1232_v38 = vadd.f32 %v2830_v34, %v943_v21  ;;  %v1597_v41 = vsel %vm787_vm0, %v1533_v30, 0.0  ;;  %v1536_v45 = vmul.f32 %v3844_v5, %v1465_v26 }
 0x14b   :  { %v992_v11 = vpop.f32.mrf.mxu0  ;;  %v1223_v42 = vpop.f32.mrf.mxu1  ;;  %1598 = vadd.xlane.f32.xlu0 %v1597_v41  ;;  %v962_v30 = vadd.f32 %v3834_v49, %v3811_v31 }
 0x14c   :  { %v1468_v53 = vmax.f32 %v1232_v38, 0.0  ;;  %v1224_v54 = vadd.f32 %v1223_v42, %v935_v55  ;;  %v1534_v3 = vmul.f32 %v3844_v5, %v1463_v37  ;;  %v1606_v62 = vsel %vm787_vm0, %v1536_v45, 0.0 }
 0x14d   :  { %v3868_v58 = vpop.f32.mrf.mxu0  ;;  %v2831_v61 = vpop.f32.mrf.mxu1  ;;  %1607 = vadd.xlane.f32.xlu1 %v1606_v62  ;;  %v954_v42 = vadd.f32 %v3834_v49, %v3803_v23 }
 0x14e   :  { %v1466_v2 = vmax.f32 %v1224_v54, 0.0  ;;  %v1235_v6 = vadd.f32 %v2831_v61, %v946_v50  ;;  %v1600_v9 = vsel %vm787_vm0, %v1534_v3, 0.0  ;;  %v1539_v13 = vmul.f32 %v3844_v5, %v1468_v53 }
 0x14f   :  { %v995_v10 = vpop.f32.mrf.mxu0  ;;  %v1226_v15 = vpop.f32.mrf.mxu1  ;;  %1601 = vadd.xlane.f32.xlu0 %v1600_v9  ;;  %v975_v3 = vadd.f32 %v3834_v49, %v3823_v43  ;;  %v978_v43 = vadd.f32 %v3834_v49, %v3827_v47 }
 0x150   :  { %v1469_v51 = vmax.f32 %v1235_v6, 0.0  ;;  %v1227_v17 = vadd.f32 %v1226_v15, %v938_v1  ;;  %v1537_v22 = vmul.f32 %v3844_v5, %v1466_v2  ;;  %v1615_v29 = vsel %vm787_vm0, %v1539_v13, 0.0 }
 0x151   :  { %v3879_v21 = vpop.f32.mrf.mxu0  ;;  %v2834_v7 = vpop.f32.mrf.mxu1  ;;  %v967_v2 = vadd.f32 %v3834_v49, %v3815_v35 }
 0x152   :  { %v1467_v25 = vmax.f32 %v1227_v17, 0.0  ;;  %v1248_v26 = vadd.f32 %v2834_v7, %v959_v14  ;;  %v1540_v63 = vmul.f32 %v3844_v5, %v1469_v51  ;;  %v1609_v31 = vsel %vm787_vm0, %v1537_v22, 0.0 }
 0x153   :  { %v1000_v27 = vpop.f32.mrf.mxu0  ;;  %v1239_v34 = vpop.f32.mrf.mxu1  ;;  %1616 = vadd.xlane.f32.xlu0 %v1615_v29  ;;  %v970_v29 = vadd.f32 %v3834_v49, %v3819_v39 }
 0x154   :  { %v1472_v55 = vmax.f32 %v1248_v26, 0.0  ;;  %v1240_v37 = vadd.f32 %v1239_v34, %v951_v18  ;;  %v1618_v19 = vsel %vm787_vm0, %v1540_v63, 0.0  ;;  %v1538_v38 = vmul.f32 %v3844_v5, %v1467_v25 }
 0x155   :  { %v3888_v41 = vpop.f32.mrf.mxu0  ;;  %v2835_v11 = vpop.f32.mrf.mxu1  ;;  %1619 = vadd.xlane.f32.xlu1 %v1618_v19 }
 0x156   :  { %v1470_v45 = vmax.f32 %v1240_v37, 0.0  ;;  %v1251_v46 = vadd.f32 %v2835_v11, %v962_v30  ;;  %v1543_v54 = vmul.f32 %v3844_v5, %v1472_v55  ;;  %v1612_v1 = vsel %vm787_vm0, %v1538_v38, 0.0 }
 0x157   :  { %v1003_v50 = vpop.f32.mrf.mxu0  ;;  %v1242_v53 = vpop.f32.mrf.mxu1  ;;  %1610 = vadd.xlane.f32.xlu0 %v1609_v31  ;;  %v991_v37 = vadd.f32 %v3834_v49, %v3856_v33  ;;  %v994_v33 = vadd.f32 %v3834_v49, %v3868_v58 }
 0x158   :  { %v1473_v61 = vmax.f32 %v1251_v46, 0.0  ;;  %v1243_v62 = vadd.f32 %v1242_v53, %v954_v42  ;;  %v1541_v9 = vmul.f32 %v3844_v5, %v1470_v45  ;;  %v1627_v13 = vsel %vm787_vm0, %v1543_v54, 0.0 }
 0x159   :  { %v1006_v23 = vpop.f32.mrf.mxu0  ;;  %v2838_v6 = vpop.f32.mrf.mxu1  ;;  %1613 = vadd.xlane.f32.xlu1 %v1612_v1  ;;  %v983_v42 = vadd.f32 %v3834_v49, %v3837_v57 }
 0x15a   :  { %v1471_v10 = vmax.f32 %v1243_v62, 0.0  ;;  %v1264_v15 = vadd.f32 %v2838_v6, %v975_v3  ;;  %v1544_v14 = vmul.f32 %v3844_v5, %v1473_v61  ;;  %v1621_v27 = vsel %vm787_vm0, %v1541_v9, 0.0 }
 0x15b   :  { %v1008_v51 = vpop.f32.mrf.mxu0  ;;  %v1255_v17 = vpop.f32.mrf.mxu1  ;;  %1628 = vadd.xlane.f32.xlu0 %v1627_v13 }
 0x15c   :  { %v1476_v18 = vmax.f32 %v1264_v15, 0.0  ;;  %v1256_v7 = vadd.f32 %v1255_v17, %v967_v2  ;;  %v1630_v35 = vsel %vm787_vm0, %v1544_v14, 0.0  ;;  %v1542_v22 = vmul.f32 %v3844_v5, %v1471_v10 }
 0x15d   :  { %v1009_v25 = vpop.f32.mrf.mxu0  ;;  %v2839_v26 = vpop.f32.mrf.mxu1  ;;  %1631 = vadd.xlane.f32.xlu1 %v1630_v35  ;;  %v986_v10 = vadd.f32 %v3834_v49, %v3848_v59  ;;  %v1007_v17 = vadd.f32 %v3834_v49, %v1006_v23 }
 0x15e   :  { %v1474_v63 = vmax.f32 %v1256_v7, 0.0  ;;  %v1267_v30 = vadd.f32 %v2839_v26, %v978_v43  ;;  %v1547_v55 = vmul.f32 %v3844_v5, %v1476_v18  ;;  %v1624_v11 = vsel %vm787_vm0, %v1542_v22, 0.0 }
 0x15f   :  { %v1011_v47 = vpop.f32.mrf.mxu0  ;;  %v1258_v34 = vpop.f32.mrf.mxu1  ;;  %1622 = vadd.xlane.f32.xlu0 %v1621_v27  ;;  %v999_v22 = vadd.f32 %v3834_v49, %v3879_v21  ;;  %v1010_v23 = vadd.f32 %v3834_v49, %v1009_v25 }
 0x160   :  { %v1477_v19 = vmax.f32 %v1267_v30, 0.0  ;;  %v1259_v38 = vadd.f32 %v1258_v34, %v970_v29  ;;  %v1545_v46 = vmul.f32 %v3844_v5, %v1474_v63  ;;  %v1639_v53 = vsel %vm787_vm0, %v1547_v55, 0.0 }
 0x161   :  { %v3915_v39 = vpop.f32.mrf.mxu0  ;;  %v2842_v45 = vpop.f32.mrf.mxu1  ;;  %1625 = vadd.xlane.f32.xlu1 %v1624_v11 }
 0x162   :  { %v1475_v31 = vmax.f32 %v1259_v38, 0.0  ;;  %v1280_v50 = vadd.f32 %v2842_v45, %v991_v37  ;;  %v1548_v54 = vmul.f32 %v3844_v5, %v1477_v19  ;;  %v1633_v58 = vsel %vm787_vm0, %v1545_v46, 0.0 }
 0x163   :  { %v1016_v3 = vpop.f32.mrf.mxu0  ;;  %v1271_v61 = vpop.f32.mrf.mxu1  ;;  %1640 = vadd.xlane.f32.xlu0 %v1639_v53  ;;  %v1002_v45 = vadd.f32 %v3834_v49, %v3888_v41 }
 0x164   :  { %v1480_v62 = vmax.f32 %v1280_v50, 0.0  ;;  %v1272_v57 = vadd.f32 %v1271_v61, %v983_v42  ;;  %v1642_v1 = vsel %vm787_vm0, %v1548_v54, 0.0  ;;  %v1546_v2 = vmul.f32 %v3844_v5, %v1475_v31 }
 0x165   :  { %v3924_v6 = vpop.f32.mrf.mxu0  ;;  %v2843_v9 = vpop.f32.mrf.mxu1  ;;  %1643 = vadd.xlane.f32.xlu1 %v1642_v1 }
 0x166   :  { %v1478_v15 = vmax.f32 %v1272_v57, 0.0  ;;  %v1283_v13 = vadd.f32 %v2843_v9, %v994_v33  ;;  %v1551_v51 = vmul.f32 %v3844_v5, %v1480_v62  ;;  %v1636_v35 = vsel %vm787_vm0, %v1546_v2, 0.0 }
 0x167   :  { %v1019_v14 = vpop.f32.mrf.mxu0  ;;  %v1274_v43 = vpop.f32.mrf.mxu1  ;;  %1634 = vadd.xlane.f32.xlu0 %v1633_v58  ;;  %v1015_v57 = vadd.f32 %v3834_v49, %v3915_v39 }
 0x168   :  { %v1481_v18 = vmax.f32 %v1283_v13, 0.0  ;;  %v1275_v7 = vadd.f32 %v1274_v43, %v986_v10  ;;  %v1549_v29 = vmul.f32 %v3844_v5, %v1478_v15  ;;  %v1651_v27 = vsel %vm787_vm0, %v1551_v51, 0.0 }
 0x169   :  { %v1022_v26 = vpop.f32.mrf.mxu0  ;;  %v2846_v59 = vpop.f32.mrf.mxu1  ;;  %1637 = vadd.xlane.f32.xlu1 %v1636_v35 }
 0x16a   :  { %v1479_v63 = vmax.f32 %v1275_v7, 0.0  ;;  %v1296_v30 = vadd.f32 %v2846_v59, %v1007_v17  ;;  %v1552_v47 = vmul.f32 %v3844_v5, %v1481_v18  ;;  %v1645_v50 = vsel %vm787_vm0, %v1549_v29, 0.0 }
 0x16b   :  { %v1024_v34 = vpop.f32.mrf.mxu0  ;;  %v1287_v55 = vpop.f32.mrf.mxu1  ;;  %1652 = vadd.xlane.f32.xlu0 %v1651_v27  ;;  %v1023_v33 = vadd.f32 %v3834_v49, %v1022_v26 }
 0x16c   :  { %v1484_v37 = vmax.f32 %v1296_v30, 0.0  ;;  %v1288_v19 = vadd.f32 %v1287_v55, %v999_v22  ;;  %v1654_v21 = vsel %vm787_vm0, %v1552_v47, 0.0  ;;  %v1550_v38 = vmul.f32 %v3844_v5, %v1479_v63 }
 0x16d   :  { %v1025_v11 = vpop.f32.mrf.mxu0  ;;  %v2847_v42 = vpop.f32.mrf.mxu1  ;;  %1655 = vadd.xlane.f32.xlu1 %v1654_v21  ;;  %v1018_v22 = vadd.f32 %v3834_v49, %v3924_v6 }
 0x16e   :  { %v1482_v46 = vmax.f32 %v1288_v19, 0.0  ;;  %v1299_v31 = vadd.f32 %v2847_v42, %v1010_v23  ;;  %v1555_v54 = vmul.f32 %v3844_v5, %v1484_v37  ;;  %v1648_v62 = vsel %vm787_vm0, %v1550_v38, 0.0 }
 0x16f   :  { %v1027_v25 = vpop.f32.mrf.mxu0  ;;  %v1290_v53 = vpop.f32.mrf.mxu1  ;;  %1646 = vadd.xlane.f32.xlu0 %v1645_v50  ;;  %v1026_v58 = vadd.f32 %v3834_v49, %v1025_v11 }
 0x170   :  { %v1485_v3 = vmax.f32 %v1299_v31, 0.0  ;;  %v1291_v61 = vadd.f32 %v1290_v53, %v1002_v45  ;;  %v1553_v2 = vmul.f32 %v3844_v5, %v1482_v46  ;;  %v1663_v15 = vsel %vm787_vm0, %v1555_v54, 0.0 }
 0x171   :  { %v1030_v1 = vpop.f32.mrf.mxu0  ;;  %v2850_v41 = vpop.f32.mrf.mxu1  ;;  %1649 = vadd.xlane.f32.xlu1 %v1648_v62 }
 0x172   :  { %v1483_v9 = vmax.f32 %v1291_v61, 0.0  ;;  %v1312_v10 = vadd.f32 %v2850_v41, %v1023_v33  ;;  %v1556_v13 = vmul.f32 %v3844_v5, %v1485_v3  ;;  %v1657_v29 = vsel %vm787_vm0, %v1553_v2, 0.0 }
 0x173   :  { %v1032_v14 = vpop.f32.mrf.mxu0  ;;  %v1303_v43 = vpop.f32.mrf.mxu1  ;;  %1664 = vadd.xlane.f32.xlu0 %v1663_v15  ;;  %v1031_v55 = vadd.f32 %v3834_v49, %v1030_v1 }
 0x174   :  { %v1488_v51 = vmax.f32 %v1312_v10, 0.0  ;;  %v1304_v17 = vadd.f32 %v1303_v43, %v1015_v57  ;;  %v1666_v39 = vsel %vm787_vm0, %v1556_v13, 0.0  ;;  %v1554_v18 = vmul.f32 %v3844_v5, %v1483_v9 }
 0x175   :  { %v1033_v7 = vpop.f32.mrf.mxu0  ;;  %v2851_v35 = vpop.f32.mrf.mxu1  ;;  %1667 = vadd.xlane.f32.xlu1 %v1666_v39 }
 0x176   :  { %v1486_v26 = vmax.f32 %v1304_v17, 0.0  ;;  %v1315_v59 = vadd.f32 %v2851_v35, %v1026_v58  ;;  %v1559_v27 = vmul.f32 %v3844_v5, %v1488_v51  ;;  %v1660_v34 = vsel %vm787_vm0, %v1554_v18, 0.0 }
 0x177   :  { %v1035_v63 = vpop.f32.mrf.mxu0  ;;  %v1306_v30 = vpop.f32.mrf.mxu1  ;;  %1658 = vadd.xlane.f32.xlu0 %v1657_v29  ;;  %v1034_v54 = vadd.f32 %v3834_v49, %v1033_v7 }
 0x178   :  { %v1489_v47 = vmax.f32 %v1315_v59, 0.0  ;;  %v1307_v23 = vadd.f32 %v1306_v30, %v1018_v22  ;;  %v1557_v6 = vmul.f32 %v3844_v5, %v1486_v26  ;;  %v1675_v11 = vsel %vm787_vm0, %v1559_v27, 0.0 }
 0x179   :  { %v1038_v37 = vpop.f32.mrf.mxu0  ;;  %v2854_v19 = vpop.f32.mrf.mxu1  ;;  %1661 = vadd.xlane.f32.xlu1 %v1660_v34 }
 0x17a   :  { %v1487_v21 = vmax.f32 %v1307_v23, 0.0  ;;  %v1039_v38 = vadd.f32 %v3834_v49, %v1038_v37  ;;  %v1560_v42 = vmul.f32 %v3844_v5, %v1489_v47  ;;  %v1669_v1 = vsel %vm787_vm0, %v1557_v6, 0.0 }
 0x17b   :  { %v1040_v45 = vpop.f32.mrf.mxu0  ;;  %v1319_v46 = vpop.f32.mrf.mxu1  ;;  %1676 = vadd.xlane.f32.xlu0 %v1675_v11 }
 0x17c   :  { %v1328_v31 = vadd.f32 %v2854_v19, %v1039_v38  ;;  %v1320_v50 = vadd.f32 %v1319_v46, %v1031_v55  ;;  %v1678_v25 = vsel %vm787_vm0, %v1560_v42, 0.0  ;;  %v1558_v53 = vmul.f32 %v3844_v5, %v1487_v21 }
 0x17d   :  { %v1041_v33 = vpop.f32.mrf.mxu0  ;;  %v2855_v3 = vpop.f32.mrf.mxu1  ;;  %1679 = vadd.xlane.f32.xlu1 %v1678_v25 }
 0x17e   :  { %v1492_v61 = vmax.f32 %v1328_v31, 0.0  ;;  %v1490_v62 = vmax.f32 %v1320_v50, 0.0  ;;  %v1042_v57 = vadd.f32 %v3834_v49, %v1041_v33  ;;  %v1672_v15 = vsel %vm787_vm0, %v1558_v53, 0.0 }
 0x17f   :  { %v1043_v41 = vpop.f32.mrf.mxu0  ;;  %v1322_v2 = vpop.f32.mrf.mxu1  ;;  %1670 = vadd.xlane.f32.xlu0 %v1669_v1 }
 0x180   :  { %v1331_v9 = vadd.f32 %v2855_v3, %v1042_v57  ;;  %v1323_v10 = vadd.f32 %v1322_v2, %v1034_v54  ;;  %v1561_v13 = vmul.f32 %v3844_v5, %v1490_v62  ;;  %v1563_v43 = vmul.f32 %v3844_v5, %v1492_v61 }
 0x181   :  { %v1046_v58 = vpop.f32.mrf.mxu0  ;;  %v2858_v14 = vpop.f32.mrf.mxu1  ;;  %1673 = vadd.xlane.f32.xlu1 %v1672_v15 }
 0x182   :  { %v1493_v51 = vmax.f32 %v1331_v9, 0.0  ;;  %v1491_v17 = vmax.f32 %v1323_v10, 0.0  ;;  %v1047_v39 = vadd.f32 %v3834_v49, %v1046_v58  ;;  %v1681_v18 = vsel %vm787_vm0, %v1561_v13, 0.0 }
 0x183   :  { %v1048_v7 = vpop.f32.mrf.mxu0  ;;  %v1335_v35 = vpop.f32.mrf.mxu1  ;;  %1682 = vadd.xlane.f32.xlu0 %v1681_v18  ;;  %v1687_v63 = vsel %vm787_vm0, %v1563_v43, 0.0 }
 0x184   :  { %v1336_v22 = vadd.f32 %v1335_v35, %v1047_v39  ;;  %v1562_v26 = vmul.f32 %v3844_v5, %v1491_v17  ;;  %v1564_v23 = vmul.f32 %v3844_v5, %v1493_v51 }
 0x185   :  { %v1049_v59 = vpop.f32.mrf.mxu0  ;;  %v2859_v29 = vpop.f32.mrf.mxu1 }
 0x186   :  { %v1494_v30 = vmax.f32 %v1336_v22, 0.0  ;;  %v1050_v27 = vadd.f32 %v3834_v49, %v1049_v59  ;;  %v1684_v47 = vsel %vm787_vm0, %v1562_v26, 0.0  ;;  %v1690_v42 = vsel %vm787_vm0, %v1564_v23, 0.0 }
 0x187   :  { %v1051_v34 = vpop.f32.mrf.mxu0  ;;  %v1338_v55 = vpop.f32.mrf.mxu1  ;;  %1685 = vadd.xlane.f32.xlu1 %v1684_v47  ;;  %1688 = vadd.xlane.f32.xlu0 %v1687_v63 }
 0x188   :  { %v1339_v37 = vadd.f32 %v1338_v55, %v1050_v27  ;;  %v1565_v19 = vmul.f32 %v3844_v5, %v1494_v30 }
 0x189   :  { %v1054_v6 = vpop.f32.mrf.mxu0  ;;  %v2862_v21 = vpop.f32.mrf.mxu1 }
 0x18a   :  { %v1495_v38 = vmax.f32 %v1339_v37, 0.0  ;;  %v1055_v11 = vadd.f32 %v3834_v49, %v1054_v6  ;;  %v1693_v45 = vsel %vm787_vm0, %v1565_v19, 0.0 }
 0x18b   :  { %v1056_v46 = vpop.f32.mrf.mxu0  ;;  %v1351_v31 = vpop.f32.mrf.mxu1  ;;  %1691 = vadd.xlane.f32.xlu1 %v1690_v42  ;;  %1694 = vadd.xlane.f32.xlu0 %v1693_v45 }
 0x18c   :  { %v1344_v50 = vadd.f32 %v2858_v14, %v1055_v11  ;;  %v1566_v25 = vmul.f32 %v3844_v5, %v1495_v38 }
 0x18d   :  { %v1057_v53 = vpop.f32.mrf.mxu0  ;;  %v2863_v54 = vpop.f32.mrf.mxu1 }
 0x18e   :  { %v1496_v33 = vmax.f32 %v1344_v50, 0.0  ;;  %v1058_v3 = vadd.f32 %v3834_v49, %v1057_v53  ;;  %v1696_v61 = vsel %vm787_vm0, %v1566_v25, 0.0  ;;  %v1119_v50 = vadd.f32 %v3834_v49, %v3779_v60 }
 0x18f   :  { %v1059_v62 = vpop.f32.mrf.mxu0  ;;  %v1354_v57 = vpop.f32.mrf.mxu1  ;;  %1697 = vadd.xlane.f32.xlu1 %v1696_v61  ;;  %v1111_v53 = vadd.f32 %v3834_v49, %v3773_v52 }
 0x190   :  { %v1347_v1 = vadd.f32 %v2859_v29, %v1058_v3  ;;  %v1567_v41 = vmul.f32 %v3844_v5, %v1496_v33 }
 0x191   :  { %v1062_v2 = vpop.f32.mrf.mxu0  ;;  %v3987_v9 = vpop.f32.mrf.mxu1 }
 0x192   :  { %v1497_v10 = vmax.f32 %v1347_v1, 0.0  ;;  %v1063_v15 = vadd.f32 %v3834_v49, %v1062_v2  ;;  %v1699_v13 = vsel %vm787_vm0, %v1567_v41, 0.0  ;;  %v1122_v41 = vadd.f32 %v3834_v49, %v3783_v0 }
 0x193   :  { %v1064_v58 = vpop.f32.mrf.mxu0  ;;  %v1367_v14 = vpop.f32.mrf.mxu1  ;;  %1700 = vadd.xlane.f32.xlu0 %v1699_v13  ;;  %v1135_v0 = vadd.f32 %v3834_v49, %v3793_v12 }
 0x194   :  { %v1352_v43 = vadd.f32 %v1351_v31, %v1063_v15  ;;  %v1568_v51 = vmul.f32 %v3844_v5, %v1497_v10 }
 0x195   :  { %v1065_v17 = vpop.f32.mrf.mxu0  ;;  %v3992_v39 = vpop.f32.mrf.mxu1 }
 0x196   :  { %v1498_v18 = vmax.f32 %v1352_v43, 0.0  ;;  %v1066_v7 = vadd.f32 %v3834_v49, %v1065_v17  ;;  %v1702_v35 = vsel %vm787_vm0, %v1568_v51, 0.0  ;;  %v1114_v43 = vadd.f32 %v3834_v49, %v3777_v56 }
 0x197   :  { %v1067_v22 = vpop.f32.mrf.mxu0  ;;  %v1370_v26 = vpop.f32.mrf.mxu1  ;;  %1703 = vadd.xlane.f32.xlu1 %v1702_v35 }
 0x198   :  { %v1355_v59 = vadd.f32 %v1354_v57, %v1066_v7  ;;  %v1569_v29 = vmul.f32 %v3844_v5, %v1498_v18 }
 0x199   :  { %v1070_v63 = vpop.f32.mrf.mxu0  ;;  %v3997_v30 = vpop.f32.mrf.mxu1 }
 0x19a   :  { %v1499_v27 = vmax.f32 %v1355_v59, 0.0  ;;  %v1071_v47 = vadd.f32 %v3834_v49, %v1070_v63  ;;  %v1705_v23 = vsel %vm787_vm0, %v1569_v29, 0.0 }
 0x19b   :  { %v1072_v34 = vpop.f32.mrf.mxu0  ;;  %v4001_v55 = vpop.f32.mrf.mxu1  ;;  %1706 = vadd.xlane.f32.xlu0 %v1705_v23 }
 0x19c   :  { %v1360_v37 = vadd.f32 %v2862_v21, %v1071_v47  ;;  %v1570_v19 = vmul.f32 %v3844_v5, %v1499_v27 }
 0x19d   :  { %v1073_v6 = vpop.f32.mrf.mxu0  ;;  %v4004_v38 = vpop.f32.mrf.mxu1 }
 0x19e   :  { %v1500_v11 = vmax.f32 %v1360_v37, 0.0  ;;  %v1074_v42 = vadd.f32 %v3834_v49, %v1073_v6  ;;  %v1708_v45 = vsel %vm787_vm0, %v1570_v19, 0.0  ;;  %v1127_v6 = vadd.f32 %v3834_v49, %v3787_v4 }
 0x19f   :  { %v1075_v46 = vpop.f32.mrf.mxu0  ;;  %v4008_v31 = vpop.f32.mrf.mxu1  ;;  %1709 = vadd.xlane.f32.xlu1 %v1708_v45  ;;  %v1138_v45 = vadd.f32 %v3834_v49, %v3797_v16 }
 0x1a0   :  { %v1363_v25 = vadd.f32 %v2863_v54, %v1074_v42  ;;  %v1571_v21 = vmul.f32 %v3844_v5, %v1500_v11 }
 0x1a1   :  { %v1078_v33 = vpop.f32.mrf.mxu0  ;;  %v2874_v3 = vpop.f32.mrf.mxu1 }
 0x1a2   :  { %v1501_v61 = vmax.f32 %v1363_v25, 0.0  ;;  %v1079_v62 = vadd.f32 %v3834_v49, %v1078_v33  ;;  %v1408_v57 = vadd.f32 %v2874_v3, %v1119_v50  ;;  %v1711_v1 = vsel %vm787_vm0, %v1571_v21, 0.0 }
 0x1a3   :  { %v1080_v2 = vpop.f32.mrf.mxu0  ;;  %v1399_v10 = vpop.f32.mrf.mxu1  ;;  %1712 = vadd.xlane.f32.xlu0 %v1711_v1 }
 0x1a4   :  { %v1368_v60 = vadd.f32 %v1367_v14, %v1079_v62  ;;  %v1512_v54 = vmax.f32 %v1408_v57, 0.0  ;;  %v1400_v15 = vadd.f32 %v1399_v10, %v1111_v53  ;;  %v1572_v13 = vmul.f32 %v3844_v5, %v1501_v61 }
 0x1a5   :  { %v1081_v52 = vpop.f32.mrf.mxu0  ;;  %v2875_v58 = vpop.f32.mrf.mxu1 }
 0x1a6   :  { %v1502_v51 = vmax.f32 %v1368_v60, 0.0  ;;  %v1082_v17 = vadd.f32 %v3834_v49, %v1081_v52  ;;  %v1411_v18 = vadd.f32 %v2875_v58, %v1122_v41  ;;  %v1714_v14 = vsel %vm787_vm0, %v1572_v13, 0.0 }
 0x1a7   :  { %v1083_v7 = vpop.f32.mrf.mxu0  ;;  %v1402_v35 = vpop.f32.mrf.mxu1  ;;  %v1583_v22 = vmul.f32 %v3844_v5, %v1512_v54  ;;  %v1510_v59 = vmax.f32 %v1400_v15, 0.0  ;;  %1715 = vadd.xlane.f32.xlu1 %v1714_v14 }
 0x1a8   :  { %v1371_v29 = vadd.f32 %v1370_v26, %v1082_v17  ;;  %v1513_v63 = vmax.f32 %v1411_v18, 0.0  ;;  %v1403_v27 = vadd.f32 %v1402_v35, %v1114_v43  ;;  %v1573_v34 = vmul.f32 %v3844_v5, %v1502_v51 }
 0x1a9   :  { %v1086_v47 = vpop.f32.mrf.mxu0  ;;  %v2878_v56 = vpop.f32.mrf.mxu1  ;;  %v1747_v23 = vsel %vm787_vm0, %v1583_v22, 0.0  ;;  %v1581_v25 = vmul.f32 %v3844_v5, %v1510_v59  ;;  %v1130_v43 = vadd.f32 %v3834_v49, %v3791_v8  ;;  %v1151_v51 = vadd.f32 %v3834_v49, %v3809_v28 }
 0x1aa   :  { %v1503_v37 = vmax.f32 %v1371_v29, 0.0  ;;  %v1087_v12 = vadd.f32 %v3834_v49, %v1086_v47  ;;  %v1424_v19 = vadd.f32 %v2878_v56, %v1135_v0  ;;  %1748 = vadd.xlane.f32.xlu0 %v1747_v23  ;;  %v1584_v26 = vmul.f32 %v3844_v5, %v1513_v63 }
 0x1ab   :  { %v1088_v11 = vpop.f32.mrf.mxu0  ;;  %v1415_v42 = vpop.f32.mrf.mxu1  ;;  %v1511_v46 = vmax.f32 %v1403_v27, 0.0  ;;  %v1717_v61 = vsel %vm787_vm0, %v1573_v34, 0.0  ;;  %v1741_v2 = vsel %vm787_vm0, %v1581_v25, 0.0  ;;  %v1143_v27 = vadd.f32 %v3834_v49, %v3801_v20 }
 0x1ac   :  { %v1376_v50 = vadd.f32 %v3987_v9, %v1087_v12  ;;  %v1516_v21 = vmax.f32 %v1424_v19, 0.0  ;;  %v1750_v3 = vsel %vm787_vm0, %v1584_v26, 0.0  ;;  %v1574_v4 = vmul.f32 %v3844_v5, %v1503_v37 }
 0x1ad   :  { %v1089_v53 = vpop.f32.mrf.mxu0  ;;  %v2879_v33 = vpop.f32.mrf.mxu1  ;;  %1751 = vadd.xlane.f32.xlu1 %v1750_v3  ;;  %v1416_v16 = vadd.f32 %v1415_v42, %v1127_v6  ;;  %v1582_v10 = vmul.f32 %v3844_v5, %v1511_v46  ;;  %v1154_v47 = vadd.f32 %v3834_v49, %v3813_v32 }
 0x1ae   :  { %v1090_v62 = vadd.f32 %v3834_v49, %v1089_v53  ;;  %v1427_v57 = vadd.f32 %v2879_v33, %v1138_v45  ;;  %1718 = vadd.xlane.f32.xlu0 %v1717_v61  ;;  %v1504_v9 = vmax.f32 %v1376_v50, 0.0  ;;  %v1720_v52 = vsel %vm787_vm0, %v1574_v4, 0.0 }
 0x1af   :  { %v1091_v1 = vpop.f32.mrf.mxu0  ;;  %v1418_v41 = vpop.f32.mrf.mxu1  ;;  %v1587_v58 = vmul.f32 %v3844_v5, %v1516_v21  ;;  %v1514_v17 = vmax.f32 %v1416_v16, 0.0  ;;  %v1744_v63 = vsel %vm787_vm0, %v1582_v10, 0.0 }
 0x1b0   :  { %v1379_v60 = vadd.f32 %v3992_v39, %v1090_v62  ;;  %v1517_v54 = vmax.f32 %v1427_v57, 0.0  ;;  %v1419_v7 = vadd.f32 %v1418_v41, %v1130_v43  ;;  %v1575_v14 = vmul.f32 %v3844_v5, %v1504_v9 }
 0x1b1   :  { %v1094_v15 = vpop.f32.mrf.mxu0  ;;  %v2882_v13 = vpop.f32.mrf.mxu1  ;;  %1721 = vadd.xlane.f32.xlu1 %v1720_v52  ;;  %v1759_v8 = vsel %vm787_vm0, %v1587_v58, 0.0  ;;  %v1585_v34 = vmul.f32 %v3844_v5, %v1514_v17  ;;  %v1146_v57 = vadd.f32 %v3834_v49, %v3805_v24  ;;  %v1159_v24 = vadd.f32 %v3834_v49, %v3817_v36 }
 0x1b2   :  { %1742 = vadd.xlane.f32.xlu0 %v1741_v2  ;;  %v1095_v39 = vadd.f32 %v3834_v49, %v1094_v15  ;;  %v1440_v35 = vadd.f32 %v2882_v13, %v1151_v51  ;;  %v1505_v22 = vmax.f32 %v1379_v60, 0.0  ;;  %v1588_v28 = vmul.f32 %v3844_v5, %v1517_v54 }
 0x1b3   :  { %v1096_v18 = vpop.f32.mrf.mxu0  ;;  %v1431_v0 = vpop.f32.mrf.mxu1  ;;  %v1515_v37 = vmax.f32 %v1419_v7, 0.0  ;;  %v1723_v6 = vsel %vm787_vm0, %v1575_v14, 0.0  ;;  %v1753_v21 = vsel %vm787_vm0, %v1585_v34, 0.0 }
 0x1b4   :  { %v1384_v12 = vadd.f32 %v4001_v55, %v1095_v39  ;;  %v1520_v19 = vmax.f32 %v1440_v35, 0.0  ;;  %v1762_v45 = vsel %vm787_vm0, %v1588_v28, 0.0  ;;  %v1576_v20 = vmul.f32 %v3844_v5, %v1505_v22 }
 0x1b5   :  { %v1097_v59 = vpop.f32.mrf.mxu0  ;;  %v2883_v29 = vpop.f32.mrf.mxu1  ;;  %1745 = vadd.xlane.f32.xlu1 %v1744_v63  ;;  %v1432_v32 = vadd.f32 %v1431_v0, %v1143_v27  ;;  %v1586_v55 = vmul.f32 %v3844_v5, %v1515_v37  ;;  %v1167_v39 = vadd.f32 %v3834_v49, %v3825_v44  ;;  %v1162_v35 = vadd.f32 %v3834_v49, %v3821_v40 }
 0x1b6   :  { %1760 = vadd.xlane.f32.xlu0 %v1759_v8  ;;  %v1098_v11 = vadd.f32 %v3834_v49, %v1097_v59  ;;  %v1443_v42 = vadd.f32 %v2883_v29, %v1154_v47  ;;  %v1506_v25 = vmax.f32 %v1384_v12, 0.0  ;;  %v1591_v53 = vmul.f32 %v3844_v5, %v1520_v19  ;;  %v4100_v12 = vld [vmem:[#allocation2] ss:$0 sm:$0xff] }
 0x1b7   :  { %v1099_v56 = vpop.f32.mrf.mxu0  ;;  %v1434_v23 = vpop.f32.mrf.mxu1  ;;  %v1726_v62 = vsel %vm787_vm0, %v1576_v20, 0.0  ;;  %v1518_v1 = vmax.f32 %v1432_v32, 0.0  ;;  %v1756_v2 = vsel %vm787_vm0, %v1586_v55, 0.0  ;;  %v1170_v44 = vadd.f32 %v3834_v49, %v3829_v48 }
 0x1b8   :  { %v1387_v33 = vadd.f32 %v4008_v31, %v1098_v11  ;;  %v1521_v3 = vmax.f32 %v1443_v42, 0.0  ;;  %v1435_v9 = vadd.f32 %v1434_v23, %v1146_v57  ;;  %v1771_v10 = vsel %vm787_vm0, %v1591_v53, 0.0 }
 0x1b9   :  { %v1102_v26 = vpop.f32.mrf.mxu0  ;;  %v2886_v46 = vpop.f32.mrf.mxu1  ;;  %1763 = vadd.xlane.f32.xlu1 %v1762_v45  ;;  %v1577_v31 = vmul.f32 %v3844_v5, %v1506_v25  ;;  %v1589_v17 = vmul.f32 %v3844_v5, %v1518_v1 }
 0x1ba   :  { %1724 = vadd.xlane.f32.xlu0 %v1723_v6  ;;  %v1103_v61 = vadd.f32 %v3834_v49, %v1102_v26  ;;  %v1507_v60 = vmax.f32 %v1387_v33, 0.0  ;;  %v1592_v13 = vmul.f32 %v3844_v5, %v1521_v3  ;;  %v1519_v58 = vmax.f32 %v1435_v9, 0.0 }
 0x1bb   :  { %v1104_v50 = vpop.f32.mrf.mxu0  ;;  %v1447_v16 = vpop.f32.mrf.mxu1  ;;  %v1729_v51 = vsel %vm787_vm0, %v1577_v31, 0.0  ;;  %v1456_v14 = vadd.f32 %v2886_v46, %v1167_v39  ;;  %v1765_v59 = vsel %vm787_vm0, %v1589_v17, 0.0 }
 0x1bc   :  { %v1392_v54 = vadd.f32 %v3997_v30, %v1103_v61  ;;  %v1448_v43 = vadd.f32 %v1447_v16, %v1159_v24  ;;  %v1774_v30 = vsel %vm787_vm0, %v1592_v13, 0.0  ;;  %v1578_v7 = vmul.f32 %v3844_v5, %v1507_v60 }
 0x1bd   :  { %v1105_v4 = vpop.f32.mrf.mxu0  ;;  %1727 = vadd.xlane.f32.xlu1 %v1726_v62  ;;  %v2887_v52 = vpop.f32.mrf.mxu1  ;;  %v1590_v29 = vmul.f32 %v3844_v5, %v1519_v58  ;;  %v1524_v27 = vmax.f32 %v1456_v14, 0.0 }
 0x1be   :  { %1754 = vadd.xlane.f32.xlu0 %v1753_v21  ;;  %v1106_v15 = vadd.f32 %v3834_v49, %v1105_v4  ;;  %v1508_v18 = vmax.f32 %v1392_v54, 0.0  ;;  %v1522_v22 = vmax.f32 %v1448_v43, 0.0  ;;  %v1732_v8 = vsel %vm787_vm0, %v1578_v7, 0.0 }
 0x1bf   :  { %v1107_v41 = vpop.f32.mrf.mxu0  ;;  %v1450_v36 = vpop.f32.mrf.mxu1  ;;  %v1459_v47 = vadd.f32 %v2887_v52, %v1170_v44  ;;  %v1768_v40 = vsel %vm787_vm0, %v1590_v29, 0.0  ;;  %v1595_v19 = vmul.f32 %v3844_v5, %v1524_v27 }
 0x1c0   :  { %v1395_v0 = vadd.f32 %v4004_v38, %v1106_v15  ;;  %v1451_v63 = vadd.f32 %v1450_v36, %v1162_v35  ;;  %v1579_v28 = vmul.f32 %v3844_v5, %v1508_v18  ;;  %v1593_v37 = vmul.f32 %v3844_v5, %v1522_v22 }
 0x1c1   :  { %1757 = vadd.xlane.f32.xlu1 %v1756_v2  ;;  %v1525_v48 = vmax.f32 %v1459_v47, 0.0  ;;  %v1783_v20 = vsel %vm787_vm0, %v1595_v19, 0.0 }
 0x1c2   :  { %1772 = vadd.xlane.f32.xlu0 %v1771_v10  ;;  %v1509_v38 = vmax.f32 %v1395_v0, 0.0  ;;  %v1523_v56 = vmax.f32 %v1451_v63, 0.0  ;;  %v1735_v23 = vsel %vm787_vm0, %v1579_v28, 0.0  ;;  %v1777_v6 = vsel %vm787_vm0, %v1593_v37, 0.0 }
 0x1c3   :  { %v1596_v25 = vmul.f32 %v3844_v5, %v1525_v48 }
 0x1c4   :  { %v1580_v34 = vmul.f32 %v3844_v5, %v1509_v38  ;;  %v1594_v11 = vmul.f32 %v3844_v5, %v1523_v56 }
 0x1c5   :  { %1775 = vadd.xlane.f32.xlu1 %v1774_v30  ;;  %v1786_v61 = vsel %vm787_vm0, %v1596_v25, 0.0 }
 0x1c6   :  { %1730 = vadd.xlane.f32.xlu0 %v1729_v51  ;;  %v1738_v49 = vsel %vm787_vm0, %v1580_v34, 0.0  ;;  %v1780_v50 = vsel %vm787_vm0, %v1594_v11, 0.0 }
 0x1c9   :  { %1733 = vadd.xlane.f32.xlu1 %v1732_v8 }
 0x1ca   :  { %1766 = vadd.xlane.f32.xlu0 %v1765_v59 }
 0x1cd   :  { %1769 = vadd.xlane.f32.xlu1 %v1768_v40 }
 0x1ce   :  { %1736 = vadd.xlane.f32.xlu0 %v1735_v23 }
 0x1d1   :  { %1739 = vadd.xlane.f32.xlu1 %v1738_v49 }
 0x1d2   :  { %1778 = vadd.xlane.f32.xlu0 %v1777_v6  ;;  %v1605_v42 = vpop.xlane.xlu1 %1604  ;;  %v2246_v6 = vld [vmem:[%s4885_s5 + $0x10] sm:$0xff] }
 0x1d3   :  { %v1798_v26 = vadd.f32 %v4100_v12, %v1605_v42 }
 0x1d4   :  { %v1599_v45 = vpop.xlane.xlu0 %1598 }
 0x1d5   :  { %v2724_v46 = vmul.f32 -1.442695, %v1798_v26  ;;  %v1796_v32 = vadd.f32 %v4100_v12, %v1599_v45  ;;  %1781 = vadd.xlane.f32.xlu1 %v1780_v50 }
 0x1d6   :  { %1784 = vadd.xlane.f32.xlu0 %v1783_v20  ;;  %v1608_v55 = vpop.xlane.xlu1 %1607 }
 0x1d7   :  { %3067 = vpow2.f32 %v2724_v46  ;;  %v2722_v21 = vmul.f32 -1.442695, %v1796_v32  ;;  %v1799_v53 = vadd.f32 %v4100_v12, %v1608_v55  ;;  %v2244_v46 = vld [vmem:[%s4885_s5] sm:$0xff] }
 0x1d8   :  { %v1602_v33 = vpop.xlane.xlu0 %1601 }
 0x1d9   :  { %3069 = vpow2.f32 %v2722_v21  ;;  %v1797_v3 = vadd.f32 %v4100_v12, %v1602_v33  ;;  %v2725_v4 = vmul.f32 -1.442695, %v1799_v53  ;;  %1787 = vadd.xlane.f32.xlu1 %v1786_v61 }
 0x1db   :  { %v2723_v62 = vmul.f32 -1.442695, %v1797_v3  ;;  %3071 = vpow2.f32 %v2725_v4 }
 0x1dc   :  { %v1617_v57 = vpop.xlane.xlu0 %1616 }
 0x1dd   :  { %3073 = vpow2.f32 %v2723_v62  ;;  %v1802_v5 = vadd.f32 %v4100_v12, %v1617_v57  ;;  %v2247_v57 = vld [vmem:[%s4885_s5 + $0x18] sm:$0xff] }
 0x1de   :  { %v1620_v16 = vpop.xlane.xlu1 %1619 }
 0x1df   :  { %v2728_v1 = vmul.f32 -1.442695, %v1802_v5  ;;  %v1803_v41 = vadd.f32 %v4100_v12, %v1620_v16 }
 0x1e0   :  { %v1611_v9 = vpop.xlane.xlu0 %1610 }
 0x1e1   :  { %3075 = vpow2.f32 %v2728_v1  ;;  %v2729_v2 = vmul.f32 -1.442695, %v1803_v41  ;;  %v1800_v10 = vadd.f32 %v4100_v12, %v1611_v9  ;;  %v2245_v1 = vld [vmem:[%s4885_s5 + $0x8] sm:$0xff] }
 0x1e2   :  { %v1614_v31 = vpop.xlane.xlu1 %1613 }
 0x1e3   :  { %3077 = vpow2.f32 %v2729_v2  ;;  %v2726_v60 = vmul.f32 -1.442695, %v1800_v10  ;;  %v1801_v54 = vadd.f32 %v4100_v12, %v1614_v31 }
 0x1e4   :  { %v3068_v15 = vpop.eup %3067  ;;  %v1629_v13 = vpop.xlane.xlu0 %1628 }
 0x1e5   :  { %v2054_v24 = vadd.f32 1.0, %v3068_v15  ;;  %3079 = vpow2.f32 %v2726_v60  ;;  %v2727_v52 = vmul.f32 -1.442695, %v1801_v54  ;;  %v1806_v58 = vadd.f32 %v4100_v12, %v1629_v13 }
 0x1e6   :  { %v3070_v43 = vpop.eup %3069  ;;  %v1632_v51 = vpop.xlane.xlu1 %1631 }
 0x1e7   :  { %3081 = vrcp.f32 %v2054_v24  ;;  %v2052_v17 = vadd.f32 1.0, %v3070_v43  ;;  %v2732_v18 = vmul.f32 -1.442695, %v1806_v58  ;;  %v1807_v0 = vadd.f32 %v4100_v12, %v1632_v51 }
 0x1e8   :  { %3083 = vpow2.f32 %v2727_v52  ;;  %v1623_v30 = vpop.xlane.xlu0 %1622  ;;  %v3072_v7 = vpop.eup %3071 }
 0x1e9   :  { %3085 = vrcp.f32 %v2052_v17  ;;  %v2733_v39 = vmul.f32 -1.442695, %v1807_v0  ;;  %v1804_v36 = vadd.f32 %v4100_v12, %v1623_v30  ;;  %v2055_v14 = vadd.f32 1.0, %v3072_v7  ;;  %v2250_v30 = vld [vmem:[%s4885_s5 + $0x30] sm:$0xff] }
 0x1ea   :  { %v3074_v35 = vpop.eup %3073  ;;  %3087 = vpow2.f32 %v2732_v18  ;;  %v1626_v22 = vpop.xlane.xlu1 %1625 }
 0x1eb   :  { %v2053_v59 = vadd.f32 1.0, %v3074_v35  ;;  %3089 = vpow2.f32 %v2733_v39  ;;  %v2730_v29 = vmul.f32 -1.442695, %v1804_v36  ;;  %v1805_v38 = vadd.f32 %v4100_v12, %v1626_v22 }
 0x1ec   :  { %3091 = vrcp.f32 %v2055_v14  ;;  %v1641_v63 = vpop.xlane.xlu0 %1640 }
 0x1ed   :  { %3093 = vrcp.f32 %v2053_v59  ;;  %v2731_v8 = vmul.f32 -1.442695, %v1805_v38  ;;  %v1810_v28 = vadd.f32 %v4100_v12, %v1641_v63  ;;  %v2251_v59 = vld [vmem:[%s4885_s5 + $0x38] sm:$0xff] }
 0x1ee   :  { %v3076_v44 = vpop.eup %3075  ;;  %3095 = vpow2.f32 %v2730_v29  ;;  %v1644_v27 = vpop.xlane.xlu1 %1643 }
 0x1ef   :  { %v2058_v47 = vadd.f32 1.0, %v3076_v44  ;;  %3097 = vpow2.f32 %v2731_v8  ;;  %v2736_v40 = vmul.f32 -1.442695, %v1810_v28  ;;  %v1811_v56 = vadd.f32 %v4100_v12, %v1644_v27  ;;  %v2248_v27 = vld [vmem:[%s4885_s5 + $0x20] sm:$0xff] }
 0x1f0   :  { %v3078_v23 = vpop.eup %3077  ;;  %v1635_v34 = vpop.xlane.xlu0 %1634 }
 0x1f1   :  { %3099 = vrcp.f32 %v2058_v47  ;;  %v2059_v37 = vadd.f32 1.0, %v3078_v23  ;;  %v2737_v19 = vmul.f32 -1.442695, %v1811_v56  ;;  %v1808_v48 = vadd.f32 %v4100_v12, %v1635_v34 }
 0x1f2   :  { %v3080_v49 = vpop.eup %3079  ;;  %3101 = vpow2.f32 %v2736_v40  ;;  %v1638_v11 = vpop.xlane.xlu1 %1637 }
 0x1f3   :  { %3103 = vrcp.f32 %v2059_v37  ;;  %v2056_v42 = vadd.f32 1.0, %v3080_v49  ;;  %v2734_v26 = vmul.f32 -1.442695, %v1808_v48  ;;  %v1809_v45 = vadd.f32 %v4100_v12, %v1638_v11 }
 0x1f4   :  { %v3082_v20 = vpop.eup %3081  ;;  %3105 = vpow2.f32 %v2737_v19  ;;  %v1653_v32 = vpop.xlane.xlu0 %1652 }
 0x1f5   :  { %v3084_v50 = vpop.eup %3083  ;;  %v2310_v25 = vmul.f32 %v3082_v20, %v2246_v6  ;;  %3107 = vrcp.f32 %v2056_v42  ;;  %v2735_v21 = vmul.f32 -1.442695, %v1809_v45  ;;  %v1814_v55 = vadd.f32 %v4100_v12, %v1653_v32  ;;  %v2249_v20 = vld [vmem:[%s4885_s5 + $0x28] sm:$0xff] }
 0x1f6   :  { %v3086_v53 = vpop.eup %3085  ;;  %v2057_v33 = vadd.f32 1.0, %v3084_v50  ;;  %3109 = vpow2.f32 %v2734_v26  ;;  %v1656_v3 = vpop.xlane.xlu1 %1655 }
 0x1f7   :  { %v3088_v61 = vpop.eup %3087  ;;  %2375 = vst.msk [vmem:[%s4886_s6 + $0x10] sm:$0xff] %vm2372_vm1, %v2310_v25  ;;  %v2439_v4 = vsub.f32 %v2246_v6, %v2310_v25  ;;  %v2308_v62 = vmul.f32 %v3086_v53, %v2244_v46  ;;  %3111 = vpow2.f32 %v2735_v21  ;;  %v2740_v5 = vmul.f32 -1.442695, %v1814_v55 }
 0x1f8   :  { %v3090_v16 = vpop.eup %3089  ;;  %3113 = vrcp.f32 %v2057_v33  ;;  %v2062_v41 = vadd.f32 1.0, %v3088_v61  ;;  %v1815_v9 = vadd.f32 %v4100_v12, %v1656_v3  ;;  %v1647_v2 = vpop.xlane.xlu0 %1646  ;;  %v2254_v33 = vld [vmem:[%s4885_s5 + $0x50] sm:$0xff] }
 0x1f9   :  { %v3092_v10 = vpop.eup %3091  ;;  %2503 = vst.msk [vmem:[%s4887_s7 + $0x10] sm:$0xff] %vm2372_vm1, %v2439_v4  ;;  %2373 = vst.msk [vmem:[%s4886_s6] sm:$0xff] %vm2372_vm1, %v2308_v62  ;;  %v2437_v31 = vsub.f32 %v2244_v46, %v2308_v62  ;;  %v2063_v60 = vadd.f32 1.0, %v3090_v16  ;;  %3115 = vpow2.f32 %v2740_v5  ;;  %v1812_v54 = vadd.f32 %v4100_v12, %v1647_v2 }
 0x1fa   :  { %v3094_v15 = vpop.eup %3093  ;;  %v2311_v13 = vmul.f32 %v3092_v10, %v2247_v57  ;;  %3117 = vrcp.f32 %v2062_v41  ;;  %v2741_v24 = vmul.f32 -1.442695, %v1815_v9  ;;  %v1650_v52 = vpop.xlane.xlu1 %1649 }
 0x1fb   :  { %v3096_v58 = vpop.eup %3095  ;;  %2501 = vst.msk [vmem:[%s4887_s7] sm:$0xff] %vm2372_vm1, %v2437_v31  ;;  %v2309_v43 = vmul.f32 %v3094_v15, %v2245_v1  ;;  %3119 = vrcp.f32 %v2063_v60  ;;  %v2738_v51 = vmul.f32 -1.442695, %v1812_v54  ;;  %v1813_v17 = vadd.f32 %v4100_v12, %v1650_v52 }
 0x1fc   :  { %v3098_v18 = vpop.eup %3097  ;;  %2376 = vst.msk [vmem:[%s4886_s6 + $0x18] sm:$0xff] %vm2372_vm1, %v2311_v13  ;;  %v2440_v0 = vsub.f32 %v2247_v57, %v2311_v13  ;;  %v2060_v7 = vadd.f32 1.0, %v3096_v58  ;;  %3121 = vpow2.f32 %v2741_v24  ;;  %v1665_v39 = vpop.xlane.xlu0 %1664  ;;  %v2255_v57 = vld [vmem:[%s4885_s5 + $0x58] sm:$0xff]  ;;  %v2252_v24 = vld [vmem:[%s4885_s5 + $0x40] sm:$0xff] }
 0x1fd   :  { %2374 = vst.msk [vmem:[%s4886_s6 + $0x8] sm:$0xff] %vm2372_vm1, %v2309_v43  ;;  %v2438_v36 = vsub.f32 %v2245_v1, %v2309_v43  ;;  %v2061_v35 = vadd.f32 1.0, %v3098_v18  ;;  %3123 = vpow2.f32 %v2738_v51  ;;  %v2739_v14 = vmul.f32 -1.442695, %v1813_v17  ;;  %v2253_v51 = vld [vmem:[%s4885_s5 + $0x48] sm:$0xff] }
 0x1fe   :  { %v3100_v22 = vpop.eup %3099  ;;  %2504 = vst.msk [vmem:[%s4887_s7 + $0x18] sm:$0xff] %vm2372_vm1, %v2440_v0  ;;  %3125 = vrcp.f32 %v2060_v7  ;;  %v1818_v29 = vadd.f32 %v4100_v12, %v1665_v39  ;;  %v1668_v38 = vpop.xlane.xlu1 %1667 }
 0x1ff   :  { %v3102_v63 = vpop.eup %3101  ;;  %2502 = vst.msk [vmem:[%s4887_s7 + $0x8] sm:$0xff] %vm2372_vm1, %v2438_v36  ;;  %v2314_v8 = vmul.f32 %v3100_v22, %v2250_v30  ;;  %3127 = vrcp.f32 %v2061_v35  ;;  %v1819_v28 = vadd.f32 %v4100_v12, %v1668_v38 }
 0x200   :  { %v3104_v44 = vpop.eup %3103  ;;  %v2066_v47 = vadd.f32 1.0, %v3102_v63  ;;  %3129 = vpow2.f32 %v2739_v14  ;;  %v2744_v40 = vmul.f32 -1.442695, %v1818_v29  ;;  %v1659_v56 = vpop.xlane.xlu0 %1658  ;;  %v2258_v63 = vld [vmem:[%s4885_s5 + $0x70] sm:$0xff] }
 0x201   :  { %v3106_v23 = vpop.eup %3105  ;;  %2379 = vst.msk [vmem:[%s4886_s6 + $0x30] sm:$0xff] %vm2372_vm1, %v2314_v8  ;;  %v2443_v34 = vsub.f32 %v2250_v30, %v2314_v8  ;;  %v2315_v37 = vmul.f32 %v3104_v44, %v2251_v59  ;;  %v2745_v19 = vmul.f32 -1.442695, %v1819_v28  ;;  %v1816_v48 = vadd.f32 %v4100_v12, %v1659_v56  ;;  %v2259_v56 = vld [vmem:[%s4885_s5 + $0x78] sm:$0xff] }
 0x202   :  { %v3108_v49 = vpop.eup %3107  ;;  %3131 = vrcp.f32 %v2066_v47  ;;  %v2067_v6 = vadd.f32 1.0, %v3106_v23  ;;  %v1662_v11 = vpop.xlane.xlu1 %1661 }
 0x203   :  { %v3110_v42 = vpop.eup %3109  ;;  %2507 = vst.msk [vmem:[%s4887_s7 + $0x30] sm:$0xff] %vm2372_vm1, %v2443_v34  ;;  %2380 = vst.msk [vmem:[%s4886_s6 + $0x38] sm:$0xff] %vm2372_vm1, %v2315_v37  ;;  %v2444_v26 = vsub.f32 %v2251_v59, %v2315_v37  ;;  %v2312_v45 = vmul.f32 %v3108_v49, %v2248_v27  ;;  %3133 = vpow2.f32 %v2744_v40  ;;  %v2742_v50 = vmul.f32 -1.442695, %v1816_v48 }
 0x204   :  { %v3112_v46 = vpop.eup %3111  ;;  %3135 = vrcp.f32 %v2067_v6  ;;  %v2064_v32 = vadd.f32 1.0, %v3110_v42  ;;  %v1817_v25 = vadd.f32 %v4100_v12, %v1662_v11  ;;  %v1677_v21 = vpop.xlane.xlu0 %1676  ;;  %v2256_v6 = vld [vmem:[%s4885_s5 + $0x60] sm:$0xff] }
 0x205   :  { %v3114_v55 = vpop.eup %3113  ;;  %2508 = vst.msk [vmem:[%s4887_s7 + $0x38] sm:$0xff] %vm2372_vm1, %v2444_v26  ;;  %2377 = vst.msk [vmem:[%s4886_s6 + $0x20] sm:$0xff] %vm2372_vm1, %v2312_v45  ;;  %v2441_v53 = vsub.f32 %v2248_v27, %v2312_v45  ;;  %v2065_v3 = vadd.f32 1.0, %v3112_v46  ;;  %3137 = vpow2.f32 %v2745_v19  ;;  %v1822_v61 = vadd.f32 %v4100_v12, %v1677_v21 }
 0x206   :  { %v3116_v4 = vpop.eup %3115  ;;  %v2313_v62 = vmul.f32 %v3114_v55, %v2249_v20  ;;  %3139 = vrcp.f32 %v2064_v32  ;;  %v2743_v5 = vmul.f32 -1.442695, %v1817_v25  ;;  %v1680_v16 = vpop.xlane.xlu1 %1679  ;;  %v2257_v32 = vld [vmem:[%s4885_s5 + $0x68] sm:$0xff] }
 0x207   :  { %v3118_v1 = vpop.eup %3117  ;;  %2505 = vst.msk [vmem:[%s4887_s7 + $0x20] sm:$0xff] %vm2372_vm1, %v2441_v53  ;;  %3141 = vrcp.f32 %v2065_v3  ;;  %v2070_v41 = vadd.f32 1.0, %v3116_v4  ;;  %v2748_v9 = vmul.f32 -1.442695, %v1822_v61  ;;  %v1823_v2 = vadd.f32 %v4100_v12, %v1680_v16  ;;  %v2262_v61 = vld [vmem:[%s4885_s5 + $0x90] sm:$0xff] }
 0x208   :  { %v3120_v10 = vpop.eup %3119  ;;  %2378 = vst.msk [vmem:[%s4886_s6 + $0x28] sm:$0xff] %vm2372_vm1, %v2313_v62  ;;  %v2442_v31 = vsub.f32 %v2249_v20, %v2313_v62  ;;  %v2318_v60 = vmul.f32 %v3118_v1, %v2254_v33  ;;  %3143 = vpow2.f32 %v2742_v50  ;;  %v1671_v54 = vpop.xlane.xlu0 %1670 }
 0x209   :  { %v3122_v15 = vpop.eup %3121  ;;  %v2319_v13 = vmul.f32 %v3120_v10, %v2255_v57  ;;  %3145 = vrcp.f32 %v2070_v41  ;;  %v1820_v52 = vadd.f32 %v4100_v12, %v1671_v54  ;;  %v2749_v18 = vmul.f32 -1.442695, %v1823_v2  ;;  %v2263_v54 = vld [vmem:[%s4885_s5 + $0x98] sm:$0xff] }
 0x20a   :  { %v3124_v58 = vpop.eup %3123  ;;  %2506 = vst.msk [vmem:[%s4887_s7 + $0x28] sm:$0xff] %vm2372_vm1, %v2442_v31  ;;  %2383 = vst.msk [vmem:[%s4886_s6 + $0x50] sm:$0xff] %vm2372_vm1, %v2318_v60  ;;  %v2447_v43 = vsub.f32 %v2254_v33, %v2318_v60  ;;  %v2071_v17 = vadd.f32 1.0, %v3122_v15  ;;  %3147 = vpow2.f32 %v2743_v5  ;;  %v1674_v0 = vpop.xlane.xlu1 %1673 }
 0x20b   :  { %v3126_v30 = vpop.eup %3125  ;;  %2384 = vst.msk [vmem:[%s4886_s6 + $0x58] sm:$0xff] %vm2372_vm1, %v2319_v13  ;;  %v2448_v7 = vsub.f32 %v2255_v57, %v2319_v13  ;;  %v2068_v39 = vadd.f32 1.0, %v3124_v58  ;;  %3149 = vpow2.f32 %v2748_v9  ;;  %v2746_v36 = vmul.f32 -1.442695, %v1820_v52 }
 0x20c   :  { %v3128_v35 = vpop.eup %3127  ;;  %2511 = vst.msk [vmem:[%s4887_s7 + $0x50] sm:$0xff] %vm2372_vm1, %v2447_v43  ;;  %v2316_v14 = vmul.f32 %v3126_v30, %v2252_v24  ;;  %3151 = vrcp.f32 %v2071_v17  ;;  %v1821_v22 = vadd.f32 %v4100_v12, %v1674_v0  ;;  %v1683_v59 = vpop.xlane.xlu0 %1682 }
 0x20d   :  { %v3130_v29 = vpop.eup %3129  ;;  %2512 = vst.msk [vmem:[%s4887_s7 + $0x58] sm:$0xff] %vm2372_vm1, %v2448_v7  ;;  %v2317_v38 = vmul.f32 %v3128_v35, %v2253_v51  ;;  %3153 = vrcp.f32 %v2068_v39  ;;  %v1824_v8 = vadd.f32 %v4100_v12, %v1683_v59  ;;  %v2261_v35 = vld [vmem:[%s4885_s5 + $0x88] sm:$0xff] }
 0x20e   :  { %2381 = vst.msk [vmem:[%s4886_s6 + $0x40] sm:$0xff] %vm2372_vm1, %v2316_v14  ;;  %v2445_v28 = vsub.f32 %v2252_v24, %v2316_v14  ;;  %v2069_v44 = vadd.f32 1.0, %v3130_v29  ;;  %3155 = vpow2.f32 %v2749_v18  ;;  %v2747_v27 = vmul.f32 -1.442695, %v1821_v22  ;;  %v2260_v24 = vld [vmem:[%s4885_s5 + $0x80] sm:$0xff] }
 0x20f   :  { %v3132_v47 = vpop.eup %3131  ;;  %2382 = vst.msk [vmem:[%s4886_s6 + $0x48] sm:$0xff] %vm2372_vm1, %v2317_v38  ;;  %v2446_v40 = vsub.f32 %v2253_v51, %v2317_v38  ;;  %3157 = vpow2.f32 %v2746_v36  ;;  %v2750_v23 = vmul.f32 -1.442695, %v1824_v8 }
 0x210   :  { %v3134_v34 = vpop.eup %3133  ;;  %2509 = vst.msk [vmem:[%s4887_s7 + $0x40] sm:$0xff] %vm2372_vm1, %v2445_v28  ;;  %v2322_v37 = vmul.f32 %v3132_v47, %v2258_v63  ;;  %3159 = vrcp.f32 %v2069_v44  ;;  %v1686_v19 = vpop.xlane.xlu1 %1685 }
 0x211   :  { %v1689_v48 = vpop.xlane.xlu0 %1688  ;;  %v3136_v49 = vpop.eup %3135  ;;  %2510 = vst.msk [vmem:[%s4887_s7 + $0x48] sm:$0xff] %vm2372_vm1, %v2446_v40  ;;  %v2074_v11 = vadd.f32 1.0, %v3134_v34  ;;  %3161 = vpow2.f32 %v2747_v27  ;;  %v1825_v42 = vadd.f32 %v4100_v12, %v1686_v19  ;;  %v2266_v40 = vld [vmem:[%s4885_s5 + $0xb0] sm:$0xff] }
 0x212   :  { %v1826_v26 = vadd.f32 %v4100_v12, %v1689_v48  ;;  %v3138_v45 = vpop.eup %3137  ;;  %2387 = vst.msk [vmem:[%s4886_s6 + $0x70] sm:$0xff] %vm2372_vm1, %v2322_v37  ;;  %v2451_v20 = vsub.f32 %v2258_v63, %v2322_v37  ;;  %v2323_v46 = vmul.f32 %v3136_v49, %v2259_v56  ;;  %3163 = vpow2.f32 %v2750_v23  ;;  %v2267_v48 = vld [vmem:[%s4885_s5 + $0xb8] sm:$0xff] }
 0x213   :  { %v3140_v50 = vpop.eup %3139  ;;  %3165 = vrcp.f32 %v2074_v11  ;;  %v2075_v25 = vadd.f32 1.0, %v3138_v45  ;;  %v2751_v21 = vmul.f32 -1.442695, %v1825_v42 }
 0x214   :  { %v2752_v55 = vmul.f32 -1.442695, %v1826_v26  ;;  %v3142_v53 = vpop.eup %3141  ;;  %2515 = vst.msk [vmem:[%s4887_s7 + $0x70] sm:$0xff] %vm2372_vm1, %v2451_v20  ;;  %2388 = vst.msk [vmem:[%s4886_s6 + $0x78] sm:$0xff] %vm2372_vm1, %v2323_v46  ;;  %v2452_v33 = vsub.f32 %v2259_v56, %v2323_v46  ;;  %v2320_v3 = vmul.f32 %v3140_v50, %v2256_v6  ;;  %v1692_v4 = vpop.xlane.xlu1 %1691 }
 0x215   :  { %v1695_v62 = vpop.xlane.xlu0 %1694  ;;  %v3144_v57 = vpop.eup %3143  ;;  %v2321_v5 = vmul.f32 %v3142_v53, %v2257_v32  ;;  %3167 = vrcp.f32 %v2075_v25  ;;  %v1827_v16 = vadd.f32 %v4100_v12, %v1692_v4 }
 0x216   :  { %v1828_v1 = vadd.f32 %v4100_v12, %v1695_v62  ;;  %v3146_v41 = vpop.eup %3145  ;;  %2516 = vst.msk [vmem:[%s4887_s7 + $0x78] sm:$0xff] %vm2372_vm1, %v2452_v33  ;;  %2385 = vst.msk [vmem:[%s4886_s6 + $0x60] sm:$0xff] %vm2372_vm1, %v2320_v3  ;;  %v2449_v9 = vsub.f32 %v2256_v6, %v2320_v3  ;;  %v2072_v2 = vadd.f32 1.0, %v3144_v57  ;;  %3169 = vpow2.f32 %v2751_v21  ;;  %v2265_v3 = vld [vmem:[%s4885_s5 + $0xa8] sm:$0xff] }
 0x217   :  { %v3148_v10 = vpop.eup %3147  ;;  %2386 = vst.msk [vmem:[%s4886_s6 + $0x68] sm:$0xff] %vm2372_vm1, %v2321_v5  ;;  %v2450_v31 = vsub.f32 %v2257_v32, %v2321_v5  ;;  %v2326_v60 = vmul.f32 %v3146_v41, %v2262_v61  ;;  %3171 = vpow2.f32 %v2752_v55  ;;  %v2753_v15 = vmul.f32 -1.442695, %v1827_v16  ;;  %v2264_v32 = vld [vmem:[%s4885_s5 + $0xa0] sm:$0xff]  ;;  %v2270_v5 = vld [vmem:[%s4885_s5 + $0xd0] sm:$0xff] }
 0x218   :  { %v3150_v13 = vpop.eup %3149  ;;  %2513 = vst.msk [vmem:[%s4887_s7 + $0x60] sm:$0xff] %vm2372_vm1, %v2449_v9  ;;  %3173 = vrcp.f32 %v2072_v2  ;;  %v2073_v52 = vadd.f32 1.0, %v3148_v10  ;;  %v2754_v58 = vmul.f32 -1.442695, %v1828_v1  ;;  %v1698_v43 = vpop.xlane.xlu1 %1697 }
 0x219   :  { %v3152_v51 = vpop.eup %3151  ;;  %2514 = vst.msk [vmem:[%s4887_s7 + $0x68] sm:$0xff] %vm2372_vm1, %v2450_v31  ;;  %2391 = vst.msk [vmem:[%s4886_s6 + $0x90] sm:$0xff] %vm2372_vm1, %v2326_v60  ;;  %v2455_v17 = vsub.f32 %v2262_v61, %v2326_v60  ;;  %v2078_v18 = vadd.f32 1.0, %v3150_v13  ;;  %3175 = vpow2.f32 %v2753_v15  ;;  %v1829_v0 = vadd.f32 %v4100_v12, %v1698_v43  ;;  %v2271_v15 = vld [vmem:[%s4885_s5 + $0xd8] sm:$0xff] }
 0x21a   :  { %v3154_v30 = vpop.eup %3153  ;;  %v2327_v7 = vmul.f32 %v3152_v51, %v2263_v54  ;;  %3177 = vrcp.f32 %v2073_v52 }
 0x21b   :  { %v3156_v39 = vpop.eup %3155  ;;  %2519 = vst.msk [vmem:[%s4887_s7 + $0x90] sm:$0xff] %vm2372_vm1, %v2455_v17  ;;  %v2324_v36 = vmul.f32 %v3154_v30, %v2260_v24  ;;  %3179 = vrcp.f32 %v2078_v18  ;;  %v2755_v14 = vmul.f32 -1.442695, %v1829_v0 }
 0x21c   :  { %v3158_v22 = vpop.eup %3157  ;;  %2392 = vst.msk [vmem:[%s4886_s6 + $0x98] sm:$0xff] %vm2372_vm1, %v2327_v7  ;;  %v2456_v59 = vsub.f32 %v2263_v54, %v2327_v7  ;;  %v2079_v29 = vadd.f32 1.0, %v3156_v39  ;;  %3181 = vpow2.f32 %v2754_v58  ;;  %v1701_v38 = vpop.xlane.xlu0 %1700  ;;  %v2268_v58 = vld [vmem:[%s4885_s5 + $0xc0] sm:$0xff]  ;;  %v2269_v39 = vld [vmem:[%s4885_s5 + $0xc8] sm:$0xff] }
 0x21d   :  { %v3160_v63 = vpop.eup %3159  ;;  %2389 = vst.msk [vmem:[%s4886_s6 + $0x80] sm:$0xff] %vm2372_vm1, %v2324_v36  ;;  %v2453_v8 = vsub.f32 %v2260_v24, %v2324_v36  ;;  %v2076_v28 = vadd.f32 1.0, %v3158_v22  ;;  %3183 = vpow2.f32 %v2755_v14  ;;  %v1830_v44 = vadd.f32 %v4100_v12, %v1701_v38  ;;  %v2272_v14 = vld [vmem:[%s4885_s5 + $0xe0] sm:$0xff] }
 0x21e   :  { %v3162_v27 = vpop.eup %3161  ;;  %2520 = vst.msk [vmem:[%s4887_s7 + $0x98] sm:$0xff] %vm2372_vm1, %v2456_v59  ;;  %v2325_v47 = vmul.f32 %v3160_v63, %v2261_v35  ;;  %3185 = vrcp.f32 %v2079_v29 }
 0x21f   :  { %v3164_v56 = vpop.eup %3163  ;;  %2517 = vst.msk [vmem:[%s4887_s7 + $0x80] sm:$0xff] %vm2372_vm1, %v2453_v8  ;;  %3187 = vrcp.f32 %v2076_v28  ;;  %v2077_v23 = vadd.f32 1.0, %v3162_v27  ;;  %v2756_v34 = vmul.f32 -1.442695, %v1830_v44 }
 0x220   :  { %v3166_v37 = vpop.eup %3165  ;;  %2390 = vst.msk [vmem:[%s4886_s6 + $0x88] sm:$0xff] %vm2372_vm1, %v2325_v47  ;;  %v2454_v19 = vsub.f32 %v2261_v35, %v2325_v47  ;;  %v2080_v49 = vadd.f32 1.0, %v3164_v56  ;;  %v1704_v6 = vpop.xlane.xlu1 %1703 }
 0x221   :  { %v2330_v11 = vmul.f32 %v3166_v37, %v2266_v40  ;;  %3189 = vrcp.f32 %v2077_v23  ;;  %v1831_v42 = vadd.f32 %v4100_v12, %v1704_v6 }
 0x222   :  { %v3168_v26 = vpop.eup %3167  ;;  %2518 = vst.msk [vmem:[%s4887_s7 + $0x88] sm:$0xff] %vm2372_vm1, %v2454_v19  ;;  %3191 = vrcp.f32 %v2080_v49  ;;  %v2274_v19 = vld [vmem:[%s4885_s5 + $0xf0] sm:$0xff] }
 0x223   :  { %v3170_v45 = vpop.eup %3169  ;;  %2395 = vst.msk [vmem:[%s4886_s6 + $0xb0] sm:$0xff] %vm2372_vm1, %v2330_v11  ;;  %v2459_v20 = vsub.f32 %v2266_v40, %v2330_v11  ;;  %v2331_v46 = vmul.f32 %v3168_v26, %v2267_v48  ;;  %3193 = vpow2.f32 %v2756_v34  ;;  %v2757_v50 = vmul.f32 -1.442695, %v1831_v42  ;;  %v2273_v40 = vld [vmem:[%s4885_s5 + $0xe8] sm:$0xff] }
 0x224   :  { %v3172_v25 = vpop.eup %3171  ;;  %v2081_v21 = vadd.f32 1.0, %v3170_v45  ;;  %v1707_v55 = vpop.xlane.xlu0 %1706  ;;  %v2275_v45 = vld [vmem:[%s4885_s5 + $0xf8] sm:$0xff] }
 0x225   :  { %v3174_v53 = vpop.eup %3173  ;;  %2523 = vst.msk [vmem:[%s4887_s7 + $0xb0] sm:$0xff] %vm2372_vm1, %v2459_v20  ;;  %2396 = vst.msk [vmem:[%s4886_s6 + $0xb8] sm:$0xff] %vm2372_vm1, %v2331_v46  ;;  %v2460_v33 = vsub.f32 %v2267_v48, %v2331_v46  ;;  %v2082_v61 = vadd.f32 1.0, %v3172_v25  ;;  %3195 = vpow2.f32 %v2757_v50  ;;  %v1832_v4 = vadd.f32 %v4100_v12, %v1707_v55 }
 0x226   :  { %v3176_v62 = vpop.eup %3175  ;;  %v2328_v57 = vmul.f32 %v3174_v53, %v2264_v32  ;;  %3197 = vrcp.f32 %v2081_v21 }
 0x227   :  { %v3178_v16 = vpop.eup %3177  ;;  %2524 = vst.msk [vmem:[%s4887_s7 + $0xb8] sm:$0xff] %vm2372_vm1, %v2460_v33  ;;  %3199 = vrcp.f32 %v2082_v61  ;;  %v2083_v1 = vadd.f32 1.0, %v3176_v62  ;;  %v2758_v41 = vmul.f32 -1.442695, %v1832_v4  ;;  %v2277_v62 = vld [vmem:[%s4885_s5 + $0x108] sm:$0xff] }
 0x228   :  { %v3180_v9 = vpop.eup %3179  ;;  %2393 = vst.msk [vmem:[%s4886_s6 + $0xa0] sm:$0xff] %vm2372_vm1, %v2328_v57  ;;  %v2457_v2 = vsub.f32 %v2264_v32, %v2328_v57  ;;  %v2329_v10 = vmul.f32 %v3178_v16, %v2265_v3  ;;  %v1710_v31 = vpop.xlane.xlu1 %1709 }
 0x229   :  { %v3182_v60 = vpop.eup %3181  ;;  %v2334_v54 = vmul.f32 %v3180_v9, %v2270_v5  ;;  %3201 = vrcp.f32 %v2083_v1  ;;  %v1833_v13 = vadd.f32 %v4100_v12, %v1710_v31 }
 0x22a   :  { %v3184_v24 = vpop.eup %3183  ;;  %2521 = vst.msk [vmem:[%s4887_s7 + $0xa0] sm:$0xff] %vm2372_vm1, %v2457_v2  ;;  %2394 = vst.msk [vmem:[%s4886_s6 + $0xa8] sm:$0xff] %vm2372_vm1, %v2329_v10  ;;  %v2458_v52 = vsub.f32 %v2265_v3, %v2329_v10  ;;  %v2084_v43 = vadd.f32 1.0, %v3182_v60  ;;  %3203 = vpow2.f32 %v2758_v41  ;;  %v2276_v3 = vld [vmem:[%s4885_s5 + $0x100] sm:$0xff] }
 0x22b   :  { %v3186_v51 = vpop.eup %3185  ;;  %2399 = vst.msk [vmem:[%s4886_s6 + $0xd0] sm:$0xff] %vm2372_vm1, %v2334_v54  ;;  %v2463_v17 = vsub.f32 %v2270_v5, %v2334_v54  ;;  %v2085_v18 = vadd.f32 1.0, %v3184_v24  ;;  %v2759_v0 = vmul.f32 -1.442695, %v1833_v13 }
 0x22c   :  { %v3188_v30 = vpop.eup %3187  ;;  %2522 = vst.msk [vmem:[%s4887_s7 + $0xa8] sm:$0xff] %vm2372_vm1, %v2458_v52  ;;  %v2335_v7 = vmul.f32 %v3186_v51, %v2271_v15  ;;  %3205 = vrcp.f32 %v2084_v43  ;;  %v1713_v36 = vpop.xlane.xlu0 %1712 }
 0x22d   :  { %2527 = vst.msk [vmem:[%s4887_s7 + $0xd0] sm:$0xff] %vm2372_vm1, %v2463_v17  ;;  %v2332_v35 = vmul.f32 %v3188_v30, %v2268_v58  ;;  %3207 = vrcp.f32 %v2085_v18  ;;  %v1834_v22 = vadd.f32 %v4100_v12, %v1713_v36  ;;  %v2278_v18 = vld [vmem:[%s4885_s5 + $0x110] sm:$0xff] }
 0x22e   :  { %v3190_v59 = vpop.eup %3189  ;;  %2400 = vst.msk [vmem:[%s4886_s6 + $0xd8] sm:$0xff] %vm2372_vm1, %v2335_v7  ;;  %v2464_v29 = vsub.f32 %v2271_v15, %v2335_v7  ;;  %3209 = vpow2.f32 %v2759_v0 }
 0x22f   :  { %v3192_v38 = vpop.eup %3191  ;;  %2397 = vst.msk [vmem:[%s4886_s6 + $0xc0] sm:$0xff] %vm2372_vm1, %v2332_v35  ;;  %v2461_v63 = vsub.f32 %v2268_v58, %v2332_v35  ;;  %v2333_v8 = vmul.f32 %v3190_v59, %v2269_v39  ;;  %v2760_v28 = vmul.f32 -1.442695, %v1834_v22  ;;  %v2279_v35 = vld [vmem:[%s4885_s5 + $0x118] sm:$0xff] }
 0x230   :  { %v3194_v44 = vpop.eup %3193  ;;  %2528 = vst.msk [vmem:[%s4887_s7 + $0xd8] sm:$0xff] %vm2372_vm1, %v2464_v29  ;;  %v2336_v27 = vmul.f32 %v3192_v38, %v2272_v14  ;;  %v1716_v23 = vpop.xlane.xlu1 %1715 }
 0x231   :  { %2525 = vst.msk [vmem:[%s4887_s7 + $0xc0] sm:$0xff] %vm2372_vm1, %v2461_v63  ;;  %2398 = vst.msk [vmem:[%s4886_s6 + $0xc8] sm:$0xff] %vm2372_vm1, %v2333_v8  ;;  %v2462_v47 = vsub.f32 %v2269_v39, %v2333_v8  ;;  %v2086_v56 = vadd.f32 1.0, %v3194_v44  ;;  %3211 = vpow2.f32 %v2760_v28  ;;  %v1835_v48 = vadd.f32 %v4100_v12, %v1716_v23 }
 0x232   :  { %v3196_v34 = vpop.eup %3195  ;;  %2401 = vst.msk [vmem:[%s4886_s6 + $0xe0] sm:$0xff] %vm2372_vm1, %v2336_v27  ;;  %v2465_v37 = vsub.f32 %v2272_v14, %v2336_v27  ;;  %v4535_v14 = vld [vmem:[#allocation2] ss:$0 sm:$0xff] }
 0x233   :  { %v3198_v49 = vpop.eup %3197  ;;  %2526 = vst.msk [vmem:[%s4887_s7 + $0xc8] sm:$0xff] %vm2372_vm1, %v2462_v47  ;;  %3213 = vrcp.f32 %v2086_v56  ;;  %v2087_v6 = vadd.f32 1.0, %v3196_v34  ;;  %v1749_v11 = vpop.xlane.xlu0 %1748  ;;  %v2761_v20 = vmul.f32 -1.442695, %v1835_v48  ;;  %v2280_v48 = vld [vmem:[%s4885_s5 + $0x120] sm:$0xff] }
 0x234   :  { %v3200_v42 = vpop.eup %3199  ;;  %2529 = vst.msk [vmem:[%s4887_s7 + $0xe0] sm:$0xff] %vm2372_vm1, %v2465_v37  ;;  %v2337_v26 = vmul.f32 %v3198_v49, %v2273_v40  ;;  %v1846_v46 = vadd.f32 %v4100_v12, %v1749_v11 }
 0x235   :  { %v2338_v32 = vmul.f32 %v3200_v42, %v2274_v19  ;;  %3215 = vrcp.f32 %v2087_v6 }
 0x236   :  { %v3202_v50 = vpop.eup %3201  ;;  %2402 = vst.msk [vmem:[%s4886_s6 + $0xe8] sm:$0xff] %vm2372_vm1, %v2337_v26  ;;  %v2466_v25 = vsub.f32 %v2273_v40, %v2337_v26  ;;  %3217 = vpow2.f32 %v2761_v20  ;;  %v2772_v21 = vmul.f32 -1.442695, %v1846_v46  ;;  %v1752_v61 = vpop.xlane.xlu1 %1751 }
 0x237   :  { %v3204_v55 = vpop.eup %3203  ;;  %2403 = vst.msk [vmem:[%s4886_s6 + $0xf0] sm:$0xff] %vm2372_vm1, %v2338_v32  ;;  %v2467_v53 = vsub.f32 %v2274_v19, %v2338_v32  ;;  %v2339_v33 = vmul.f32 %v3202_v50, %v2275_v45  ;;  %v1719_v4 = vpop.xlane.xlu0 %1718  ;;  %v1847_v5 = vadd.f32 %v4100_v12, %v1752_v61 }
 0x238   :  { %2530 = vst.msk [vmem:[%s4887_s7 + $0xe8] sm:$0xff] %vm2372_vm1, %v2466_v25  ;;  %v2088_v57 = vadd.f32 1.0, %v3204_v55  ;;  %3219 = vpow2.f32 %v2772_v21  ;;  %v1836_v16 = vadd.f32 %v4100_v12, %v1719_v4  ;;  %v2281_v25 = vld [vmem:[%s4885_s5 + $0x128] sm:$0xff] }
 0x239   :  { %v3206_v1 = vpop.eup %3205  ;;  %2531 = vst.msk [vmem:[%s4887_s7 + $0xf0] sm:$0xff] %vm2372_vm1, %v2467_v53  ;;  %2404 = vst.msk [vmem:[%s4886_s6 + $0xf8] sm:$0xff] %vm2372_vm1, %v2339_v33  ;;  %v2468_v41 = vsub.f32 %v2275_v45, %v2339_v33  ;;  %v2773_v10 = vmul.f32 -1.442695, %v1847_v5 }
 0x23a   :  { %v3208_v9 = vpop.eup %3207  ;;  %v2340_v2 = vmul.f32 %v3206_v1, %v2276_v3  ;;  %3221 = vrcp.f32 %v2088_v57  ;;  %v2762_v31 = vmul.f32 -1.442695, %v1836_v16  ;;  %v1722_v15 = vpop.xlane.xlu1 %1721  ;;  %v2282_v16 = vld [vmem:[%s4885_s5 + $0x130] sm:$0xff] }
 0x23b   :  { %v3210_v60 = vpop.eup %3209  ;;  %2532 = vst.msk [vmem:[%s4887_s7 + $0xf8] sm:$0xff] %vm2372_vm1, %v2468_v41  ;;  %v2341_v54 = vmul.f32 %v3208_v9, %v2277_v62  ;;  %v1743_v13 = vpop.xlane.xlu0 %1742  ;;  %3223 = vpow2.f32 %v2773_v10  ;;  %v1837_v58 = vadd.f32 %v4100_v12, %v1722_v15 }
 0x23c   :  { %2405 = vst.msk [vmem:[%s4886_s6 + $0x100] sm:$0xff] %vm2372_vm1, %v2340_v2  ;;  %v2469_v24 = vsub.f32 %v2276_v3, %v2340_v2  ;;  %v2089_v52 = vadd.f32 1.0, %v3210_v60  ;;  %3225 = vpow2.f32 %v2762_v31  ;;  %v1844_v51 = vadd.f32 %v4100_v12, %v1743_v13 }
 0x23d   :  { %2406 = vst.msk [vmem:[%s4886_s6 + $0x108] sm:$0xff] %vm2372_vm1, %v2341_v54  ;;  %v2470_v43 = vsub.f32 %v2277_v62, %v2341_v54  ;;  %v2763_v0 = vmul.f32 -1.442695, %v1837_v58 }
 0x23e   :  { %v3212_v17 = vpop.eup %3211  ;;  %2533 = vst.msk [vmem:[%s4887_s7 + $0x100] sm:$0xff] %vm2372_vm1, %v2469_v24  ;;  %3227 = vrcp.f32 %v2089_v52  ;;  %v2770_v7 = vmul.f32 -1.442695, %v1844_v51  ;;  %v1746_v12 = vpop.xlane.xlu1 %1745 }
 0x23f   :  { %2534 = vst.msk [vmem:[%s4887_s7 + $0x108] sm:$0xff] %vm2372_vm1, %v2470_v43  ;;  %v2090_v30 = vadd.f32 1.0, %v3212_v17  ;;  %v1761_v39 = vpop.xlane.xlu0 %1760  ;;  %3229 = vpow2.f32 %v2763_v0  ;;  %v1845_v22 = vadd.f32 %v4535_v14, %v1746_v12  ;;  %v2283_v0 = vld [vmem:[%s4885_s5 + $0x138] sm:$0xff] }
 0x240   :  { %v3214_v36 = vpop.eup %3213  ;;  %v1850_v59 = vadd.f32 %v4535_v14, %v1761_v39 }
 0x241   :  { %v2342_v29 = vmul.f32 %v3214_v36, %v2278_v18  ;;  %3231 = vrcp.f32 %v2090_v30  ;;  %v2771_v63 = vmul.f32 -1.442695, %v1845_v22  ;;  %v2294_v36 = vld [vmem:[%s4885_s5 + $0x190] sm:$0xff] }
 0x242   :  { %v3216_v38 = vpop.eup %3215  ;;  %3233 = vpow2.f32 %v2770_v7  ;;  %v2776_v8 = vmul.f32 -1.442695, %v1850_v59  ;;  %v1764_v47 = vpop.xlane.xlu1 %1763 }
 0x243   :  { %v3218_v28 = vpop.eup %3217  ;;  %2407 = vst.msk [vmem:[%s4886_s6 + $0x110] sm:$0xff] %vm2372_vm1, %v2342_v29  ;;  %v2471_v44 = vsub.f32 %v2278_v18, %v2342_v29  ;;  %v2343_v27 = vmul.f32 %v3216_v38, %v2279_v35  ;;  %v1725_v40 = vpop.xlane.xlu0 %1724  ;;  %3235 = vpow2.f32 %v2771_v63  ;;  %v1851_v23 = vadd.f32 %v4535_v14, %v1764_v47 }
 0x244   :  { %v2091_v56 = vadd.f32 1.0, %v3218_v28  ;;  %v1838_v34 = vadd.f32 %v4535_v14, %v1725_v40  ;;  %3237 = vpow2.f32 %v2776_v8 }
 0x245   :  { %v3220_v37 = vpop.eup %3219  ;;  %2535 = vst.msk [vmem:[%s4887_s7 + $0x110] sm:$0xff] %vm2372_vm1, %v2471_v44  ;;  %2408 = vst.msk [vmem:[%s4886_s6 + $0x118] sm:$0xff] %vm2372_vm1, %v2343_v27  ;;  %v2472_v19 = vsub.f32 %v2279_v35, %v2343_v27  ;;  %v2777_v6 = vmul.f32 -1.442695, %v1851_v23  ;;  %v2295_v23 = vld [vmem:[%s4885_s5 + $0x198] sm:$0xff] }
 0x246   :  { %3239 = vrcp.f32 %v2091_v56  ;;  %v2102_v49 = vadd.f32 1.0, %v3220_v37  ;;  %v2764_v11 = vmul.f32 -1.442695, %v1838_v34  ;;  %v1728_v26 = vpop.xlane.xlu1 %1727 }
 0x247   :  { %v3222_v42 = vpop.eup %3221  ;;  %2536 = vst.msk [vmem:[%s4887_s7 + $0x118] sm:$0xff] %vm2372_vm1, %v2472_v19  ;;  %v1755_v45 = vpop.xlane.xlu0 %1754  ;;  %v1839_v46 = vadd.f32 %v4535_v14, %v1728_v26 }
 0x248   :  { %v2344_v20 = vmul.f32 %v3222_v42, %v2280_v48  ;;  %3241 = vrcp.f32 %v2102_v49  ;;  %v1848_v32 = vadd.f32 %v4535_v14, %v1755_v45  ;;  %v3224_v50 = vpop.eup %3223 }
 0x249   :  { %3243 = vpow2.f32 %v2777_v6  ;;  %v3226_v21 = vpop.eup %3225  ;;  %v2103_v53 = vadd.f32 1.0, %v3224_v50  ;;  %v2765_v33 = vmul.f32 -1.442695, %v1839_v46  ;;  %v2284_v6 = vld [vmem:[%s4885_s5 + $0x140] sm:$0xff] }
 0x24a   :  { %2409 = vst.msk [vmem:[%s4886_s6 + $0x120] sm:$0xff] %vm2372_vm1, %v2344_v20  ;;  %v2473_v55 = vsub.f32 %v2280_v48, %v2344_v20  ;;  %3245 = vpow2.f32 %v2764_v11  ;;  %v2092_v61 = vadd.f32 1.0, %v3226_v21  ;;  %v2774_v4 = vmul.f32 -1.442695, %v1848_v32  ;;  %v1758_v62 = vpop.xlane.xlu1 %1757  ;;  %v2285_v21 = vld [vmem:[%s4885_s5 + $0x148] sm:$0xff] }
 0x24b   :  { %v3228_v3 = vpop.eup %3227  ;;  %v1773_v57 = vpop.xlane.xlu0 %1772  ;;  %3247 = vrcp.f32 %v2103_v53  ;;  %v1849_v1 = vadd.f32 %v4535_v14, %v1758_v62 }
 0x24c   :  { %2537 = vst.msk [vmem:[%s4887_s7 + $0x120] sm:$0xff] %vm2372_vm1, %v2473_v55  ;;  %v2345_v5 = vmul.f32 %v3228_v3, %v2281_v25  ;;  %v1854_v41 = vadd.f32 %v4535_v14, %v1773_v57  ;;  %v3230_v9 = vpop.eup %3229  ;;  %3249 = vrcp.f32 %v2092_v61 }
 0x24d   :  { %v2093_v31 = vadd.f32 1.0, %v3230_v9  ;;  %3251 = vpow2.f32 %v2765_v33  ;;  %v2775_v60 = vmul.f32 -1.442695, %v1849_v1 }
 0x24e   :  { %v3232_v2 = vpop.eup %3231  ;;  %2410 = vst.msk [vmem:[%s4886_s6 + $0x128] sm:$0xff] %vm2372_vm1, %v2345_v5  ;;  %v2474_v10 = vsub.f32 %v2281_v25, %v2345_v5  ;;  %3253 = vpow2.f32 %v2774_v4  ;;  %v2780_v13 = vmul.f32 -1.442695, %v1854_v41  ;;  %v1776_v24 = vpop.xlane.xlu1 %1775 }
 0x24f   :  { %v3234_v54 = vpop.eup %3233  ;;  %v2346_v15 = vmul.f32 %v3232_v2, %v2282_v16  ;;  %v1731_v52 = vpop.xlane.xlu0 %1730  ;;  %3255 = vrcp.f32 %v2093_v31  ;;  %v1855_v43 = vadd.f32 %v4535_v14, %v1776_v24 }
 0x250   :  { %2538 = vst.msk [vmem:[%s4887_s7 + $0x128] sm:$0xff] %vm2372_vm1, %v2474_v10  ;;  %v2100_v58 = vadd.f32 1.0, %v3234_v54  ;;  %v1840_v51 = vadd.f32 %v4535_v14, %v1731_v52  ;;  %v3236_v17 = vpop.eup %3235  ;;  %3257 = vpow2.f32 %v2775_v60  ;;  %v2293_v60 = vld [vmem:[%s4885_s5 + $0x188] sm:$0xff] }
 0x251   :  { %2411 = vst.msk [vmem:[%s4886_s6 + $0x130] sm:$0xff] %vm2372_vm1, %v2346_v15  ;;  %v2475_v18 = vsub.f32 %v2282_v16, %v2346_v15  ;;  %v3238_v30 = vpop.eup %3237  ;;  %v2101_v7 = vadd.f32 1.0, %v3236_v17  ;;  %v2781_v12 = vmul.f32 -1.442695, %v1855_v43  ;;  %v2292_v16 = vld [vmem:[%s4885_s5 + $0x180] sm:$0xff] }
 0x252   :  { %3259 = vrcp.f32 %v2100_v58  ;;  %v2106_v35 = vadd.f32 1.0, %v3238_v30  ;;  %v2766_v22 = vmul.f32 -1.442695, %v1840_v51  ;;  %v1734_v59 = vpop.xlane.xlu1 %1733  ;;  %v2298_v51 = vld [vmem:[%s4885_s5 + $0x1b0] sm:$0xff] }
 0x253   :  { %v3240_v39 = vpop.eup %3239  ;;  %2539 = vst.msk [vmem:[%s4887_s7 + $0x130] sm:$0xff] %vm2372_vm1, %v2475_v18  ;;  %3261 = vpow2.f32 %v2780_v13  ;;  %v1767_v29 = vpop.xlane.xlu0 %1766  ;;  %v1841_v63 = vadd.f32 %v4535_v14, %v1734_v59 }
 0x254   :  { %v2347_v38 = vmul.f32 %v3240_v39, %v2283_v0  ;;  %3263 = vrcp.f32 %v2101_v7  ;;  %v1852_v8 = vadd.f32 %v4535_v14, %v1767_v29 }
 0x255   :  { %v3242_v28 = vpop.eup %3241  ;;  %3265 = vrcp.f32 %v2106_v35  ;;  %v2767_v40 = vmul.f32 -1.442695, %v1841_v63 }
 0x256   :  { %v3244_v44 = vpop.eup %3243  ;;  %2412 = vst.msk [vmem:[%s4886_s6 + $0x138] sm:$0xff] %vm2372_vm1, %v2347_v38  ;;  %v2476_v27 = vsub.f32 %v2283_v0, %v2347_v38  ;;  %v2358_v47 = vmul.f32 %v3242_v28, %v2294_v36  ;;  %3267 = vpow2.f32 %v2781_v12  ;;  %v2778_v37 = vmul.f32 -1.442695, %v1852_v8  ;;  %v1770_v19 = vpop.xlane.xlu1 %1769  ;;  %v2299_v8 = vld [vmem:[%s4885_s5 + $0x1b8] sm:$0xff] }
 0x257   :  { %v3246_v56 = vpop.eup %3245  ;;  %v2107_v34 = vadd.f32 1.0, %v3244_v44  ;;  %3269 = vpow2.f32 %v2766_v22  ;;  %v1737_v48 = vpop.xlane.xlu0 %1736  ;;  %v1853_v42 = vadd.f32 %v4535_v14, %v1770_v19 }
 0x258   :  { %2540 = vst.msk [vmem:[%s4887_s7 + $0x138] sm:$0xff] %vm2372_vm1, %v2476_v27  ;;  %2423 = vst.msk [vmem:[%s4886_s6 + $0x190] sm:$0xff] %vm2372_vm1, %v2358_v47  ;;  %v2487_v49 = vsub.f32 %v2294_v36, %v2358_v47  ;;  %v2094_v11 = vadd.f32 1.0, %v3246_v56  ;;  %3271 = vpow2.f32 %v2767_v40  ;;  %v3248_v26 = vpop.eup %3247  ;;  %v1842_v45 = vadd.f32 %v4535_v14, %v1737_v48  ;;  %v2286_v40 = vld [vmem:[%s4885_s5 + $0x150] sm:$0xff] }
 0x259   :  { %3273 = vrcp.f32 %v2107_v34  ;;  %v3250_v20 = vpop.eup %3249  ;;  %v2359_v46 = vmul.f32 %v3248_v26, %v2295_v23  ;;  %v2779_v32 = vmul.f32 -1.442695, %v1853_v42  ;;  %v2287_v42 = vld [vmem:[%s4885_s5 + $0x158] sm:$0xff] }
 0x25a   :  { %2551 = vst.msk [vmem:[%s4887_s7 + $0x190] sm:$0xff] %vm2372_vm1, %v2487_v49  ;;  %3275 = vrcp.f32 %v2094_v11  ;;  %v3252_v50 = vpop.eup %3251  ;;  %v2348_v25 = vmul.f32 %v3250_v20, %v2284_v6  ;;  %v2768_v55 = vmul.f32 -1.442695, %v1842_v45  ;;  %v1740_v53 = vpop.xlane.xlu1 %1739 }
 0x25b   :  { %3277 = vpow2.f32 %v2778_v37  ;;  %v1779_v33 = vpop.xlane.xlu0 %1778  ;;  %v3254_v3 = vpop.eup %3253  ;;  %2424 = vst.msk [vmem:[%s4886_s6 + $0x198] sm:$0xff] %vm2372_vm1, %v2359_v46  ;;  %v2488_v61 = vsub.f32 %v2295_v23, %v2359_v46  ;;  %v2095_v4 = vadd.f32 1.0, %v3252_v50  ;;  %v1843_v62 = vadd.f32 %v4535_v14, %v1740_v53  ;;  %v2296_v46 = vld [vmem:[%s4885_s5 + $0x1a0] sm:$0xff]  ;;  %v2297_v53 = vld [vmem:[%s4885_s5 + $0x1a8] sm:$0xff] }
 0x25c   :  { %3279 = vpow2.f32 %v2779_v32  ;;  %v3256_v57 = vpop.eup %3255  ;;  %2413 = vst.msk [vmem:[%s4886_s6 + $0x140] sm:$0xff] %vm2372_vm1, %v2348_v25  ;;  %v2477_v5 = vsub.f32 %v2284_v6, %v2348_v25  ;;  %v2104_v1 = vadd.f32 1.0, %v3254_v3  ;;  %v1856_v41 = vadd.f32 %v4535_v14, %v1779_v33 }
 0x25d   :  { %3281 = vpow2.f32 %v2768_v55  ;;  %v3258_v9 = vpop.eup %3257  ;;  %2552 = vst.msk [vmem:[%s4887_s7 + $0x198] sm:$0xff] %vm2372_vm1, %v2488_v61  ;;  %v2349_v2 = vmul.f32 %v3256_v57, %v2285_v21  ;;  %v2769_v10 = vmul.f32 -1.442695, %v1843_v62  ;;  %v2302_v62 = vld [vmem:[%s4885_s5 + $0x1d0] sm:$0xff] }
 0x25e   :  { %3283 = vrcp.f32 %v2095_v4  ;;  %2541 = vst.msk [vmem:[%s4887_s7 + $0x140] sm:$0xff] %vm2372_vm1, %v2477_v5  ;;  %v2105_v54 = vadd.f32 1.0, %v3258_v9  ;;  %v2782_v15 = vmul.f32 -1.442695, %v1856_v41  ;;  %v1782_v13 = vpop.xlane.xlu1 %1781 }
 0x25f   :  { %v3260_v31 = vpop.eup %3259  ;;  %3285 = vrcp.f32 %v2104_v1  ;;  %v1785_v24 = vpop.xlane.xlu0 %1784  ;;  %2414 = vst.msk [vmem:[%s4886_s6 + $0x148] sm:$0xff] %vm2372_vm1, %v2349_v2  ;;  %v2478_v58 = vsub.f32 %v2285_v21, %v2349_v2  ;;  %v1857_v17 = vadd.f32 %v4535_v14, %v1782_v13 }
 0x260   :  { %v3262_v52 = vpop.eup %3261  ;;  %v2356_v43 = vmul.f32 %v3260_v31, %v2292_v16  ;;  %3287 = vpow2.f32 %v2769_v10  ;;  %v1858_v30 = vadd.f32 %v4535_v14, %v1785_v24 }
 0x261   :  { %v3264_v18 = vpop.eup %3263  ;;  %3289 = vrcp.f32 %v2105_v54  ;;  %v2110_v0 = vadd.f32 1.0, %v3262_v52  ;;  %2542 = vst.msk [vmem:[%s4887_s7 + $0x148] sm:$0xff] %vm2372_vm1, %v2478_v58  ;;  %v2783_v36 = vmul.f32 -1.442695, %v1857_v17  ;;  %v2289_v58 = vld [vmem:[%s4885_s5 + $0x168] sm:$0xff] }
 0x262   :  { %v3266_v7 = vpop.eup %3265  ;;  %2421 = vst.msk [vmem:[%s4886_s6 + $0x180] sm:$0xff] %vm2372_vm1, %v2356_v43  ;;  %v2485_v12 = vsub.f32 %v2292_v16, %v2356_v43  ;;  %v2357_v39 = vmul.f32 %v3264_v18, %v2293_v60  ;;  %3291 = vpow2.f32 %v2782_v15  ;;  %v2784_v59 = vmul.f32 -1.442695, %v1858_v30  ;;  %v1788_v29 = vpop.xlane.xlu1 %1787  ;;  %v2288_v15 = vld [vmem:[%s4885_s5 + $0x160] sm:$0xff] }
 0x263   :  { %v3268_v35 = vpop.eup %3267  ;;  %v2362_v22 = vmul.f32 %v3266_v7, %v2298_v51  ;;  %3293 = vrcp.f32 %v2110_v0  ;;  %v1859_v44 = vadd.f32 %v4535_v14, %v1788_v29 }
 0x264   :  { %v3270_v38 = vpop.eup %3269  ;;  %2549 = vst.msk [vmem:[%s4887_s7 + $0x180] sm:$0xff] %vm2372_vm1, %v2485_v12  ;;  %2422 = vst.msk [vmem:[%s4886_s6 + $0x188] sm:$0xff] %vm2372_vm1, %v2357_v39  ;;  %v2486_v63 = vsub.f32 %v2293_v60, %v2357_v39  ;;  %v2111_v28 = vadd.f32 1.0, %v3268_v35  ;;  %3295 = vpow2.f32 %v2783_v36  ;;  %v2303_v60 = vld [vmem:[%s4885_s5 + $0x1d8] sm:$0xff]  ;;  %v2300_v39 = vld [vmem:[%s4885_s5 + $0x1c0] sm:$0xff] }
 0x265   :  { %v3272_v27 = vpop.eup %3271  ;;  %2427 = vst.msk [vmem:[%s4886_s6 + $0x1b0] sm:$0xff] %vm2372_vm1, %v2362_v22  ;;  %v2491_v47 = vsub.f32 %v2298_v51, %v2362_v22  ;;  %v2096_v56 = vadd.f32 1.0, %v3270_v38  ;;  %3297 = vpow2.f32 %v2784_v59  ;;  %v2785_v34 = vmul.f32 -1.442695, %v1859_v44  ;;  %v2301_v35 = vld [vmem:[%s4885_s5 + $0x1c8] sm:$0xff]  ;;  %v2290_v38 = vld [vmem:[%s4885_s5 + $0x170] sm:$0xff] }
 0x266   :  { %v3274_v23 = vpop.eup %3273  ;;  %2550 = vst.msk [vmem:[%s4887_s7 + $0x188] sm:$0xff] %vm2372_vm1, %v2486_v63  ;;  %3299 = vrcp.f32 %v2111_v28  ;;  %v2097_v14 = vadd.f32 1.0, %v3272_v27 }
 0x267   :  { %v3276_v37 = vpop.eup %3275  ;;  %2555 = vst.msk [vmem:[%s4887_s7 + $0x1b0] sm:$0xff] %vm2372_vm1, %v2491_v47  ;;  %v2363_v19 = vmul.f32 %v3274_v23, %v2299_v8  ;;  %3301 = vrcp.f32 %v2096_v56 }
 0x268   :  { %v3278_v48 = vpop.eup %3277  ;;  %v2350_v49 = vmul.f32 %v3276_v37, %v2286_v40  ;;  %3303 = vrcp.f32 %v2097_v14 }
 0x269   :  { %v3280_v6 = vpop.eup %3279  ;;  %2428 = vst.msk [vmem:[%s4886_s6 + $0x1b8] sm:$0xff] %vm2372_vm1, %v2363_v19  ;;  %v2492_v11 = vsub.f32 %v2299_v8, %v2363_v19  ;;  %v2108_v26 = vadd.f32 1.0, %v3278_v48  ;;  %3305 = vpow2.f32 %v2785_v34  ;;  %v2304_v34 = vld [vmem:[%s4885_s5 + $0x1e0] sm:$0xff]  ;;  %v2305_v48 = vld [vmem:[%s4885_s5 + $0x1e8] sm:$0xff] }
 0x26a   :  { %v3282_v45 = vpop.eup %3281  ;;  %2415 = vst.msk [vmem:[%s4886_s6 + $0x150] sm:$0xff] %vm2372_vm1, %v2350_v49  ;;  %v2479_v20 = vsub.f32 %v2286_v40, %v2350_v49  ;;  %v2109_v32 = vadd.f32 1.0, %v3280_v6  ;;  %v2291_v40 = vld [vmem:[%s4885_s5 + $0x178] sm:$0xff] }
 0x26b   :  { %v3284_v50 = vpop.eup %3283  ;;  %2556 = vst.msk [vmem:[%s4887_s7 + $0x1b8] sm:$0xff] %vm2372_vm1, %v2492_v11  ;;  %3307 = vrcp.f32 %v2108_v26  ;;  %v2098_v25 = vadd.f32 1.0, %v3282_v45  ;;  %v2306_v11 = vld [vmem:[%s4885_s5 + $0x1f0] sm:$0xff] }
 0x26c   :  { %v3286_v21 = vpop.eup %3285  ;;  %2543 = vst.msk [vmem:[%s4887_s7 + $0x150] sm:$0xff] %vm2372_vm1, %v2479_v20  ;;  %v2351_v55 = vmul.f32 %v3284_v50, %v2287_v42  ;;  %3309 = vrcp.f32 %v2109_v32  ;;  %v2307_v50 = vld [vmem:[%s4885_s5 + $0x1f8] sm:$0xff] }
 0x26d   :  { %v3288_v33 = vpop.eup %3287  ;;  %v2360_v3 = vmul.f32 %v3286_v21, %v2296_v46  ;;  %3311 = vrcp.f32 %v2098_v25 }
 0x26e   :  { %v3290_v61 = vpop.eup %3289  ;;  %2416 = vst.msk [vmem:[%s4886_s6 + $0x158] sm:$0xff] %vm2372_vm1, %v2351_v55  ;;  %v2480_v4 = vsub.f32 %v2287_v42, %v2351_v55  ;;  %v2099_v57 = vadd.f32 1.0, %v3288_v33 }
 0x26f   :  { %v3292_v5 = vpop.eup %3291  ;;  %2425 = vst.msk [vmem:[%s4886_s6 + $0x1a0] sm:$0xff] %vm2372_vm1, %v2360_v3  ;;  %v2489_v16 = vsub.f32 %v2296_v46, %v2360_v3  ;;  %v2361_v1 = vmul.f32 %v3290_v61, %v2297_v53 }
 0x270   :  { %v3294_v41 = vpop.eup %3293  ;;  %2544 = vst.msk [vmem:[%s4887_s7 + $0x158] sm:$0xff] %vm2372_vm1, %v2480_v4  ;;  %3313 = vrcp.f32 %v2099_v57  ;;  %v2112_v9 = vadd.f32 1.0, %v3292_v5 }
 0x271   :  { %v3296_v2 = vpop.eup %3295  ;;  %2553 = vst.msk [vmem:[%s4887_s7 + $0x1a0] sm:$0xff] %vm2372_vm1, %v2489_v16  ;;  %2426 = vst.msk [vmem:[%s4886_s6 + $0x1a8] sm:$0xff] %vm2372_vm1, %v2361_v1  ;;  %v2490_v10 = vsub.f32 %v2297_v53, %v2361_v1  ;;  %v2366_v31 = vmul.f32 %v3294_v41, %v2302_v62 }
 0x272   :  { %v3298_v54 = vpop.eup %3297  ;;  %3315 = vrcp.f32 %v2112_v9  ;;  %v2113_v13 = vadd.f32 1.0, %v3296_v2 }
 0x273   :  { %v3300_v24 = vpop.eup %3299  ;;  %2554 = vst.msk [vmem:[%s4887_s7 + $0x1a8] sm:$0xff] %vm2372_vm1, %v2490_v10  ;;  %2431 = vst.msk [vmem:[%s4886_s6 + $0x1d0] sm:$0xff] %vm2372_vm1, %v2366_v31  ;;  %v2495_v52 = vsub.f32 %v2302_v62, %v2366_v31  ;;  %v2114_v43 = vadd.f32 1.0, %v3298_v54 }
 0x274   :  { %v3302_v51 = vpop.eup %3301  ;;  %v2367_v17 = vmul.f32 %v3300_v24, %v2303_v60  ;;  %3317 = vrcp.f32 %v2113_v13 }
 0x275   :  { %v3304_v18 = vpop.eup %3303  ;;  %2559 = vst.msk [vmem:[%s4887_s7 + $0x1d0] sm:$0xff] %vm2372_vm1, %v2495_v52  ;;  %v2352_v0 = vmul.f32 %v3302_v51, %v2288_v15  ;;  %3319 = vrcp.f32 %v2114_v43 }
 0x276   :  { %v3306_v30 = vpop.eup %3305  ;;  %2432 = vst.msk [vmem:[%s4886_s6 + $0x1d8] sm:$0xff] %vm2372_vm1, %v2367_v17  ;;  %v2496_v7 = vsub.f32 %v2303_v60, %v2367_v17  ;;  %v2353_v12 = vmul.f32 %v3304_v18, %v2289_v58 }
 0x277   :  { %2417 = vst.msk [vmem:[%s4886_s6 + $0x160] sm:$0xff] %vm2372_vm1, %v2352_v0  ;;  %v2481_v36 = vsub.f32 %v2288_v15, %v2352_v0  ;;  %v2115_v22 = vadd.f32 1.0, %v3306_v30 }
 0x278   :  { %v3308_v59 = vpop.eup %3307  ;;  %2560 = vst.msk [vmem:[%s4887_s7 + $0x1d8] sm:$0xff] %vm2372_vm1, %v2496_v7  ;;  %2418 = vst.msk [vmem:[%s4886_s6 + $0x168] sm:$0xff] %vm2372_vm1, %v2353_v12  ;;  %v2482_v29 = vsub.f32 %v2289_v58, %v2353_v12 }
 0x279   :  { %v3310_v63 = vpop.eup %3309  ;;  %2545 = vst.msk [vmem:[%s4887_s7 + $0x160] sm:$0xff] %vm2372_vm1, %v2481_v36  ;;  %v2364_v8 = vmul.f32 %v3308_v59, %v2300_v39  ;;  %3321 = vrcp.f32 %v2115_v22 }
 0x27a   :  { %v3312_v28 = vpop.eup %3311  ;;  %2546 = vst.msk [vmem:[%s4887_s7 + $0x168] sm:$0xff] %vm2372_vm1, %v2482_v29  ;;  %v2365_v44 = vmul.f32 %v3310_v63, %v2301_v35 }
 0x27b   :  { %2429 = vst.msk [vmem:[%s4886_s6 + $0x1c0] sm:$0xff] %vm2372_vm1, %v2364_v8  ;;  %v2493_v27 = vsub.f32 %v2300_v39, %v2364_v8  ;;  %v2354_v47 = vmul.f32 %v3312_v28, %v2290_v38 }
 0x27c   :  { %2430 = vst.msk [vmem:[%s4886_s6 + $0x1c8] sm:$0xff] %vm2372_vm1, %v2365_v44  ;;  %v2494_v56 = vsub.f32 %v2301_v35, %v2365_v44 }
 0x27d   :  { %v3314_v23 = vpop.eup %3313  ;;  %2557 = vst.msk [vmem:[%s4887_s7 + $0x1c0] sm:$0xff] %vm2372_vm1, %v2493_v27  ;;  %2419 = vst.msk [vmem:[%s4886_s6 + $0x170] sm:$0xff] %vm2372_vm1, %v2354_v47  ;;  %v2483_v14 = vsub.f32 %v2290_v38, %v2354_v47 }
 0x27e   :  { %2558 = vst.msk [vmem:[%s4887_s7 + $0x1c8] sm:$0xff] %vm2372_vm1, %v2494_v56  ;;  %v2355_v37 = vmul.f32 %v3314_v23, %v2291_v40 }
 0x27f   :  { %v3316_v19 = vpop.eup %3315  ;;  %2547 = vst.msk [vmem:[%s4887_s7 + $0x170] sm:$0xff] %vm2372_vm1, %v2483_v14 }
 0x280   :  { %2420 = vst.msk [vmem:[%s4886_s6 + $0x178] sm:$0xff] %vm2372_vm1, %v2355_v37  ;;  %v2484_v49 = vsub.f32 %v2291_v40, %v2355_v37  ;;  %v2368_v6 = vmul.f32 %v3316_v19, %v2304_v34 }
 0x281   :  { %v3318_v42 = vpop.eup %3317 }
 0x282   :  { %v3320_v26 = vpop.eup %3319  ;;  %2548 = vst.msk [vmem:[%s4887_s7 + $0x178] sm:$0xff] %vm2372_vm1, %v2484_v49  ;;  %2433 = vst.msk [vmem:[%s4886_s6 + $0x1e0] sm:$0xff] %vm2372_vm1, %v2368_v6  ;;  %v2497_v45 = vsub.f32 %v2304_v34, %v2368_v6  ;;  %v2369_v20 = vmul.f32 %v3318_v42, %v2305_v48 }
 0x283   :  { %v2370_v46 = vmul.f32 %v3320_v26, %v2306_v11 }
 0x284   :  { %2561 = vst.msk [vmem:[%s4887_s7 + $0x1e0] sm:$0xff] %vm2372_vm1, %v2497_v45  ;;  %2434 = vst.msk [vmem:[%s4886_s6 + $0x1e8] sm:$0xff] %vm2372_vm1, %v2369_v20  ;;  %v2498_v32 = vsub.f32 %v2305_v48, %v2369_v20 }
 0x285   :  { %2435 = vst.msk [vmem:[%s4886_s6 + $0x1f0] sm:$0xff] %vm2372_vm1, %v2370_v46  ;;  %v2499_v25 = vsub.f32 %v2306_v11, %v2370_v46 }
 0x286   :  { %v3322_v21 = vpop.eup %3321  ;;  %2562 = vst.msk [vmem:[%s4887_s7 + $0x1e8] sm:$0xff] %vm2372_vm1, %v2498_v32 }
 0x287   :  { %2563 = vst.msk [vmem:[%s4887_s7 + $0x1f0] sm:$0xff] %vm2372_vm1, %v2499_v25  ;;  %v2371_v55 = vmul.f32 %v3322_v21, %v2307_v50 }
 0x289   :  { %2436 = vst.msk [vmem:[%s4886_s6 + $0x1f8] sm:$0xff] %vm2372_vm1, %v2371_v55  ;;  %v2500_v53 = vsub.f32 %v2307_v50, %v2371_v55 }
 0x28b   :  { %2564 = vst.msk [vmem:[%s4887_s7 + $0x1f8] sm:$0xff] %vm2372_vm1, %v2500_v53 }

// kernel: monet_forward.30
= control target key start
LH: loop header
LB: loop body
LE: loop exit
PB: predicated region body
PF: predicated region fallthrough
CT: control target
= control target key end

     0   :  { %s688_s12 = smov 0   ;;  %s784_s0 = inlined_call_operand.vmem [shape: bf16[896,36], index: 0, kind: input, shape index: {}]   ;;  %s785_s1 = inlined_call_operand.vmem [shape: bf16[36,32], index: 1, kind: input, shape index: {}]   ;;  %s786_s2 = inlined_call_operand.vmem [shape: f32[1,32], index: 2, kind: input, shape index: {}]   ;;  %s787_s3 = inlined_call_operand.vmem [shape: bf16[896,32], index: 3, kind: output, shape index: {}]  }
   0x1 LB: > { %s537_s13 = sadd.s32 4294967295, %s666_s12   ;;  %p541_p0 = scmp.ge.s32.totalorder %s666_s12, 1  ;;  %s666_s12 = sphi %s688_s12, %s13_s12  }
   0x2   : > { %p138_p1 = scmp.lt.s32.totalorder %s666_s12, 8 }
   0x4   : > { %p139_p2 = pnand %p541_p0, %p138_p1 }
   0x5   : > { %s542_s18 = sshll.u32 (!%p139_p2), %s537_s13, 4 }
   0x6   : > { %142 = sbr.rel (%p139_p2) target bundleno = 238 (0xee), region = 32  ;;  %p163_p3 = scmp.lt.s32.totalorder (!%p139_p2), %s542_s18, 111 }
   0xb   : > { %v649_v0 = vld [vmem:[%s785_s1 + $0x10] ss:$0 sps:$4 sm:$0x33]   ;;  %vm283_vm0 = vcmask 1041408   ;;  %v650_v1 = vld [vmem:[%s785_s1 + $0x8] sm:$0xff]   ;;  %v651_v3 = vld [vmem:[%s785_s1] sm:$0xff]  }
   0xc   : > { %639 = vmatprep.subr.msk.bf16.mxu0 %vm283_vm0, %v649_v0  ;;  %640 = vmatprep.subr.msk.bf16.mxu1 %vm283_vm0, %v649_v0  ;;  %v285_v2 = vsel %vm283_vm0, %v649_v0, 0  ;;  %s789_s18 = smov (!%p163_p3, %s542_s18), 111  ;;  %vm258_vm1 = vcmask 293888   ;;  %v724_v12 = vld [vmem:[%s786_s2] ss:$0 sm:$0xff]  ;;  %vm464_vm2 = vcmask 257024  }
   0xd   : > { %612 = vmatpush3.bf16.msra.mxu0 %v285_v2  ;;  %636 = vmatpush3.bf16.msra.mxu1 %v285_v2  ;;  %s543_s21 = sshll.u32 %s789_s18, 2 }
   0xe   : > { %613 = vmatprep.subr.bf16.mxu0 %v650_v1  ;;  %634 = vmatprep.subr.bf16.mxu1 %v650_v1  ;;  %s166_s24 = scalar_lea.vmem %s784_s0, %s543_s21  ;;  %s735_s29 = scalar_lea.vmem %s787_s3, %s543_s21 }
   0xf   : > { %v652_v4 = vld [vmem:[%s166_s24] sm:$0xff]   ;;  %v654_v6 = vld [vmem:[%s166_s24 + $0x8] sm:$0xff]   ;;  %v656_v8 = vld [vmem:[%s166_s24 + $0x10] sm:$0xff]  }
  0x10   : > { %v653_v5 = vld [vmem:[%s166_s24 + $0x20] sm:$0xff]   ;;  %617 = vmatprep.mubr.msk.bf16.mxu0 %vm258_vm1, %v652_v4  ;;  %v655_v7 = vld [vmem:[%s166_s24 + $0x28] sm:$0xff]   ;;  %v657_v9 = vld [vmem:[%s166_s24 + $0x30] sm:$0xff]  }
  0x11   : > { %614 = vmatpush3.bf16.msra.mxu0 %v650_v1  ;;  %637 = vmatpush3.bf16.msra.mxu1 %v650_v1  ;;  %v658_v10 = vld [vmem:[%s166_s24 + $0x18] sm:$0xff]  }
  0x12   : > { %615 = vmatprep.subr.bf16.mxu0 %v651_v3  ;;  %635 = vmatprep.subr.bf16.mxu1 %v651_v3  ;;  %v659_v11 = vld [vmem:[%s166_s24 + $0x38] sm:$0xff]  }
  0x13   : > { %625 = vmatprep.mubr.msk.bf16.mxu1 %vm258_vm1, %v653_v5 }
  0x15   : > { %616 = vmatpush3.bf16.msra.mxu0 %v651_v3  ;;  %638 = vmatpush3.bf16.msra.mxu1 %v651_v3 }
  0x18   : > { %618 = vmatmul.mubr.msk.bf16.vlgmr.msra.gmra.mxu0 %vm258_vm1, %v654_v6  ;;  %626 = vmatmul.mubr.msk.bf16.vlgmr.msra.gmra.mxu1 %vm258_vm1, %v655_v7 }
  0x19   : > { %621 = vmatprep.mubr.msk.bf16.mxu0 %vm258_vm1, %v656_v8  ;;  %629 = vmatprep.mubr.msk.bf16.mxu1 %vm258_vm1, %v657_v9 }
  0x20   : > { %622 = vmatmul.mubr.msk.bf16.gmra.mxu0 %vm258_vm1, %v658_v10  ;;  %630 = vmatmul.mubr.msk.bf16.gmra.mxu1 %vm258_vm1, %v659_v11 }
  0xd8   : > { %v619_v13 = vpop.f32.mrf.mxu0  ;;  %v627_v14 = vpop.f32.mrf.mxu1 }
  0xd9   : > { %v330_v15 = vadd.f32 %v619_v13, %v724_v12  ;;  %v362_v16 = vadd.f32 %v627_v14, %v724_v12 }
  0xda   : > { %v321_v17 = vpop.f32.mrf.mxu0  ;;  %v353_v18 = vpop.f32.mrf.mxu1 }
  0xdb   : > { %v386_v19 = vmax.f32 %v330_v15, 0.0  ;;  %v394_v20 = vmax.f32 %v362_v16, 0.0  ;;  %v322_v21 = vadd.f32 %v724_v12, %v321_v17  ;;  %v354_v22 = vadd.f32 %v724_v12, %v353_v18 }
  0xdc   : > { %v620_v23 = vpop.f32.mrf.mxu0  ;;  %v628_v24 = vpop.f32.mrf.mxu1 }
  0xdd   : > { %v586_v25 = vpack.c.bf16 %v386_v19, %v386_v19  ;;  %v594_v26 = vpack.c.bf16 %v394_v20, %v394_v20  ;;  %v384_v27 = vmax.f32 %v322_v21, 0.0  ;;  %v392_v28 = vmax.f32 %v354_v22, 0.0 }
  0xde   : > { %v333_v29 = vadd.f32 %v620_v23, %v724_v12  ;;  %v365_v30 = vadd.f32 %v628_v24, %v724_v12  ;;  %v324_v31 = vpop.f32.mrf.mxu0  ;;  %v356_v32 = vpop.f32.mrf.mxu1 }
  0xdf   : > { %467 = vst.msk [vmem:[%s735_s29 + $0x8] sm:$0xf] %vm464_vm2, %v586_v25  ;;  %475 = vst.msk [vmem:[%s735_s29 + $0x28] sm:$0xf] %vm464_vm2, %v594_v26  ;;  %v584_v33 = vpack.c.bf16 %v384_v27, %v384_v27  ;;  %v592_v34 = vpack.c.bf16 %v392_v28, %v392_v28  ;;  %v325_v35 = vadd.f32 %v724_v12, %v324_v31 }
  0xe0   : > { %v357_v36 = vadd.f32 %v724_v12, %v356_v32  ;;  %v387_v37 = vmax.f32 %v333_v29, 0.0  ;;  %v395_v38 = vmax.f32 %v365_v30, 0.0  ;;  %v623_v39 = vpop.f32.mrf.mxu0  ;;  %v631_v40 = vpop.f32.mrf.mxu1 }
  0xe1   : > { %465 = vst.msk [vmem:[%s735_s29] sm:$0xf] %vm464_vm2, %v584_v33  ;;  %473 = vst.msk [vmem:[%s735_s29 + $0x20] sm:$0xf] %vm464_vm2, %v592_v34  ;;  %v385_v41 = vmax.f32 %v325_v35, 0.0  ;;  %v346_v43 = vadd.f32 %v623_v39, %v724_v12  ;;  %v378_v44 = vadd.f32 %v631_v40, %v724_v12 }
  0xe2   : > { %v393_v42 = vmax.f32 %v357_v36, 0.0  ;;  %v587_v45 = vpack.c.bf16 %v387_v37, %v387_v37  ;;  %v595_v46 = vpack.c.bf16 %v395_v38, %v395_v38  ;;  %v337_v47 = vpop.f32.mrf.mxu0  ;;  %v369_v48 = vpop.f32.mrf.mxu1 }
  0xe3   : > { %v585_v49 = vpack.c.bf16 %v385_v41, %v385_v41  ;;  %v390_v51 = vmax.f32 %v346_v43, 0.0  ;;  %v398_v52 = vmax.f32 %v378_v44, 0.0  ;;  %v338_v53 = vadd.f32 %v724_v12, %v337_v47 }
  0xe4   : > { %v593_v50 = vpack.c.bf16 %v393_v42, %v393_v42  ;;  %468 = vst.msk [vmem:[%s735_s29 + $0xc] sm:$0xf] %vm464_vm2, %v587_v45  ;;  %476 = vst.msk [vmem:[%s735_s29 + $0x2c] sm:$0xf] %vm464_vm2, %v595_v46  ;;  %v370_v54 = vadd.f32 %v724_v12, %v369_v48  ;;  %v624_v55 = vpop.f32.mrf.mxu0  ;;  %v632_v56 = vpop.f32.mrf.mxu1 }
  0xe5   : > { %466 = vst.msk [vmem:[%s735_s29 + $0x4] sm:$0xf] %vm464_vm2, %v585_v49  ;;  %v590_v57 = vpack.c.bf16 %v390_v51, %v390_v51  ;;  %v598_v58 = vpack.c.bf16 %v398_v52, %v398_v52  ;;  %v349_v59 = vadd.f32 %v624_v55, %v724_v12  ;;  %v381_v60 = vadd.f32 %v632_v56, %v724_v12 }
  0xe6   : > { %474 = vst.msk [vmem:[%s735_s29 + $0x24] sm:$0xf] %vm464_vm2, %v593_v50  ;;  %v388_v61 = vmax.f32 %v338_v53, 0.0  ;;  %v396_v62 = vmax.f32 %v370_v54, 0.0  ;;  %v340_v63 = vpop.f32.mrf.mxu0  ;;  %v372_v0 = vpop.f32.mrf.mxu1 }
  0xe7   : > { %471 = vst.msk [vmem:[%s735_s29 + $0x18] sm:$0xf] %vm464_vm2, %v590_v57  ;;  %479 = vst.msk [vmem:[%s735_s29 + $0x38] sm:$0xf] %vm464_vm2, %v598_v58  ;;  %v391_v1 = vmax.f32 %v349_v59, 0.0  ;;  %v399_v2 = vmax.f32 %v381_v60, 0.0  ;;  %v341_v3 = vadd.f32 %v724_v12, %v340_v63  ;;  %v373_v4 = vadd.f32 %v724_v12, %v372_v0 }
  0xe8   : > { %v588_v5 = vpack.c.bf16 %v388_v61, %v388_v61  ;;  %v596_v6 = vpack.c.bf16 %v396_v62, %v396_v62 }
  0xe9   : > { %v591_v7 = vpack.c.bf16 %v391_v1, %v391_v1  ;;  %v599_v8 = vpack.c.bf16 %v399_v2, %v399_v2  ;;  %v389_v9 = vmax.f32 %v341_v3, 0.0  ;;  %v397_v10 = vmax.f32 %v373_v4, 0.0 }
  0xea   : > { %469 = vst.msk [vmem:[%s735_s29 + $0x10] sm:$0xf] %vm464_vm2, %v588_v5  ;;  %477 = vst.msk [vmem:[%s735_s29 + $0x30] sm:$0xf] %vm464_vm2, %v596_v6 }
  0xeb   : > { %472 = vst.msk [vmem:[%s735_s29 + $0x1c] sm:$0xf] %vm464_vm2, %v591_v7  ;;  %480 = vst.msk [vmem:[%s735_s29 + $0x3c] sm:$0xf] %vm464_vm2, %v599_v8  ;;  %v589_v11 = vpack.c.bf16 %v389_v9, %v389_v9  ;;  %v597_v13 = vpack.c.bf16 %v397_v10, %v397_v10 }
  0xed   : > { %470 = vst.msk [vmem:[%s735_s29 + $0x14] sm:$0xf] %vm464_vm2, %v589_v11  ;;  %478 = vst.msk [vmem:[%s735_s29 + $0x34] sm:$0xf] %vm464_vm2, %v597_v13 }
  0xee PF: > { %s13_s12 = sadd.s32 1, %s666_s12  }
  0xef   : > { %p10_p4 = scmp.ge.s32.totalorder %s13_s12, 9  }
  0xf1   :  { %12 = sbr.rel (!%p10_p4) target bundleno = 1 (0x1), region = 62 }

// kernel: monet_forward.31
= control target key start
LH: loop header
LB: loop body
LE: loop exit
PB: predicated region body
PF: predicated region fallthrough
CT: control target
= control target key end

     0   :  { %vm432_vm0 = vcmask 261120   ;;  %vm905_vm1 = vcmask 519168   ;;  %s1714_s1 = inlined_call_operand.vmem [shape: bf16[288,64], index: 1, kind: input, shape index: {}]   ;;  %s1715_s0 = inlined_call_operand.vmem [shape: bf16[224,288], index: 0, kind: input, shape index: {}]   ;;  %s1716_s2 = inlined_call_operand.vmem [shape: f32[1,64], index: 2, kind: input, shape index: {}]   ;;  %s1717_s3 = inlined_call_operand.vmem [shape: bf16[224,64], index: 3, kind: output, shape index: {}]  }
   0x1   :  { %v1233_v0 = vld [vmem:[%s1714_s1 + $0x78] sm:$0xff]   ;;  %v1235_v2 = vld [vmem:[%s1714_s1 + $0x70] sm:$0xff]   ;;  %v1237_v4 = vld [vmem:[%s1714_s1 + $0x68] sm:$0xff]  }
   0x2   :  { %v1234_v1 = vld [vmem:[%s1714_s1 + $0x38] sm:$0xff]   ;;  %1069 = vmatprep.subr.bf16.mxu0 %v1233_v0  ;;  %1217 = vmatprep.subr.bf16.mxu1 %v1233_v0  ;;  %v1236_v3 = vld [vmem:[%s1714_s1 + $0x30] sm:$0xff]   ;;  %v1238_v5 = vld [vmem:[%s1714_s1 + $0x28] sm:$0xff]  }
   0x3   :  { %1070 = vmatpush3.bf16.msra.mxu0 %v1234_v1  ;;  %1225 = vmatpush3.bf16.msra.mxu1 %v1234_v1  ;;  %v1239_v6 = vld [vmem:[%s1714_s1 + $0x60] sm:$0xff]   ;;  %v1241_v8 = vld [vmem:[%s1714_s1 + $0x58] sm:$0xff]   ;;  %v1243_v10 = vld [vmem:[%s1714_s1 + $0x50] sm:$0xff]  }
   0x4   :  { %1071 = vmatprep.subr.bf16.mxu0 %v1235_v2  ;;  %1218 = vmatprep.subr.bf16.mxu1 %v1235_v2  ;;  %v1240_v7 = vld [vmem:[%s1714_s1 + $0x20] sm:$0xff]   ;;  %v1242_v9 = vld [vmem:[%s1714_s1 + $0x18] sm:$0xff]   ;;  %v1244_v13 = vld [vmem:[%s1714_s1 + $0x10] sm:$0xff]  }
   0x5   :  { %v1251_v11 = vld [vmem:[%s1715_s0 + $0x4] ss:$12 sps:$4 sm:$0xff]   ;;  %v1254_v12 = vld [vmem:[%s1715_s0 + $0x10c] ss:$12 sps:$4 sm:$0xff]   ;;  %v1252_v20 = vld [vmem:[%s1715_s0 + $0x108] ss:$12 sps:$4 sm:$0xff]  }
   0x6   :  { %v1245_v14 = vld [vmem:[%s1714_s1 + $0x48] sm:$0xff]   ;;  %507 = vmatprep.mubr.bf16.mxu0 %v1251_v11  ;;  %595 = vmatprep.mubr.bf16.mxu1 %v1254_v12  ;;  %v1247_v16 = vld [vmem:[%s1714_s1 + $0x40] sm:$0xff]   ;;  %v1266_v28 = vld [vmem:[%s1715_s0 + $0x30] ss:$12 sps:$4 sm:$0xff]  }
   0x7   :  { %1072 = vmatpush3.bf16.msra.mxu0 %v1236_v3  ;;  %1226 = vmatpush3.bf16.msra.mxu1 %v1236_v3  ;;  %v1246_v15 = vld [vmem:[%s1714_s1 + $0x8] sm:$0xff]   ;;  %v1248_v17 = vld [vmem:[%s1714_s1] sm:$0xff]   ;;  %v1278_v37 = vld [vmem:[%s1715_s0 + $0x50] ss:$12 sps:$4 sm:$0xff]  }
   0x8   :  { %1073 = vmatprep.subr.bf16.mxu0 %v1237_v4  ;;  %1219 = vmatprep.subr.bf16.mxu1 %v1237_v4  ;;  %v1261_v18 = vld [vmem:[%s1714_s1 + $0x88] sm:$0xff]   ;;  %v1257_v22 = vld [vmem:[%s1715_s0 + $0x124] ss:$12 sps:$4 sm:$0xff]   ;;  %v1262_v26 = vld [vmem:[%s1715_s0 + $0x34] ss:$12 sps:$4 sm:$0xff]  }
   0x9   :  { %v1249_v19 = vld [vmem:[%s1715_s0] ss:$12 sps:$4 sm:$0xff]   ;;  %v1255_v21 = vld [vmem:[%s1715_s0 + $0x1c] ss:$12 sps:$4 sm:$0xff]   ;;  %v1259_v24 = vld [vmem:[%s1715_s0 + $0x18] ss:$12 sps:$4 sm:$0xff]  }
   0xa   :  { %v1268_v23 = vld [vmem:[%s1714_s1 + $0x80] sm:$0xff]   ;;  %v1264_v27 = vld [vmem:[%s1715_s0 + $0x13c] ss:$12 sps:$4 sm:$0xff]   ;;  %v1269_v30 = vld [vmem:[%s1715_s0 + $0x4c] ss:$12 sps:$4 sm:$0xff]  }
   0xb   :  { %1074 = vmatpush3.bf16.msra.mxu0 %v1238_v5  ;;  %1227 = vmatpush3.bf16.msra.mxu1 %v1238_v5  ;;  %v1260_v25 = vld [vmem:[%s1715_s0 + $0x120] ss:$12 sps:$4 sm:$0xff]   ;;  %v1267_v29 = vld [vmem:[%s1715_s0 + $0x138] ss:$12 sps:$4 sm:$0xff]   ;;  %v1271_v31 = vld [vmem:[%s1715_s0 + $0x8] ss:$12 sps:$4 sm:$0xff]  }
   0xc   :  { %1075 = vmatprep.subr.bf16.mxu0 %v1239_v6  ;;  %1220 = vmatprep.subr.bf16.mxu1 %v1239_v6  ;;  %v1272_v32 = vld [vmem:[%s1715_s0 + $0x48] ss:$12 sps:$4 sm:$0xff]   ;;  %v1273_v33 = vld [vmem:[%s1715_s0 + $0x20] ss:$12 sps:$4 sm:$0xff]   ;;  %v1274_v34 = vld [vmem:[%s1715_s0 + $0x64] ss:$12 sps:$4 sm:$0xff]  }
   0xd   :  { %v1276_v35 = vld [vmem:[%s1715_s0 + $0x38] ss:$12 sps:$4 sm:$0xff]   ;;  %v1277_v36 = vld [vmem:[%s1715_s0 + $0x60] ss:$12 sps:$4 sm:$0xff]   ;;  %v1279_v38 = vld [vmem:[%s1715_s0 + $0x7c] ss:$12 sps:$4 sm:$0xff]  }
   0xe   :  { %v1281_v39 = vld [vmem:[%s1715_s0 + $0x68] ss:$12 sps:$4 sm:$0xff]   ;;  %v1282_v40 = vld [vmem:[%s1715_s0 + $0x78] ss:$12 sps:$4 sm:$0xff]   ;;  %v1283_v41 = vld [vmem:[%s1715_s0 + $0x80] ss:$12 sps:$4 sm:$0xff]  }
   0xf   :  { %1076 = vmatpush3.bf16.msra.mxu0 %v1240_v7  ;;  %1228 = vmatpush3.bf16.msra.mxu1 %v1240_v7  ;;  %v1284_v42 = vld [vmem:[%s1715_s0 + $0x94] ss:$12 sps:$4 sm:$0xff]   ;;  %v1286_v43 = vld [vmem:[%s1715_s0 + $0x98] ss:$12 sps:$4 sm:$0xff]   ;;  %v1287_v44 = vld [vmem:[%s1715_s0 + $0x90] ss:$12 sps:$4 sm:$0xff]  }
  0x10   :  { %1077 = vmatprep.subr.bf16.mxu0 %v1241_v8  ;;  %1221 = vmatprep.subr.bf16.mxu1 %v1241_v8  ;;  %v1288_v45 = vld [vmem:[%s1715_s0 + $0xb0] ss:$12 sps:$4 sm:$0xff]   ;;  %v1289_v46 = vld [vmem:[%s1715_s0 + $0xac] ss:$12 sps:$4 sm:$0xff]   ;;  %v1291_v47 = vld [vmem:[%s1715_s0 + $0xc8] ss:$12 sps:$4 sm:$0xff]  }
  0x11   :  { %v1292_v48 = vld [vmem:[%s1715_s0 + $0xa8] ss:$12 sps:$4 sm:$0xff]   ;;  %v1293_v49 = vld [vmem:[%s1715_s0 + $0xe0] ss:$12 sps:$4 sm:$0xff]   ;;  %v1294_v50 = vld [vmem:[%s1715_s0 + $0xc4] ss:$12 sps:$4 sm:$0xff]  }
  0x12   :  { %v1296_v51 = vld [vmem:[%s1715_s0 + $0xf8] ss:$12 sps:$4 sm:$0xff]   ;;  %v1297_v52 = vld [vmem:[%s1715_s0 + $0xc0] ss:$12 sps:$4 sm:$0xff]   ;;  %v1298_v53 = vld [vmem:[%s1715_s0 + $0x110] ss:$12 sps:$4 sm:$0xff]  }
  0x13   :  { %1078 = vmatpush3.bf16.msra.mxu0 %v1242_v9  ;;  %1229 = vmatpush3.bf16.msra.mxu1 %v1242_v9  ;;  %v1299_v54 = vld [vmem:[%s1715_s0 + $0xdc] ss:$12 sps:$4 sm:$0xff]   ;;  %v1302_v56 = vld [vmem:[%s1715_s0 + $0xd8] ss:$12 sps:$4 sm:$0xff]   ;;  %v1303_v57 = vld [vmem:[%s1715_s0 + $0x140] ss:$12 sps:$4 sm:$0xff]  }
  0x14   :  { %1079 = vmatprep.subr.bf16.mxu0 %v1243_v10  ;;  %1222 = vmatprep.subr.bf16.mxu1 %v1243_v10  ;;  %v1301_v55 = vld [vmem:[%s1715_s0 + $0x128] ss:$12 sps:$4 sm:$0xff]   ;;  %v1306_v59 = vld [vmem:[%s1715_s0 + $0xf0] ss:$12 sps:$4 sm:$0xff]  }
  0x15   :  { %v1304_v58 = vld [vmem:[%s1715_s0 + $0xf4] ss:$12 sps:$4 sm:$0xff]  }
  0x17   :  { %1080 = vmatpush3.bf16.msra.mxu0 %v1244_v13  ;;  %1230 = vmatpush3.bf16.msra.mxu1 %v1244_v13 }
  0x18   :  { %1081 = vmatprep.subr.bf16.mxu0 %v1245_v14  ;;  %1223 = vmatprep.subr.bf16.mxu1 %v1245_v14 }
  0x1b   :  { %1082 = vmatpush3.bf16.msra.mxu0 %v1246_v15  ;;  %1231 = vmatpush3.bf16.msra.mxu1 %v1246_v15 }
  0x1c   :  { %1083 = vmatprep.subr.bf16.mxu0 %v1247_v16  ;;  %1224 = vmatprep.subr.bf16.mxu1 %v1247_v16 }
  0x1f   :  { %1084 = vmatpush3.bf16.msra.mxu0 %v1248_v17  ;;  %1232 = vmatpush3.bf16.msra.mxu1 %v1248_v17 }
  0x20   :  { %1185 = vmatprep.subr.bf16.mxu1 %v1261_v18 }
  0x22   :  { %508 = vmatmul.mubr.bf16.vlgmr.msra.gmra.mxu0 %v1249_v19  ;;  %596 = vmatmul.mubr.bf16.vlgmr.msra.gmra.mxu1 %v1252_v20 }
  0x23   :  { %515 = vmatprep.mubr.bf16.mxu0 %v1255_v21  ;;  %603 = vmatprep.mubr.bf16.mxu1 %v1257_v22  ;;  %v1548_v22 = vld [vmem:[%s1716_s2] ss:$0 sm:$0xff] }
  0x24   :  { %1186 = vmatpush3.bf16.msra.mxu1 %v1261_v18 }
  0x25   :  { %1187 = vmatprep.subr.bf16.mxu1 %v1268_v23 }
  0x28   :  { %1188 = vmatpush3.bf16.msra.mxu1 %v1268_v23 }
  0x2a   :  { %516 = vmatmul.mubr.bf16.gmra.mxu0 %v1259_v24  ;;  %604 = vmatmul.mubr.bf16.gmra.mxu1 %v1260_v25 }
  0x2b   :  { %523 = vmatprep.mubr.bf16.mxu0 %v1262_v26  ;;  %611 = vmatprep.mubr.bf16.mxu1 %v1264_v27 }
  0x32   :  { %524 = vmatmul.mubr.bf16.gmra.mxu0 %v1266_v28  ;;  %612 = vmatmul.mubr.bf16.gmra.mxu1 %v1267_v29 }
  0x33   :  { %531 = vmatprep.mubr.bf16.mxu0 %v1269_v30  ;;  %1189 = vmatprep.mubr.msk.bf16.mxu1 %vm432_vm0, %v1271_v31 }
  0x3a   :  { %532 = vmatmul.mubr.bf16.gmra.mxu0 %v1272_v32  ;;  %1190 = vmatmul.mubr.msk.bf16.vlgmr.msra.gmra.mxu1 %vm432_vm0, %v1273_v33 }
  0x3b   :  { %539 = vmatprep.mubr.bf16.mxu0 %v1274_v34  ;;  %1193 = vmatprep.mubr.msk.bf16.mxu1 %vm432_vm0, %v1276_v35 }
  0x42   :  { %540 = vmatmul.mubr.bf16.gmra.mxu0 %v1277_v36  ;;  %1194 = vmatmul.mubr.msk.bf16.gmra.mxu1 %vm432_vm0, %v1278_v37 }
  0x43   :  { %547 = vmatprep.mubr.bf16.mxu0 %v1279_v38  ;;  %1197 = vmatprep.mubr.msk.bf16.mxu1 %vm432_vm0, %v1281_v39 }
  0x4a   :  { %548 = vmatmul.mubr.bf16.gmra.mxu0 %v1282_v40  ;;  %1198 = vmatmul.mubr.msk.bf16.gmra.mxu1 %vm432_vm0, %v1283_v41 }
  0x4b   :  { %555 = vmatprep.mubr.bf16.mxu0 %v1284_v42  ;;  %1201 = vmatprep.mubr.msk.bf16.mxu1 %vm432_vm0, %v1286_v43 }
  0x52   :  { %556 = vmatmul.mubr.bf16.gmra.mxu0 %v1287_v44  ;;  %1202 = vmatmul.mubr.msk.bf16.gmra.mxu1 %vm432_vm0, %v1288_v45 }
  0x53   :  { %563 = vmatprep.mubr.bf16.mxu0 %v1289_v46  ;;  %1205 = vmatprep.mubr.msk.bf16.mxu1 %vm432_vm0, %v1291_v47 }
  0x5a   :  { %564 = vmatmul.mubr.bf16.gmra.mxu0 %v1292_v48  ;;  %1206 = vmatmul.mubr.msk.bf16.gmra.mxu1 %vm432_vm0, %v1293_v49 }
  0x5b   :  { %571 = vmatprep.mubr.bf16.mxu0 %v1294_v50  ;;  %1209 = vmatprep.mubr.msk.bf16.mxu1 %vm432_vm0, %v1296_v51 }
  0x62   :  { %572 = vmatmul.mubr.bf16.gmra.mxu0 %v1297_v52  ;;  %1210 = vmatmul.mubr.msk.bf16.gmra.mxu1 %vm432_vm0, %v1298_v53 }
  0x63   :  { %579 = vmatprep.mubr.bf16.mxu0 %v1299_v54  ;;  %1213 = vmatprep.mubr.msk.bf16.mxu1 %vm432_vm0, %v1301_v55 }
  0x6a   :  { %580 = vmatmul.mubr.bf16.gmra.mxu0 %v1302_v56  ;;  %1214 = vmatmul.mubr.msk.bf16.gmra.mxu1 %vm432_vm0, %v1303_v57 }
  0x6b   :  { %587 = vmatprep.mubr.bf16.mxu0 %v1304_v58 }
  0x72   :  { %588 = vmatmul.mubr.bf16.gmra.mxu0 %v1306_v59 }
  0xe2   :  { %v1085_v60 = vpop.f32.mrf.mxu0  ;;  %v1521_v61 = vpop.f32.mrf.mxu1 }
  0xe4   :  { %v1086_v62 = vpop.f32.mrf.mxu0  ;;  %v1523_v63 = vpop.f32.mrf.mxu1 }
  0xe5   :  { %v1087_v19 = vadd.f32 %v1086_v62, %v1085_v60 }
  0xe6   :  { %v1088_v0 = vpop.f32.mrf.mxu0  ;;  %v1525_v1 = vpop.f32.mrf.mxu1 }
  0xe7   :  { %v510_v29 = vadd.f32 %v1087_v19, %v1548_v22 }
  0xe8   :  { %v1089_v2 = vpop.f32.mrf.mxu0  ;;  %v1527_v3 = vpop.f32.mrf.mxu1 }
  0xe9   :  { %v1090_v25 = vadd.f32 %v1089_v2, %v1088_v0 }
  0xea   :  { %v1091_v4 = vpop.f32.mrf.mxu0  ;;  %v1529_v5 = vpop.f32.mrf.mxu1 }
  0xeb   :  { %v513_v38 = vadd.f32 %v1090_v25, %v1548_v22 }
  0xec   :  { %v1092_v6 = vpop.f32.mrf.mxu0  ;;  %v1531_v7 = vpop.f32.mrf.mxu1 }
  0xed   :  { %v1093_v16 = vadd.f32 %v1092_v6, %v1091_v4 }
  0xee   :  { %v1094_v8 = vpop.f32.mrf.mxu0  ;;  %v1533_v9 = vpop.f32.mrf.mxu1 }
  0xef   :  { %v518_v24 = vadd.f32 %v1093_v16, %v1548_v22 }
  0xf0   :  { %v1095_v10 = vpop.f32.mrf.mxu0  ;;  %v1535_v11 = vpop.f32.mrf.mxu1 }
  0xf1   :  { %v1096_v23 = vadd.f32 %v1095_v10, %v1094_v8 }
  0xf2   :  { %v1097_v12 = vpop.f32.mrf.mxu0  ;;  %v1537_v13 = vpop.f32.mrf.mxu1 }
  0xf3   :  { %v521_v35 = vadd.f32 %v1096_v23, %v1548_v22 }
  0xf4   :  { %v1098_v14 = vpop.f32.mrf.mxu0  ;;  %v1539_v15 = vpop.f32.mrf.mxu1 }
  0xf5   :  { %v1099_v39 = vadd.f32 %v1098_v14, %v1097_v12 }
  0xf6   :  { %v1100_v17 = vpop.f32.mrf.mxu0  ;;  %v1541_v18 = vpop.f32.mrf.mxu1 }
  0xf7   :  { %v526_v56 = vadd.f32 %v1099_v39, %v1548_v22 }
  0xf8   :  { %v1101_v20 = vpop.f32.mrf.mxu0  ;;  %v1543_v21 = vpop.f32.mrf.mxu1 }
  0xf9   :  { %v1102_v50 = vadd.f32 %v1101_v20, %v1100_v17 }
  0xfa   :  { %v1103_v26 = vpop.f32.mrf.mxu0  ;;  %v1191_v27 = vpop.f32.mrf.mxu1 }
  0xfb   :  { %v663_v28 = vadd.f32 %v1191_v27, %v518_v24  ;;  %v529_v6 = vadd.f32 %v1102_v50, %v1548_v22 }
  0xfc   :  { %v1104_v30 = vpop.f32.mrf.mxu0  ;;  %v654_v31 = vpop.f32.mrf.mxu1 }
  0xfd   :  { %v767_v32 = vmax.f32 %v663_v28, 0.0  ;;  %v1105_v33 = vadd.f32 %v1104_v30, %v1103_v26  ;;  %v655_v34 = vadd.f32 %v654_v31, %v510_v29 }
  0xfe   :  { %v1106_v36 = vpop.f32.mrf.mxu0  ;;  %v1192_v37 = vpop.f32.mrf.mxu1 }
  0xff   :  { %v1043_v40 = vpack.c.bf16 %v767_v32, %v767_v32  ;;  %v765_v41 = vmax.f32 %v655_v34, 0.0  ;;  %v666_v42 = vadd.f32 %v1192_v37, %v521_v35  ;;  %v534_v45 = vadd.f32 %v1105_v33, %v1548_v22 }
 0x100   :  { %v1107_v43 = vpop.f32.mrf.mxu0  ;;  %v657_v44 = vpop.f32.mrf.mxu1 }
 0x101   :  { %908 = vst.msk [vmem:[%s1717_s3 + $0x8] sm:$0xf] %vm905_vm1, %v1043_v40  ;;  %v1041_v46 = vpack.c.bf16 %v765_v41, %v765_v41  ;;  %v768_v47 = vmax.f32 %v666_v42, 0.0  ;;  %v1108_v48 = vadd.f32 %v1107_v43, %v1106_v36  ;;  %v658_v49 = vadd.f32 %v657_v44, %v513_v38 }
 0x102   :  { %v1109_v51 = vpop.f32.mrf.mxu0  ;;  %v1195_v52 = vpop.f32.mrf.mxu1 }
 0x103   :  { %906 = vst.msk [vmem:[%s1717_s3] sm:$0xf] %vm905_vm1, %v1041_v46  ;;  %v1044_v53 = vpack.c.bf16 %v768_v47, %v768_v47  ;;  %v766_v54 = vmax.f32 %v658_v49, 0.0  ;;  %v679_v55 = vadd.f32 %v1195_v52, %v534_v45  ;;  %v537_v0 = vadd.f32 %v1108_v48, %v1548_v22 }
 0x104   :  { %v1110_v57 = vpop.f32.mrf.mxu0  ;;  %v670_v58 = vpop.f32.mrf.mxu1 }
 0x105   :  { %909 = vst.msk [vmem:[%s1717_s3 + $0xc] sm:$0xf] %vm905_vm1, %v1044_v53  ;;  %v1042_v59 = vpack.c.bf16 %v766_v54, %v766_v54  ;;  %v771_v60 = vmax.f32 %v679_v55, 0.0  ;;  %v671_v62 = vadd.f32 %v670_v58, %v526_v56  ;;  %v1111_v10 = vadd.f32 %v1110_v57, %v1109_v51 }
 0x106   :  { %v1112_v2 = vpop.f32.mrf.mxu0  ;;  %v1196_v4 = vpop.f32.mrf.mxu1 }
 0x107   :  { %907 = vst.msk [vmem:[%s1717_s3 + $0x4] sm:$0xf] %vm905_vm1, %v1042_v59  ;;  %v1047_v8 = vpack.c.bf16 %v771_v60, %v771_v60  ;;  %v769_v12 = vmax.f32 %v671_v62, 0.0  ;;  %v682_v14 = vadd.f32 %v1196_v4, %v537_v0  ;;  %v542_v29 = vadd.f32 %v1111_v10, %v1548_v22 }
 0x108   :  { %v1113_v16 = vpop.f32.mrf.mxu0  ;;  %v673_v17 = vpop.f32.mrf.mxu1 }
 0x109   :  { %912 = vst.msk [vmem:[%s1717_s3 + $0x18] sm:$0xf] %vm905_vm1, %v1047_v8  ;;  %v1045_v19 = vpack.c.bf16 %v769_v12, %v769_v12  ;;  %v772_v20 = vmax.f32 %v682_v14, 0.0  ;;  %v674_v23 = vadd.f32 %v673_v17, %v529_v6  ;;  %v1114_v27 = vadd.f32 %v1113_v16, %v1112_v2 }
 0x10a   :  { %v1115_v24 = vpop.f32.mrf.mxu0  ;;  %v1199_v25 = vpop.f32.mrf.mxu1 }
 0x10b   :  { %910 = vst.msk [vmem:[%s1717_s3 + $0x10] sm:$0xf] %vm905_vm1, %v1045_v19  ;;  %v1048_v26 = vpack.c.bf16 %v772_v20, %v772_v20  ;;  %v770_v28 = vmax.f32 %v674_v23, 0.0  ;;  %v545_v39 = vadd.f32 %v1114_v27, %v1548_v22  ;;  %v1153_v19 = vadd.f32 %v1523_v63, %v1521_v61 }
 0x10c   :  { %v1116_v30 = vpop.f32.mrf.mxu0  ;;  %v686_v31 = vpop.f32.mrf.mxu1 }
 0x10d   :  { %913 = vst.msk [vmem:[%s1717_s3 + $0x1c] sm:$0xf] %vm905_vm1, %v1048_v26  ;;  %v1046_v32 = vpack.c.bf16 %v770_v28, %v770_v28  ;;  %v1117_v33 = vadd.f32 %v1116_v30, %v1115_v24  ;;  %v687_v34 = vadd.f32 %v686_v31, %v542_v29  ;;  %v1156_v29 = vadd.f32 %v1527_v3, %v1525_v1 }
 0x10e   :  { %v1118_v35 = vpop.f32.mrf.mxu0  ;;  %v1200_v36 = vpop.f32.mrf.mxu1  ;;  %v1165_v1 = vadd.f32 %v1539_v15, %v1537_v13 }
 0x10f   :  { %911 = vst.msk [vmem:[%s1717_s3 + $0x14] sm:$0xf] %vm905_vm1, %v1046_v32  ;;  %v550_v37 = vadd.f32 %v1117_v33, %v1548_v22  ;;  %v773_v38 = vmax.f32 %v687_v34, 0.0  ;;  %v598_v33 = vadd.f32 %v1153_v19, %v1548_v22 }
 0x110   :  { %v1119_v40 = vpop.f32.mrf.mxu0  ;;  %v689_v41 = vpop.f32.mrf.mxu1 }
 0x111   :  { %v695_v42 = vadd.f32 %v1199_v25, %v550_v37  ;;  %v1049_v43 = vpack.c.bf16 %v773_v38, %v773_v38  ;;  %v1120_v44 = vadd.f32 %v1119_v40, %v1118_v35  ;;  %v690_v45 = vadd.f32 %v689_v41, %v545_v39 }
 0x112   :  { %v1121_v46 = vpop.f32.mrf.mxu0  ;;  %v1203_v47 = vpop.f32.mrf.mxu1  ;;  %v601_v40 = vadd.f32 %v1156_v29, %v1548_v22 }
 0x113   :  { %v775_v48 = vmax.f32 %v695_v42, 0.0  ;;  %914 = vst.msk [vmem:[%s1717_s3 + $0x20] sm:$0xf] %vm905_vm1, %v1049_v43  ;;  %v553_v49 = vadd.f32 %v1120_v44, %v1548_v22  ;;  %v774_v50 = vmax.f32 %v690_v45, 0.0 }
 0x114   :  { %v1122_v51 = vpop.f32.mrf.mxu0  ;;  %v702_v52 = vpop.f32.mrf.mxu1 }
 0x115   :  { %v1051_v53 = vpack.c.bf16 %v775_v48, %v775_v48  ;;  %v698_v54 = vadd.f32 %v1200_v36, %v553_v49  ;;  %v1050_v55 = vpack.c.bf16 %v774_v50, %v774_v50  ;;  %v1123_v56 = vadd.f32 %v1122_v51, %v1121_v46 }
 0x116   :  { %v1124_v57 = vpop.f32.mrf.mxu0  ;;  %v1204_v58 = vpop.f32.mrf.mxu1  ;;  %v1159_v49 = vadd.f32 %v1531_v7, %v1529_v5  ;;  %v1168_v50 = vadd.f32 %v1543_v21, %v1541_v18 }
 0x117   :  { %916 = vst.msk [vmem:[%s1717_s3 + $0x28] sm:$0xf] %vm905_vm1, %v1051_v53  ;;  %v776_v59 = vmax.f32 %v698_v54, 0.0  ;;  %915 = vst.msk [vmem:[%s1717_s3 + $0x24] sm:$0xf] %vm905_vm1, %v1050_v55  ;;  %v558_v60 = vadd.f32 %v1123_v56, %v1548_v22  ;;  %v614_v53 = vadd.f32 %v1165_v1, %v1548_v22 }
 0x118   :  { %v1125_v62 = vpop.f32.mrf.mxu0  ;;  %v705_v0 = vpop.f32.mrf.mxu1 }
 0x119   :  { %v1052_v2 = vpack.c.bf16 %v776_v59, %v776_v59  ;;  %v703_v4 = vadd.f32 %v702_v52, %v558_v60  ;;  %v1126_v6 = vadd.f32 %v1125_v62, %v1124_v57  ;;  %v1162_v60 = vadd.f32 %v1535_v11, %v1533_v9 }
 0x11a   :  { %v1127_v8 = vpop.f32.mrf.mxu0  ;;  %v1607_v10 = vpop.f32.mrf.mxu1 }
 0x11b   :  { %917 = vst.msk [vmem:[%s1717_s3 + $0x2c] sm:$0xf] %vm905_vm1, %v1052_v2  ;;  %v777_v12 = vmax.f32 %v703_v4, 0.0  ;;  %v561_v14 = vadd.f32 %v1126_v6, %v1548_v22  ;;  %v617_v4 = vadd.f32 %v1168_v50, %v1548_v22 }
 0x11c   :  { %v1128_v16 = vpop.f32.mrf.mxu0  ;;  %v718_v17 = vpop.f32.mrf.mxu1 }
 0x11d   :  { %v1053_v20 = vpack.c.bf16 %v777_v12, %v777_v12  ;;  %v706_v23 = vadd.f32 %v705_v0, %v561_v14  ;;  %v1129_v24 = vadd.f32 %v1128_v16, %v1127_v8  ;;  %v606_v0 = vadd.f32 %v1159_v49, %v1548_v22 }
 0x11e   :  { %v1130_v25 = vpop.f32.mrf.mxu0  ;;  %v1616_v26 = vpop.f32.mrf.mxu1 }
 0x11f   :  { %918 = vst.msk [vmem:[%s1717_s3 + $0x30] sm:$0xf] %vm905_vm1, %v1053_v20  ;;  %v778_v27 = vmax.f32 %v706_v23, 0.0  ;;  %v566_v28 = vadd.f32 %v1129_v24, %v1548_v22 }
 0x120   :  { %v1131_v30 = vpop.f32.mrf.mxu0  ;;  %v721_v31 = vpop.f32.mrf.mxu1 }
 0x121   :  { %v1054_v61 = vpack.c.bf16 %v778_v27, %v778_v27  ;;  %v711_v63 = vadd.f32 %v1203_v47, %v566_v28  ;;  %v1132_v32 = vadd.f32 %v1131_v30, %v1130_v25  ;;  %v609_v27 = vadd.f32 %v1162_v60, %v1548_v22 }
 0x122   :  { %v1133_v34 = vpop.f32.mrf.mxu0  ;;  %v1211_v35 = vpop.f32.mrf.mxu1 }
 0x123   :  { %919 = vst.msk [vmem:[%s1717_s3 + $0x34] sm:$0xf] %vm905_vm1, %v1054_v61  ;;  %v779_v36 = vmax.f32 %v711_v63, 0.0  ;;  %v569_v37 = vadd.f32 %v1132_v32, %v1548_v22  ;;  %v743_v38 = vadd.f32 %v1211_v35, %v598_v33 }
 0x124   :  { %v1134_v3 = vpop.f32.mrf.mxu0  ;;  %v1633_v39 = vpop.f32.mrf.mxu1 }
 0x125   :  { %v1055_v41 = vpack.c.bf16 %v779_v36, %v779_v36  ;;  %v714_v42 = vadd.f32 %v1204_v58, %v569_v37  ;;  %v787_v43 = vmax.f32 %v743_v38, 0.0  ;;  %v1135_v44 = vadd.f32 %v1134_v3, %v1133_v34 }
 0x126   :  { %v1136_v45 = vpop.f32.mrf.mxu0  ;;  %v1212_v46 = vpop.f32.mrf.mxu1 }
 0x127   :  { %920 = vst.msk [vmem:[%s1717_s3 + $0x38] sm:$0xf] %vm905_vm1, %v1055_v41  ;;  %v780_v47 = vmax.f32 %v714_v42, 0.0  ;;  %v1063_v48 = vpack.c.bf16 %v787_v43, %v787_v43  ;;  %v574_v13 = vadd.f32 %v1135_v44, %v1548_v22  ;;  %v746_v15 = vadd.f32 %v1212_v46, %v601_v40 }
 0x128   :  { %v1137_v51 = vpop.f32.mrf.mxu0  ;;  %v1645_v52 = vpop.f32.mrf.mxu1 }
 0x129   :  { %v1056_v54 = vpack.c.bf16 %v780_v47, %v780_v47  ;;  %928 = vst.msk [vmem:[%s1717_s3 + $0x58] sm:$0xf] %vm905_vm1, %v1063_v48  ;;  %v719_v55 = vadd.f32 %v718_v17, %v574_v13  ;;  %v788_v56 = vmax.f32 %v746_v15, 0.0  ;;  %v1138_v57 = vadd.f32 %v1137_v51, %v1136_v45 }
 0x12a   :  { %v1139_v58 = vpop.f32.mrf.mxu0  ;;  %v1215_v59 = vpop.f32.mrf.mxu1 }
 0x12b   :  { %921 = vst.msk [vmem:[%s1717_s3 + $0x3c] sm:$0xf] %vm905_vm1, %v1056_v54  ;;  %v781_v5 = vmax.f32 %v719_v55, 0.0  ;;  %v1064_v7 = vpack.c.bf16 %v788_v56, %v788_v56  ;;  %v577_v18 = vadd.f32 %v1138_v57, %v1548_v22  ;;  %v759_v21 = vadd.f32 %v1215_v59, %v614_v53 }
 0x12c   :  { %v1140_v62 = vpop.f32.mrf.mxu0  ;;  %v750_v2 = vpop.f32.mrf.mxu1 }
 0x12d   :  { %v1057_v6 = vpack.c.bf16 %v781_v5, %v781_v5  ;;  %929 = vst.msk [vmem:[%s1717_s3 + $0x5c] sm:$0xf] %vm905_vm1, %v1064_v7  ;;  %v722_v8 = vadd.f32 %v721_v31, %v577_v18  ;;  %v791_v12 = vmax.f32 %v759_v21, 0.0  ;;  %v1141_v14 = vadd.f32 %v1140_v62, %v1139_v58 }
 0x12e   :  { %v751_v16 = vadd.f32 %v750_v2, %v606_v0  ;;  %v1142_v17 = vpop.f32.mrf.mxu0  ;;  %v1216_v19 = vpop.f32.mrf.mxu1 }
 0x12f   :  { %922 = vst.msk [vmem:[%s1717_s3 + $0x40] sm:$0xf] %vm905_vm1, %v1057_v6  ;;  %v782_v9 = vmax.f32 %v722_v8, 0.0  ;;  %v1067_v11 = vpack.c.bf16 %v791_v12, %v791_v12  ;;  %v582_v20 = vadd.f32 %v1141_v14, %v1548_v22  ;;  %v762_v23 = vadd.f32 %v1216_v19, %v617_v4 }
 0x130   :  { %v789_v24 = vmax.f32 %v751_v16, 0.0  ;;  %v1143_v25 = vpop.f32.mrf.mxu0  ;;  %v753_v28 = vpop.f32.mrf.mxu1 }
 0x131   :  { %v1058_v29 = vpack.c.bf16 %v782_v9, %v782_v9  ;;  %932 = vst.msk [vmem:[%s1717_s3 + $0x68] sm:$0xf] %vm905_vm1, %v1067_v11  ;;  %v727_v30 = vadd.f32 %v1607_v10, %v582_v20  ;;  %v792_v31 = vmax.f32 %v762_v23, 0.0  ;;  %v1144_v61 = vadd.f32 %v1143_v25, %v1142_v17 }
 0x132   :  { %v1065_v63 = vpack.c.bf16 %v789_v24, %v789_v24  ;;  %v754_v32 = vadd.f32 %v753_v28, %v609_v27  ;;  %v1145_v33 = vpop.f32.mrf.mxu0 }
 0x133   :  { %923 = vst.msk [vmem:[%s1717_s3 + $0x44] sm:$0xf] %vm905_vm1, %v1058_v29  ;;  %v783_v34 = vmax.f32 %v727_v30, 0.0  ;;  %v1068_v35 = vpack.c.bf16 %v792_v31, %v792_v31  ;;  %v585_v36 = vadd.f32 %v1144_v61, %v1548_v22 }
 0x134   :  { %930 = vst.msk [vmem:[%s1717_s3 + $0x60] sm:$0xf] %vm905_vm1, %v1065_v63  ;;  %v790_v10 = vmax.f32 %v754_v32, 0.0  ;;  %v1146_v37 = vpop.f32.mrf.mxu0 }
 0x135   :  { %v1059_v38 = vpack.c.bf16 %v783_v34, %v783_v34  ;;  %933 = vst.msk [vmem:[%s1717_s3 + $0x6c] sm:$0xf] %vm905_vm1, %v1068_v35  ;;  %v730_v1 = vadd.f32 %v1616_v26, %v585_v36  ;;  %v1147_v3 = vadd.f32 %v1146_v37, %v1145_v33 }
 0x136   :  { %v1066_v40 = vpack.c.bf16 %v790_v10, %v790_v10  ;;  %v1148_v41 = vpop.f32.mrf.mxu0 }
 0x137   :  { %924 = vst.msk [vmem:[%s1717_s3 + $0x48] sm:$0xf] %vm905_vm1, %v1059_v38  ;;  %v784_v42 = vmax.f32 %v730_v1, 0.0  ;;  %v590_v43 = vadd.f32 %v1147_v3, %v1548_v22 }
 0x138   :  { %931 = vst.msk [vmem:[%s1717_s3 + $0x64] sm:$0xf] %vm905_vm1, %v1066_v40  ;;  %v1149_v44 = vpop.f32.mrf.mxu0 }
 0x139   :  { %v1060_v45 = vpack.c.bf16 %v784_v42, %v784_v42  ;;  %v735_v26 = vadd.f32 %v1633_v39, %v590_v43  ;;  %v1150_v46 = vadd.f32 %v1149_v44, %v1148_v41 }
 0x13b   :  { %925 = vst.msk [vmem:[%s1717_s3 + $0x4c] sm:$0xf] %vm905_vm1, %v1060_v45  ;;  %v785_v47 = vmax.f32 %v735_v26, 0.0  ;;  %v593_v48 = vadd.f32 %v1150_v46, %v1548_v22 }
 0x13d   :  { %v1061_v13 = vpack.c.bf16 %v785_v47, %v785_v47  ;;  %v738_v15 = vadd.f32 %v1645_v52, %v593_v48 }
 0x13f   :  { %926 = vst.msk [vmem:[%s1717_s3 + $0x50] sm:$0xf] %vm905_vm1, %v1061_v13  ;;  %v786_v49 = vmax.f32 %v738_v15, 0.0 }
 0x141   :  { %v1062_v50 = vpack.c.bf16 %v786_v49, %v786_v49 }
 0x143   :  { %927 = vst.msk [vmem:[%s1717_s3 + $0x54] sm:$0xf] %vm905_vm1, %v1062_v50 }

// kernel: monet_forward.32
= control target key start
LH: loop header
LB: loop body
LE: loop exit
PB: predicated region body
PF: predicated region fallthrough
CT: control target
= control target key end

     0   :  { %vm1428_vm0 = vcmask 261120   ;;  %vm1430_vm1 = vcmask 259072   ;;  %vm1456_vm2 = vcmask 7168   ;;  %vm1458_vm3 = vcmask 5120   ;;  %s2535_s1 = inlined_call_operand.vmem [shape: bf16[1024,256], index: 1, kind: input, shape index: {}]   ;;  %s2536_s0 = inlined_call_operand.vmem [shape: bf16[14,1024], index: 0, kind: input, shape index: {}]   ;;  %s2537_s3 = inlined_call_operand.vmem [shape: bf16[256,32], index: 3, kind: input, shape index: {}]   ;;  %s2538_s5 = inlined_call_operand.vmem [shape: bf16[256,32], index: 5, kind: input, shape index: {}]   ;;  %s2539_s2 = inlined_call_operand.vmem [shape: f32[1,256], index: 2, kind: input, shape index: {}]   ;;  %s2540_s4 = inlined_call_operand.vmem [shape: f32[1,32], index: 4, kind: input, shape index: {}]   ;;  %s2541_s6 = inlined_call_operand.vmem [shape: f32[1,32], index: 6, kind: input, shape index: {}]   ;;  %s2542_s7 = inlined_call_operand.vmem [shape: f32[14,32], index: 7, kind: input, shape index: {}]   ;;  %s2543_s8 = inlined_call_operand.vmem [shape: f32[14,32], index: 8, kind: output, shape index: {0}]   ;;  %s2544_s9 = inlined_call_operand.vmem [shape: f32[14,1], index: 9, kind: output, shape index: {1}]  }
   0x1   :  { %v1690_v0 = vld [vmem:[%s2535_s1 + $0x74] ss:$8 sps:$4 sm:$0xff]   ;;  %v1694_v2 = vld [vmem:[%s2535_s1 + $0x70] ss:$8 sps:$4 sm:$0xff]   ;;  %v1696_v4 = vld [vmem:[%s2535_s1 + $0x64] ss:$8 sps:$4 sm:$0xff]  }
   0x2   :  { %v1692_v1 = vld [vmem:[%s2535_s1 + $0x174] ss:$8 sps:$4 sm:$0xff]   ;;  %860 = vmatprep.subr.bf16.mxu0 %v1690_v0  ;;  %v1695_v3 = vld [vmem:[%s2535_s1 + $0x170] ss:$8 sps:$4 sm:$0xff]   ;;  %v1698_v5 = vld [vmem:[%s2535_s1 + $0x164] ss:$8 sps:$4 sm:$0xff]  }
   0x3   :  { %903 = vmatprep.subr.bf16.mxu1 %v1692_v1  ;;  %861 = vmatpush1.bf16.msra.mxu0 %v1694_v2  ;;  %v1700_v6 = vld [vmem:[%s2535_s1 + $0x60] ss:$8 sps:$4 sm:$0xff]   ;;  %v1702_v8 = vld [vmem:[%s2535_s1 + $0x54] ss:$8 sps:$4 sm:$0xff]   ;;  %v1706_v10 = vld [vmem:[%s2535_s1 + $0x50] ss:$8 sps:$4 sm:$0xff]  }
   0x4   :  { %904 = vmatpush1.bf16.msra.mxu1 %v1695_v3  ;;  %862 = vmatprep.subr.bf16.mxu0 %v1696_v4  ;;  %v1701_v7 = vld [vmem:[%s2535_s1 + $0x160] ss:$8 sps:$4 sm:$0xff]   ;;  %v1704_v9 = vld [vmem:[%s2535_s1 + $0x154] ss:$8 sps:$4 sm:$0xff]   ;;  %v1707_v11 = vld [vmem:[%s2535_s1 + $0x150] ss:$8 sps:$4 sm:$0xff]  }
   0x5   :  { %905 = vmatprep.subr.bf16.mxu1 %v1698_v5  ;;  %v1708_v12 = vld [vmem:[%s2535_s1 + $0x44] ss:$8 sps:$4 sm:$0xff]   ;;  %v1712_v14 = vld [vmem:[%s2535_s1 + $0x40] ss:$8 sps:$4 sm:$0xff]   ;;  %v1714_v16 = vld [vmem:[%s2535_s1 + $0x34] ss:$8 sps:$4 sm:$0xff]  }
   0x6   :  { %v1710_v13 = vld [vmem:[%s2535_s1 + $0x144] ss:$8 sps:$4 sm:$0xff]   ;;  %v1713_v15 = vld [vmem:[%s2535_s1 + $0x140] ss:$8 sps:$4 sm:$0xff]   ;;  %v1716_v17 = vld [vmem:[%s2535_s1 + $0x134] ss:$8 sps:$4 sm:$0xff]  }
   0x7   :  { %863 = vmatpush1.bf16.msra.mxu0 %v1700_v6  ;;  %v1718_v18 = vld [vmem:[%s2535_s1 + $0x30] ss:$8 sps:$4 sm:$0xff]   ;;  %v1720_v20 = vld [vmem:[%s2535_s1 + $0x24] ss:$8 sps:$4 sm:$0xff]   ;;  %v1724_v22 = vld [vmem:[%s2535_s1 + $0x20] ss:$8 sps:$4 sm:$0xff]  }
   0x8   :  { %906 = vmatpush1.bf16.msra.mxu1 %v1701_v7  ;;  %864 = vmatprep.subr.bf16.mxu0 %v1702_v8  ;;  %v1719_v19 = vld [vmem:[%s2535_s1 + $0x130] ss:$8 sps:$4 sm:$0xff]   ;;  %v1722_v21 = vld [vmem:[%s2535_s1 + $0x124] ss:$8 sps:$4 sm:$0xff]   ;;  %v1725_v23 = vld [vmem:[%s2535_s1 + $0x120] ss:$8 sps:$4 sm:$0xff]  }
   0x9   :  { %907 = vmatprep.subr.bf16.mxu1 %v1704_v9  ;;  %v1726_v24 = vld [vmem:[%s2535_s1 + $0x14] ss:$8 sps:$4 sm:$0xff]   ;;  %v1730_v26 = vld [vmem:[%s2535_s1 + $0x10] ss:$8 sps:$4 sm:$0xff]   ;;  %v1732_v28 = vld [vmem:[%s2535_s1 + $0x4] ss:$8 sps:$4 sm:$0xff]  }
   0xa   :  { %v1728_v25 = vld [vmem:[%s2535_s1 + $0x114] ss:$8 sps:$4 sm:$0xff]   ;;  %v1731_v27 = vld [vmem:[%s2535_s1 + $0x110] ss:$8 sps:$4 sm:$0xff]   ;;  %v1734_v29 = vld [vmem:[%s2535_s1 + $0x104] ss:$8 sps:$4 sm:$0xff]  }
   0xb   :  { %865 = vmatpush1.bf16.msra.mxu0 %v1706_v10  ;;  %v1736_v30 = vld [vmem:[%s2535_s1] ss:$8 sps:$4 sm:$0xff]   ;;  %v1738_v32 = vld [vmem:[%s2535_s1 + $0xf4] ss:$8 sps:$4 sm:$0xff]   ;;  %v1742_v34 = vld [vmem:[%s2535_s1 + $0xf0] ss:$8 sps:$4 sm:$0xff]  }
   0xc   :  { %908 = vmatpush1.bf16.msra.mxu1 %v1707_v11  ;;  %866 = vmatprep.subr.bf16.mxu0 %v1708_v12  ;;  %v1737_v31 = vld [vmem:[%s2535_s1 + $0x100] ss:$8 sps:$4 sm:$0xff]   ;;  %v1740_v33 = vld [vmem:[%s2535_s1 + $0x1f4] ss:$8 sps:$4 sm:$0xff]   ;;  %v1743_v35 = vld [vmem:[%s2535_s1 + $0x1f0] ss:$8 sps:$4 sm:$0xff]  }
   0xd   :  { %909 = vmatprep.subr.bf16.mxu1 %v1710_v13  ;;  %v1744_v36 = vld [vmem:[%s2535_s1 + $0xe4] ss:$8 sps:$4 sm:$0xff]   ;;  %v1748_v38 = vld [vmem:[%s2535_s1 + $0xe0] ss:$8 sps:$4 sm:$0xff]   ;;  %v1750_v40 = vld [vmem:[%s2535_s1 + $0xd4] ss:$8 sps:$4 sm:$0xff]  }
   0xe   :  { %v1746_v37 = vld [vmem:[%s2535_s1 + $0x1e4] ss:$8 sps:$4 sm:$0xff]   ;;  %v1749_v39 = vld [vmem:[%s2535_s1 + $0x1e0] ss:$8 sps:$4 sm:$0xff]   ;;  %v1752_v41 = vld [vmem:[%s2535_s1 + $0x1d4] ss:$8 sps:$4 sm:$0xff]  }
   0xf   :  { %867 = vmatpush1.bf16.msra.mxu0 %v1712_v14  ;;  %v1754_v42 = vld [vmem:[%s2535_s1 + $0xd0] ss:$8 sps:$4 sm:$0xff]   ;;  %v1756_v44 = vld [vmem:[%s2535_s1 + $0xc4] ss:$8 sps:$4 sm:$0xff]   ;;  %v1760_v46 = vld [vmem:[%s2535_s1 + $0xc0] ss:$8 sps:$4 sm:$0xff]  }
  0x10   :  { %910 = vmatpush1.bf16.msra.mxu1 %v1713_v15  ;;  %868 = vmatprep.subr.bf16.mxu0 %v1714_v16  ;;  %v1755_v43 = vld [vmem:[%s2535_s1 + $0x1d0] ss:$8 sps:$4 sm:$0xff]   ;;  %v1758_v45 = vld [vmem:[%s2535_s1 + $0x1c4] ss:$8 sps:$4 sm:$0xff]   ;;  %v1761_v47 = vld [vmem:[%s2535_s1 + $0x1c0] ss:$8 sps:$4 sm:$0xff]  }
  0x11   :  { %911 = vmatprep.subr.bf16.mxu1 %v1716_v17  ;;  %v32_v48 = vld [vmem:[%s2536_s0] sm:$0xff]  ;;  %v33_v50 = vld [vmem:[%s2536_s0 + $0x8] sm:$0xff]  ;;  %v1762_v52 = vld [vmem:[%s2535_s1 + $0xb4] ss:$8 sps:$4 sm:$0xff]  }
  0x12   :  { %v36_v49 = vld [vmem:[%s2536_s0 + $0x20] sm:$0x77]  ;;  %v37_v51 = vld [vmem:[%s2536_s0 + $0x28] sm:$0x77]  ;;  %v1764_v54 = vld [vmem:[%s2535_s1 + $0x1b4] ss:$8 sps:$4 sm:$0xff]  }
  0x13   :  { %869 = vmatpush1.bf16.msra.mxu0 %v1718_v18  ;;  %v1469_v53 = vcombine.high %v32_v48, %v36_v49  ;;  %v1471_v55 = vcombine.high %v33_v50, %v37_v51  ;;  %v1766_v56 = vld [vmem:[%s2535_s1 + $0xb0] ss:$8 sps:$4 sm:$0xff]   ;;  %v1768_v58 = vld [vmem:[%s2535_s1 + $0xa4] ss:$8 sps:$4 sm:$0xff]   ;;  %v1772_v60 = vld [vmem:[%s2535_s1 + $0xa0] ss:$8 sps:$4 sm:$0xff]   ;;  %v1468_v8 = vcombine.low %v32_v48, %v36_v49  ;;  %v1470_v9 = vcombine.low %v33_v50, %v37_v51 }
  0x14   :  { %912 = vmatpush1.bf16.msra.mxu1 %v1719_v19  ;;  %870 = vmatprep.subr.bf16.mxu0 %v1720_v20  ;;  %v1767_v57 = vld [vmem:[%s2535_s1 + $0x1b0] ss:$8 sps:$4 sm:$0xff]   ;;  %v1770_v59 = vld [vmem:[%s2535_s1 + $0x1a4] ss:$8 sps:$4 sm:$0xff]   ;;  %v1773_v61 = vld [vmem:[%s2535_s1 + $0x1a0] ss:$8 sps:$4 sm:$0xff]  }
  0x15   :  { %913 = vmatprep.subr.bf16.mxu1 %v1722_v21  ;;  %892 = vmatprep.mubr.bf16.mxu0 %v1469_v53  ;;  %v1774_v62 = vld [vmem:[%s2535_s1 + $0x94] ss:$8 sps:$4 sm:$0xff]   ;;  %v1778_v0 = vld [vmem:[%s2535_s1 + $0x90] ss:$8 sps:$4 sm:$0xff]   ;;  %v1780_v2 = vld [vmem:[%s2535_s1 + $0x84] ss:$8 sps:$4 sm:$0xff]  }
  0x16   :  { %935 = vmatprep.mubr.bf16.mxu1 %v1471_v55  ;;  %v1776_v63 = vld [vmem:[%s2535_s1 + $0x194] ss:$8 sps:$4 sm:$0xff]   ;;  %v1779_v1 = vld [vmem:[%s2535_s1 + $0x190] ss:$8 sps:$4 sm:$0xff]   ;;  %v1782_v3 = vld [vmem:[%s2535_s1 + $0x184] ss:$8 sps:$4 sm:$0xff]  }
  0x17   :  { %871 = vmatpush1.bf16.msra.mxu0 %v1724_v22  ;;  %v1784_v4 = vld [vmem:[%s2535_s1 + $0x80] ss:$8 sps:$4 sm:$0xff]   ;;  %v1788_v6 = vld [vmem:[%s2535_s1 + $0x274] ss:$8 sps:$4 sm:$0xff]   ;;  %v1786_v10 = vld [vmem:[%s2535_s1 + $0x270] ss:$8 sps:$4 sm:$0xff]  }
  0x18   :  { %914 = vmatpush1.bf16.msra.mxu1 %v1725_v23  ;;  %872 = vmatprep.subr.bf16.mxu0 %v1726_v24  ;;  %v1785_v5 = vld [vmem:[%s2535_s1 + $0x180] ss:$8 sps:$4 sm:$0xff]   ;;  %v1791_v7 = vld [vmem:[%s2535_s1 + $0x374] ss:$8 sps:$4 sm:$0xff]   ;;  %v1789_v11 = vld [vmem:[%s2535_s1 + $0x370] ss:$8 sps:$4 sm:$0xff]  }
  0x19   :  { %915 = vmatprep.subr.bf16.mxu1 %v1728_v25  ;;  %v1794_v12 = vld [vmem:[%s2535_s1 + $0x264] ss:$8 sps:$4 sm:$0xff]   ;;  %v1792_v14 = vld [vmem:[%s2535_s1 + $0x260] ss:$8 sps:$4 sm:$0xff]   ;;  %v1800_v16 = vld [vmem:[%s2535_s1 + $0x254] ss:$8 sps:$4 sm:$0xff]  }
  0x1a   :  { %v1797_v13 = vld [vmem:[%s2535_s1 + $0x364] ss:$8 sps:$4 sm:$0xff]   ;;  %v1795_v15 = vld [vmem:[%s2535_s1 + $0x360] ss:$8 sps:$4 sm:$0xff]   ;;  %v1803_v17 = vld [vmem:[%s2535_s1 + $0x354] ss:$8 sps:$4 sm:$0xff]  }
  0x1b   :  { %873 = vmatpush1.bf16.msra.mxu0 %v1730_v26  ;;  %v1798_v18 = vld [vmem:[%s2535_s1 + $0x250] ss:$8 sps:$4 sm:$0xff]   ;;  %v1806_v20 = vld [vmem:[%s2535_s1 + $0x244] ss:$8 sps:$4 sm:$0xff]   ;;  %v1804_v22 = vld [vmem:[%s2535_s1 + $0x240] ss:$8 sps:$4 sm:$0xff]  }
  0x1c   :  { %916 = vmatpush1.bf16.msra.mxu1 %v1731_v27  ;;  %874 = vmatprep.subr.bf16.mxu0 %v1732_v28  ;;  %v1801_v19 = vld [vmem:[%s2535_s1 + $0x350] ss:$8 sps:$4 sm:$0xff]   ;;  %v1809_v21 = vld [vmem:[%s2535_s1 + $0x344] ss:$8 sps:$4 sm:$0xff]   ;;  %v1807_v23 = vld [vmem:[%s2535_s1 + $0x340] ss:$8 sps:$4 sm:$0xff]  }
  0x1d   :  { %917 = vmatprep.subr.bf16.mxu1 %v1734_v29  ;;  %v1812_v24 = vld [vmem:[%s2535_s1 + $0x234] ss:$8 sps:$4 sm:$0xff]   ;;  %v1810_v26 = vld [vmem:[%s2535_s1 + $0x230] ss:$8 sps:$4 sm:$0xff]   ;;  %v1818_v28 = vld [vmem:[%s2535_s1 + $0x224] ss:$8 sps:$4 sm:$0xff]  }
  0x1e   :  { %v1815_v25 = vld [vmem:[%s2535_s1 + $0x334] ss:$8 sps:$4 sm:$0xff]   ;;  %v1813_v27 = vld [vmem:[%s2535_s1 + $0x330] ss:$8 sps:$4 sm:$0xff]   ;;  %v1821_v29 = vld [vmem:[%s2535_s1 + $0x324] ss:$8 sps:$4 sm:$0xff]  }
  0x1f   :  { %875 = vmatpush1.bf16.msra.mxu0 %v1736_v30  ;;  %v1816_v30 = vld [vmem:[%s2535_s1 + $0x220] ss:$8 sps:$4 sm:$0xff]   ;;  %v1834_v48 = vld [vmem:[%s2535_s1 + $0x2f0] ss:$8 sps:$4 sm:$0xff]   ;;  %v1842_v50 = vld [vmem:[%s2535_s1 + $0x2e4] ss:$8 sps:$4 sm:$0xff]  }
  0x20   :  { %918 = vmatpush1.bf16.msra.mxu1 %v1737_v31  ;;  %876 = vmatprep.subr.bf16.mxu0 %v1738_v32  ;;  %v1819_v31 = vld [vmem:[%s2535_s1 + $0x320] ss:$8 sps:$4 sm:$0xff]   ;;  %v1824_v32 = vld [vmem:[%s2535_s1 + $0x214] ss:$8 sps:$4 sm:$0xff]   ;;  %v1837_v49 = vld [vmem:[%s2535_s1 + $0x3f0] ss:$8 sps:$4 sm:$0xff]  }
  0x21   :  { %919 = vmatprep.subr.bf16.mxu1 %v1740_v33  ;;  %v1827_v33 = vld [vmem:[%s2535_s1 + $0x314] ss:$8 sps:$4 sm:$0xff]   ;;  %v1845_v51 = vld [vmem:[%s2535_s1 + $0x3e4] ss:$8 sps:$4 sm:$0xff]   ;;  %v1843_v53 = vld [vmem:[%s2535_s1 + $0x3e0] ss:$8 sps:$4 sm:$0xff]  }
  0x22   :  { %v1851_v55 = vld [vmem:[%s2535_s1 + $0x3d4] ss:$8 sps:$4 sm:$0xff]  }
  0x23   :  { %877 = vmatpush2.bf16.msra.mxu0 %v1742_v34  ;;  %v2269_v34 = vld [vmem:[%s2536_s0 + $0x10] sm:$0xff] }
  0x24   :  { %920 = vmatpush2.bf16.msra.mxu1 %v1743_v35  ;;  %878 = vmatprep.subr.bf16.mxu0 %v1744_v36  ;;  %v2274_v35 = vld [vmem:[%s2536_s0 + $0x30] sm:$0x77]  ;;  %v2279_v36 = vld [vmem:[%s2536_s0 + $0x18] sm:$0xff] }
  0x25   :  { %921 = vmatprep.subr.bf16.mxu1 %v1746_v37  ;;  %v2284_v37 = vld [vmem:[%s2536_s0 + $0x38] sm:$0x77] }
  0x27   :  { %879 = vmatpush2.bf16.msra.mxu0 %v1748_v38  ;;  %v1822_v38 = vld [vmem:[%s2535_s1 + $0x210] ss:$8 sps:$4 sm:$0xff]  }
  0x28   :  { %922 = vmatpush2.bf16.msra.mxu1 %v1749_v39  ;;  %880 = vmatprep.subr.bf16.mxu0 %v1750_v40  ;;  %v1825_v39 = vld [vmem:[%s2535_s1 + $0x310] ss:$8 sps:$4 sm:$0xff]   ;;  %v1473_v40 = vcombine.high %v2269_v34, %v2274_v35 }
  0x29   :  { %923 = vmatprep.subr.bf16.mxu1 %v1752_v41  ;;  %v1830_v41 = vld [vmem:[%s2535_s1 + $0x204] ss:$8 sps:$4 sm:$0xff]  }
  0x2b   :  { %881 = vmatpush2.bf16.msra.mxu0 %v1754_v42  ;;  %v1833_v42 = vld [vmem:[%s2535_s1 + $0x304] ss:$8 sps:$4 sm:$0xff]  }
  0x2c   :  { %924 = vmatpush2.bf16.msra.mxu1 %v1755_v43  ;;  %882 = vmatprep.subr.bf16.mxu0 %v1756_v44  ;;  %v1475_v43 = vcombine.high %v2279_v36, %v2284_v37  ;;  %v1828_v44 = vld [vmem:[%s2535_s1 + $0x200] ss:$8 sps:$4 sm:$0xff]  }
  0x2d   :  { %925 = vmatprep.subr.bf16.mxu1 %v1758_v45  ;;  %v1831_v45 = vld [vmem:[%s2535_s1 + $0x300] ss:$8 sps:$4 sm:$0xff]  }
  0x2f   :  { %883 = vmatpush2.bf16.msra.mxu0 %v1760_v46  ;;  %v1836_v46 = vld [vmem:[%s2535_s1 + $0x2f4] ss:$8 sps:$4 sm:$0xff]  }
  0x30   :  { %926 = vmatpush2.bf16.msra.mxu1 %v1761_v47  ;;  %884 = vmatprep.subr.bf16.mxu0 %v1762_v52  ;;  %v1839_v47 = vld [vmem:[%s2535_s1 + $0x3f4] ss:$8 sps:$4 sm:$0xff]   ;;  %v1840_v52 = vld [vmem:[%s2535_s1 + $0x2e0] ss:$8 sps:$4 sm:$0xff]  }
  0x31   :  { %927 = vmatprep.subr.bf16.mxu1 %v1764_v54  ;;  %v1848_v54 = vld [vmem:[%s2535_s1 + $0x2d4] ss:$8 sps:$4 sm:$0xff]  }
  0x33   :  { %885 = vmatpush2.bf16.msra.mxu0 %v1766_v56  ;;  %v1846_v56 = vld [vmem:[%s2535_s1 + $0x2d0] ss:$8 sps:$4 sm:$0xff]  }
  0x34   :  { %928 = vmatpush2.bf16.msra.mxu1 %v1767_v57  ;;  %886 = vmatprep.subr.bf16.mxu0 %v1768_v58  ;;  %v1849_v57 = vld [vmem:[%s2535_s1 + $0x3d0] ss:$8 sps:$4 sm:$0xff]   ;;  %v1854_v58 = vld [vmem:[%s2535_s1 + $0x2c4] ss:$8 sps:$4 sm:$0xff]  }
  0x35   :  { %929 = vmatprep.subr.bf16.mxu1 %v1770_v59  ;;  %v1857_v59 = vld [vmem:[%s2535_s1 + $0x3c4] ss:$8 sps:$4 sm:$0xff]  }
  0x37   :  { %887 = vmatpush2.bf16.msra.mxu0 %v1772_v60  ;;  %v1852_v60 = vld [vmem:[%s2535_s1 + $0x2c0] ss:$8 sps:$4 sm:$0xff]  }
  0x38   :  { %930 = vmatpush2.bf16.msra.mxu1 %v1773_v61  ;;  %888 = vmatprep.subr.bf16.mxu0 %v1774_v62  ;;  %v1855_v61 = vld [vmem:[%s2535_s1 + $0x3c0] ss:$8 sps:$4 sm:$0xff]   ;;  %v1860_v62 = vld [vmem:[%s2535_s1 + $0x2b4] ss:$8 sps:$4 sm:$0xff]  }
  0x39   :  { %931 = vmatprep.subr.bf16.mxu1 %v1776_v63  ;;  %v1863_v63 = vld [vmem:[%s2535_s1 + $0x3b4] ss:$8 sps:$4 sm:$0xff]  }
  0x3b   :  { %889 = vmatpush2.bf16.msra.mxu0 %v1778_v0  ;;  %v1858_v0 = vld [vmem:[%s2535_s1 + $0x2b0] ss:$8 sps:$4 sm:$0xff]  }
  0x3c   :  { %932 = vmatpush2.bf16.msra.mxu1 %v1779_v1  ;;  %890 = vmatprep.subr.bf16.mxu0 %v1780_v2  ;;  %v1861_v1 = vld [vmem:[%s2535_s1 + $0x3b0] ss:$8 sps:$4 sm:$0xff]   ;;  %v1866_v2 = vld [vmem:[%s2535_s1 + $0x2a4] ss:$8 sps:$4 sm:$0xff]  }
  0x3d   :  { %933 = vmatprep.subr.bf16.mxu1 %v1782_v3  ;;  %v1869_v3 = vld [vmem:[%s2535_s1 + $0x3a4] ss:$8 sps:$4 sm:$0xff]  }
  0x3f   :  { %891 = vmatpush2.bf16.msra.mxu0 %v1784_v4  ;;  %v1864_v4 = vld [vmem:[%s2535_s1 + $0x2a0] ss:$8 sps:$4 sm:$0xff]  }
  0x40   :  { %934 = vmatpush2.bf16.msra.mxu1 %v1785_v5  ;;  %946 = vmatprep.subr.bf16.mxu0 %v1788_v6  ;;  %v1867_v5 = vld [vmem:[%s2535_s1 + $0x3a0] ss:$8 sps:$4 sm:$0xff]   ;;  %v1872_v6 = vld [vmem:[%s2535_s1 + $0x294] ss:$8 sps:$4 sm:$0xff]  }
  0x41   :  { %989 = vmatprep.subr.bf16.mxu1 %v1791_v7  ;;  %v1875_v7 = vld [vmem:[%s2535_s1 + $0x394] ss:$8 sps:$4 sm:$0xff]  }
  0x42   :  { %893 = vmatmul.mubr.bf16.vlgmr.msra.gmra.mxu0 %v1468_v8  ;;  %v1870_v8 = vld [vmem:[%s2535_s1 + $0x290] ss:$8 sps:$4 sm:$0xff]  }
  0x43   :  { %936 = vmatmul.mubr.bf16.vlgmr.msra.gmra.mxu1 %v1470_v9  ;;  %947 = vmatpush1.bf16.msra.mxu0 %v1786_v10  ;;  %v1873_v9 = vld [vmem:[%s2535_s1 + $0x390] ss:$8 sps:$4 sm:$0xff]   ;;  %v1878_v10 = vld [vmem:[%s2535_s1 + $0x284] ss:$8 sps:$4 sm:$0xff]  }
  0x44   :  { %990 = vmatpush1.bf16.msra.mxu1 %v1789_v11  ;;  %948 = vmatprep.subr.bf16.mxu0 %v1794_v12  ;;  %v1881_v11 = vld [vmem:[%s2535_s1 + $0x384] ss:$8 sps:$4 sm:$0xff]   ;;  %v1876_v12 = vld [vmem:[%s2535_s1 + $0x280] ss:$8 sps:$4 sm:$0xff]  }
  0x45   :  { %991 = vmatprep.subr.bf16.mxu1 %v1797_v13  ;;  %978 = vmatprep.mubr.bf16.mxu0 %v1473_v40  ;;  %v1879_v13 = vld [vmem:[%s2535_s1 + $0x380] ss:$8 sps:$4 sm:$0xff]  }
  0x46   :  { %1021 = vmatprep.mubr.bf16.mxu1 %v1475_v43  ;;  %v1906_v40 = vld [vmem:[%s2537_s3 + $0x48] sm:$0xff]  }
  0x47   :  { %949 = vmatpush1.bf16.msra.mxu0 %v1792_v14  ;;  %v1472_v14 = vcombine.low %v2269_v34, %v2274_v35  ;;  %v1900_v34 = vld [vmem:[%s2537_s3 + $0x18] sm:$0xff]   ;;  %v1909_v43 = vld [vmem:[%s2538_s5 + $0x8] sm:$0xff]  }
  0x48   :  { %992 = vmatpush1.bf16.msra.mxu1 %v1795_v15  ;;  %950 = vmatprep.subr.bf16.mxu0 %v1800_v16  ;;  %v1474_v15 = vcombine.low %v2279_v36, %v2284_v37  ;;  %v1882_v16 = vld [vmem:[%s2537_s3 + $0x78] sm:$0xff]   ;;  %v1902_v36 = vld [vmem:[%s2537_s3 + $0x50] sm:$0xff]  }
  0x49   :  { %993 = vmatprep.subr.bf16.mxu1 %v1803_v17  ;;  %v1883_v17 = vld [vmem:[%s2538_s5 + $0x78] sm:$0xff]   ;;  %v1903_v37 = vld [vmem:[%s2538_s5 + $0x50] sm:$0xff]  }
  0x4a   :  { %v1901_v35 = vld [vmem:[%s2538_s5 + $0x18] sm:$0xff]  }
  0x4b   :  { %951 = vmatpush1.bf16.msra.mxu0 %v1798_v18  ;;  %v1884_v18 = vld [vmem:[%s2537_s3 + $0x38] sm:$0xff]  }
  0x4c   :  { %994 = vmatpush1.bf16.msra.mxu1 %v1801_v19  ;;  %952 = vmatprep.subr.bf16.mxu0 %v1806_v20  ;;  %v1885_v19 = vld [vmem:[%s2538_s5 + $0x38] sm:$0xff]   ;;  %v1886_v20 = vld [vmem:[%s2537_s3 + $0x70] sm:$0xff]  }
  0x4d   :  { %995 = vmatprep.subr.bf16.mxu1 %v1809_v21  ;;  %v1887_v21 = vld [vmem:[%s2538_s5 + $0x70] sm:$0xff]  }
  0x4f   :  { %953 = vmatpush1.bf16.msra.mxu0 %v1804_v22  ;;  %v1888_v22 = vld [vmem:[%s2537_s3 + $0x30] sm:$0xff]  }
  0x50   :  { %996 = vmatpush1.bf16.msra.mxu1 %v1807_v23  ;;  %954 = vmatprep.subr.bf16.mxu0 %v1812_v24  ;;  %v1889_v23 = vld [vmem:[%s2538_s5 + $0x30] sm:$0xff]   ;;  %v1890_v24 = vld [vmem:[%s2537_s3 + $0x68] sm:$0xff]  }
  0x51   :  { %997 = vmatprep.subr.bf16.mxu1 %v1815_v25  ;;  %v1891_v25 = vld [vmem:[%s2538_s5 + $0x68] sm:$0xff]  }
  0x53   :  { %955 = vmatpush1.bf16.msra.mxu0 %v1810_v26  ;;  %v1892_v26 = vld [vmem:[%s2537_s3 + $0x28] sm:$0xff]  }
  0x54   :  { %998 = vmatpush1.bf16.msra.mxu1 %v1813_v27  ;;  %956 = vmatprep.subr.bf16.mxu0 %v1818_v28  ;;  %v1893_v27 = vld [vmem:[%s2538_s5 + $0x28] sm:$0xff]   ;;  %v1894_v28 = vld [vmem:[%s2537_s3 + $0x60] sm:$0xff]  }
  0x55   :  { %999 = vmatprep.subr.bf16.mxu1 %v1821_v29  ;;  %v1895_v29 = vld [vmem:[%s2538_s5 + $0x60] sm:$0xff]  }
  0x57   :  { %957 = vmatpush1.bf16.msra.mxu0 %v1816_v30  ;;  %v1896_v30 = vld [vmem:[%s2537_s3 + $0x20] sm:$0xff]  }
  0x58   :  { %1000 = vmatpush1.bf16.msra.mxu1 %v1819_v31  ;;  %958 = vmatprep.subr.bf16.mxu0 %v1824_v32  ;;  %v1897_v31 = vld [vmem:[%s2538_s5 + $0x20] sm:$0xff]   ;;  %v1898_v32 = vld [vmem:[%s2537_s3 + $0x58] sm:$0xff]  }
  0x59   :  { %1001 = vmatprep.subr.bf16.mxu1 %v1827_v33  ;;  %v1899_v33 = vld [vmem:[%s2538_s5 + $0x58] sm:$0xff]  }
  0x5b   :  { %959 = vmatpush1.bf16.msra.mxu0 %v1822_v38  ;;  %v1904_v38 = vld [vmem:[%s2537_s3 + $0x10] sm:$0xff]  }
  0x5c   :  { %1002 = vmatpush1.bf16.msra.mxu1 %v1825_v39  ;;  %960 = vmatprep.subr.bf16.mxu0 %v1830_v41  ;;  %v1905_v39 = vld [vmem:[%s2538_s5 + $0x10] sm:$0xff]   ;;  %v1907_v41 = vld [vmem:[%s2538_s5 + $0x48] sm:$0xff]  }
  0x5d   :  { %1003 = vmatprep.subr.bf16.mxu1 %v1833_v42  ;;  %v1908_v42 = vld [vmem:[%s2537_s3 + $0x8] sm:$0xff]  }
  0x5f   :  { %961 = vmatpush1.bf16.msra.mxu0 %v1828_v44  ;;  %v1910_v44 = vld [vmem:[%s2537_s3 + $0x40] sm:$0xff]  }
  0x60   :  { %1004 = vmatpush1.bf16.msra.mxu1 %v1831_v45  ;;  %962 = vmatprep.subr.bf16.mxu0 %v1836_v46  ;;  %v1911_v45 = vld [vmem:[%s2538_s5 + $0x40] sm:$0xff]  }
  0x61   :  { %1005 = vmatprep.subr.bf16.mxu1 %v1839_v47  ;;  %v1912_v46 = vld [vmem:[%s2537_s3] sm:$0xff]  }
  0x62   :  { %v1913_v47 = vld [vmem:[%s2538_s5] sm:$0xff]  }
  0x63   :  { %963 = vmatpush2.bf16.msra.mxu0 %v1834_v48  ;;  %v170_v48 = vlaneseq }
  0x64   :  { %1006 = vmatpush2.bf16.msra.mxu1 %v1837_v49  ;;  %964 = vmatprep.subr.bf16.mxu0 %v1842_v50 }
  0x65   :  { %1007 = vmatprep.subr.bf16.mxu1 %v1845_v51  ;;  %v171_v49 = vshrl.u32 %v170_v48, 7 }
  0x67   :  { %965 = vmatpush2.bf16.msra.mxu0 %v1840_v52  ;;  %v176_v52 = vsub.s32 1, %v171_v49 }
  0x68   :  { %1008 = vmatpush2.bf16.msra.mxu1 %v1843_v53  ;;  %966 = vmatprep.subr.bf16.mxu0 %v1848_v54  ;;  %v168_v53 = vld [vmem:[%s2539_s2] sm:$0x3]  ;;  %v172_v54 = vsub.s32 0, %v171_v49 }
  0x69   :  { %1009 = vmatprep.subr.bf16.mxu1 %v1851_v55 }
  0x6b   :  { %967 = vmatpush2.bf16.msra.mxu0 %v1846_v56 }
  0x6c   :  { %1010 = vmatpush2.bf16.msra.mxu1 %v1849_v57  ;;  %968 = vmatprep.subr.bf16.mxu0 %v1854_v58  ;;  %v177_v57 = vrot.slane %v168_v53, %v176_v52  ;;  %v173_v58 = vrot.slane %v168_v53, %v172_v54 }
  0x6d   :  { %1011 = vmatprep.subr.bf16.mxu1 %v1857_v59 }
  0x6f   :  { %969 = vmatpush2.bf16.msra.mxu0 %v1852_v60 }
  0x70   :  { %1012 = vmatpush2.bf16.msra.mxu1 %v1855_v61  ;;  %970 = vmatprep.subr.bf16.mxu0 %v1860_v62 }
  0x71   :  { %1013 = vmatprep.subr.bf16.mxu1 %v1863_v63 }
  0x73   :  { %971 = vmatpush2.bf16.msra.mxu0 %v1858_v0 }
  0x74   :  { %1014 = vmatpush2.bf16.msra.mxu1 %v1861_v1  ;;  %972 = vmatprep.subr.bf16.mxu0 %v1866_v2 }
  0x75   :  { %1015 = vmatprep.subr.bf16.mxu1 %v1869_v3 }
  0x77   :  { %973 = vmatpush2.bf16.msra.mxu0 %v1864_v4 }
  0x78   :  { %1016 = vmatpush2.bf16.msra.mxu1 %v1867_v5  ;;  %974 = vmatprep.subr.bf16.mxu0 %v1872_v6 }
  0x79   :  { %1017 = vmatprep.subr.bf16.mxu1 %v1875_v7 }
  0x7b   :  { %975 = vmatpush2.bf16.msra.mxu0 %v1870_v8 }
  0x7c   :  { %1018 = vmatpush2.bf16.msra.mxu1 %v1873_v9  ;;  %976 = vmatprep.subr.bf16.mxu0 %v1878_v10 }
  0x7d   :  { %1019 = vmatprep.subr.bf16.mxu1 %v1881_v11 }
  0x7f   :  { %977 = vmatpush2.bf16.msra.mxu0 %v1876_v12 }
  0x80   :  { %1020 = vmatpush2.bf16.msra.mxu1 %v1879_v13  ;;  %1646 = vmatprep.subr.bf16.mxu0 %v1882_v16 }
  0x81   :  { %1668 = vmatprep.subr.bf16.mxu1 %v1883_v17 }
  0x82   :  { %979 = vmatmul.mubr.bf16.vlgmr.msra.gmra.mxu0 %v1472_v14 }
  0x83   :  { %1022 = vmatmul.mubr.bf16.vlgmr.msra.gmra.mxu1 %v1474_v15  ;;  %1647 = vmatpush3.bf16.msra.mxu0 %v1884_v18 }
  0x84   :  { %1669 = vmatpush3.bf16.msra.mxu1 %v1885_v19  ;;  %1648 = vmatprep.subr.bf16.mxu0 %v1886_v20 }
  0x85   :  { %1670 = vmatprep.subr.bf16.mxu1 %v1887_v21 }
  0x87   :  { %1649 = vmatpush3.bf16.msra.mxu0 %v1888_v22 }
  0x88   :  { %1671 = vmatpush3.bf16.msra.mxu1 %v1889_v23  ;;  %1650 = vmatprep.subr.bf16.mxu0 %v1890_v24 }
  0x89   :  { %1672 = vmatprep.subr.bf16.mxu1 %v1891_v25 }
  0x8b   :  { %1651 = vmatpush3.bf16.msra.mxu0 %v1892_v26 }
  0x8c   :  { %1673 = vmatpush3.bf16.msra.mxu1 %v1893_v27  ;;  %1652 = vmatprep.subr.bf16.mxu0 %v1894_v28 }
  0x8d   :  { %1674 = vmatprep.subr.bf16.mxu1 %v1895_v29 }
  0x8f   :  { %1653 = vmatpush3.bf16.msra.mxu0 %v1896_v30 }
  0x90   :  { %1675 = vmatpush3.bf16.msra.mxu1 %v1897_v31  ;;  %1654 = vmatprep.subr.bf16.mxu0 %v1898_v32  ;;  %v1604_v31 = vld [vmem:[%s2540_s4] ss:$0 sm:$0xff] }
  0x91   :  { %1676 = vmatprep.subr.bf16.mxu1 %v1899_v33  ;;  %v1621_v33 = vld [vmem:[%s2541_s6] ss:$0 sm:$0xff] }
  0x93   :  { %1655 = vmatpush3.bf16.msra.mxu0 %v1900_v34 }
  0x94   :  { %1677 = vmatpush3.bf16.msra.mxu1 %v1901_v35  ;;  %1656 = vmatprep.subr.bf16.mxu0 %v1902_v36 }
  0x95   :  { %1678 = vmatprep.subr.bf16.mxu1 %v1903_v37 }
  0x97   :  { %1657 = vmatpush3.bf16.msra.mxu0 %v1904_v38 }
  0x98   :  { %1679 = vmatpush3.bf16.msra.mxu1 %v1905_v39  ;;  %1658 = vmatprep.subr.bf16.mxu0 %v1906_v40 }
  0x99   :  { %1680 = vmatprep.subr.bf16.mxu1 %v1907_v41 }
  0x9b   :  { %1659 = vmatpush3.bf16.msra.mxu0 %v1908_v42 }
  0x9c   :  { %1681 = vmatpush3.bf16.msra.mxu1 %v1909_v43  ;;  %1660 = vmatprep.subr.bf16.mxu0 %v1910_v44 }
  0x9d   :  { %1682 = vmatprep.subr.bf16.mxu1 %v1911_v45 }
  0x9f   :  { %1661 = vmatpush3.bf16.msra.mxu0 %v1912_v46 }
  0xa0   :  { %1683 = vmatpush3.bf16.msra.mxu1 %v1913_v47 }
 0x102   :  { %v894_v50 = vpop.f32.mrf.mxu0 }
 0x103   :  { %v937_v51 = vpop.f32.mrf.mxu1  ;;  %v895_v62 = vadd.f32 %v894_v50, %v173_v58 }
 0x104   :  { %v896_v55 = vpop.f32.mrf.mxu0 }
 0x105   :  { %v939_v56 = vpop.f32.mrf.mxu1  ;;  %v897_v61 = vadd.f32 %v896_v55, %v177_v57  ;;  %v938_v6 = vadd.f32 %v937_v51, %v895_v62 }
 0x106   :  { %v898_v59 = vpop.f32.mrf.mxu0 }
 0x107   :  { %v941_v60 = vpop.f32.mrf.mxu1  ;;  %v899_v1 = vadd.f32 %v898_v59, %v173_v58  ;;  %v940_v4 = vadd.f32 %v939_v56, %v897_v61 }
 0x108   :  { %v900_v63 = vpop.f32.mrf.mxu0 }
 0x109   :  { %v943_v0 = vpop.f32.mrf.mxu1  ;;  %v901_v5 = vadd.f32 %v900_v63, %v177_v57  ;;  %v942_v9 = vadd.f32 %v941_v60, %v899_v1  ;;  %v1422_v63 = vld [vmem:[%s2542_s7] sm:$0xff] }
 0x10b   :  { %v944_v14 = vadd.f32 %v943_v0, %v901_v5 }
 0x142   :  { %v980_v2 = vpop.f32.mrf.mxu0 }
 0x143   :  { %v1023_v3 = vpop.f32.mrf.mxu1  ;;  %v981_v11 = vadd.f32 %v980_v2, %v938_v6 }
 0x144   :  { %v982_v7 = vpop.f32.mrf.mxu0 }
 0x145   :  { %v1025_v8 = vpop.f32.mrf.mxu1  ;;  %v983_v10 = vadd.f32 %v982_v7, %v940_v4  ;;  %v1024_v20 = vadd.f32 %v1023_v3, %v981_v11  ;;  %v1423_v7 = vld [vmem:[%s2542_s7 + $0x8] sm:$0x3f] }
 0x146   :  { %v984_v12 = vpop.f32.mrf.mxu0 }
 0x147   :  { %v1027_v13 = vpop.f32.mrf.mxu1  ;;  %v985_v15 = vadd.f32 %v984_v12, %v942_v9  ;;  %v1026_v17 = vadd.f32 %v1025_v8, %v983_v10  ;;  %v1032_v26 = vmax.f32 %v1024_v20, 0.0 }
 0x148   :  { %v986_v16 = vpop.f32.mrf.mxu0 }
 0x149   :  { %v1028_v18 = vadd.f32 %v1027_v13, %v985_v15  ;;  %v987_v19 = vadd.f32 %v986_v16, %v944_v14  ;;  %v1029_v21 = vpop.f32.mrf.mxu1  ;;  %v1033_v24 = vmax.f32 %v1026_v17, 0.0 }
 0x14b   :  { %v1030_v22 = vadd.f32 %v1029_v21, %v987_v19  ;;  %v1034_v23 = vmax.f32 %v1028_v18, 0.0 }
 0x14d   :  { %v1035_v25 = vmax.f32 %v1030_v22, 0.0  ;;  %v1036_v28 = vpack.c.bf16 %v1034_v23, %v1032_v26 }
 0x14f   :  { %v1037_v27 = vpack.c.bf16 %v1035_v25, %v1033_v24 }
 0x151   :  { %1205 = vmatprep.mubr.bf16.mxu0 %v1037_v27  ;;  %1381 = vmatprep.mubr.bf16.mxu1 %v1037_v27 }
 0x152   :  { %1206 = vmatmul.mubr.bf16.vlgmr.msra.gmra.mxu0 %v1036_v28  ;;  %1382 = vmatmul.mubr.bf16.vlgmr.msra.gmra.mxu1 %v1036_v28 }
 0x212   :  { %v1662_v29 = vpop.f32.mrf.mxu0  ;;  %v1684_v30 = vpop.f32.mrf.mxu1 }
 0x214   :  { %v1663_v32 = vpop.f32.mrf.mxu0  ;;  %v1685_v34 = vpop.f32.mrf.mxu1 }
 0x215   :  { %v1664_v35 = vadd.f32 %v1663_v32, %v1662_v29  ;;  %v1686_v36 = vadd.f32 %v1685_v34, %v1684_v30 }
 0x216   :  { %v1665_v37 = vpop.f32.mrf.mxu0  ;;  %v1687_v38 = vpop.f32.mrf.mxu1 }
 0x217   :  { %v1208_v39 = vadd.f32 %v1664_v35, %v1604_v31  ;;  %v1384_v40 = vadd.f32 %v1686_v36, %v1621_v33 }
 0x218   :  { %v1666_v41 = vpop.f32.mrf.mxu0  ;;  %v1688_v42 = vpop.f32.mrf.mxu1 }
 0x219   :  { %v1638_v43 = vmul.f32 -1.442695, %v1208_v39  ;;  %v1642_v44 = vmul.f32 -1.442695, %v1384_v40  ;;  %v1667_v45 = vadd.f32 %v1666_v41, %v1665_v37  ;;  %v1689_v46 = vadd.f32 %v1688_v42, %v1687_v38 }
 0x21b   :  { %1914 = vpow2.f32 %v1638_v43  ;;  %v1211_v47 = vadd.f32 %v1667_v45, %v1604_v31  ;;  %v1387_v48 = vadd.f32 %v1689_v46, %v1621_v33 }
 0x21c   :  { %1916 = vpow2.f32 %v1642_v44 }
 0x21d   :  { %v1639_v49 = vmul.f32 -1.442695, %v1211_v47  ;;  %v1643_v50 = vmul.f32 -1.442695, %v1387_v48 }
 0x21f   :  { %1918 = vpow2.f32 %v1639_v49 }
 0x220   :  { %1920 = vpow2.f32 %v1643_v50 }
 0x228   :  { %v1915_v51 = vpop.eup %1914 }
 0x229   :  { %v1917_v52 = vpop.eup %1916  ;;  %v1396_v53 = vadd.f32 1.0, %v1915_v51 }
 0x22a   :  { %v1412_v54 = vadd.f32 1.0, %v1917_v52 }
 0x22b   :  { %1922 = vrcp.f32 %v1396_v53 }
 0x22c   :  { %v1919_v55 = vpop.eup %1918  ;;  %1924 = vrcp.f32 %v1412_v54 }
 0x22d   :  { %v1921_v56 = vpop.eup %1920  ;;  %v1397_v57 = vadd.f32 1.0, %v1919_v55 }
 0x22e   :  { %v1413_v58 = vadd.f32 1.0, %v1921_v56 }
 0x22f   :  { %1926 = vrcp.f32 %v1397_v57 }
 0x230   :  { %1928 = vrcp.f32 %v1413_v58 }
 0x238   :  { %v1923_v59 = vpop.eup %1922 }
 0x239   :  { %v1925_v60 = vpop.eup %1924  ;;  %v1402_v61 = vmul.f32 6.0, %v1923_v59 }
 0x23a   :  { %v1418_v62 = vmul.f32 3.0, %v1925_v60 }
 0x23b   :  { %v1640_v3 = vadd.f32 -3.0, %v1402_v61 }
 0x23c   :  { %v1927_v0 = vpop.eup %1926  ;;  %v1420_v1 = vmax.f32 %v1418_v62, 1e-06 }
 0x23d   :  { %v1929_v2 = vpop.eup %1928  ;;  %v1403_v6 = vmul.f32 6.0, %v1927_v0  ;;  %v1440_v14 = vmul.f32 %v1640_v3, %v1640_v3 }
 0x23e   :  { %v1419_v4 = vmul.f32 3.0, %v1929_v2  ;;  %v1424_v5 = vmul.f32 %v1422_v63, %v1420_v1  ;;  %1930 = vlog2.f32 %v1420_v1  ;;  %v1438_v13 = vmul.f32 %v1420_v1, %v1420_v1 }
 0x23f   :  { %v1641_v10 = vadd.f32 -3.0, %v1403_v6 }
 0x240   :  { %v1421_v8 = vmax.f32 %v1419_v4, 1e-06  ;;  %v1426_v9 = vadd.f32 %v1640_v3, %v1424_v5  ;;  %v1442_v15 = vadd.f32 %v1440_v14, %v1438_v13 }
 0x241   :  { %v1441_v17 = vmul.f32 %v1641_v10, %v1641_v10 }
 0x242   :  { %1429 = vst.msk [vmem:[%s2543_s8] sm:$0xff] %vm1428_vm0, %v1426_v9  ;;  %v1425_v11 = vmul.f32 %v1423_v7, %v1421_v8  ;;  %1932 = vlog2.f32 %v1421_v8  ;;  %v1439_v16 = vmul.f32 %v1421_v8, %v1421_v8  ;;  %v1444_v21 = vmul.f32 0.5, %v1442_v15 }
 0x244   :  { %v1427_v12 = vadd.f32 %v1641_v10, %v1425_v11  ;;  %v1443_v22 = vadd.f32 %v1441_v17, %v1439_v16 }
 0x246   :  { %1431 = vst.msk [vmem:[%s2543_s8 + $0x8] sm:$0x3f] %vm1430_vm1, %v1427_v12  ;;  %v1445_v28 = vmul.f32 0.5, %v1443_v22 }
 0x24b   :  { %v1931_v18 = vpop.eup %1930 }
 0x24c   :  { %v1433_v19 = vmul.f32 0.6931472, %v1931_v18 }
 0x24e   :  { %v1436_v20 = vsub.f32 0.0, %v1433_v19 }
 0x24f   :  { %v1933_v23 = vpop.eup %1932 }
 0x250   :  { %v1446_v24 = vadd.f32 %v1444_v21, %v1436_v20  ;;  %v1435_v25 = vmul.f32 0.6931472, %v1933_v23 }
 0x252   :  { %v1644_v26 = vadd.f32 -0.5, %v1446_v24  ;;  %v1437_v27 = vsub.f32 0.0, %v1435_v25 }
 0x254   :  { %v1450_v29 = vsel %vm1428_vm0, %v1644_v26, 0.0  ;;  %v1447_v30 = vadd.f32 %v1445_v28, %v1437_v27 }
 0x255   :  { %1451 = vadd.xlane.f32.xlu0 %v1450_v29 }
 0x256   :  { %v1645_v31 = vadd.f32 -0.5, %v1447_v30 }
 0x258   :  { %v1453_v32 = vsel %vm1430_vm1, %v1645_v31, 0.0 }
 0x259   :  { %1454 = vadd.xlane.f32.xlu0 %v1453_v32 }
 0x2de   :  { %v1452_v33 = vpop.xlane.xlu0 %1451 }
 0x2df   :  { %1457 = vst.msk [vmem:[%s2544_s9] sm:$0xff] %vm1456_vm2, %v1452_v33 }
 0x2e2   :  { %v1455_v34 = vpop.xlane.xlu0 %1454 }
 0x2e3   :  { %1459 = vst.msk [vmem:[%s2544_s9 + $0x8] sm:$0x3f] %vm1458_vm3, %v1455_v34 }

// kernel: monet_forward.33
= control target key start
LH: loop header
LB: loop body
LE: loop exit
PB: predicated region body
PF: predicated region fallthrough
CT: control target
= control target key end

     0   :  { %s2685_s12 = smov 0   ;;  %s3250_s0 = inlined_call_operand.vmem [shape: bf16[3584,306], index: 0, kind: input, shape index: {}]   ;;  %s3251_s1 = inlined_call_operand.vmem [shape: bf16[306,32], index: 1, kind: input, shape index: {}]   ;;  %s3252_s2 = inlined_call_operand.vmem [shape: f32[1,32], index: 2, kind: input, shape index: {}]   ;;  %s3253_s3 = inlined_call_operand.vmem [shape: bf16[3584,32], index: 3, kind: output, shape index: {}]  }
   0x1 LB: > { %s2069_s13 = sadd.s32 4294967295, %s2662_s12   ;;  %p2073_p0 = scmp.ge.s32.totalorder %s2662_s12, 1  ;;  %s2662_s12 = sphi %s2685_s12, %s13_s12  }
   0x2   : > { %p139_p1 = scmp.lt.s32.totalorder %s2662_s12, 8 }
   0x4   : > { %p140_p2 = pnand %p2073_p0, %p139_p1 }
   0x5   : > { %s2074_s16 = sshll.u32 (!%p140_p2), %s2069_s13, 6 }
   0x6   : > { %143 = sbr.rel (%p140_p2) target bundleno = 466 (0x1d2), region = 32  ;;  %p165_p3 = scmp.lt.s32.totalorder (!%p140_p2), %s2074_s16, 447 }
   0xb   : > { %v2508_v0 = vld [vmem:[%s3251_s1 + $0x38] sm:$0xff]   ;;  %v2664_v1 = vmov 0   ;;  %v2509_v2 = vld [vmem:[%s3251_s1 + $0x30] sm:$0xff]   ;;  %v2510_v3 = vld [vmem:[%s3251_s1 + $0x28] sm:$0xff]   ;;  %s3255_s16 = smov (!%p165_p3, %s2074_s16), 447  ;;  %vm1046_vm0 = vcmask 1040384  }
   0xc   : > { %1050 = vmatprep.subr.bf16.mxu0 %v2664_v1  ;;  %2465 = vmatprep.subr.bf16.mxu1 %v2664_v1  ;;  %v2511_v4 = vld [vmem:[%s3251_s1 + $0x20] sm:$0xff]   ;;  %s2498_s23 = smul.u32 12, %s3255_s16  ;;  %v2512_v5 = vld [vmem:[%s3251_s1 + $0x18] sm:$0xff]   ;;  %v2513_v7 = vld [vmem:[%s3251_s1 + $0x10] sm:$0xff]   ;;  %vm949_vm1 = vcmask 408576   ;;  %s2077_s9 = sshll.u32 %s3255_s16, 2 }
   0xd   : > { %1051 = vmatpush1.bf16.msra.mxu0 %v2508_v0  ;;  %2481 = vmatpush1.bf16.msra.mxu1 %v2508_v0  ;;  %v2514_v9 = vld [vmem:[%s3251_s1 + $0x8] sm:$0xff]   ;;  %v2515_v10 = vld [vmem:[%s3251_s1] sm:$0xff]   ;;  %v2516_v11 = vld [vmem:[%s3251_s1 + $0x78] sm:$0xff]   ;;  %s2994_s13 = scalar_lea.vmem %s3253_s3, %s2077_s9  ;;  %vm1948_vm2 = vcmask 257024  }
   0xe   : > { %1052 = vmatprep.subr.bf16.mxu0 %v2664_v1  ;;  %2466 = vmatprep.subr.bf16.mxu1 %v2664_v1  ;;  %s2722_s28 = scalar_lea.vmem %s3250_s0, %s2498_s23  ;;  %v2517_v12 = vld [vmem:[%s3251_s1 + $0x70] sm:$0xff]   ;;  %v2518_v13 = vld [vmem:[%s3251_s1 + $0x68] sm:$0xff]   ;;  %v2519_v14 = vld [vmem:[%s3251_s1 + $0x60] sm:$0xff]  }
   0xf   : > { %v2526_v6 = vld [vmem:[%s2722_s28 + $0x4] ss:$12 sps:$4 sm:$0xff]   ;;  %v2520_v15 = vld [vmem:[%s3251_s1 + $0x58] sm:$0xff]   ;;  %v2522_v17 = vld [vmem:[%s3251_s1 + $0x48] sm:$0xff]  }
  0x10   : > { %v2529_v8 = vld [vmem:[%s2722_s28 + $0x244] ss:$12 sps:$4 sm:$0xff]   ;;  %1082 = vmatprep.mubr.bf16.mxu0 %v2526_v6  ;;  %v2524_v19 = vld [vmem:[%s2722_s28] ss:$12 sps:$4 sm:$0xff]   ;;  %v2531_v22 = vld [vmem:[%s2722_s28 + $0x1c] ss:$12 sps:$4 sm:$0xff]  }
  0x11   : > { %1053 = vmatpush1.bf16.msra.mxu0 %v2509_v2  ;;  %2482 = vmatpush1.bf16.msra.mxu1 %v2509_v2  ;;  %v2521_v16 = vld [vmem:[%s3251_s1 + $0x50] sm:$0xff]   ;;  %v2523_v18 = vld [vmem:[%s3251_s1 + $0x40] sm:$0xff]   ;;  %v2530_v20 = vld [vmem:[%s3251_s1 + $0x98] ss:$0 sps:$4 sm:$0x11]  }
  0x12   : > { %1054 = vmatprep.subr.bf16.mxu0 %v2664_v1  ;;  %2467 = vmatprep.subr.bf16.mxu1 %v2664_v1  ;;  %v2527_v21 = vld [vmem:[%s2722_s28 + $0x240] ss:$12 sps:$4 sm:$0xff]   ;;  %v2533_v23 = vld [vmem:[%s2722_s28 + $0x25c] ss:$12 sps:$4 sm:$0xff]   ;;  %v1048_v24 = vsel %vm1046_vm0, %v2530_v20, 0  ;;  %v2543_v25 = vld [vmem:[%s3251_s1 + $0x90] sm:$0xff]  }
  0x13   : > { %1274 = vmatprep.mubr.bf16.mxu1 %v2529_v8  ;;  %v2556_v26 = vld [vmem:[%s3251_s1 + $0x88] sm:$0xff]   ;;  %v2535_v27 = vld [vmem:[%s2722_s28 + $0x18] ss:$12 sps:$4 sm:$0xff]   ;;  %v2537_v29 = vld [vmem:[%s2722_s28 + $0x34] ss:$12 sps:$4 sm:$0xff]  }
  0x14   : > { %v2536_v28 = vld [vmem:[%s2722_s28 + $0x258] ss:$12 sps:$4 sm:$0xff]   ;;  %v2539_v30 = vld [vmem:[%s2722_s28 + $0x274] ss:$12 sps:$4 sm:$0xff]   ;;  %v2541_v32 = vld [vmem:[%s2722_s28 + $0x30] ss:$12 sps:$4 sm:$0xff]  }
  0x15   : > { %1055 = vmatpush1.bf16.msra.mxu0 %v2510_v3  ;;  %2483 = vmatpush1.bf16.msra.mxu1 %v2510_v3  ;;  %v2569_v31 = vld [vmem:[%s3251_s1 + $0x80] sm:$0xff]   ;;  %v2542_v33 = vld [vmem:[%s2722_s28 + $0x270] ss:$12 sps:$4 sm:$0xff]   ;;  %v2544_v34 = vld [vmem:[%s2722_s28 + $0x4c] ss:$12 sps:$4 sm:$0xff]  }
  0x16   : > { %1056 = vmatprep.subr.bf16.mxu0 %v2664_v1  ;;  %2468 = vmatprep.subr.bf16.mxu1 %v2664_v1  ;;  %v2546_v35 = vld [vmem:[%s2722_s28 + $0x28c] ss:$12 sps:$4 sm:$0xff]   ;;  %v2548_v36 = vld [vmem:[%s2722_s28 + $0x48] ss:$12 sps:$4 sm:$0xff]   ;;  %v2550_v38 = vld [vmem:[%s2722_s28 + $0x64] ss:$12 sps:$4 sm:$0xff]  }
  0x17   : > { %v2549_v37 = vld [vmem:[%s2722_s28 + $0x288] ss:$12 sps:$4 sm:$0xff]   ;;  %v2552_v39 = vld [vmem:[%s2722_s28 + $0x2a4] ss:$12 sps:$4 sm:$0xff]   ;;  %v2554_v40 = vld [vmem:[%s2722_s28 + $0x60] ss:$12 sps:$4 sm:$0xff]  }
  0x18   : > { %v2555_v41 = vld [vmem:[%s2722_s28 + $0x2a0] ss:$12 sps:$4 sm:$0xff]   ;;  %v2557_v42 = vld [vmem:[%s2722_s28 + $0x7c] ss:$12 sps:$4 sm:$0xff]   ;;  %v2561_v44 = vld [vmem:[%s2722_s28 + $0x78] ss:$12 sps:$4 sm:$0xff]  }
  0x19   : > { %1057 = vmatpush1.bf16.msra.mxu0 %v2511_v4  ;;  %2484 = vmatpush1.bf16.msra.mxu1 %v2511_v4  ;;  %v2559_v43 = vld [vmem:[%s2722_s28 + $0x2bc] ss:$12 sps:$4 sm:$0xff]   ;;  %v2562_v45 = vld [vmem:[%s2722_s28 + $0x2b8] ss:$12 sps:$4 sm:$0xff]   ;;  %v2563_v46 = vld [vmem:[%s2722_s28 + $0x94] ss:$12 sps:$4 sm:$0xff]  }
  0x1a   : > { %1058 = vmatprep.subr.bf16.mxu0 %v2664_v1  ;;  %2469 = vmatprep.subr.bf16.mxu1 %v2664_v1  ;;  %v2565_v47 = vld [vmem:[%s2722_s28 + $0x2d4] ss:$12 sps:$4 sm:$0xff]   ;;  %v2567_v48 = vld [vmem:[%s2722_s28 + $0x90] ss:$12 sps:$4 sm:$0xff]   ;;  %v2570_v50 = vld [vmem:[%s2722_s28 + $0xac] ss:$12 sps:$4 sm:$0xff]  }
  0x1b   : > { %v2568_v49 = vld [vmem:[%s2722_s28 + $0x2d0] ss:$12 sps:$4 sm:$0xff]   ;;  %v2572_v51 = vld [vmem:[%s2722_s28 + $0x2ec] ss:$12 sps:$4 sm:$0xff]   ;;  %v2574_v52 = vld [vmem:[%s2722_s28 + $0xa8] ss:$12 sps:$4 sm:$0xff]  }
  0x1c   : > { %v2575_v53 = vld [vmem:[%s2722_s28 + $0x2e8] ss:$12 sps:$4 sm:$0xff]   ;;  %v2576_v54 = vld [vmem:[%s2722_s28 + $0xc4] ss:$12 sps:$4 sm:$0xff]   ;;  %v2579_v56 = vld [vmem:[%s2722_s28 + $0xc0] ss:$12 sps:$4 sm:$0xff]  }
  0x1d   : > { %1059 = vmatpush1.bf16.msra.mxu0 %v2512_v5  ;;  %2485 = vmatpush1.bf16.msra.mxu1 %v2512_v5  ;;  %v2578_v55 = vld [vmem:[%s2722_s28 + $0x8] ss:$12 sps:$4 sm:$0xff]   ;;  %v2580_v57 = vld [vmem:[%s2722_s28 + $0x20] ss:$12 sps:$4 sm:$0xff]   ;;  %v2583_v59 = vld [vmem:[%s2722_s28 + $0x38] ss:$12 sps:$4 sm:$0xff]  }
  0x1e   : > { %1060 = vmatprep.subr.bf16.mxu0 %v2664_v1  ;;  %2470 = vmatprep.subr.bf16.mxu1 %v2664_v1  ;;  %v2581_v58 = vld [vmem:[%s2722_s28 + $0xdc] ss:$12 sps:$4 sm:$0xff]   ;;  %v2584_v60 = vld [vmem:[%s2722_s28 + $0xd8] ss:$12 sps:$4 sm:$0xff]   ;;  %v2586_v62 = vld [vmem:[%s2722_s28 + $0xf4] ss:$12 sps:$4 sm:$0xff]  }
  0x1f   : > { %v2585_v61 = vld [vmem:[%s2722_s28 + $0x50] ss:$12 sps:$4 sm:$0xff]   ;;  %v2588_v63 = vld [vmem:[%s2722_s28 + $0x68] ss:$12 sps:$4 sm:$0xff]   ;;  %v2591_v2 = vld [vmem:[%s2722_s28 + $0x10c] ss:$12 sps:$4 sm:$0xff]  }
  0x20   : > { %v2589_v0 = vld [vmem:[%s2722_s28 + $0xf0] ss:$12 sps:$4 sm:$0xff]   ;;  %v2593_v3 = vld [vmem:[%s2722_s28 + $0x98] ss:$12 sps:$4 sm:$0xff]   ;;  %v2594_v4 = vld [vmem:[%s2722_s28 + $0x108] ss:$12 sps:$4 sm:$0xff]  }
  0x21   : > { %1061 = vmatpush1.bf16.msra.mxu0 %v2513_v7  ;;  %2486 = vmatpush1.bf16.msra.mxu1 %v2513_v7  ;;  %v2595_v5 = vld [vmem:[%s2722_s28 + $0xb0] ss:$12 sps:$4 sm:$0xff]   ;;  %v2598_v7 = vld [vmem:[%s2722_s28 + $0xc8] ss:$12 sps:$4 sm:$0xff]   ;;  %v2599_v8 = vld [vmem:[%s2722_s28 + $0x120] ss:$12 sps:$4 sm:$0xff]  }
  0x22   : > { %1062 = vmatprep.subr.bf16.mxu0 %v2664_v1  ;;  %2471 = vmatprep.subr.bf16.mxu1 %v2664_v1  ;;  %v2596_v6 = vld [vmem:[%s2722_s28 + $0x124] ss:$12 sps:$4 sm:$0xff]  }
  0x25   : > { %1063 = vmatpush1.bf16.msra.mxu0 %v2514_v9  ;;  %2487 = vmatpush1.bf16.msra.mxu1 %v2514_v9  ;;  %v2600_v9 = vld [vmem:[%s2722_s28 + $0xe0] ss:$12 sps:$4 sm:$0xff]  }
  0x26   : > { %1064 = vmatprep.subr.bf16.mxu0 %v2664_v1  ;;  %2472 = vmatprep.subr.bf16.mxu1 %v2664_v1 }
  0x29   : > { %1065 = vmatpush1.bf16.msra.mxu0 %v2515_v10  ;;  %2488 = vmatpush1.bf16.msra.mxu1 %v2515_v10  ;;  %v2601_v10 = vld [vmem:[%s2722_s28 + $0x13c] ss:$12 sps:$4 sm:$0xff]  }
  0x2a   : > { %1066 = vmatprep.subr.bf16.mxu0 %v2664_v1  ;;  %2473 = vmatprep.subr.bf16.mxu1 %v2664_v1 }
  0x2d   : > { %1067 = vmatpush2.bf16.msra.mxu0 %v2516_v11  ;;  %2489 = vmatpush2.bf16.msra.mxu1 %v2516_v11  ;;  %v2603_v11 = vld [vmem:[%s2722_s28 + $0xf8] ss:$12 sps:$4 sm:$0xff]  }
  0x2e   : > { %1068 = vmatprep.subr.bf16.mxu0 %v2664_v1  ;;  %2474 = vmatprep.subr.bf16.mxu1 %v2664_v1 }
  0x31   : > { %1069 = vmatpush2.bf16.msra.mxu0 %v2517_v12  ;;  %2490 = vmatpush2.bf16.msra.mxu1 %v2517_v12  ;;  %v2604_v12 = vld [vmem:[%s2722_s28 + $0x138] ss:$12 sps:$4 sm:$0xff]  }
  0x32   : > { %1070 = vmatprep.subr.bf16.mxu0 %v2664_v1  ;;  %2475 = vmatprep.subr.bf16.mxu1 %v2664_v1 }
  0x35   : > { %1071 = vmatpush2.bf16.msra.mxu0 %v2518_v13  ;;  %2491 = vmatpush2.bf16.msra.mxu1 %v2518_v13  ;;  %v2605_v13 = vld [vmem:[%s2722_s28 + $0x110] ss:$12 sps:$4 sm:$0xff]  }
  0x36   : > { %1072 = vmatprep.subr.bf16.mxu0 %v2664_v1  ;;  %2476 = vmatprep.subr.bf16.mxu1 %v2664_v1 }
  0x39   : > { %1073 = vmatpush2.bf16.msra.mxu0 %v2519_v14  ;;  %2492 = vmatpush2.bf16.msra.mxu1 %v2519_v14  ;;  %v2606_v14 = vld [vmem:[%s2722_s28 + $0x154] ss:$12 sps:$4 sm:$0xff]  }
  0x3a   : > { %1074 = vmatprep.subr.bf16.mxu0 %v2664_v1  ;;  %2477 = vmatprep.subr.bf16.mxu1 %v2664_v1 }
  0x3d   : > { %1075 = vmatpush2.bf16.msra.mxu0 %v2520_v15  ;;  %2493 = vmatpush2.bf16.msra.mxu1 %v2520_v15  ;;  %v2608_v15 = vld [vmem:[%s2722_s28 + $0x128] ss:$12 sps:$4 sm:$0xff]  }
  0x3e   : > { %1076 = vmatprep.subr.bf16.mxu0 %v2664_v1  ;;  %2478 = vmatprep.subr.bf16.mxu1 %v2664_v1 }
  0x41   : > { %1077 = vmatpush2.bf16.msra.mxu0 %v2521_v16  ;;  %2494 = vmatpush2.bf16.msra.mxu1 %v2521_v16  ;;  %v2609_v16 = vld [vmem:[%s2722_s28 + $0x150] ss:$12 sps:$4 sm:$0xff]  }
  0x42   : > { %1078 = vmatprep.subr.bf16.mxu0 %v2664_v1  ;;  %2479 = vmatprep.subr.bf16.mxu1 %v2664_v1 }
  0x45   : > { %1079 = vmatpush2.bf16.msra.mxu0 %v2522_v17  ;;  %2495 = vmatpush2.bf16.msra.mxu1 %v2522_v17  ;;  %v2610_v17 = vld [vmem:[%s2722_s28 + $0x140] ss:$12 sps:$4 sm:$0xff]  }
  0x46   : > { %1080 = vmatprep.subr.bf16.mxu0 %v2664_v1  ;;  %2480 = vmatprep.subr.bf16.mxu1 %v2664_v1  ;;  %v2590_v1 = vld [vmem:[%s2722_s28 + $0x80] ss:$12 sps:$4 sm:$0xff]  }
  0x49   : > { %1081 = vmatpush2.bf16.msra.mxu0 %v2523_v18  ;;  %2496 = vmatpush2.bf16.msra.mxu1 %v2523_v18  ;;  %v2611_v18 = vld [vmem:[%s2722_s28 + $0x16c] ss:$12 sps:$4 sm:$0xff]  }
  0x4a   : > { %2497 = vmatprep.subr.msk.bf16.mxu1 %vm1046_vm0, %v2530_v20  ;;  %v2614_v20 = vld [vmem:[%s2722_s28 + $0x168] ss:$12 sps:$4 sm:$0xff]  }
  0x4c   : > { %1083 = vmatmul.mubr.bf16.vlgmr.msra.gmra.mxu0 %v2524_v19  ;;  %1275 = vmatmul.mubr.bf16.vlgmr.msra.gmra.mxu1 %v2527_v21  ;;  %v2613_v19 = vld [vmem:[%s2722_s28 + $0x158] ss:$12 sps:$4 sm:$0xff]   ;;  %v2615_v21 = vld [vmem:[%s2722_s28 + $0x170] ss:$12 sps:$4 sm:$0xff]  }
  0x4d   : > { %2394 = vmatpush3.bf16.msra.mxu1 %v1048_v24  ;;  %1090 = vmatprep.mubr.bf16.mxu0 %v2531_v22  ;;  %v2616_v22 = vld [vmem:[%s2722_s28 + $0x184] ss:$12 sps:$4 sm:$0xff]   ;;  %v2619_v24 = vld [vmem:[%s2722_s28 + $0x180] ss:$12 sps:$4 sm:$0xff]  }
  0x4e   : > { %1282 = vmatprep.mubr.bf16.mxu1 %v2533_v23  ;;  %2395 = vmatprep.subr.bf16.mxu1 %v2543_v25  ;;  %v2618_v23 = vld [vmem:[%s2722_s28 + $0x188] ss:$12 sps:$4 sm:$0xff]  }
  0x51   : > { %2396 = vmatpush3.bf16.msra.mxu1 %v2543_v25  ;;  %v2620_v25 = vld [vmem:[%s2722_s28 + $0x1a0] ss:$12 sps:$4 sm:$0xff]  }
  0x52   : > { %2397 = vmatprep.subr.bf16.mxu1 %v2556_v26 }
  0x54   : > { %1091 = vmatmul.mubr.bf16.gmra.mxu0 %v2535_v27  ;;  %1283 = vmatmul.mubr.bf16.gmra.mxu1 %v2536_v28  ;;  %v2623_v27 = vld [vmem:[%s2722_s28 + $0x1b8] ss:$12 sps:$4 sm:$0xff]  }
  0x55   : > { %1098 = vmatprep.mubr.bf16.mxu0 %v2537_v29  ;;  %1290 = vmatprep.mubr.bf16.mxu1 %v2539_v30  ;;  %v2624_v28 = vld [vmem:[%s2722_s28 + $0x198] ss:$12 sps:$4 sm:$0xff]   ;;  %v2625_v29 = vld [vmem:[%s2722_s28 + $0x1d0] ss:$12 sps:$4 sm:$0xff]   ;;  %v2626_v30 = vld [vmem:[%s2722_s28 + $0x1b4] ss:$12 sps:$4 sm:$0xff]  }
  0x56   : > { %2398 = vmatpush3.bf16.msra.mxu1 %v2556_v26  ;;  %v2621_v26 = vld [vmem:[%s2722_s28 + $0x19c] ss:$12 sps:$4 sm:$0xff]  }
  0x57   : > { %2399 = vmatprep.subr.bf16.mxu1 %v2569_v31 }
  0x5a   : > { %2400 = vmatpush3.bf16.msra.mxu1 %v2569_v31  ;;  %v2628_v31 = vld [vmem:[%s2722_s28 + $0x1e8] ss:$12 sps:$4 sm:$0xff]  }
  0x5c   : > { %1099 = vmatmul.mubr.bf16.gmra.mxu0 %v2541_v32  ;;  %1291 = vmatmul.mubr.bf16.gmra.mxu1 %v2542_v33  ;;  %v2629_v32 = vld [vmem:[%s2722_s28 + $0x1b0] ss:$12 sps:$4 sm:$0xff]   ;;  %v2630_v33 = vld [vmem:[%s2722_s28 + $0x200] ss:$12 sps:$4 sm:$0xff]  }
  0x5d   : > { %1106 = vmatprep.mubr.bf16.mxu0 %v2544_v34  ;;  %1298 = vmatprep.mubr.bf16.mxu1 %v2546_v35  ;;  %v2631_v34 = vld [vmem:[%s2722_s28 + $0x1cc] ss:$12 sps:$4 sm:$0xff]  }
  0x5e   : > { %v2633_v35 = vld [vmem:[%s2722_s28 + $0x218] ss:$12 sps:$4 sm:$0xff]  }
  0x64   : > { %1107 = vmatmul.mubr.bf16.gmra.mxu0 %v2548_v36  ;;  %1299 = vmatmul.mubr.bf16.gmra.mxu1 %v2549_v37  ;;  %v2634_v36 = vld [vmem:[%s2722_s28 + $0x1c8] ss:$12 sps:$4 sm:$0xff]   ;;  %v2635_v37 = vld [vmem:[%s2722_s28 + $0x230] ss:$12 sps:$4 sm:$0xff]  }
  0x65   : > { %1114 = vmatprep.mubr.bf16.mxu0 %v2550_v38  ;;  %1306 = vmatprep.mubr.bf16.mxu1 %v2552_v39  ;;  %v2636_v38 = vld [vmem:[%s2722_s28 + $0x1e4] ss:$12 sps:$4 sm:$0xff]   ;;  %v2638_v39 = vld [vmem:[%s2722_s28 + $0x248] ss:$12 sps:$4 sm:$0xff]  }
  0x6c   : > { %1115 = vmatmul.mubr.bf16.gmra.mxu0 %v2554_v40  ;;  %1307 = vmatmul.mubr.bf16.gmra.mxu1 %v2555_v41  ;;  %v2639_v40 = vld [vmem:[%s2722_s28 + $0x1e0] ss:$12 sps:$4 sm:$0xff]  }
  0x6d   : > { %1122 = vmatprep.mubr.bf16.mxu0 %v2557_v42  ;;  %1314 = vmatprep.mubr.bf16.mxu1 %v2559_v43  ;;  %v2640_v41 = vld [vmem:[%s2722_s28 + $0x260] ss:$12 sps:$4 sm:$0xff]   ;;  %v2641_v42 = vld [vmem:[%s2722_s28 + $0x1fc] ss:$12 sps:$4 sm:$0xff]   ;;  %v2643_v43 = vld [vmem:[%s2722_s28 + $0x278] ss:$12 sps:$4 sm:$0xff]  }
  0x74   : > { %1123 = vmatmul.mubr.bf16.gmra.mxu0 %v2561_v44  ;;  %1315 = vmatmul.mubr.bf16.gmra.mxu1 %v2562_v45  ;;  %v2644_v44 = vld [vmem:[%s2722_s28 + $0x1f8] ss:$12 sps:$4 sm:$0xff]   ;;  %v2645_v45 = vld [vmem:[%s2722_s28 + $0x290] ss:$12 sps:$4 sm:$0xff]  }
  0x75   : > { %1130 = vmatprep.mubr.bf16.mxu0 %v2563_v46  ;;  %1322 = vmatprep.mubr.bf16.mxu1 %v2565_v47  ;;  %v2646_v46 = vld [vmem:[%s2722_s28 + $0x214] ss:$12 sps:$4 sm:$0xff]  }
  0x76   : > { %v2648_v47 = vld [vmem:[%s2722_s28 + $0x2a8] ss:$12 sps:$4 sm:$0xff]  }
  0x7c   : > { %1131 = vmatmul.mubr.bf16.gmra.mxu0 %v2567_v48  ;;  %1323 = vmatmul.mubr.bf16.gmra.mxu1 %v2568_v49  ;;  %v2649_v48 = vld [vmem:[%s2722_s28 + $0x210] ss:$12 sps:$4 sm:$0xff]   ;;  %v2650_v49 = vld [vmem:[%s2722_s28 + $0x2c0] ss:$12 sps:$4 sm:$0xff]  }
  0x7d   : > { %1138 = vmatprep.mubr.bf16.mxu0 %v2570_v50  ;;  %1330 = vmatprep.mubr.bf16.mxu1 %v2572_v51  ;;  %v2651_v50 = vld [vmem:[%s2722_s28 + $0x22c] ss:$12 sps:$4 sm:$0xff]  }
  0x7e   : > { %v2653_v51 = vld [vmem:[%s2722_s28 + $0x2d8] ss:$12 sps:$4 sm:$0xff]  }
  0x84   : > { %1139 = vmatmul.mubr.bf16.gmra.mxu0 %v2574_v52  ;;  %1331 = vmatmul.mubr.bf16.gmra.mxu1 %v2575_v53  ;;  %v2654_v52 = vld [vmem:[%s2722_s28 + $0x228] ss:$12 sps:$4 sm:$0xff]   ;;  %v2655_v53 = vld [vmem:[%s2722_s28 + $0x2f0] ss:$12 sps:$4 sm:$0xff]  }
  0x85   : > { %1146 = vmatprep.mubr.bf16.mxu0 %v2576_v54  ;;  %2401 = vmatprep.mubr.msk.bf16.mxu1 %vm949_vm1, %v2578_v55 }
  0x8c   : > { %1147 = vmatmul.mubr.bf16.gmra.mxu0 %v2579_v56  ;;  %2402 = vmatmul.mubr.msk.bf16.vlgmr.msra.gmra.mxu1 %vm949_vm1, %v2580_v57 }
  0x8d   : > { %1154 = vmatprep.mubr.bf16.mxu0 %v2581_v58  ;;  %2405 = vmatprep.mubr.msk.bf16.mxu1 %vm949_vm1, %v2583_v59 }
  0x94   : > { %1155 = vmatmul.mubr.bf16.gmra.mxu0 %v2584_v60  ;;  %2406 = vmatmul.mubr.msk.bf16.gmra.mxu1 %vm949_vm1, %v2585_v61 }
  0x95   : > { %1162 = vmatprep.mubr.bf16.mxu0 %v2586_v62  ;;  %2409 = vmatprep.mubr.msk.bf16.mxu1 %vm949_vm1, %v2588_v63 }
  0x9c   : > { %1163 = vmatmul.mubr.bf16.gmra.mxu0 %v2589_v0  ;;  %2410 = vmatmul.mubr.msk.bf16.gmra.mxu1 %vm949_vm1, %v2590_v1 }
  0x9d   : > { %1170 = vmatprep.mubr.bf16.mxu0 %v2591_v2  ;;  %2413 = vmatprep.mubr.msk.bf16.mxu1 %vm949_vm1, %v2593_v3 }
  0xa4   : > { %1171 = vmatmul.mubr.bf16.gmra.mxu0 %v2594_v4  ;;  %2414 = vmatmul.mubr.msk.bf16.gmra.mxu1 %vm949_vm1, %v2595_v5 }
  0xa5   : > { %1178 = vmatprep.mubr.bf16.mxu0 %v2596_v6  ;;  %2417 = vmatprep.mubr.msk.bf16.mxu1 %vm949_vm1, %v2598_v7 }
  0xac   : > { %1179 = vmatmul.mubr.bf16.gmra.mxu0 %v2599_v8  ;;  %2418 = vmatmul.mubr.msk.bf16.gmra.mxu1 %vm949_vm1, %v2600_v9 }
  0xad   : > { %1186 = vmatprep.mubr.bf16.mxu0 %v2601_v10  ;;  %2421 = vmatprep.mubr.msk.bf16.mxu1 %vm949_vm1, %v2603_v11 }
  0xb4   : > { %1187 = vmatmul.mubr.bf16.gmra.mxu0 %v2604_v12  ;;  %2422 = vmatmul.mubr.msk.bf16.gmra.mxu1 %vm949_vm1, %v2605_v13 }
  0xb5   : > { %1194 = vmatprep.mubr.bf16.mxu0 %v2606_v14  ;;  %2425 = vmatprep.mubr.msk.bf16.mxu1 %vm949_vm1, %v2608_v15 }
  0xbc   : > { %1195 = vmatmul.mubr.bf16.gmra.mxu0 %v2609_v16  ;;  %2426 = vmatmul.mubr.msk.bf16.gmra.mxu1 %vm949_vm1, %v2610_v17 }
  0xbd   : > { %1202 = vmatprep.mubr.bf16.mxu0 %v2611_v18  ;;  %2429 = vmatprep.mubr.msk.bf16.mxu1 %vm949_vm1, %v2613_v19 }
  0xc4   : > { %1203 = vmatmul.mubr.bf16.gmra.mxu0 %v2614_v20  ;;  %2430 = vmatmul.mubr.msk.bf16.gmra.mxu1 %vm949_vm1, %v2615_v21 }
  0xc5   : > { %1210 = vmatprep.mubr.bf16.mxu0 %v2616_v22  ;;  %2433 = vmatprep.mubr.msk.bf16.mxu1 %vm949_vm1, %v2618_v23 }
  0xcc   : > { %1211 = vmatmul.mubr.bf16.gmra.mxu0 %v2619_v24  ;;  %2434 = vmatmul.mubr.msk.bf16.gmra.mxu1 %vm949_vm1, %v2620_v25 }
  0xcd   : > { %1218 = vmatprep.mubr.bf16.mxu0 %v2621_v26  ;;  %2437 = vmatprep.mubr.msk.bf16.mxu1 %vm949_vm1, %v2623_v27 }
  0xd4   : > { %1219 = vmatmul.mubr.bf16.gmra.mxu0 %v2624_v28  ;;  %2438 = vmatmul.mubr.msk.bf16.gmra.mxu1 %vm949_vm1, %v2625_v29 }
  0xd5   : > { %1226 = vmatprep.mubr.bf16.mxu0 %v2626_v30  ;;  %2441 = vmatprep.mubr.msk.bf16.mxu1 %vm949_vm1, %v2628_v31 }
  0xdc   : > { %1227 = vmatmul.mubr.bf16.gmra.mxu0 %v2629_v32  ;;  %2442 = vmatmul.mubr.msk.bf16.gmra.mxu1 %vm949_vm1, %v2630_v33 }
  0xdd   : > { %1234 = vmatprep.mubr.bf16.mxu0 %v2631_v34  ;;  %2445 = vmatprep.mubr.msk.bf16.mxu1 %vm949_vm1, %v2633_v35 }
  0xe4   : > { %1235 = vmatmul.mubr.bf16.gmra.mxu0 %v2634_v36  ;;  %2446 = vmatmul.mubr.msk.bf16.gmra.mxu1 %vm949_vm1, %v2635_v37 }
  0xe5   : > { %1242 = vmatprep.mubr.bf16.mxu0 %v2636_v38  ;;  %2449 = vmatprep.mubr.msk.bf16.mxu1 %vm949_vm1, %v2638_v39 }
  0xec   : > { %1243 = vmatmul.mubr.bf16.gmra.mxu0 %v2639_v40  ;;  %2450 = vmatmul.mubr.msk.bf16.gmra.mxu1 %vm949_vm1, %v2640_v41 }
  0xed   : > { %1250 = vmatprep.mubr.bf16.mxu0 %v2641_v42  ;;  %2453 = vmatprep.mubr.msk.bf16.mxu1 %vm949_vm1, %v2643_v43 }
  0xf4   : > { %1251 = vmatmul.mubr.bf16.gmra.mxu0 %v2644_v44  ;;  %2454 = vmatmul.mubr.msk.bf16.gmra.mxu1 %vm949_vm1, %v2645_v45 }
  0xf5   : > { %1258 = vmatprep.mubr.bf16.mxu0 %v2646_v46  ;;  %2457 = vmatprep.mubr.msk.bf16.mxu1 %vm949_vm1, %v2648_v47 }
  0xfc   : > { %1259 = vmatmul.mubr.bf16.gmra.mxu0 %v2649_v48  ;;  %2458 = vmatmul.mubr.msk.bf16.gmra.mxu1 %vm949_vm1, %v2650_v49 }
  0xfd   : > { %1266 = vmatprep.mubr.bf16.mxu0 %v2651_v50  ;;  %2461 = vmatprep.mubr.msk.bf16.mxu1 %vm949_vm1, %v2653_v51 }
 0x104   : > { %1267 = vmatmul.mubr.bf16.gmra.mxu0 %v2654_v52  ;;  %2462 = vmatmul.mubr.msk.bf16.gmra.mxu1 %vm949_vm1, %v2655_v53  ;;  %v2982_v52 = vld [vmem:[%s3252_s2] ss:$0 sm:$0xff] }
 0x10c   : > { %v2921_v54 = vpop.f32.mrf.mxu0  ;;  %v2923_v55 = vpop.f32.mrf.mxu1 }
 0x10e   : > { %v1086_v56 = vpop.f32.mrf.mxu0  ;;  %v1278_v57 = vpop.f32.mrf.mxu1 }
 0x110   : > { %v2925_v58 = vpop.f32.mrf.mxu0  ;;  %v2927_v59 = vpop.f32.mrf.mxu1 }
 0x112   : > { %v1089_v60 = vpop.f32.mrf.mxu0  ;;  %v1281_v61 = vpop.f32.mrf.mxu1 }
 0x114   : > { %v1092_v62 = vpop.f32.mrf.mxu0  ;;  %v2929_v63 = vpop.f32.mrf.mxu1 }
 0x115   : > { %v1093_v57 = vadd.f32 %v2982_v52, %v1092_v62 }
 0x116   : > { %v1094_v0 = vpop.f32.mrf.mxu0  ;;  %v1286_v1 = vpop.f32.mrf.mxu1 }
 0x117   : > { %v1085_v0 = vadd.f32 %v2982_v52, %v2921_v54  ;;  %v1088_v54 = vadd.f32 %v2982_v52, %v2925_v58 }
 0x118   : > { %v1095_v2 = vpop.f32.mrf.mxu0  ;;  %v2931_v3 = vpop.f32.mrf.mxu1 }
 0x11a   : > { %v1097_v4 = vpop.f32.mrf.mxu0  ;;  %v1289_v5 = vpop.f32.mrf.mxu1 }
 0x11c   : > { %v2933_v6 = vpop.f32.mrf.mxu0  ;;  %v2935_v7 = vpop.f32.mrf.mxu1 }
 0x11d   : > { %v1101_v58 = vadd.f32 %v2982_v52, %v2933_v6 }
 0x11e   : > { %v1102_v8 = vpop.f32.mrf.mxu0  ;;  %v1294_v9 = vpop.f32.mrf.mxu1 }
 0x11f   : > { %v1096_v8 = vadd.f32 %v2982_v52, %v1095_v2 }
 0x120   : > { %v2937_v10 = vpop.f32.mrf.mxu0  ;;  %v2939_v11 = vpop.f32.mrf.mxu1 }
 0x121   : > { %v1104_v6 = vadd.f32 %v2982_v52, %v2937_v10 }
 0x122   : > { %v1105_v12 = vpop.f32.mrf.mxu0  ;;  %v1297_v13 = vpop.f32.mrf.mxu1 }
 0x124   : > { %v1108_v14 = vpop.f32.mrf.mxu0  ;;  %v2941_v15 = vpop.f32.mrf.mxu1 }
 0x126   : > { %v1110_v16 = vpop.f32.mrf.mxu0  ;;  %v1302_v17 = vpop.f32.mrf.mxu1 }
 0x128   : > { %v2943_v18 = vpop.f32.mrf.mxu0  ;;  %v2945_v19 = vpop.f32.mrf.mxu1 }
 0x12a   : > { %v1113_v20 = vpop.f32.mrf.mxu0  ;;  %v1305_v21 = vpop.f32.mrf.mxu1 }
 0x12c   : > { %v2947_v22 = vpop.f32.mrf.mxu0  ;;  %v2949_v23 = vpop.f32.mrf.mxu1 }
 0x12d   : > { %v1117_v10 = vadd.f32 %v2982_v52, %v2947_v22 }
 0x12e   : > { %v1118_v24 = vpop.f32.mrf.mxu0  ;;  %v1310_v25 = vpop.f32.mrf.mxu1 }
 0x12f   : > { %v1109_v24 = vadd.f32 %v2982_v52, %v1108_v14  ;;  %v1112_v14 = vadd.f32 %v2982_v52, %v2943_v18 }
 0x130   : > { %v2951_v26 = vpop.f32.mrf.mxu0  ;;  %v2953_v27 = vpop.f32.mrf.mxu1 }
 0x131   : > { %v1120_v22 = vadd.f32 %v2982_v52, %v2951_v26 }
 0x132   : > { %v1121_v28 = vpop.f32.mrf.mxu0  ;;  %v1313_v29 = vpop.f32.mrf.mxu1 }
 0x134   : > { %v2955_v30 = vpop.f32.mrf.mxu0  ;;  %v2957_v31 = vpop.f32.mrf.mxu1 }
 0x135   : > { %v1125_v18 = vadd.f32 %v2982_v52, %v2955_v30 }
 0x136   : > { %v1126_v32 = vpop.f32.mrf.mxu0  ;;  %v1318_v33 = vpop.f32.mrf.mxu1 }
 0x138   : > { %v2959_v34 = vpop.f32.mrf.mxu0  ;;  %v2961_v35 = vpop.f32.mrf.mxu1 }
 0x139   : > { %v1128_v30 = vadd.f32 %v2982_v52, %v2959_v34 }
 0x13a   : > { %v1129_v36 = vpop.f32.mrf.mxu0  ;;  %v1321_v37 = vpop.f32.mrf.mxu1 }
 0x13c   : > { %v2963_v38 = vpop.f32.mrf.mxu0  ;;  %v2965_v39 = vpop.f32.mrf.mxu1 }
 0x13d   : > { %v1133_v26 = vadd.f32 %v2982_v52, %v2963_v38 }
 0x13e   : > { %v1134_v40 = vpop.f32.mrf.mxu0  ;;  %v1326_v41 = vpop.f32.mrf.mxu1 }
 0x140   : > { %v2967_v42 = vpop.f32.mrf.mxu0  ;;  %v2969_v43 = vpop.f32.mrf.mxu1 }
 0x141   : > { %v1136_v38 = vadd.f32 %v2982_v52, %v2967_v42 }
 0x142   : > { %v1137_v44 = vpop.f32.mrf.mxu0  ;;  %v1329_v45 = vpop.f32.mrf.mxu1 }
 0x144   : > { %v2971_v46 = vpop.f32.mrf.mxu0  ;;  %v2973_v47 = vpop.f32.mrf.mxu1 }
 0x145   : > { %v1141_v34 = vadd.f32 %v2982_v52, %v2971_v46 }
 0x146   : > { %v1142_v48 = vpop.f32.mrf.mxu0  ;;  %v1334_v49 = vpop.f32.mrf.mxu1 }
 0x148   : > { %v2975_v50 = vpop.f32.mrf.mxu0  ;;  %v2977_v51 = vpop.f32.mrf.mxu1 }
 0x149   : > { %v1144_v46 = vadd.f32 %v2982_v52, %v2975_v50 }
 0x14a   : > { %v1145_v53 = vpop.f32.mrf.mxu0  ;;  %v1337_v56 = vpop.f32.mrf.mxu1 }
 0x14c   : > { %v2985_v60 = vpop.f32.mrf.mxu0  ;;  %v2403_v61 = vpop.f32.mrf.mxu1 }
 0x14d   : > { %v1382_v1 = vadd.f32 %v2403_v61, %v1093_v57  ;;  %v1149_v42 = vadd.f32 %v2982_v52, %v2985_v60 }
 0x14e   : > { %v1150_v4 = vpop.f32.mrf.mxu0  ;;  %v1373_v5 = vpop.f32.mrf.mxu1 }
 0x14f   : > { %v1630_v9 = vmax.f32 %v1382_v1, 0.0  ;;  %v1374_v12 = vadd.f32 %v1373_v5, %v1085_v0 }
 0x150   : > { %v2996_v62 = vpop.f32.mrf.mxu0  ;;  %v2404_v13 = vpop.f32.mrf.mxu1 }
 0x151   : > { %v2295_v16 = vpack.c.bf16 %v1630_v9, %v1630_v9  ;;  %v1628_v17 = vmax.f32 %v1374_v12, 0.0  ;;  %v1385_v20 = vadd.f32 %v2404_v13, %v1096_v8  ;;  %v1152_v60 = vadd.f32 %v2982_v52, %v2996_v62 }
 0x152   : > { %v1153_v2 = vpop.f32.mrf.mxu0  ;;  %v1376_v21 = vpop.f32.mrf.mxu1 }
 0x153   : > { %1951 = vst.msk [vmem:[%s2994_s13 + $0x8] sm:$0xf] %vm1948_vm2, %v2295_v16  ;;  %v2293_v25 = vpack.c.bf16 %v1628_v17, %v1628_v17  ;;  %v1631_v28 = vmax.f32 %v1385_v20, 0.0  ;;  %v1377_v29 = vadd.f32 %v1376_v21, %v1088_v54 }
 0x154   : > { %v3003_v32 = vpop.f32.mrf.mxu0  ;;  %v2407_v33 = vpop.f32.mrf.mxu1 }
 0x155   : > { %1949 = vst.msk [vmem:[%s2994_s13] sm:$0xf] %vm1948_vm2, %v2293_v25  ;;  %v2296_v36 = vpack.c.bf16 %v1631_v28, %v1631_v28  ;;  %v1629_v37 = vmax.f32 %v1377_v29, 0.0  ;;  %v1398_v40 = vadd.f32 %v2407_v33, %v1109_v24  ;;  %v1157_v50 = vadd.f32 %v2982_v52, %v3003_v32 }
 0x156   : > { %v1158_v41 = vpop.f32.mrf.mxu0  ;;  %v1389_v44 = vpop.f32.mrf.mxu1 }
 0x157   : > { %1952 = vst.msk [vmem:[%s2994_s13 + $0xc] sm:$0xf] %vm1948_vm2, %v2296_v36  ;;  %v2294_v45 = vpack.c.bf16 %v1629_v37, %v1629_v37  ;;  %v1634_v48 = vmax.f32 %v1398_v40, 0.0  ;;  %v1390_v49 = vadd.f32 %v1389_v44, %v1101_v58 }
 0x158   : > { %v3013_v53 = vpop.f32.mrf.mxu0  ;;  %v2408_v56 = vpop.f32.mrf.mxu1 }
 0x159   : > { %1950 = vst.msk [vmem:[%s2994_s13 + $0x4] sm:$0xf] %vm1948_vm2, %v2294_v45  ;;  %v2299_v57 = vpack.c.bf16 %v1634_v48, %v1634_v48  ;;  %v1632_v61 = vmax.f32 %v1390_v49, 0.0  ;;  %v1401_v0 = vadd.f32 %v2408_v56, %v1112_v14  ;;  %v1160_v32 = vadd.f32 %v2982_v52, %v3013_v53 }
 0x15a   : > { %v1161_v1 = vpop.f32.mrf.mxu0  ;;  %v1392_v4 = vpop.f32.mrf.mxu1 }
 0x15b   : > { %1955 = vst.msk [vmem:[%s2994_s13 + $0x18] sm:$0xf] %vm1948_vm2, %v2299_v57  ;;  %v2297_v5 = vpack.c.bf16 %v1632_v61, %v1632_v61  ;;  %v1635_v8 = vmax.f32 %v1401_v0, 0.0  ;;  %v1393_v9 = vadd.f32 %v1392_v4, %v1104_v6 }
 0x15c   : > { %v3023_v12 = vpop.f32.mrf.mxu0  ;;  %v2411_v13 = vpop.f32.mrf.mxu1 }
 0x15d   : > { %1953 = vst.msk [vmem:[%s2994_s13 + $0x10] sm:$0xf] %vm1948_vm2, %v2297_v5  ;;  %v2300_v54 = vpack.c.bf16 %v1635_v8, %v1635_v8  ;;  %v1633_v16 = vmax.f32 %v1393_v9, 0.0  ;;  %v1414_v17 = vadd.f32 %v2411_v13, %v1125_v18  ;;  %v1165_v62 = vadd.f32 %v2982_v52, %v3023_v12 }
 0x15e   : > { %v1166_v20 = vpop.f32.mrf.mxu0  ;;  %v1405_v2 = vpop.f32.mrf.mxu1 }
 0x15f   : > { %1956 = vst.msk [vmem:[%s2994_s13 + $0x1c] sm:$0xf] %vm1948_vm2, %v2300_v54  ;;  %v2298_v21 = vpack.c.bf16 %v1633_v16, %v1633_v16  ;;  %v1638_v24 = vmax.f32 %v1414_v17, 0.0  ;;  %v1406_v25 = vadd.f32 %v1405_v2, %v1117_v10 }
 0x160   : > { %v3033_v28 = vpop.f32.mrf.mxu0  ;;  %v2412_v29 = vpop.f32.mrf.mxu1 }
 0x161   : > { %1954 = vst.msk [vmem:[%s2994_s13 + $0x14] sm:$0xf] %vm1948_vm2, %v2298_v21  ;;  %v2303_v33 = vpack.c.bf16 %v1638_v24, %v1638_v24  ;;  %v1636_v58 = vmax.f32 %v1406_v25, 0.0  ;;  %v1417_v36 = vadd.f32 %v2412_v29, %v1128_v30  ;;  %v1168_v12 = vadd.f32 %v2982_v52, %v3033_v28 }
 0x162   : > { %v1169_v37 = vpop.f32.mrf.mxu0  ;;  %v1408_v40 = vpop.f32.mrf.mxu1 }
 0x163   : > { %1959 = vst.msk [vmem:[%s2994_s13 + $0x28] sm:$0xf] %vm1948_vm2, %v2303_v33  ;;  %v2301_v41 = vpack.c.bf16 %v1636_v58, %v1636_v58  ;;  %v1639_v44 = vmax.f32 %v1417_v36, 0.0  ;;  %v1409_v14 = vadd.f32 %v1408_v40, %v1120_v22 }
 0x164   : > { %v1172_v45 = vpop.f32.mrf.mxu0  ;;  %v2415_v48 = vpop.f32.mrf.mxu1 }
 0x165   : > { %1957 = vst.msk [vmem:[%s2994_s13 + $0x20] sm:$0xf] %vm1948_vm2, %v2301_v41  ;;  %v2304_v49 = vpack.c.bf16 %v1639_v44, %v1639_v44  ;;  %v1637_v56 = vmax.f32 %v1409_v14, 0.0  ;;  %v1430_v6 = vadd.f32 %v2415_v48, %v1141_v34  ;;  %v1173_v53 = vadd.f32 %v2982_v52, %v1172_v45 }
 0x166   : > { %v1174_v57 = vpop.f32.mrf.mxu0  ;;  %v1421_v61 = vpop.f32.mrf.mxu1 }
 0x167   : > { %1960 = vst.msk [vmem:[%s2994_s13 + $0x2c] sm:$0xf] %vm1948_vm2, %v2304_v49  ;;  %v2302_v0 = vpack.c.bf16 %v1637_v56, %v1637_v56  ;;  %v1642_v1 = vmax.f32 %v1430_v6, 0.0  ;;  %v1422_v4 = vadd.f32 %v1421_v61, %v1133_v26 }
 0x168   : > { %v1175_v18 = vpop.f32.mrf.mxu0  ;;  %v2416_v5 = vpop.f32.mrf.mxu1 }
 0x169   : > { %1958 = vst.msk [vmem:[%s2994_s13 + $0x24] sm:$0xf] %vm1948_vm2, %v2302_v0  ;;  %v2307_v8 = vpack.c.bf16 %v1642_v1, %v1642_v1  ;;  %v1640_v9 = vmax.f32 %v1422_v4, 0.0  ;;  %v1433_v13 = vadd.f32 %v2416_v5, %v1144_v46  ;;  %v1176_v45 = vadd.f32 %v2982_v52, %v1175_v18 }
 0x16a   : > { %v1177_v10 = vpop.f32.mrf.mxu0  ;;  %v1424_v54 = vpop.f32.mrf.mxu1 }
 0x16b   : > { %1963 = vst.msk [vmem:[%s2994_s13 + $0x38] sm:$0xf] %vm1948_vm2, %v2307_v8  ;;  %v2305_v16 = vpack.c.bf16 %v1640_v9, %v1640_v9  ;;  %v1643_v17 = vmax.f32 %v1433_v13, 0.0  ;;  %v1425_v20 = vadd.f32 %v1424_v54, %v1136_v38 }
 0x16c   : > { %v1180_v2 = vpop.f32.mrf.mxu0  ;;  %v2419_v30 = vpop.f32.mrf.mxu1 }
 0x16d   : > { %1961 = vst.msk [vmem:[%s2994_s13 + $0x30] sm:$0xf] %vm1948_vm2, %v2305_v16  ;;  %v2308_v21 = vpack.c.bf16 %v1643_v17, %v1643_v17  ;;  %v1641_v24 = vmax.f32 %v1425_v20, 0.0  ;;  %v1446_v25 = vadd.f32 %v2419_v30, %v1157_v50  ;;  %v1181_v28 = vadd.f32 %v2982_v52, %v1180_v2 }
 0x16e   : > { %v1182_v29 = vpop.f32.mrf.mxu0  ;;  %v1437_v22 = vpop.f32.mrf.mxu1 }
 0x16f   : > { %1964 = vst.msk [vmem:[%s2994_s13 + $0x3c] sm:$0xf] %vm1948_vm2, %v2308_v21  ;;  %v2306_v33 = vpack.c.bf16 %v1641_v24, %v1641_v24  ;;  %v1646_v58 = vmax.f32 %v1446_v25, 0.0  ;;  %v1438_v36 = vadd.f32 %v1437_v22, %v1149_v42 }
 0x170   : > { %v1183_v37 = vpop.f32.mrf.mxu0  ;;  %v2420_v40 = vpop.f32.mrf.mxu1 }
 0x171   : > { %1962 = vst.msk [vmem:[%s2994_s13 + $0x34] sm:$0xf] %vm1948_vm2, %v2306_v33  ;;  %v2311_v34 = vpack.c.bf16 %v1646_v58, %v1646_v58  ;;  %v1644_v41 = vmax.f32 %v1438_v36, 0.0  ;;  %v1449_v44 = vadd.f32 %v2420_v40, %v1160_v32  ;;  %v1184_v2 = vadd.f32 %v2982_v52, %v1183_v37 }
 0x172   : > { %v1185_v14 = vpop.f32.mrf.mxu0  ;;  %v1440_v48 = vpop.f32.mrf.mxu1 }
 0x173   : > { %1967 = vst.msk [vmem:[%s2994_s13 + $0x48] sm:$0xf] %vm1948_vm2, %v2311_v34  ;;  %v2309_v26 = vpack.c.bf16 %v1644_v41, %v1644_v41  ;;  %v1647_v49 = vmax.f32 %v1449_v44, 0.0  ;;  %v1441_v56 = vadd.f32 %v1440_v48, %v1152_v60 }
 0x174   : > { %v1188_v6 = vpop.f32.mrf.mxu0  ;;  %v2423_v57 = vpop.f32.mrf.mxu1 }
 0x175   : > { %1965 = vst.msk [vmem:[%s2994_s13 + $0x40] sm:$0xf] %vm1948_vm2, %v2309_v26  ;;  %v2312_v61 = vpack.c.bf16 %v1647_v49, %v1647_v49  ;;  %v1645_v46 = vmax.f32 %v1441_v56, 0.0  ;;  %v1462_v0 = vadd.f32 %v2423_v57, %v1173_v53  ;;  %v1189_v18 = vadd.f32 %v2982_v52, %v1188_v6 }
 0x176   : > { %v1190_v1 = vpop.f32.mrf.mxu0  ;;  %v1453_v4 = vpop.f32.mrf.mxu1 }
 0x177   : > { %1968 = vst.msk [vmem:[%s2994_s13 + $0x4c] sm:$0xf] %vm1948_vm2, %v2312_v61  ;;  %v2310_v5 = vpack.c.bf16 %v1645_v46, %v1645_v46  ;;  %v1650_v38 = vmax.f32 %v1462_v0, 0.0  ;;  %v1454_v8 = vadd.f32 %v1453_v4, %v1165_v62 }
 0x178   : > { %v1191_v9 = vpop.f32.mrf.mxu0  ;;  %v2424_v13 = vpop.f32.mrf.mxu1 }
 0x179   : > { %1966 = vst.msk [vmem:[%s2994_s13 + $0x44] sm:$0xf] %vm1948_vm2, %v2310_v5  ;;  %v2315_v10 = vpack.c.bf16 %v1650_v38, %v1650_v38  ;;  %v1648_v54 = vmax.f32 %v1454_v8, 0.0  ;;  %v1465_v50 = vadd.f32 %v2424_v13, %v1176_v45  ;;  %v1192_v58 = vadd.f32 %v2982_v52, %v1191_v9 }
 0x17a   : > { %v1193_v16 = vpop.f32.mrf.mxu0  ;;  %v1456_v17 = vpop.f32.mrf.mxu1 }
 0x17b   : > { %1971 = vst.msk [vmem:[%s2994_s13 + $0x58] sm:$0xf] %vm1948_vm2, %v2315_v10  ;;  %v2313_v20 = vpack.c.bf16 %v1648_v54, %v1648_v54  ;;  %v1651_v30 = vmax.f32 %v1465_v50, 0.0  ;;  %v1457_v42 = vadd.f32 %v1456_v17, %v1168_v12 }
 0x17c   : > { %v1196_v21 = vpop.f32.mrf.mxu0  ;;  %v2427_v24 = vpop.f32.mrf.mxu1 }
 0x17d   : > { %1969 = vst.msk [vmem:[%s2994_s13 + $0x50] sm:$0xf] %vm1948_vm2, %v2313_v20  ;;  %v2316_v25 = vpack.c.bf16 %v1651_v30, %v1651_v30  ;;  %v1649_v29 = vmax.f32 %v1457_v42, 0.0  ;;  %v1478_v22 = vadd.f32 %v2427_v24, %v1189_v18  ;;  %v1197_v61 = vadd.f32 %v2982_v52, %v1196_v21 }
 0x17e   : > { %v1198_v32 = vpop.f32.mrf.mxu0  ;;  %v1469_v33 = vpop.f32.mrf.mxu1 }
 0x17f   : > { %1972 = vst.msk [vmem:[%s2994_s13 + $0x5c] sm:$0xf] %vm1948_vm2, %v2316_v25  ;;  %v2314_v36 = vpack.c.bf16 %v1649_v29, %v1649_v29  ;;  %v1654_v40 = vmax.f32 %v1478_v22, 0.0  ;;  %v1470_v60 = vadd.f32 %v1469_v33, %v1181_v28 }
 0x180   : > { %v1199_v34 = vpop.f32.mrf.mxu0  ;;  %v2428_v41 = vpop.f32.mrf.mxu1 }
 0x181   : > { %1970 = vst.msk [vmem:[%s2994_s13 + $0x54] sm:$0xf] %vm1948_vm2, %v2314_v36  ;;  %v2319_v44 = vpack.c.bf16 %v1654_v40, %v1654_v40  ;;  %v1652_v14 = vmax.f32 %v1470_v60, 0.0  ;;  %v1481_v48 = vadd.f32 %v2428_v41, %v1192_v58  ;;  %v1200_v13 = vadd.f32 %v2982_v52, %v1199_v34 }
 0x182   : > { %v1201_v53 = vpop.f32.mrf.mxu0  ;;  %v1472_v26 = vpop.f32.mrf.mxu1 }
 0x183   : > { %1975 = vst.msk [vmem:[%s2994_s13 + $0x68] sm:$0xf] %vm1948_vm2, %v2319_v44  ;;  %v2317_v49 = vpack.c.bf16 %v1652_v14, %v1652_v14  ;;  %v1655_v56 = vmax.f32 %v1481_v48, 0.0  ;;  %v1473_v6 = vadd.f32 %v1472_v26, %v1184_v2 }
 0x184   : > { %v1204_v57 = vpop.f32.mrf.mxu0  ;;  %v2431_v62 = vpop.f32.mrf.mxu1 }
 0x185   : > { %1973 = vst.msk [vmem:[%s2994_s13 + $0x60] sm:$0xf] %vm1948_vm2, %v2317_v49  ;;  %v2320_v37 = vpack.c.bf16 %v1655_v56, %v1655_v56  ;;  %v1653_v46 = vmax.f32 %v1473_v6, 0.0  ;;  %v1205_v0 = vadd.f32 %v2982_v52, %v1204_v57 }
 0x186   : > { %v1206_v1 = vpop.f32.mrf.mxu0  ;;  %v1485_v4 = vpop.f32.mrf.mxu1 }
 0x187   : > { %1976 = vst.msk [vmem:[%s2994_s13 + $0x6c] sm:$0xf] %vm1948_vm2, %v2320_v37  ;;  %v2318_v45 = vpack.c.bf16 %v1653_v46, %v1653_v46  ;;  %v1494_v5 = vadd.f32 %v2431_v62, %v1205_v0  ;;  %v1486_v38 = vadd.f32 %v1485_v4, %v1197_v61 }
 0x188   : > { %v1207_v8 = vpop.f32.mrf.mxu0  ;;  %v2432_v9 = vpop.f32.mrf.mxu1 }
 0x189   : > { %1974 = vst.msk [vmem:[%s2994_s13 + $0x64] sm:$0xf] %vm1948_vm2, %v2318_v45  ;;  %v1658_v12 = vmax.f32 %v1494_v5, 0.0  ;;  %v1656_v10 = vmax.f32 %v1486_v38, 0.0  ;;  %v1208_v54 = vadd.f32 %v2982_v52, %v1207_v8 }
 0x18a   : > { %v1209_v50 = vpop.f32.mrf.mxu0  ;;  %v1488_v16 = vpop.f32.mrf.mxu1 }
 0x18b   : > { %v2323_v17 = vpack.c.bf16 %v1658_v12, %v1658_v12  ;;  %v2321_v18 = vpack.c.bf16 %v1656_v10, %v1656_v10  ;;  %v1497_v20 = vadd.f32 %v2432_v9, %v1208_v54  ;;  %v1489_v30 = vadd.f32 %v1488_v16, %v1200_v13 }
 0x18c   : > { %v1212_v42 = vpop.f32.mrf.mxu0  ;;  %v2435_v21 = vpop.f32.mrf.mxu1 }
 0x18d   : > { %1979 = vst.msk [vmem:[%s2994_s13 + $0x78] sm:$0xf] %vm1948_vm2, %v2323_v17  ;;  %1977 = vst.msk [vmem:[%s2994_s13 + $0x70] sm:$0xf] %vm1948_vm2, %v2321_v18  ;;  %v1659_v24 = vmax.f32 %v1497_v20, 0.0  ;;  %v1657_v28 = vmax.f32 %v1489_v30, 0.0  ;;  %v1213_v25 = vadd.f32 %v2982_v52, %v1212_v42 }
 0x18e   : > { %v1214_v29 = vpop.f32.mrf.mxu0  ;;  %v1501_v22 = vpop.f32.mrf.mxu1 }
 0x18f   : > { %v2324_v32 = vpack.c.bf16 %v1659_v24, %v1659_v24  ;;  %v2322_v33 = vpack.c.bf16 %v1657_v28, %v1657_v28  ;;  %v1502_v58 = vadd.f32 %v1501_v22, %v1213_v25 }
 0x190   : > { %v1215_v36 = vpop.f32.mrf.mxu0  ;;  %v2436_v40 = vpop.f32.mrf.mxu1 }
 0x191   : > { %1980 = vst.msk [vmem:[%s2994_s13 + $0x7c] sm:$0xf] %vm1948_vm2, %v2324_v32  ;;  %1978 = vst.msk [vmem:[%s2994_s13 + $0x74] sm:$0xf] %vm1948_vm2, %v2322_v33  ;;  %v1660_v60 = vmax.f32 %v1502_v58, 0.0  ;;  %v1216_v34 = vadd.f32 %v2982_v52, %v1215_v36 }
 0x192   : > { %v1217_v41 = vpop.f32.mrf.mxu0  ;;  %v1504_v2 = vpop.f32.mrf.mxu1 }
 0x193   : > { %v2325_v44 = vpack.c.bf16 %v1660_v60, %v1660_v60  ;;  %v1505_v14 = vadd.f32 %v1504_v2, %v1216_v34 }
 0x194   : > { %v1220_v48 = vpop.f32.mrf.mxu0  ;;  %v2439_v53 = vpop.f32.mrf.mxu1 }
 0x195   : > { %1981 = vst.msk [vmem:[%s2994_s13 + $0x80] sm:$0xf] %vm1948_vm2, %v2325_v44  ;;  %v1661_v26 = vmax.f32 %v1505_v14, 0.0  ;;  %v1221_v49 = vadd.f32 %v2982_v52, %v1220_v48  ;;  %v1285_v14 = vadd.f32 %v2982_v52, %v2929_v63 }
 0x196   : > { %v1222_v56 = vpop.f32.mrf.mxu0  ;;  %v1517_v6 = vpop.f32.mrf.mxu1 }
 0x197   : > { %v2326_v57 = vpack.c.bf16 %v1661_v26, %v1661_v26  ;;  %v1510_v62 = vadd.f32 %v2435_v21, %v1221_v49 }
 0x198   : > { %v1223_v61 = vpop.f32.mrf.mxu0  ;;  %v2440_v37 = vpop.f32.mrf.mxu1 }
 0x199   : > { %1982 = vst.msk [vmem:[%s2994_s13 + $0x84] sm:$0xf] %vm1948_vm2, %v2326_v57  ;;  %v1662_v46 = vmax.f32 %v1510_v62, 0.0  ;;  %v1224_v0 = vadd.f32 %v2982_v52, %v1223_v61 }
 0x19a   : > { %v1225_v1 = vpop.f32.mrf.mxu0  ;;  %v1520_v4 = vpop.f32.mrf.mxu1 }
 0x19b   : > { %v2327_v45 = vpack.c.bf16 %v1662_v46, %v1662_v46  ;;  %v1513_v5 = vadd.f32 %v2436_v40, %v1224_v0 }
 0x19c   : > { %v1228_v38 = vpop.f32.mrf.mxu0  ;;  %v3125_v8 = vpop.f32.mrf.mxu1 }
 0x19d   : > { %1983 = vst.msk [vmem:[%s2994_s13 + $0x88] sm:$0xf] %vm1948_vm2, %v2327_v45  ;;  %v1663_v9 = vmax.f32 %v1513_v5, 0.0  ;;  %v1229_v13 = vadd.f32 %v2982_v52, %v1228_v38  ;;  %v1288_v45 = vadd.f32 %v2982_v52, %v2931_v3 }
 0x19e   : > { %v1230_v12 = vpop.f32.mrf.mxu0  ;;  %v1533_v10 = vpop.f32.mrf.mxu1 }
 0x19f   : > { %v2328_v54 = vpack.c.bf16 %v1663_v9, %v1663_v9  ;;  %v1518_v50 = vadd.f32 %v1517_v6, %v1229_v13 }
 0x1a0   : > { %v1231_v16 = vpop.f32.mrf.mxu0  ;;  %v3130_v17 = vpop.f32.mrf.mxu1 }
 0x1a1   : > { %1984 = vst.msk [vmem:[%s2994_s13 + $0x8c] sm:$0xf] %vm1948_vm2, %v2328_v54  ;;  %v1664_v18 = vmax.f32 %v1518_v50, 0.0  ;;  %v1232_v20 = vadd.f32 %v2982_v52, %v1231_v16 }
 0x1a2   : > { %v1233_v30 = vpop.f32.mrf.mxu0  ;;  %v1536_v42 = vpop.f32.mrf.mxu1 }
 0x1a3   : > { %v2329_v21 = vpack.c.bf16 %v1664_v18, %v1664_v18  ;;  %v1521_v24 = vadd.f32 %v1520_v4, %v1232_v20 }
 0x1a4   : > { %v1236_v28 = vpop.f32.mrf.mxu0  ;;  %v3135_v25 = vpop.f32.mrf.mxu1 }
 0x1a5   : > { %1985 = vst.msk [vmem:[%s2994_s13 + $0x90] sm:$0xf] %vm1948_vm2, %v2329_v21  ;;  %v1665_v29 = vmax.f32 %v1521_v24, 0.0  ;;  %v1237_v22 = vadd.f32 %v2982_v52, %v1236_v28 }
 0x1a6   : > { %v1238_v32 = vpop.f32.mrf.mxu0  ;;  %v3140_v33 = vpop.f32.mrf.mxu1 }
 0x1a7   : > { %v2330_v58 = vpack.c.bf16 %v1665_v29, %v1665_v29  ;;  %v1526_v36 = vadd.f32 %v2439_v53, %v1237_v22  ;;  %v1277_v53 = vadd.f32 %v2982_v52, %v2923_v55  ;;  %v1293_v32 = vadd.f32 %v2982_v52, %v2935_v7 }
 0x1a8   : > { %v1239_v40 = vpop.f32.mrf.mxu0  ;;  %v3142_v60 = vpop.f32.mrf.mxu1 }
 0x1a9   : > { %1986 = vst.msk [vmem:[%s2994_s13 + $0x94] sm:$0xf] %vm1948_vm2, %v2330_v58  ;;  %v1666_v34 = vmax.f32 %v1526_v36, 0.0  ;;  %v1240_v41 = vadd.f32 %v2982_v52, %v1239_v40 }
 0x1aa   : > { %v1241_v2 = vpop.f32.mrf.mxu0  ;;  %v3147_v44 = vpop.f32.mrf.mxu1 }
 0x1ab   : > { %v2331_v48 = vpack.c.bf16 %v1666_v34, %v1666_v34  ;;  %v1529_v26 = vadd.f32 %v2440_v37, %v1240_v41  ;;  %v1280_v37 = vadd.f32 %v2982_v52, %v2927_v59 }
 0x1ac   : > { %v1244_v49 = vpop.f32.mrf.mxu0  ;;  %v2451_v56 = vpop.f32.mrf.mxu1 }
 0x1ad   : > { %1987 = vst.msk [vmem:[%s2994_s13 + $0x98] sm:$0xf] %vm1948_vm2, %v2331_v48  ;;  %v1667_v6 = vmax.f32 %v1529_v26, 0.0  ;;  %v1245_v57 = vadd.f32 %v2982_v52, %v1244_v49  ;;  %v1574_v62 = vadd.f32 %v2451_v56, %v1285_v14  ;;  %v1296_v48 = vadd.f32 %v2982_v52, %v2939_v11 }
 0x1ae   : > { %v1246_v61 = vpop.f32.mrf.mxu0  ;;  %v1565_v46 = vpop.f32.mrf.mxu1 }
 0x1af   : > { %v2332_v0 = vpack.c.bf16 %v1667_v6, %v1667_v6  ;;  %v1534_v1 = vadd.f32 %v1533_v10, %v1245_v57  ;;  %v1678_v4 = vmax.f32 %v1574_v62, 0.0  ;;  %v1566_v63 = vadd.f32 %v1565_v46, %v1277_v53 }
 0x1b0   : > { %v1247_v55 = vpop.f32.mrf.mxu0  ;;  %v2452_v5 = vpop.f32.mrf.mxu1  ;;  %v1301_v10 = vadd.f32 %v2982_v52, %v2941_v15 }
 0x1b1   : > { %1988 = vst.msk [vmem:[%s2994_s13 + $0x9c] sm:$0xf] %vm1948_vm2, %v2332_v0  ;;  %v1668_v38 = vmax.f32 %v1534_v1, 0.0  ;;  %v2343_v9 = vpack.c.bf16 %v1678_v4, %v1678_v4  ;;  %v1676_v13 = vmax.f32 %v1566_v63, 0.0  ;;  %v1248_v12 = vadd.f32 %v2982_v52, %v1247_v55 }
 0x1b2   : > { %v1577_v54 = vadd.f32 %v2452_v5, %v1288_v45  ;;  %v1249_v50 = vpop.f32.mrf.mxu0  ;;  %v1568_v59 = vpop.f32.mrf.mxu1  ;;  %v1309_v1 = vadd.f32 %v2982_v52, %v2949_v23  ;;  %v1317_v4 = vadd.f32 %v2982_v52, %v2957_v31 }
 0x1b3   : > { %v2333_v16 = vpack.c.bf16 %v1668_v38, %v1668_v38  ;;  %1999 = vst.msk [vmem:[%s2994_s13 + $0xc8] sm:$0xf] %vm1948_vm2, %v2343_v9  ;;  %v2341_v3 = vpack.c.bf16 %v1676_v13, %v1676_v13  ;;  %v1537_v18 = vadd.f32 %v1536_v42, %v1248_v12  ;;  %v1569_v20 = vadd.f32 %v1568_v59, %v1280_v37 }
 0x1b4   : > { %v1679_v30 = vmax.f32 %v1577_v54, 0.0  ;;  %v1252_v21 = vpop.f32.mrf.mxu0  ;;  %v2455_v24 = vpop.f32.mrf.mxu1  ;;  %v1304_v42 = vadd.f32 %v2982_v52, %v2945_v19  ;;  %v1320_v9 = vadd.f32 %v2982_v52, %v2961_v35 }
 0x1b5   : > { %1989 = vst.msk [vmem:[%s2994_s13 + $0xa0] sm:$0xf] %vm1948_vm2, %v2333_v16  ;;  %1997 = vst.msk [vmem:[%s2994_s13 + $0xc0] sm:$0xf] %vm1948_vm2, %v2341_v3  ;;  %v1669_v28 = vmax.f32 %v1537_v18, 0.0  ;;  %v1677_v29 = vmax.f32 %v1569_v20, 0.0  ;;  %v1253_v15 = vadd.f32 %v2982_v52, %v1252_v21  ;;  %v1590_v22 = vadd.f32 %v2455_v24, %v1301_v10 }
 0x1b6   : > { %v2344_v58 = vpack.c.bf16 %v1679_v30, %v1679_v30  ;;  %v1254_v36 = vpop.f32.mrf.mxu0  ;;  %v1581_v40 = vpop.f32.mrf.mxu1  ;;  %v1312_v21 = vadd.f32 %v2982_v52, %v2953_v27 }
 0x1b7   : > { %v2334_v34 = vpack.c.bf16 %v1669_v28, %v1669_v28  ;;  %v2342_v41 = vpack.c.bf16 %v1677_v29, %v1677_v29  ;;  %v1542_v2 = vadd.f32 %v3125_v8, %v1253_v15  ;;  %v1682_v14 = vmax.f32 %v1590_v22, 0.0 }
 0x1b8   : > { %2000 = vst.msk [vmem:[%s2994_s13 + $0xcc] sm:$0xf] %vm1948_vm2, %v2344_v58  ;;  %v1582_v26 = vadd.f32 %v1581_v40, %v1293_v32  ;;  %v1255_v49 = vpop.f32.mrf.mxu0  ;;  %v2456_v7 = vpop.f32.mrf.mxu1  ;;  %v1325_v58 = vadd.f32 %v2982_v52, %v2965_v39 }
 0x1b9   : > { %1990 = vst.msk [vmem:[%s2994_s13 + $0xa4] sm:$0xf] %vm1948_vm2, %v2334_v34  ;;  %1998 = vst.msk [vmem:[%s2994_s13 + $0xc4] sm:$0xf] %vm1948_vm2, %v2342_v41  ;;  %v1670_v19 = vmax.f32 %v1542_v2, 0.0  ;;  %v2347_v56 = vpack.c.bf16 %v1682_v14, %v1682_v14  ;;  %v1256_v53 = vadd.f32 %v2982_v52, %v1255_v49  ;;  %v1593_v8 = vadd.f32 %v2456_v7, %v1304_v42 }
 0x1ba   : > { %v1680_v6 = vmax.f32 %v1582_v26, 0.0  ;;  %v1257_v57 = vpop.f32.mrf.mxu0  ;;  %v1584_v62 = vpop.f32.mrf.mxu1 }
 0x1bb   : > { %v2335_v61 = vpack.c.bf16 %v1670_v19, %v1670_v19  ;;  %2003 = vst.msk [vmem:[%s2994_s13 + $0xd8] sm:$0xf] %vm1948_vm2, %v2347_v56  ;;  %v1545_v11 = vadd.f32 %v3130_v17, %v1256_v53  ;;  %v1683_v46 = vmax.f32 %v1593_v8, 0.0  ;;  %v1585_v0 = vadd.f32 %v1584_v62, %v1296_v48 }
 0x1bc   : > { %v2345_v63 = vpack.c.bf16 %v1680_v6, %v1680_v6  ;;  %v1260_v37 = vpop.f32.mrf.mxu0  ;;  %v2459_v45 = vpop.f32.mrf.mxu1  ;;  %v1328_v19 = vadd.f32 %v2982_v52, %v2969_v43  ;;  %v1336_v56 = vadd.f32 %v2982_v52, %v2977_v51 }
 0x1bd   : > { %1991 = vst.msk [vmem:[%s2994_s13 + $0xa8] sm:$0xf] %vm1948_vm2, %v2335_v61  ;;  %v1671_v55 = vmax.f32 %v1545_v11, 0.0  ;;  %v2348_v5 = vpack.c.bf16 %v1683_v46, %v1683_v46  ;;  %v1681_v38 = vmax.f32 %v1585_v0, 0.0  ;;  %v1261_v17 = vadd.f32 %v2982_v52, %v1260_v37 }
 0x1be   : > { %2001 = vst.msk [vmem:[%s2994_s13 + $0xd0] sm:$0xf] %vm1948_vm2, %v2345_v63  ;;  %v1606_v23 = vadd.f32 %v2459_v45, %v1317_v4  ;;  %v1262_v13 = vpop.f32.mrf.mxu0  ;;  %v1597_v31 = vpop.f32.mrf.mxu1 }
 0x1bf   : > { %v2336_v12 = vpack.c.bf16 %v1671_v55, %v1671_v55  ;;  %2004 = vst.msk [vmem:[%s2994_s13 + $0xdc] sm:$0xf] %vm1948_vm2, %v2348_v5  ;;  %v2346_v10 = vpack.c.bf16 %v1681_v38, %v1681_v38  ;;  %v1550_v54 = vadd.f32 %v3140_v33, %v1261_v17  ;;  %v1598_v50 = vadd.f32 %v1597_v31, %v1309_v1 }
 0x1c0   : > { %v1686_v59 = vmax.f32 %v1606_v23, 0.0  ;;  %v1263_v16 = vpop.f32.mrf.mxu0  ;;  %v2460_v3 = vpop.f32.mrf.mxu1  ;;  %v1333_v33 = vadd.f32 %v2982_v52, %v2973_v47 }
 0x1c1   : > { %1992 = vst.msk [vmem:[%s2994_s13 + $0xac] sm:$0xf] %vm1948_vm2, %v2336_v12  ;;  %2002 = vst.msk [vmem:[%s2994_s13 + $0xd4] sm:$0xf] %vm1948_vm2, %v2346_v10  ;;  %v1672_v35 = vmax.f32 %v1550_v54, 0.0  ;;  %v1684_v18 = vmax.f32 %v1598_v50, 0.0  ;;  %v1264_v20 = vadd.f32 %v2982_v52, %v1263_v16  ;;  %v1609_v30 = vadd.f32 %v2460_v3, %v1320_v9 }
 0x1c2   : > { %v2351_v24 = vpack.c.bf16 %v1686_v59, %v1686_v59  ;;  %v1265_v28 = vpop.f32.mrf.mxu0  ;;  %v1600_v29 = vpop.f32.mrf.mxu1 }
 0x1c3   : > { %v2337_v15 = vpack.c.bf16 %v1672_v35, %v1672_v35  ;;  %v2349_v22 = vpack.c.bf16 %v1684_v18, %v1684_v18  ;;  %v1553_v32 = vadd.f32 %v3147_v44, %v1264_v20  ;;  %v1687_v42 = vmax.f32 %v1609_v30, 0.0 }
 0x1c4   : > { %2007 = vst.msk [vmem:[%s2994_s13 + $0xe8] sm:$0xf] %vm1948_vm2, %v2351_v24  ;;  %v1601_v36 = vadd.f32 %v1600_v29, %v1312_v21  ;;  %v1268_v40 = vpop.f32.mrf.mxu0  ;;  %v2463_v27 = vpop.f32.mrf.mxu1 }
 0x1c5   : > { %1993 = vst.msk [vmem:[%s2994_s13 + $0xb0] sm:$0xf] %vm1948_vm2, %v2337_v15  ;;  %2005 = vst.msk [vmem:[%s2994_s13 + $0xe0] sm:$0xf] %vm1948_vm2, %v2349_v22  ;;  %v1673_v47 = vmax.f32 %v1553_v32, 0.0  ;;  %v2352_v34 = vpack.c.bf16 %v1687_v42, %v1687_v42  ;;  %v1269_v41 = vadd.f32 %v2982_v52, %v1268_v40  ;;  %v1622_v44 = vadd.f32 %v2463_v27, %v1333_v33 }
 0x1c6   : > { %v1685_v2 = vmax.f32 %v1601_v36, 0.0  ;;  %v1270_v14 = vpop.f32.mrf.mxu0  ;;  %v1613_v48 = vpop.f32.mrf.mxu1 }
 0x1c7   : > { %v2338_v39 = vpack.c.bf16 %v1673_v47, %v1673_v47  ;;  %2008 = vst.msk [vmem:[%s2994_s13 + $0xec] sm:$0xf] %vm1948_vm2, %v2352_v34  ;;  %v1558_v26 = vadd.f32 %v3135_v25, %v1269_v41  ;;  %v1690_v49 = vmax.f32 %v1622_v44, 0.0  ;;  %v1614_v7 = vadd.f32 %v1613_v48, %v1325_v58 }
 0x1c8   : > { %v2350_v53 = vpack.c.bf16 %v1685_v2, %v1685_v2  ;;  %v1271_v8 = vpop.f32.mrf.mxu0  ;;  %v2464_v6 = vpop.f32.mrf.mxu1 }
 0x1c9   : > { %1994 = vst.msk [vmem:[%s2994_s13 + $0xb4] sm:$0xf] %vm1948_vm2, %v2338_v39  ;;  %v1674_v57 = vmax.f32 %v1558_v26, 0.0  ;;  %v2355_v62 = vpack.c.bf16 %v1690_v49, %v1690_v49  ;;  %v1688_v61 = vmax.f32 %v1614_v7, 0.0  ;;  %v1272_v25 = vadd.f32 %v2982_v52, %v1271_v8 }
 0x1ca   : > { %2006 = vst.msk [vmem:[%s2994_s13 + $0xe4] sm:$0xf] %vm1948_vm2, %v2350_v53  ;;  %v1625_v11 = vadd.f32 %v2464_v6, %v1336_v56  ;;  %v1273_v43 = vpop.f32.mrf.mxu0  ;;  %v1616_v46 = vpop.f32.mrf.mxu1 }
 0x1cb   : > { %v2339_v51 = vpack.c.bf16 %v1674_v57, %v1674_v57  ;;  %2011 = vst.msk [vmem:[%s2994_s13 + $0xf8] sm:$0xf] %vm1948_vm2, %v2355_v62  ;;  %v2353_v0 = vpack.c.bf16 %v1688_v61, %v1688_v61  ;;  %v1561_v1 = vadd.f32 %v3142_v60, %v1272_v25  ;;  %v1617_v4 = vadd.f32 %v1616_v46, %v1328_v19 }
 0x1cc   : > { %v1691_v63 = vmax.f32 %v1625_v11, 0.0 }
 0x1cd   : > { %1995 = vst.msk [vmem:[%s2994_s13 + $0xb8] sm:$0xf] %vm1948_vm2, %v2339_v51  ;;  %2009 = vst.msk [vmem:[%s2994_s13 + $0xf0] sm:$0xf] %vm1948_vm2, %v2353_v0  ;;  %v1675_v52 = vmax.f32 %v1561_v1, 0.0  ;;  %v1689_v37 = vmax.f32 %v1617_v4, 0.0 }
 0x1ce   : > { %v2356_v45 = vpack.c.bf16 %v1691_v63, %v1691_v63 }
 0x1cf   : > { %v2340_v55 = vpack.c.bf16 %v1675_v52, %v1675_v52  ;;  %v2354_v5 = vpack.c.bf16 %v1689_v37, %v1689_v37 }
 0x1d0   : > { %2012 = vst.msk [vmem:[%s2994_s13 + $0xfc] sm:$0xf] %vm1948_vm2, %v2356_v45 }
 0x1d1   : > { %1996 = vst.msk [vmem:[%s2994_s13 + $0xbc] sm:$0xf] %vm1948_vm2, %v2340_v55  ;;  %2010 = vst.msk [vmem:[%s2994_s13 + $0xf4] sm:$0xf] %vm1948_vm2, %v2354_v5 }
 0x1d2 PF: > { %s13_s12 = sadd.s32 1, %s2662_s12  }
 0x1d3   : > { %p10_p4 = scmp.ge.s32.totalorder %s13_s12, 9  }
 0x1d5   :  { %12 = sbr.rel (!%p10_p4) target bundleno = 1 (0x1), region = 62 }

// kernel: monet_forward.34
= control target key start
LH: loop header
LB: loop body
LE: loop exit
PB: predicated region body
PF: predicated region fallthrough
CT: control target
= control target key end

     0   :  { %s3742_s13 = smov 0   ;;  %s4897_s0 = inlined_call_operand.vmem [shape: bf16[3584,288], index: 0, kind: input, shape index: {}]   ;;  %s4898_s1 = inlined_call_operand.vmem [shape: bf16[288,32], index: 1, kind: input, shape index: {}]   ;;  %s4899_s2 = inlined_call_operand.vmem [shape: f32[1,32], index: 2, kind: input, shape index: {}]   ;;  %s4900_s3 = inlined_call_operand.vmem [shape: bf16[32,3], index: 3, kind: input, shape index: {}]   ;;  %s4901_s4 = inlined_call_operand.vmem [shape: f32[1,3], index: 4, kind: input, shape index: {}]   ;;  %s4902_s5 = inlined_call_operand.vmem [shape: f32[3584,3], index: 5, kind: input, shape index: {}]   ;;  %s4903_s6 = inlined_call_operand.vmem [shape: f32[3584,1], index: 6, kind: input, shape index: {}]   ;;  %s4904_s7 = inlined_call_operand.vmem [shape: f32[3584,2], index: 7, kind: input, shape index: {}]   ;;  %s4905_s8 = inlined_call_operand.vmem [shape: f32[3584,1], index: 8, kind: output, shape index: {0}]   ;;  %s4906_s9 = inlined_call_operand.vmem [shape: f32[3584,3], index: 9, kind: output, shape index: {1}]   ;;  %s4907_s10 = inlined_call_operand.vmem [shape: f32[3584,1], index: 10, kind: output, shape index: {2}]  }
   0x1 LB: > { %s3040_s14 = sadd.s32 4294967295, %s3682_s13   ;;  %p3044_p0 = scmp.ge.s32.totalorder %s3682_s13, 1  ;;  %s3682_s13 = sphi %s3742_s13, %s21_s13  }
   0x2   : > { %p352_p1 = scmp.lt.s32.totalorder %s3682_s13, 15 }
   0x4   : > { %p353_p2 = pnand %p3044_p0, %p352_p1 }
   0x6   : > { %356 = sbr.rel (%p353_p2) target bundleno = 1036 (0x40c), region = 52 }
   0xb   : > { %v3464_v0 = vld [vmem:[%s4898_s1 + $0x78] sm:$0xff]   ;;  %s3045_s17 = sshll.u32 %s3040_s14, 5  ;;  %v3466_v2 = vld [vmem:[%s4898_s1 + $0x70] sm:$0xff]   ;;  %v3468_v4 = vld [vmem:[%s4898_s1 + $0x68] sm:$0xff]   ;;  %vm915_vm0 = vcmask 261120   ;;  %v3684_v22 = vmov 1  }
   0xc   : > { %v3465_v1 = vld [vmem:[%s4898_s1 + $0x38] sm:$0xff]   ;;  %3227 = vmatprep.subr.bf16.mxu0 %v3464_v0  ;;  %v3467_v3 = vld [vmem:[%s4898_s1 + $0x30] sm:$0xff]   ;;  %p417_p3 = scmp.lt.s32.totalorder %s3045_s17, 447  ;;  %v3469_v5 = vld [vmem:[%s4898_s1 + $0x28] sm:$0xff]   ;;  %3460 = vset.pattern.permute.xlu0 %v3684_v22  ;;  %v3685_v24 = vmov 0   ;;  %s3686_s15 = smov 126  }
   0xd   : > { %3228 = vmatpush3.bf16.msra.mxu0 %v3465_v1  ;;  %v3470_v6 = vld [vmem:[%s4898_s1 + $0x60] sm:$0xff]   ;;  %v3472_v8 = vld [vmem:[%s4898_s1 + $0x58] sm:$0xff]   ;;  %v3479_v10 = vld [vmem:[%s4898_s1 + $0x88] sm:$0xff]   ;;  %3459 = vset.pattern.permute.xlu1 %v3685_v24  ;;  %vm2526_vm1 = vcmask 23552   ;;  %vm2623_vm2 = vcmask 7168  }
   0xe   : > { %3229 = vmatprep.subr.bf16.mxu0 %v3466_v2  ;;  %s5088_s17 = smov (!%p417_p3, %s3045_s17), 447  ;;  %v3471_v7 = vld [vmem:[%s4898_s1 + $0x20] sm:$0xff]   ;;  %v3473_v9 = vld [vmem:[%s4898_s1 + $0x18] sm:$0xff]   ;;  %v3474_v11 = vld [vmem:[%s4898_s1 + $0x50] sm:$0xff]   ;;  %3375 = vmatprep.subr.bf16.mxu1 %v3479_v10 }
   0xf   : > { %s3447_s12 = smul.u32 12, %s5088_s17  ;;  %v3475_v12 = vld [vmem:[%s4898_s1 + $0x10] sm:$0xff]   ;;  %v3476_v13 = vld [vmem:[%s4898_s1 + $0x48] sm:$0xff]   ;;  %3376 = vmatpush3.bf16.msra.mxu1 %v3479_v10  ;;  %v3484_v15 = vld [vmem:[%s4898_s1 + $0x80] sm:$0xff]   ;;  %s3838_s20 = sshll.u32 %s5088_s17, 3 }
  0x10   : > { %3377 = vmatprep.subr.bf16.mxu1 %v3484_v15  ;;  %v3477_v18 = vld [vmem:[%s4898_s1 + $0x8] sm:$0xff]   ;;  %v3478_v19 = vld [vmem:[%s4898_s1 + $0x40] sm:$0xff]   ;;  %s3846_s24 = scalar_lea.vmem %s4904_s7, %s3838_s20  ;;  %s3939_s29 = scalar_lea.vmem %s4903_s6, %s3838_s20 }
  0x11   : > { %3230 = vmatpush3.bf16.msra.mxu0 %v3467_v3  ;;  %s3789_s23 = scalar_lea.vmem %s4897_s0, %s3447_s12  ;;  %v3480_v21 = vld [vmem:[%s4898_s1] sm:$0xff]   ;;  %v1793_v41 = vld [vmem:[%s3846_s24 + $0x18] sm:$0xff]  ;;  %v3860_v42 = vld [vmem:[%s3846_s24 + $0x10] sm:$0xff]  ;;  %s4186_s19 = scalar_lea.vmem %s4902_s5, %s3838_s20 }
  0x12   : > { %3231 = vmatprep.subr.bf16.mxu0 %v3468_v4  ;;  %v3483_v14 = vld [vmem:[%s3789_s23 + $0x4] ss:$12 sps:$4 sm:$0xff]   ;;  %v3485_v16 = vld [vmem:[%s3789_s23 + $0x8] ss:$12 sps:$4 sm:$0xff]   ;;  %v3486_v17 = vld [vmem:[%s3789_s23 + $0x20] ss:$12 sps:$4 sm:$0xff]   ;;  %1898 = vperm.xlu1 %3459, %v3860_v42   ;;  %s4471_s26 = scalar_lea.vmem %s4907_s10, %s3838_s20  ;;  %s4631_s28 = scalar_lea.vmem %s4905_s8, %s3838_s20 }
  0x13   : > { %996 = vmatprep.mubr.bf16.mxu0 %v3483_v14  ;;  %3378 = vmatpush3.bf16.msra.mxu1 %v3484_v15  ;;  %v3493_v20 = vld [vmem:[%s3789_s23 + $0x38] ss:$12 sps:$4 sm:$0xff]   ;;  %v3481_v23 = vld [vmem:[%s3789_s23] ss:$12 sps:$4 sm:$0xff]   ;;  %v3494_v25 = vld [vmem:[%s3789_s23 + $0x50] ss:$12 sps:$4 sm:$0xff]  }
  0x14   : > { %3379 = vmatprep.mubr.msk.bf16.mxu1 %vm915_vm0, %v3485_v16  ;;  %v3501_v26 = vld [vmem:[%s3789_s23 + $0x68] ss:$12 sps:$4 sm:$0xff]   ;;  %v3489_v28 = vld [vmem:[%s3789_s23 + $0x18] ss:$12 sps:$4 sm:$0xff]   ;;  %v3502_v29 = vld [vmem:[%s3789_s23 + $0x80] ss:$12 sps:$4 sm:$0xff]  }
  0x15   : > { %3232 = vmatpush3.bf16.msra.mxu0 %v3469_v5  ;;  %v3487_v27 = vld [vmem:[%s3789_s23 + $0x1c] ss:$12 sps:$4 sm:$0xff]   ;;  %v3512_v30 = vld [vmem:[%s3789_s23 + $0x98] ss:$12 sps:$4 sm:$0xff]   ;;  %v3490_v31 = vld [vmem:[%s3789_s23 + $0x34] ss:$12 sps:$4 sm:$0xff]  }
  0x16   : > { %3233 = vmatprep.subr.bf16.mxu0 %v3470_v6  ;;  %3380 = vmatmul.mubr.msk.bf16.vlgmr.msra.gmra.mxu1 %vm915_vm0, %v3486_v17  ;;  %v3492_v32 = vld [vmem:[%s3789_s23 + $0x30] ss:$12 sps:$4 sm:$0xff]   ;;  %v3520_v34 = vld [vmem:[%s3789_s23 + $0xc8] ss:$12 sps:$4 sm:$0xff]   ;;  %v3495_v35 = vld [vmem:[%s3789_s23 + $0x4c] ss:$12 sps:$4 sm:$0xff]  }
  0x17   : > { %3383 = vmatprep.mubr.msk.bf16.mxu1 %vm915_vm0, %v3493_v20  ;;  %v3513_v33 = vld [vmem:[%s3789_s23 + $0xb0] ss:$12 sps:$4 sm:$0xff]   ;;  %v3497_v36 = vld [vmem:[%s3789_s23 + $0x48] ss:$12 sps:$4 sm:$0xff]   ;;  %v3521_v37 = vld [vmem:[%s3789_s23 + $0xe0] ss:$12 sps:$4 sm:$0xff]   ;;  %1903 = vperm.xlu1 %3459, %v1793_v41  }
  0x18   : > { %v3528_v38 = vld [vmem:[%s3789_s23 + $0xf8] ss:$12 sps:$4 sm:$0xff]   ;;  %v1795_v43 = vld [vmem:[%s3846_s24 + $0x28] sm:$0xff]  ;;  %v3529_v46 = vld [vmem:[%s3789_s23 + $0x110] ss:$12 sps:$4 sm:$0xff]  }
  0x19   : > { %3234 = vmatpush3.bf16.msra.mxu0 %v3471_v7  ;;  %v3852_v39 = vld [vmem:[%s3846_s24] sm:$0xff]  ;;  %v3546_v44 = vld [vmem:[%s4900_s3 + $0x8] sm:$0xff]   ;;  %v1797_v49 = vld [vmem:[%s3846_s24 + $0x38] sm:$0xff] }
  0x1a   : > { %3235 = vmatprep.subr.bf16.mxu0 %v3472_v8  ;;  %v3498_v40 = vld [vmem:[%s3789_s23 + $0x64] ss:$12 sps:$4 sm:$0xff]   ;;  %2143 = vperm.xlu0 %3460, %v3852_v39   ;;  %v3500_v45 = vld [vmem:[%s3789_s23 + $0x60] ss:$12 sps:$4 sm:$0xff]   ;;  %v3536_v47 = vld [vmem:[%s3789_s23 + $0x128] ss:$12 sps:$4 sm:$0xff]  }
  0x1b   : > { %3411 = vmatprep.subr.bf16.mxu1 %v3546_v44  ;;  %v3503_v48 = vld [vmem:[%s3789_s23 + $0x7c] ss:$12 sps:$4 sm:$0xff]   ;;  %1913 = vperm.xlu1 %3459, %v1795_v43   ;;  %v3537_v51 = vld [vmem:[%s3789_s23 + $0x140] ss:$12 sps:$4 sm:$0xff]   ;;  %v3505_v52 = vld [vmem:[%s3789_s23 + $0x78] ss:$12 sps:$4 sm:$0xff]  }
  0x1c   : > { %3412 = vmatpush3.bf16.msra.mxu1 %v3546_v44  ;;  %v1799_v50 = vld [vmem:[%s3846_s24 + $0x48] sm:$0xff]  ;;  %v3544_v53 = vld [vmem:[%s3789_s23 + $0x158] ss:$12 sps:$4 sm:$0xff]   ;;  %v3506_v54 = vld [vmem:[%s3789_s23 + $0x94] ss:$12 sps:$4 sm:$0xff]  }
  0x1d   : > { %3236 = vmatpush3.bf16.msra.mxu0 %v3473_v9  ;;  %v1801_v55 = vld [vmem:[%s3846_s24 + $0x58] sm:$0xff]  ;;  %v1803_v56 = vld [vmem:[%s3846_s24 + $0x68] sm:$0xff]  ;;  %v3514_v63 = vld [vmem:[%s3789_s23 + $0xc4] ss:$12 sps:$4 sm:$0xff]  }
  0x1e   : > { %3237 = vmatprep.subr.bf16.mxu0 %v3474_v11  ;;  %3384 = vmatmul.mubr.msk.bf16.gmra.mxu1 %vm915_vm0, %v3494_v25  ;;  %v3545_v57 = vld [vmem:[%s3789_s23 + $0x170] ss:$12 sps:$4 sm:$0xff]   ;;  %v3509_v59 = vld [vmem:[%s3789_s23 + $0xac] ss:$12 sps:$4 sm:$0xff]   ;;  %v3511_v62 = vld [vmem:[%s3789_s23 + $0xa8] ss:$12 sps:$4 sm:$0xff]  }
  0x1f   : > { %3387 = vmatprep.mubr.msk.bf16.mxu1 %vm915_vm0, %v3501_v26  ;;  %2155 = vperm.xlu0 %3460, %v1793_v41   ;;  %v3508_v58 = vld [vmem:[%s3789_s23 + $0x90] ss:$12 sps:$4 sm:$0xff]   ;;  %v1807_v61 = vld [vmem:[%s3846_s24 + $0x88] sm:$0xff]  ;;  %v3519_v6 = vld [vmem:[%s3789_s23 + $0xd8] ss:$12 sps:$4 sm:$0xff]  }
  0x20   : > { %1923 = vperm.xlu1 %3459, %v1797_v49   ;;  %v1805_v60 = vld [vmem:[%s3846_s24 + $0x78] sm:$0xff]  ;;  %v1811_v1 = vld [vmem:[%s3846_s24 + $0xa8] sm:$0xff]  ;;  %v3522_v7 = vld [vmem:[%s3789_s23 + $0xf4] ss:$12 sps:$4 sm:$0xff]  }
  0x21   : > { %3238 = vmatpush3.bf16.msra.mxu0 %v3475_v12  ;;  %v1809_v0 = vld [vmem:[%s3846_s24 + $0x98] sm:$0xff]  ;;  %v3516_v2 = vld [vmem:[%s3789_s23 + $0xc0] ss:$12 sps:$4 sm:$0xff]   ;;  %v3527_v14 = vld [vmem:[%s3789_s23 + $0x108] ss:$12 sps:$4 sm:$0xff]  }
  0x22   : > { %3239 = vmatprep.subr.bf16.mxu0 %v3476_v13  ;;  %v3517_v3 = vld [vmem:[%s3789_s23 + $0xdc] ss:$12 sps:$4 sm:$0xff]   ;;  %v3547_v9 = vld [vmem:[%s4900_s3] sm:$0xff]   ;;  %v3525_v12 = vld [vmem:[%s3789_s23 + $0x10c] ss:$12 sps:$4 sm:$0xff]  }
  0x23   : > { %2163 = vperm.xlu0 %3460, %v1795_v43   ;;  %v1813_v4 = vld [vmem:[%s3846_s24 + $0xb8] sm:$0xff]  ;;  %v1815_v5 = vld [vmem:[%s3846_s24 + $0xc8] sm:$0xff]  ;;  %3413 = vmatprep.subr.bf16.mxu1 %v3547_v9  ;;  %v3530_v15 = vld [vmem:[%s3789_s23 + $0x124] ss:$12 sps:$4 sm:$0xff]  }
  0x24   : > { %1933 = vperm.xlu1 %3459, %v1799_v50   ;;  %v1817_v8 = vld [vmem:[%s3846_s24 + $0xd8] sm:$0xff]  ;;  %v1819_v10 = vld [vmem:[%s3846_s24 + $0xe8] sm:$0xff]  ;;  %3414 = vmatpush3.bf16.msra.mxu1 %v3547_v9  ;;  %v1794_v17 = vld [vmem:[%s3846_s24 + $0x20] sm:$0xff] }
  0x25   : > { %3240 = vmatpush3.bf16.msra.mxu0 %v3477_v18  ;;  %v3524_v11 = vld [vmem:[%s3789_s23 + $0xf0] ss:$12 sps:$4 sm:$0xff]   ;;  %v1791_v16 = vld [vmem:[%s3846_s24 + $0x8] sm:$0xff]  ;;  %v1802_v26 = vld [vmem:[%s3846_s24 + $0x60] sm:$0xff] }
  0x26   : > { %3241 = vmatprep.subr.bf16.mxu0 %v3478_v19  ;;  %3388 = vmatmul.mubr.msk.bf16.gmra.mxu1 %vm915_vm0, %v3502_v29  ;;  %v1821_v13 = vld [vmem:[%s3846_s24 + $0xf8] sm:$0xff]  ;;  %v3532_v18 = vld [vmem:[%s3789_s23 + $0x120] ss:$12 sps:$4 sm:$0xff]   ;;  %v1796_v20 = vld [vmem:[%s3846_s24 + $0x30] sm:$0xff] }
  0x27   : > { %3391 = vmatprep.mubr.msk.bf16.mxu1 %vm915_vm0, %v3512_v30  ;;  %2171 = vperm.xlu0 %3460, %v1797_v49   ;;  %v3533_v19 = vld [vmem:[%s3789_s23 + $0x13c] ss:$12 sps:$4 sm:$0xff]   ;;  %v1800_v25 = vld [vmem:[%s3846_s24 + $0x50] sm:$0xff]  ;;  %v1806_v30 = vld [vmem:[%s3846_s24 + $0x80] sm:$0xff] }
  0x28   : > { %1943 = vperm.xlu1 %3459, %v1801_v55   ;;  %v1804_v29 = vld [vmem:[%s3846_s24 + $0x70] sm:$0xff]  ;;  %v1766_v43 = vld [vmem:[%s3939_s29 + $0x40] sm:$0xff]  ;;  %v1765_v49 = vld [vmem:[%s3939_s29 + $0x38] sm:$0xff] }
  0x29   : > { %3242 = vmatpush3.bf16.msra.mxu0 %v3480_v21  ;;  %v1798_v21 = vld [vmem:[%s3846_s24 + $0x40] sm:$0xff]  ;;  %v1764_v41 = vld [vmem:[%s3939_s29 + $0x30] sm:$0xff] }
  0x2a   : > { %v1760_v44 = vld [vmem:[%s3939_s29 + $0x10] sm:$0xff]  ;;  %v1786_v9 = vld [vmem:[%s3939_s29 + $0xe0] sm:$0xff] }
  0x2b   : > { %2179 = vperm.xlu0 %3460, %v1799_v50   ;;  %v1774_v50 = vld [vmem:[%s3939_s29 + $0x80] sm:$0xff] }
  0x2c   : > { %997 = vmatmul.mubr.bf16.vlgmr.msra.gmra.mxu0 %v3481_v23  ;;  %1953 = vperm.xlu1 %3459, %v1803_v56   ;;  %v3535_v23 = vld [vmem:[%s3789_s23 + $0x138] ss:$12 sps:$4 sm:$0xff]  }
  0x2d   : > { %1004 = vmatprep.mubr.bf16.mxu0 %v3487_v27  ;;  %v3540_v27 = vld [vmem:[%s3789_s23 + $0x150] ss:$12 sps:$4 sm:$0xff]  }
  0x2e   : > { %3392 = vmatmul.mubr.msk.bf16.gmra.mxu1 %vm915_vm0, %v3513_v33  ;;  %v1810_v33 = vld [vmem:[%s3846_s24 + $0xa0] sm:$0xff] }
  0x2f   : > { %3395 = vmatprep.mubr.msk.bf16.mxu1 %vm915_vm0, %v3520_v34  ;;  %2187 = vperm.xlu0 %3460, %v1801_v55   ;;  %v1812_v34 = vld [vmem:[%s3846_s24 + $0xb0] sm:$0xff]  ;;  %v1771_v55 = vld [vmem:[%s3939_s29 + $0x68] sm:$0xff] }
  0x30   : > { %1963 = vperm.xlu1 %3459, %v1805_v60  }
  0x33   : > { %2195 = vperm.xlu0 %3460, %v1803_v56   ;;  %v1780_v56 = vld [vmem:[%s3939_s29 + $0xb0] sm:$0xff] }
  0x34   : > { %1005 = vmatmul.mubr.bf16.gmra.mxu0 %v3489_v28  ;;  %1973 = vperm.xlu1 %3459, %v1807_v61   ;;  %v3541_v28 = vld [vmem:[%s3789_s23 + $0x16c] ss:$12 sps:$4 sm:$0xff]  }
  0x35   : > { %1012 = vmatprep.mubr.bf16.mxu0 %v3490_v31  ;;  %v3543_v31 = vld [vmem:[%s3789_s23 + $0x168] ss:$12 sps:$4 sm:$0xff]  }
  0x36   : > { %3396 = vmatmul.mubr.msk.bf16.gmra.mxu1 %vm915_vm0, %v3521_v37  ;;  %v1818_v37 = vld [vmem:[%s3846_s24 + $0xe0] sm:$0xff] }
  0x37   : > { %3399 = vmatprep.mubr.msk.bf16.mxu1 %vm915_vm0, %v3528_v38  ;;  %2203 = vperm.xlu0 %3460, %v1805_v60   ;;  %v1820_v38 = vld [vmem:[%s3846_s24 + $0xf0] sm:$0xff]  ;;  %v1775_v60 = vld [vmem:[%s3939_s29 + $0x88] sm:$0xff] }
  0x38   : > { %1983 = vperm.xlu1 %3459, %v1809_v0  }
  0x3b   : > { %2211 = vperm.xlu0 %3460, %v1807_v61  }
  0x3c   : > { %1013 = vmatmul.mubr.bf16.gmra.mxu0 %v3492_v32  ;;  %1993 = vperm.xlu1 %3459, %v1811_v1   ;;  %v1808_v32 = vld [vmem:[%s3846_s24 + $0x90] sm:$0xff] }
  0x3d   : > { %1020 = vmatprep.mubr.bf16.mxu0 %v3495_v35  ;;  %v1814_v35 = vld [vmem:[%s3846_s24 + $0xc0] sm:$0xff] }
  0x3e   : > { %3400 = vmatmul.mubr.msk.bf16.gmra.mxu1 %vm915_vm0, %v3529_v46  ;;  %v1761_v46 = vld [vmem:[%s3939_s29 + $0x18] sm:$0xff] }
  0x3f   : > { %3403 = vmatprep.mubr.msk.bf16.mxu1 %vm915_vm0, %v3536_v47  ;;  %2219 = vperm.xlu0 %3460, %v1809_v0   ;;  %v1770_v47 = vld [vmem:[%s3939_s29 + $0x60] sm:$0xff] }
  0x40   : > { %2003 = vperm.xlu1 %3459, %v1813_v4   ;;  %v3967_v0 = vld [vmem:[%s4899_s2] ss:$0 sm:$0xff] }
  0x43   : > { %2227 = vperm.xlu0 %3460, %v1811_v1  }
  0x44   : > { %1021 = vmatmul.mubr.bf16.gmra.mxu0 %v3497_v36  ;;  %2013 = vperm.xlu1 %3459, %v1815_v5   ;;  %v1816_v36 = vld [vmem:[%s3846_s24 + $0xd0] sm:$0xff]  ;;  %s4193_s24 = scalar_lea.vmem %s4906_s9, %s3838_s20 }
  0x45   : > { %1028 = vmatprep.mubr.bf16.mxu0 %v3498_v40  ;;  %v1762_v40 = vld [vmem:[%s3939_s29 + $0x20] sm:$0xff] }
  0x46   : > { %3404 = vmatmul.mubr.msk.bf16.gmra.mxu1 %vm915_vm0, %v3537_v51  ;;  %v1767_v51 = vld [vmem:[%s3939_s29 + $0x48] sm:$0xff] }
  0x47   : > { %3407 = vmatprep.mubr.msk.bf16.mxu1 %vm915_vm0, %v3544_v53  ;;  %2235 = vperm.xlu0 %3460, %v1813_v4   ;;  %v1769_v53 = vld [vmem:[%s3939_s29 + $0x58] sm:$0xff] }
  0x48   : > { %2023 = vperm.xlu1 %3459, %v1817_v8  }
  0x4b   : > { %2243 = vperm.xlu0 %3460, %v1815_v5  }
  0x4c   : > { %1029 = vmatmul.mubr.bf16.gmra.mxu0 %v3500_v45  ;;  %2033 = vperm.xlu1 %3459, %v1819_v10   ;;  %v1768_v45 = vld [vmem:[%s3939_s29 + $0x50] sm:$0xff] }
  0x4d   : > { %1036 = vmatprep.mubr.bf16.mxu0 %v3503_v48  ;;  %v1772_v48 = vld [vmem:[%s3939_s29 + $0x70] sm:$0xff] }
  0x4e   : > { %3408 = vmatmul.mubr.msk.bf16.gmra.mxu1 %vm915_vm0, %v3545_v57  ;;  %v1773_v57 = vld [vmem:[%s3939_s29 + $0x78] sm:$0xff] }
  0x4f   : > { %2251 = vperm.xlu0 %3460, %v1817_v8  }
  0x50   : > { %2043 = vperm.xlu1 %3459, %v1821_v13  }
  0x53   : > { %2259 = vperm.xlu0 %3460, %v1819_v10   ;;  %v1779_v10 = vld [vmem:[%s3939_s29 + $0xa8] sm:$0xff] }
  0x54   : > { %1037 = vmatmul.mubr.bf16.gmra.mxu0 %v3505_v52  ;;  %3461 = vset.pattern.permute.xlu1 %v3684_v22  ;;  %v3538_v22 = vld [vmem:[%s3789_s23 + $0x154] ss:$12 sps:$4 sm:$0xff]  }
  0x55   : > { %1044 = vmatprep.mubr.bf16.mxu0 %v3506_v54  ;;  %2147 = vperm.xlu1 %3461, %v1791_v16   ;;  %v1776_v52 = vld [vmem:[%s3939_s29 + $0x90] sm:$0xff]  ;;  %v1778_v54 = vld [vmem:[%s3939_s29 + $0xa0] sm:$0xff] }
  0x57   : > { %2267 = vperm.xlu0 %3460, %v1821_v13  }
  0x59   : > { %2151 = vperm.xlu1 %3461, %v3860_v42   ;;  %v1758_v42 = vld [vmem:[%s3939_s29] sm:$0xff] }
  0x5b   : > { %3462 = vset.pattern.permute.xlu0 %v3685_v24 }
  0x5c   : > { %1045 = vmatmul.mubr.bf16.gmra.mxu0 %v3508_v58  ;;  %1888 = vperm.xlu0 %3462, %v3852_v39   ;;  %v1759_v39 = vld [vmem:[%s3939_s29 + $0x8] sm:$0xff] }
  0x5d   : > { %1052 = vmatprep.mubr.bf16.mxu0 %v3509_v59  ;;  %2159 = vperm.xlu1 %3461, %v1794_v17   ;;  %v1782_v59 = vld [vmem:[%s3939_s29 + $0xc0] sm:$0xff] }
  0x60   : > { %1893 = vperm.xlu0 %3462, %v1791_v16  }
  0x61   : > { %2167 = vperm.xlu1 %3461, %v1796_v20  }
  0x64   : > { %1053 = vmatmul.mubr.bf16.gmra.mxu0 %v3511_v62  ;;  %1908 = vperm.xlu0 %3462, %v1794_v17  }
  0x65   : > { %1060 = vmatprep.mubr.bf16.mxu0 %v3514_v63  ;;  %2175 = vperm.xlu1 %3461, %v1798_v21  }
  0x68   : > { %1918 = vperm.xlu0 %3462, %v1796_v20  }
  0x69   : > { %2183 = vperm.xlu1 %3461, %v1800_v25  }
  0x6c   : > { %1061 = vmatmul.mubr.bf16.gmra.mxu0 %v3516_v2  ;;  %1928 = vperm.xlu0 %3462, %v1798_v21   ;;  %v1784_v2 = vld [vmem:[%s3939_s29 + $0xd0] sm:$0xff] }
  0x6d   : > { %1068 = vmatprep.mubr.bf16.mxu0 %v3517_v3  ;;  %2191 = vperm.xlu1 %3461, %v1802_v26   ;;  %v1777_v3 = vld [vmem:[%s3939_s29 + $0x98] sm:$0xff] }
  0x70   : > { %1938 = vperm.xlu0 %3462, %v1800_v25  }
  0x71   : > { %2199 = vperm.xlu1 %3461, %v1804_v29  }
  0x74   : > { %1069 = vmatmul.mubr.bf16.gmra.mxu0 %v3519_v6  ;;  %1948 = vperm.xlu0 %3462, %v1802_v26   ;;  %v1783_v26 = vld [vmem:[%s3939_s29 + $0xc8] sm:$0xff] }
  0x75   : > { %1076 = vmatprep.mubr.bf16.mxu0 %v3522_v7  ;;  %2207 = vperm.xlu1 %3461, %v1806_v30  }
  0x78   : > { %1958 = vperm.xlu0 %3462, %v1804_v29  }
  0x79   : > { %2215 = vperm.xlu1 %3461, %v1808_v32  }
  0x7c   : > { %1077 = vmatmul.mubr.bf16.gmra.mxu0 %v3524_v11  ;;  %1968 = vperm.xlu0 %3462, %v1806_v30  }
  0x7d   : > { %1084 = vmatprep.mubr.bf16.mxu0 %v3525_v12  ;;  %2223 = vperm.xlu1 %3461, %v1810_v33  }
  0x80   : > { %1978 = vperm.xlu0 %3462, %v1808_v32  }
  0x81   : > { %2231 = vperm.xlu1 %3461, %v1812_v34  }
  0x84   : > { %1085 = vmatmul.mubr.bf16.gmra.mxu0 %v3527_v14  ;;  %1988 = vperm.xlu0 %3462, %v1810_v33  }
  0x85   : > { %1092 = vmatprep.mubr.bf16.mxu0 %v3530_v15  ;;  %2239 = vperm.xlu1 %3461, %v1814_v35   ;;  %v1781_v15 = vld [vmem:[%s3939_s29 + $0xb8] sm:$0xff] }
  0x88   : > { %1998 = vperm.xlu0 %3462, %v1812_v34   ;;  %v1785_v34 = vld [vmem:[%s3939_s29 + $0xd8] sm:$0xff] }
  0x89   : > { %2247 = vperm.xlu1 %3461, %v1816_v36  }
  0x8c   : > { %1093 = vmatmul.mubr.bf16.gmra.mxu0 %v3532_v18  ;;  %2008 = vperm.xlu0 %3462, %v1814_v35  }
  0x8d   : > { %1100 = vmatprep.mubr.bf16.mxu0 %v3533_v19  ;;  %2255 = vperm.xlu1 %3461, %v1818_v37   ;;  %v1788_v19 = vld [vmem:[%s3939_s29 + $0xf0] sm:$0xff] }
  0x90   : > { %2018 = vperm.xlu0 %3462, %v1816_v36  }
  0x91   : > { %2263 = vperm.xlu1 %3461, %v1820_v38  }
  0x94   : > { %1101 = vmatmul.mubr.bf16.gmra.mxu0 %v3535_v23  ;;  %2028 = vperm.xlu0 %3462, %v1818_v37  }
  0x95   : > { %1108 = vmatprep.mubr.bf16.mxu0 %v3538_v22  ;;  %3463 = vset.pattern.permute.xlu1 %v3685_v24  ;;  %v1763_v24 = vld [vmem:[%s3939_s29 + $0x28] sm:$0xff] }
  0x96   : > { %2336 = vperm.xlu1 %3463, %v1758_v42  }
  0x98   : > { %2038 = vperm.xlu0 %3462, %v1820_v38  }
  0x9a   : > { %2346 = vperm.xlu1 %3463, %v1760_v44  }
  0x9c   : > { %1109 = vmatmul.mubr.bf16.gmra.mxu0 %v3540_v27  ;;  %2341 = vperm.xlu0 %3462, %v1759_v39  }
  0x9d   : > { %1116 = vmatprep.mubr.bf16.mxu0 %v3541_v28 }
  0x9e   : > { %2351 = vperm.xlu1 %3463, %v1761_v46  }
  0xa0   : > { %2356 = vperm.xlu0 %3462, %v1762_v40  }
  0xa2   : > { %2361 = vperm.xlu1 %3463, %v1763_v24  }
  0xa4   : > { %1117 = vmatmul.mubr.bf16.gmra.mxu0 %v3543_v31  ;;  %2366 = vperm.xlu0 %3462, %v1764_v41  }
  0xa6   : > { %2371 = vperm.xlu1 %3463, %v1765_v49  }
  0xa8   : > { %2376 = vperm.xlu0 %3462, %v1766_v43   ;;  %v1787_v43 = vld [vmem:[%s3939_s29 + $0xe8] sm:$0xff] }
  0xaa   : > { %2381 = vperm.xlu1 %3463, %v1767_v51  }
  0xac   : > { %2386 = vperm.xlu0 %3462, %v1768_v45  }
  0xae   : > { %2391 = vperm.xlu1 %3463, %v1769_v53  }
  0xb0   : > { %2396 = vperm.xlu0 %3462, %v1770_v47  }
  0xb2   : > { %2401 = vperm.xlu1 %3463, %v1771_v55  }
  0xb4   : > { %2406 = vperm.xlu0 %3462, %v1772_v48  }
  0xb6   : > { %2411 = vperm.xlu1 %3463, %v1773_v57  }
  0xb8   : > { %2416 = vperm.xlu0 %3462, %v1774_v50   ;;  %v1789_v50 = vld [vmem:[%s3939_s29 + $0xf8] sm:$0xff] }
  0xba   : > { %2421 = vperm.xlu1 %3463, %v1775_v60  }
  0xbc   : > { %2426 = vperm.xlu0 %3462, %v1776_v52  }
  0xbe   : > { %2431 = vperm.xlu1 %3463, %v1777_v3  }
  0xc0   : > { %2436 = vperm.xlu0 %3462, %v1778_v54  }
  0xc2   : > { %2441 = vperm.xlu1 %3463, %v1779_v10  }
  0xc4   : > { %2446 = vperm.xlu0 %3462, %v1780_v56  }
  0xc6   : > { %2451 = vperm.xlu1 %3463, %v1781_v15  }
  0xc8   : > { %2456 = vperm.xlu0 %3462, %v1782_v59  }
  0xca   : > { %2461 = vperm.xlu1 %3463, %v1783_v26  }
  0xcc   : > { %2466 = vperm.xlu0 %3462, %v1784_v2  }
  0xce   : > { %2471 = vperm.xlu1 %3463, %v1785_v34  }
  0xd0   : > { %2476 = vperm.xlu0 %3462, %v1786_v9  }
  0xd2   : > { %2481 = vperm.xlu1 %3463, %v1787_v43  }
  0xd4   : > { %2486 = vperm.xlu0 %3462, %v1788_v19  }
  0xd6   : > { %v3381_v58 = vpop.f32.mrf.mxu1  ;;  %2491 = vperm.xlu1 %3463, %v1789_v50  }
  0xd8   : > { %v1159_v62 = vpop.f32.mrf.mxu1 }
  0xda   : > { %v3382_v5 = vpop.f32.mrf.mxu1 }
  0xdc   : > { %v1162_v12 = vpop.f32.mrf.mxu1 }
  0xde   : > { %v3385_v21 = vpop.f32.mrf.mxu1 }
  0xe0   : > { %v1175_v31 = vpop.f32.mrf.mxu1 }
  0xe2   : > { %v3386_v39 = vpop.f32.mrf.mxu1 }
  0xe4   : > { %v1178_v24 = vpop.f32.mrf.mxu1 }
  0xe6   : > { %v3389_v55 = vpop.f32.mrf.mxu1 }
  0xec   : > { %v3243_v61 = vpop.f32.mrf.mxu0 }
  0xee   : > { %v3244_v63 = vpop.f32.mrf.mxu0 }
  0xef   : > { %v3245_v1 = vadd.f32 %v3244_v63, %v3243_v61  ;;  %v1191_v63 = vpop.f32.mrf.mxu1 }
  0xf0   : > { %v3246_v4 = vpop.f32.mrf.mxu0 }
  0xf1   : > { %v999_v6 = vadd.f32 %v3245_v1, %v3967_v0 }
  0xf2   : > { %v3247_v7 = vpop.f32.mrf.mxu0 }
  0xf3   : > { %v3248_v8 = vadd.f32 %v3247_v7, %v3246_v4  ;;  %v1160_v13 = vadd.f32 %v1159_v62, %v999_v6  ;;  %v3390_v7 = vpop.f32.mrf.mxu1 }
  0xf4   : > { %v3249_v11 = vpop.f32.mrf.mxu0 }
  0xf5   : > { %v1002_v14 = vadd.f32 %v3248_v8, %v3967_v0  ;;  %v1286_v23 = vmax.f32 %v1160_v13, 0.0  ;;  %v1194_v15 = vpop.f32.mrf.mxu1 }
  0xf6   : > { %v3250_v16 = vpop.f32.mrf.mxu0 }
  0xf7   : > { %v3251_v17 = vadd.f32 %v3250_v16, %v3249_v11  ;;  %v1163_v18 = vadd.f32 %v1162_v12, %v1002_v14 }
  0xf8   : > { %v3252_v20 = vpop.f32.mrf.mxu0 }
  0xf9   : > { %v1007_v22 = vadd.f32 %v3251_v17, %v3967_v0  ;;  %v1287_v25 = vmax.f32 %v1163_v18, 0.0  ;;  %v3993_v18 = vpop.permute.xlu1 %1898 }
  0xfa   : > { %v3253_v27 = vpop.f32.mrf.mxu0 }
  0xfb   : > { %v1318_v28 = vpack.c.bf16 %v1287_v25, %v1286_v23  ;;  %v3254_v29 = vadd.f32 %v3253_v27, %v3252_v20  ;;  %v1168_v32 = vadd.f32 %v3381_v58, %v1007_v22  ;;  %v3393_v22 = vpop.f32.mrf.mxu1 }
  0xfc   : > { %v3255_v30 = vpop.f32.mrf.mxu0 }
  0xfd   : > { %v1010_v33 = vadd.f32 %v3254_v29, %v3967_v0  ;;  %3415 = vmatprep.mubr.msk.bf16.mxu1 %vm915_vm0, %v1318_v28  ;;  %v1288_v40 = vmax.f32 %v1168_v32, 0.0 }
  0xfe   : > { %v3256_v35 = vpop.f32.mrf.mxu0 }
  0xff   : > { %v1171_v36 = vadd.f32 %v3382_v5, %v1010_v33  ;;  %v3257_v37 = vadd.f32 %v3256_v35, %v3255_v30  ;;  %v1207_v33 = vpop.f32.mrf.mxu1 }
 0x100   : > { %v3258_v38 = vpop.f32.mrf.mxu0 }
 0x101   : > { %v1289_v41 = vmax.f32 %v1171_v36, 0.0  ;;  %v1015_v42 = vadd.f32 %v3257_v37, %v3967_v0 }
 0x102   : > { %v3259_v44 = vpop.f32.mrf.mxu0 }
 0x103   : > { %v1319_v45 = vpack.c.bf16 %v1289_v41, %v1288_v40  ;;  %v3260_v46 = vadd.f32 %v3259_v44, %v3258_v38  ;;  %v1176_v48 = vadd.f32 %v1175_v31, %v1015_v42  ;;  %v3996_v31 = vpop.permute.xlu1 %1903  ;;  %v3394_v40 = vpop.f32.mrf.mxu1 }
 0x104   : > { %v3261_v47 = vpop.f32.mrf.mxu0 }
 0x105   : > { %3416 = vmatmul.mubr.msk.bf16.vlgmr.msra.gmra.mxu1 %vm915_vm0, %v1319_v45  ;;  %v1018_v49 = vadd.f32 %v3260_v46, %v3967_v0  ;;  %v1290_v56 = vmax.f32 %v1176_v48, 0.0 }
 0x106   : > { %v3262_v51 = vpop.f32.mrf.mxu0 }
 0x107   : > { %v3263_v52 = vadd.f32 %v3262_v51, %v3261_v47  ;;  %v1179_v53 = vadd.f32 %v1178_v24, %v1018_v49  ;;  %v4001_v44 = vpop.permute.xlu1 %1913  ;;  %v1210_v49 = vpop.f32.mrf.mxu1 }
 0x108   : > { %v3264_v54 = vpop.f32.mrf.mxu0  ;;  %4939 = vst [vmem:[#allocation2_spill] sm:$0xff] %v4001_v44 }
 0x109   : > { %v1023_v57 = vadd.f32 %v3263_v52, %v3967_v0  ;;  %v1291_v58 = vmax.f32 %v1179_v53, 0.0  ;;  %v4005_v52 = vpop.permute.xlu0 %2143 }
 0x10a   : > { %v3265_v59 = vpop.f32.mrf.mxu0 }
 0x10b   : > { %v1320_v60 = vpack.c.bf16 %v1291_v58, %v1290_v56  ;;  %v3266_v61 = vadd.f32 %v3265_v59, %v3264_v54  ;;  %v1184_v1 = vadd.f32 %v3385_v21, %v1023_v57  ;;  %v4007_v56 = vpop.permute.xlu1 %1923  ;;  %v3397_v58 = vpop.f32.mrf.mxu1 }
 0x10c   : > { %v3267_v62 = vpop.f32.mrf.mxu0 }
 0x10d   : > { %v1026_v2 = vadd.f32 %v3266_v61, %v3967_v0  ;;  %3419 = vmatprep.mubr.msk.bf16.mxu1 %vm915_vm0, %v1320_v60  ;;  %v1292_v8 = vmax.f32 %v1184_v1, 0.0 }
 0x10e   : > { %v3268_v3 = vpop.f32.mrf.mxu0 }
 0x10f   : > { %v1187_v4 = vadd.f32 %v3386_v39, %v1026_v2  ;;  %v3269_v5 = vadd.f32 %v3268_v3, %v3267_v62  ;;  %v1223_v3 = vpop.f32.mrf.mxu1 }
 0x110   : > { %v3270_v6 = vpop.f32.mrf.mxu0 }
 0x111   : > { %v1293_v9 = vmax.f32 %v1187_v4, 0.0  ;;  %v1031_v10 = vadd.f32 %v3269_v5, %v3967_v0  ;;  %v4010_v4 = vpop.permute.xlu0 %2155 }
 0x112   : > { %v3271_v11 = vpop.f32.mrf.mxu0 }
 0x113   : > { %v1321_v12 = vpack.c.bf16 %v1293_v9, %v1292_v8  ;;  %v3272_v13 = vadd.f32 %v3271_v11, %v3270_v6  ;;  %v1192_v16 = vadd.f32 %v1191_v63, %v1031_v10  ;;  %v4014_v6 = vpop.permute.xlu1 %1933 }
 0x114   : > { %v3273_v14 = vpop.f32.mrf.mxu0  ;;  %4940 = vst [vmem:[#allocation3_spill] sm:$0xff] %v4014_v6 }
 0x115   : > { %3420 = vmatmul.mubr.msk.bf16.gmra.mxu1 %vm915_vm0, %v1321_v12  ;;  %v1034_v17 = vadd.f32 %v3272_v13, %v3967_v0  ;;  %v1294_v25 = vmax.f32 %v1192_v16, 0.0  ;;  %v3398_v12 = vpop.f32.mrf.mxu1  ;;  %v4017_v16 = vpop.permute.xlu0 %2163 }
 0x116   : > { %v3274_v19 = vpop.f32.mrf.mxu0  ;;  %4941 = vst [vmem:[#allocation4_spill] sm:$0xff] %v4017_v16 }
 0x117   : > { %v3275_v20 = vadd.f32 %v3274_v19, %v3273_v14  ;;  %v1195_v21 = vadd.f32 %v1194_v15, %v1034_v17 }
 0x118   : > { %v3276_v23 = vpop.f32.mrf.mxu0 }
 0x119   : > { %v1039_v26 = vadd.f32 %v3275_v20, %v3967_v0  ;;  %v1295_v27 = vmax.f32 %v1195_v21, 0.0  ;;  %v4019_v21 = vpop.permute.xlu1 %1943 }
 0x11a   : > { %v3277_v28 = vpop.f32.mrf.mxu0  ;;  %4942 = vst [vmem:[#allocation5_spill] sm:$0xff] %v4019_v21 }
 0x11b   : > { %v1322_v29 = vpack.c.bf16 %v1295_v27, %v1294_v25  ;;  %v3278_v30 = vadd.f32 %v3277_v28, %v3276_v23  ;;  %v1200_v34 = vadd.f32 %v3389_v55, %v1039_v26 }
 0x11c   : > { %v3279_v32 = vpop.f32.mrf.mxu0 }
 0x11d   : > { %v1042_v35 = vadd.f32 %v3278_v30, %v3967_v0  ;;  %3423 = vmatprep.mubr.msk.bf16.mxu1 %vm915_vm0, %v1322_v29  ;;  %v1296_v41 = vmax.f32 %v1200_v34, 0.0 }
 0x11e   : > { %v3280_v36 = vpop.f32.mrf.mxu0 }
 0x11f   : > { %v1203_v37 = vadd.f32 %v3390_v7, %v1042_v35  ;;  %v3281_v38 = vadd.f32 %v3280_v36, %v3279_v32  ;;  %v4026_v36 = vpop.permute.xlu1 %1953 }
 0x120   : > { %v3282_v39 = vpop.f32.mrf.mxu0  ;;  %4944 = vst [vmem:[#allocation7_spill] sm:$0xff] %v4026_v36 }
 0x121   : > { %v1297_v42 = vmax.f32 %v1203_v37, 0.0  ;;  %v1047_v43 = vadd.f32 %v3281_v38, %v3967_v0 }
 0x122   : > { %v3283_v45 = vpop.f32.mrf.mxu0 }
 0x123   : > { %v1323_v46 = vpack.c.bf16 %v1297_v42, %v1296_v41  ;;  %v3284_v47 = vadd.f32 %v3283_v45, %v3282_v39  ;;  %v1208_v24 = vadd.f32 %v1207_v33, %v1047_v43  ;;  %v4023_v33 = vpop.permute.xlu0 %2171 }
 0x124   : > { %v3285_v48 = vpop.f32.mrf.mxu0  ;;  %4943 = vst [vmem:[#allocation6_spill] sm:$0xff] %v4023_v33 }
 0x125   : > { %3424 = vmatmul.mubr.msk.bf16.gmra.mxu1 %vm915_vm0, %v1323_v46  ;;  %v1050_v50 = vadd.f32 %v3284_v47, %v3967_v0  ;;  %v1298_v54 = vmax.f32 %v1208_v24, 0.0 }
 0x126   : > { %v3286_v51 = vpop.f32.mrf.mxu0 }
 0x127   : > { %v3287_v53 = vadd.f32 %v3286_v51, %v3285_v48  ;;  %v1211_v55 = vadd.f32 %v1210_v49, %v1050_v50  ;;  %v4030_v46 = vpop.permute.xlu0 %2179  ;;  %v4032_v49 = vpop.permute.xlu1 %1963 }
 0x128   : > { %v3288_v57 = vpop.f32.mrf.mxu0  ;;  %4945 = vst [vmem:[#allocation8_spill] sm:$0xff] %v4030_v46  ;;  %4946 = vst [vmem:[#allocation9_spill] sm:$0xff] %v4032_v49  ;;  %v1823_v46 = vld [vmem:[%s4186_s19 + $0x8] sm:$0xff] }
 0x129   : > { %v1055_v59 = vadd.f32 %v3287_v53, %v3967_v0  ;;  %v1299_v60 = vmax.f32 %v1211_v55, 0.0 }
 0x12a   : > { %v3289_v61 = vpop.f32.mrf.mxu0 }
 0x12b   : > { %v1216_v62 = vadd.f32 %v3393_v22, %v1055_v59  ;;  %v3290_v63 = vadd.f32 %v3289_v61, %v3288_v57  ;;  %v1324_v1 = vpack.c.bf16 %v1299_v60, %v1298_v54  ;;  %v1226_v22 = vpop.f32.mrf.mxu1 }
 0x12c   : > { %v3291_v2 = vpop.f32.mrf.mxu0 }
 0x12d   : > { %v1058_v5 = vadd.f32 %v3290_v63, %v3967_v0  ;;  %3427 = vmatprep.mubr.msk.bf16.mxu1 %vm915_vm0, %v1324_v1  ;;  %v1300_v8 = vmax.f32 %v1216_v62, 0.0  ;;  %v3401_v32 = vpop.f32.mrf.mxu1  ;;  %v4035_v62 = vpop.permute.xlu0 %2187 }
 0x12e   : > { %v3292_v7 = vpop.f32.mrf.mxu0  ;;  %4947 = vst [vmem:[#allocation10_spill] sm:$0xff] %v4035_v62  ;;  %v4039_v1 = vpop.permute.xlu1 %1973 }
 0x12f   : > { %v1219_v9 = vadd.f32 %v3394_v40, %v1058_v5  ;;  %v3293_v10 = vadd.f32 %v3292_v7, %v3291_v2  ;;  %v1239_v42 = vpop.f32.mrf.mxu1  ;;  %4948 = vst [vmem:[#allocation11_spill] sm:$0xff] %v4039_v1 }
 0x130   : > { %v3294_v11 = vpop.f32.mrf.mxu0 }
 0x131   : > { %v1301_v13 = vmax.f32 %v1219_v9, 0.0  ;;  %v1063_v14 = vadd.f32 %v3293_v10, %v3967_v0  ;;  %v3402_v51 = vpop.f32.mrf.mxu1 }
 0x132   : > { %v3295_v15 = vpop.f32.mrf.mxu0 }
 0x133   : > { %v1325_v17 = vpack.c.bf16 %v1301_v13, %v1300_v8  ;;  %v3296_v19 = vadd.f32 %v3295_v15, %v3294_v11  ;;  %v1224_v20 = vadd.f32 %v1223_v3, %v1063_v14  ;;  %v1242_v61 = vpop.f32.mrf.mxu1  ;;  %v4042_v13 = vpop.permute.xlu0 %2195 }
 0x134   : > { %v3297_v23 = vpop.f32.mrf.mxu0  ;;  %4949 = vst [vmem:[#allocation12_spill] sm:$0xff] %v4042_v13 }
 0x135   : > { %3428 = vmatmul.mubr.msk.bf16.gmra.mxu1 %vm915_vm0, %v1325_v17  ;;  %v1066_v25 = vadd.f32 %v3296_v19, %v3967_v0  ;;  %v1302_v28 = vmax.f32 %v1224_v20, 0.0  ;;  %v3405_v9 = vpop.f32.mrf.mxu1  ;;  %v4044_v19 = vpop.permute.xlu1 %1983 }
 0x136   : > { %v3298_v26 = vpop.f32.mrf.mxu0  ;;  %4950 = vst [vmem:[#allocation13_spill] sm:$0xff] %v4044_v19 }
 0x137   : > { %v3299_v27 = vadd.f32 %v3298_v26, %v3297_v23  ;;  %v1227_v29 = vadd.f32 %v1226_v22, %v1066_v25  ;;  %v1255_v23 = vpop.f32.mrf.mxu1 }
 0x138   : > { %v3300_v30 = vpop.f32.mrf.mxu0 }
 0x139   : > { %v1071_v34 = vadd.f32 %v3299_v27, %v3967_v0  ;;  %v1303_v35 = vmax.f32 %v1227_v29, 0.0 }
 0x13a   : > { %v3301_v37 = vpop.f32.mrf.mxu0 }
 0x13b   : > { %v1232_v38 = vadd.f32 %v3397_v58, %v1071_v34  ;;  %v3302_v39 = vadd.f32 %v3301_v37, %v3300_v30  ;;  %v1326_v40 = vpack.c.bf16 %v1303_v35, %v1302_v28  ;;  %v3406_v30 = vpop.f32.mrf.mxu1  ;;  %v4048_v34 = vpop.permute.xlu0 %2203 }
 0x13c   : > { %v3303_v41 = vpop.f32.mrf.mxu0  ;;  %4951 = vst [vmem:[#allocation14_spill] sm:$0xff] %v4048_v34  ;;  %v4051_v37 = vpop.permute.xlu1 %1993 }
 0x13d   : > { %v1074_v43 = vadd.f32 %v3302_v39, %v3967_v0  ;;  %3431 = vmatprep.mubr.msk.bf16.mxu1 %vm915_vm0, %v1326_v40  ;;  %v1304_v47 = vmax.f32 %v1232_v38, 0.0  ;;  %4952 = vst [vmem:[#allocation15_spill] sm:$0xff] %v4051_v37 }
 0x13e   : > { %v3304_v45 = vpop.f32.mrf.mxu0 }
 0x13f   : > { %v1235_v24 = vadd.f32 %v3398_v12, %v1074_v43  ;;  %v3305_v48 = vadd.f32 %v3304_v45, %v3303_v41  ;;  %v1258_v43 = vpop.f32.mrf.mxu1 }
 0x140   : > { %v3306_v50 = vpop.f32.mrf.mxu0 }
 0x141   : > { %v1305_v53 = vmax.f32 %v1235_v24, 0.0  ;;  %v1079_v54 = vadd.f32 %v3305_v48, %v3967_v0  ;;  %v4055_v24 = vpop.permute.xlu0 %2211 }
 0x142   : > { %v3307_v55 = vpop.f32.mrf.mxu0  ;;  %4953 = vst [vmem:[#allocation16_spill] sm:$0xff] %v4055_v24 }
 0x143   : > { %v1327_v57 = vpack.c.bf16 %v1305_v53, %v1304_v47  ;;  %v3308_v58 = vadd.f32 %v3307_v55, %v3306_v50  ;;  %v1240_v59 = vadd.f32 %v1239_v42, %v1079_v54  ;;  %v4057_v53 = vpop.permute.xlu1 %2003  ;;  %v3409_v55 = vpop.f32.mrf.mxu1 }
 0x144   : > { %v3309_v60 = vpop.f32.mrf.mxu0  ;;  %4954 = vst [vmem:[#allocation17_spill] sm:$0xff] %v4057_v53 }
 0x145   : > { %3432 = vmatmul.mubr.msk.bf16.gmra.mxu1 %vm915_vm0, %v1327_v57  ;;  %v1082_v63 = vadd.f32 %v3308_v58, %v3967_v0  ;;  %v1306_v5 = vmax.f32 %v1240_v59, 0.0 }
 0x146   : > { %v3310_v2 = vpop.f32.mrf.mxu0 }
 0x147   : > { %v3311_v3 = vadd.f32 %v3310_v2, %v3309_v60  ;;  %v1243_v7 = vadd.f32 %v1242_v61, %v1082_v63 }
 0x148   : > { %v3312_v8 = vpop.f32.mrf.mxu0 }
 0x149   : > { %v1087_v10 = vadd.f32 %v3311_v3, %v3967_v0  ;;  %v1307_v11 = vmax.f32 %v1243_v7, 0.0  ;;  %v1271_v3 = vpop.f32.mrf.mxu1 }
 0x14a   : > { %v3313_v12 = vpop.f32.mrf.mxu0 }
 0x14b   : > { %v1248_v14 = vadd.f32 %v3401_v32, %v1087_v10  ;;  %v3314_v15 = vadd.f32 %v3313_v12, %v3312_v8  ;;  %v1328_v17 = vpack.c.bf16 %v1307_v11, %v1306_v5  ;;  %v4060_v5 = vpop.permute.xlu0 %2219  ;;  %v4064_v8 = vpop.permute.xlu1 %2013 }
 0x14c   : > { %v3315_v20 = vpop.f32.mrf.mxu0  ;;  %4955 = vst [vmem:[#allocation18_spill] sm:$0xff] %v4060_v5  ;;  %4956 = vst [vmem:[#allocation19_spill] sm:$0xff] %v4064_v8 }
 0x14d   : > { %v1090_v22 = vadd.f32 %v3314_v15, %v3967_v0  ;;  %3435 = vmatprep.mubr.msk.bf16.mxu1 %vm915_vm0, %v1328_v17  ;;  %v1308_v26 = vmax.f32 %v1248_v14, 0.0  ;;  %v3410_v17 = vpop.f32.mrf.mxu1 }
 0x14e   : > { %v3316_v25 = vpop.f32.mrf.mxu0 }
 0x14f   : > { %v1251_v27 = vadd.f32 %v3402_v51, %v1090_v22  ;;  %v3317_v28 = vadd.f32 %v3316_v25, %v3315_v20  ;;  %v4067_v22 = vpop.permute.xlu0 %2227 }
 0x150   : > { %v3318_v29 = vpop.f32.mrf.mxu0  ;;  %4957 = vst [vmem:[#allocation20_spill] sm:$0xff] %v4067_v22 }
 0x151   : > { %v1309_v35 = vmax.f32 %v1251_v27, 0.0  ;;  %v1095_v32 = vadd.f32 %v3317_v28, %v3967_v0  ;;  %v4069_v28 = vpop.permute.xlu1 %2023 }
 0x152   : > { %v3319_v38 = vpop.f32.mrf.mxu0  ;;  %4958 = vst [vmem:[#allocation21_spill] sm:$0xff] %v4069_v28 }
 0x153   : > { %v1329_v39 = vpack.c.bf16 %v1309_v35, %v1308_v26  ;;  %v3320_v40 = vadd.f32 %v3319_v38, %v3318_v29  ;;  %v1256_v41 = vadd.f32 %v1255_v23, %v1095_v32  ;;  %v1274_v35 = vpop.f32.mrf.mxu1 }
 0x154   : > { %v3321_v42 = vpop.f32.mrf.mxu0 }
 0x155   : > { %3436 = vmatmul.mubr.msk.bf16.gmra.mxu1 %vm915_vm0, %v1329_v39  ;;  %v1098_v45 = vadd.f32 %v3320_v40, %v3967_v0  ;;  %v1310_v50 = vmax.f32 %v1256_v41, 0.0 }
 0x156   : > { %v3322_v47 = vpop.f32.mrf.mxu0 }
 0x157   : > { %v3323_v48 = vadd.f32 %v3322_v47, %v3321_v42  ;;  %v1259_v51 = vadd.f32 %v1258_v43, %v1098_v45  ;;  %v4073_v42 = vpop.permute.xlu0 %2235 }
 0x158   : > { %v3324_v54 = vpop.f32.mrf.mxu0  ;;  %4959 = vst [vmem:[#allocation22_spill] sm:$0xff] %v4073_v42 }
 0x159   : > { %v1103_v57 = vadd.f32 %v3323_v48, %v3967_v0  ;;  %v1311_v58 = vmax.f32 %v1259_v51, 0.0  ;;  %v4076_v48 = vpop.permute.xlu1 %2033 }
 0x15a   : > { %v3325_v59 = vpop.f32.mrf.mxu0  ;;  %4960 = vst [vmem:[#allocation23_spill] sm:$0xff] %v4076_v48 }
 0x15b   : > { %v1264_v60 = vadd.f32 %v3405_v9, %v1103_v57  ;;  %v3326_v61 = vadd.f32 %v3325_v59, %v3324_v54  ;;  %v1330_v63 = vpack.c.bf16 %v1311_v58, %v1310_v50 }
 0x15c   : > { %v3327_v2 = vpop.f32.mrf.mxu0 }
 0x15d   : > { %v1106_v7 = vadd.f32 %v3326_v61, %v3967_v0  ;;  %3439 = vmatprep.mubr.msk.bf16.mxu1 %vm915_vm0, %v1330_v63  ;;  %v1312_v11 = vmax.f32 %v1264_v60, 0.0  ;;  %v4080_v60 = vpop.permute.xlu0 %2243  ;;  %v4082_v61 = vpop.permute.xlu1 %2043 }
 0x15e   : > { %v3328_v10 = vpop.f32.mrf.mxu0  ;;  %4961 = vst [vmem:[#allocation24_spill] sm:$0xff] %v4080_v60 }
 0x15f   : > { %v1267_v12 = vadd.f32 %v3406_v30, %v1106_v7  ;;  %v3329_v14 = vadd.f32 %v3328_v10, %v3327_v2 }
 0x160   : > { %v3330_v15 = vpop.f32.mrf.mxu0 }
 0x161   : > { %v1313_v20 = vmax.f32 %v1267_v12, 0.0  ;;  %v1111_v9 = vadd.f32 %v3329_v14, %v3967_v0  ;;  %v4087_v7 = vpop.permute.xlu1 %2147 }
 0x162   : > { %v3331_v23 = vpop.f32.mrf.mxu0 }
 0x163   : > { %v1331_v25 = vpack.c.bf16 %v1313_v20, %v1312_v11  ;;  %v3332_v26 = vadd.f32 %v3331_v23, %v3330_v15  ;;  %v1272_v27 = vadd.f32 %v1271_v3, %v1111_v9  ;;  %v4085_v3 = vpop.permute.xlu0 %2251 }
 0x164   : > { %v3333_v29 = vpop.f32.mrf.mxu0  ;;  %4962 = vst [vmem:[#allocation25_spill] sm:$0xff] %v4085_v3 }
 0x165   : > { %3440 = vmatmul.mubr.msk.bf16.gmra.mxu1 %vm915_vm0, %v1331_v25  ;;  %v1114_v30 = vadd.f32 %v3332_v26, %v3967_v0  ;;  %v1314_v39 = vmax.f32 %v1272_v27, 0.0  ;;  %v4091_v10 = vpop.permute.xlu1 %2151 }
 0x166   : > { %v3334_v32 = vpop.f32.mrf.mxu0 }
 0x167   : > { %v3335_v38 = vadd.f32 %v3334_v32, %v3333_v29  ;;  %v1275_v40 = vadd.f32 %v1274_v35, %v1114_v30 }
 0x168   : > { %v3336_v41 = vpop.f32.mrf.mxu0 }
 0x169   : > { %v1119_v43 = vadd.f32 %v3335_v38, %v3967_v0  ;;  %v1315_v45 = vmax.f32 %v1275_v40, 0.0  ;;  %v4095_v11 = vpop.permute.xlu1 %2159 }
 0x16a   : > { %v3337_v47 = vpop.f32.mrf.mxu0 }
 0x16b   : > { %v1280_v50 = vadd.f32 %v3409_v55, %v1119_v43  ;;  %v3338_v51 = vadd.f32 %v3337_v47, %v3336_v41  ;;  %v1332_v54 = vpack.c.bf16 %v1315_v45, %v1314_v39  ;;  %v4089_v55 = vpop.permute.xlu0 %2259  ;;  %v4140_v47 = vld [vmem:[%s4901_s4] ss:$0 sm:$0xff] }
 0x16c   : > { %4963 = vst [vmem:[#allocation26_spill] sm:$0xff] %v4089_v55 }
 0x16d   : > { %v1122_v57 = vadd.f32 %v3338_v51, %v3967_v0  ;;  %3443 = vmatprep.mubr.msk.bf16.mxu1 %vm915_vm0, %v1332_v54  ;;  %v1316_v58 = vmax.f32 %v1280_v50, 0.0  ;;  %v4099_v14 = vpop.permute.xlu1 %2167 }
 0x16f   : > { %v1283_v59 = vadd.f32 %v3410_v17, %v1122_v57  ;;  %v4093_v0 = vpop.permute.xlu0 %2267 }
 0x171   : > { %v1317_v63 = vmax.f32 %v1283_v59, 0.0  ;;  %v4103_v17 = vpop.permute.xlu1 %2175 }
 0x173   : > { %v1333_v2 = vpack.c.bf16 %v1317_v63, %v1316_v58  ;;  %v4097_v12 = vpop.permute.xlu0 %1888 }
 0x175   : > { %3444 = vmatmul.mubr.msk.bf16.gmra.mxu1 %vm915_vm0, %v1333_v2  ;;  %v4107_v9 = vpop.permute.xlu1 %2183 }
 0x177   : > { %v4101_v15 = vpop.permute.xlu0 %1893 }
 0x179   : > { %v4111_v25 = vpop.permute.xlu1 %2191 }
 0x17a   : > { %4964 = vst [vmem:[#allocation27_spill] sm:$0xff] %v4111_v25 }
 0x17b   : > { %v4105_v20 = vpop.permute.xlu0 %1908 }
 0x17d   : > { %v4115_v27 = vpop.permute.xlu1 %2199 }
 0x17e   : > { %4965 = vst [vmem:[#allocation28_spill] sm:$0xff] %v4115_v27 }
 0x17f   : > { %v4109_v23 = vpop.permute.xlu0 %1918 }
 0x181   : > { %v4119_v35 = vpop.permute.xlu1 %2207 }
 0x182   : > { %4966 = vst [vmem:[#allocation29_spill] sm:$0xff] %v4119_v35 }
 0x183   : > { %v4113_v26 = vpop.permute.xlu0 %1928 }
 0x185   : > { %v4123_v32 = vpop.permute.xlu1 %2215 }
 0x186   : > { %4968 = vst [vmem:[#allocation31_spill] sm:$0xff] %v4123_v32 }
 0x187   : > { %v4117_v29 = vpop.permute.xlu0 %1938 }
 0x189   : > { %v4127_v39 = vpop.permute.xlu1 %2223 }
 0x18a   : > { %4970 = vst [vmem:[#allocation33_spill] sm:$0xff] %v4127_v39 }
 0x18b   : > { %v4121_v30 = vpop.permute.xlu0 %1948 }
 0x18c   : > { %4967 = vst [vmem:[#allocation30_spill] sm:$0xff] %v4121_v30 }
 0x18d   : > { %v4131_v41 = vpop.permute.xlu1 %2231 }
 0x18e   : > { %4972 = vst [vmem:[#allocation35_spill] sm:$0xff] %v4131_v41 }
 0x18f   : > { %v4125_v38 = vpop.permute.xlu0 %1958 }
 0x190   : > { %4969 = vst [vmem:[#allocation32_spill] sm:$0xff] %v4125_v38 }
 0x191   : > { %v4135_v45 = vpop.permute.xlu1 %2239 }
 0x192   : > { %4974 = vst [vmem:[#allocation37_spill] sm:$0xff] %v4135_v45 }
 0x193   : > { %v4129_v40 = vpop.permute.xlu0 %1968 }
 0x194   : > { %4971 = vst [vmem:[#allocation34_spill] sm:$0xff] %v4129_v40 }
 0x195   : > { %v4144_v51 = vpop.permute.xlu1 %2247 }
 0x196   : > { %4976 = vst [vmem:[#allocation39_spill] sm:$0xff] %v4144_v51 }
 0x197   : > { %v4133_v43 = vpop.permute.xlu0 %1978 }
 0x198   : > { %4973 = vst [vmem:[#allocation36_spill] sm:$0xff] %v4133_v43 }
 0x199   : > { %v4151_v60 = vpop.permute.xlu1 %2255 }
 0x19a   : > { %4978 = vst [vmem:[#allocation41_spill] sm:$0xff] %v4151_v60 }
 0x19b   : > { %v4142_v50 = vpop.permute.xlu0 %1988 }
 0x19c   : > { %4975 = vst [vmem:[#allocation38_spill] sm:$0xff] %v4142_v50 }
 0x19d   : > { %v4159_v42 = vpop.permute.xlu1 %2263 }
 0x19f   : > { %v4149_v55 = vpop.permute.xlu0 %1998 }
 0x1a0   : > { %4977 = vst [vmem:[#allocation40_spill] sm:$0xff] %v4149_v55 }
 0x1c5   : > { %v3417_v54 = vpop.f32.mrf.mxu1 }
 0x1c6   : > { %v1448_v57 = vadd.f32 %v3417_v54, %v4140_v47 }
 0x1c7   : > { %v1439_v58 = vpop.f32.mrf.mxu1 }
 0x1c8   : > { %v3163_v59 = vmul.f32 -1.442695, %v1448_v57  ;;  %v1440_v63 = vadd.f32 %v4140_v47, %v1439_v58  ;;  %2756 = vrot.lane.b32.xlu1 %v1448_v57, %s3686_s15  ;;  %v4157_v57 = vpop.permute.xlu0 %2008 }
 0x1c9   : > { %v3418_v2 = vpop.f32.mrf.mxu1  ;;  %4979 = vst [vmem:[#allocation42_spill] sm:$0xff] %v4157_v57 }
 0x1ca   : > { %3548 = vpow2.f32 %v3163_v59  ;;  %v3161_v48 = vmul.f32 -1.442695, %v1440_v63  ;;  %v1451_v3 = vadd.f32 %v3418_v2, %v4140_v47 }
 0x1cb   : > { %v1442_v22 = vpop.f32.mrf.mxu1 }
 0x1cc   : > { %3550 = vpow2.f32 %v3161_v48  ;;  %v3164_v8 = vmul.f32 -1.442695, %v1451_v3  ;;  %v1443_v54 = vadd.f32 %v4140_v47, %v1442_v22  ;;  %2752 = vrot.lane.b32.xlu1 %v1440_v63, %s3686_s15  ;;  %v4162_v2 = vpop.permute.xlu0 %2018  ;;  %v4164_v48 = vpop.permute.xlu1 %2336 }
 0x1cd   : > { %4980 = vst [vmem:[#allocation43_spill] sm:$0xff] %v4162_v2 }
 0x1ce   : > { %3552 = vpow2.f32 %v3164_v8  ;;  %v3162_v58 = vmul.f32 -1.442695, %v1443_v54  ;;  %2754 = vrot.lane.b32.xlu0 %v1443_v54, %s3686_s15 }
 0x1d0   : > { %3554 = vpow2.f32 %v3162_v58  ;;  %2758 = vrot.lane.b32.xlu1 %v1451_v3, %s3686_s15  ;;  %v4170_v19 = vpop.permute.xlu0 %2028 }
 0x1d1   : > { %4981 = vst [vmem:[#allocation44_spill] sm:$0xff] %v4170_v19 }
 0x1d5   : > { %v3421_v59 = vpop.f32.mrf.mxu1 }
 0x1d6   : > { %v1464_v22 = vadd.f32 %v3421_v59, %v4140_v47  ;;  %v4172_v59 = vpop.permute.xlu1 %2346 }
 0x1d7   : > { %v3549_v28 = vpop.eup %3548  ;;  %v1455_v63 = vpop.f32.mrf.mxu1 }
 0x1d8   : > { %v1664_v8 = vadd.f32 1.0, %v3549_v28  ;;  %v3167_v24 = vmul.f32 -1.442695, %v1464_v22  ;;  %v1456_v54 = vadd.f32 %v4140_v47, %v1455_v63  ;;  %2764 = vrot.lane.b32.xlu0 %v1464_v22, %s3686_s15 }
 0x1d9   : > { %v3551_v37 = vpop.eup %3550  ;;  %v3422_v5 = vpop.f32.mrf.mxu1 }
 0x1da   : > { %3556 = vrcp.f32 %v1664_v8  ;;  %v1662_v58 = vadd.f32 1.0, %v3551_v37  ;;  %v3165_v3 = vmul.f32 -1.442695, %v1456_v54  ;;  %v1467_v53 = vadd.f32 %v3422_v5, %v4140_v47  ;;  %v4180_v63 = vpop.permute.xlu1 %2351 }
 0x1db   : > { %v3553_v60 = vpop.eup %3552  ;;  %3558 = vpow2.f32 %v3167_v24  ;;  %v1458_v1 = vpop.f32.mrf.mxu1 }
 0x1dc   : > { %3560 = vrcp.f32 %v1662_v58  ;;  %v1665_v28 = vadd.f32 1.0, %v3553_v60  ;;  %v3168_v45 = vmul.f32 -1.442695, %v1467_v53  ;;  %v1459_v22 = vadd.f32 %v4140_v47, %v1458_v1  ;;  %2760 = vrot.lane.b32.xlu0 %v1456_v54, %s3686_s15  ;;  %2766 = vrot.lane.b32.xlu1 %v1467_v53, %s3686_s15  ;;  %v4178_v60 = vpop.permute.xlu0 %2038 }
 0x1dd   : > { %v3555_v37 = vpop.eup %3554  ;;  %3562 = vpow2.f32 %v3165_v3 }
 0x1de   : > { %3564 = vrcp.f32 %v1665_v28  ;;  %v1663_v24 = vadd.f32 1.0, %v3555_v37  ;;  %v3166_v5 = vmul.f32 -1.442695, %v1459_v22  ;;  %v4198_v28 = vpop.permute.xlu1 %2361 }
 0x1df   : > { %3566 = vpow2.f32 %v3168_v45  ;;  %4982 = vst [vmem:[#allocation45_spill] sm:$0xff] %v4198_v28 }
 0x1e0   : > { %3568 = vrcp.f32 %v1663_v24  ;;  %2762 = vrot.lane.b32.xlu1 %v1459_v22, %s3686_s15  ;;  %v4195_v58 = vpop.permute.xlu0 %2341 }
 0x1e1   : > { %3570 = vpow2.f32 %v3166_v5  ;;  %v1824_v5 = vld [vmem:[%s4186_s19 + $0x10] sm:$0xff] }
 0x1e5   : > { %v3425_v1 = vpop.f32.mrf.mxu1 }
 0x1e6   : > { %v1480_v53 = vadd.f32 %v3425_v1, %v4140_v47 }
 0x1e7   : > { %v3557_v8 = vpop.eup %3556  ;;  %v1471_v45 = vpop.f32.mrf.mxu1 }
 0x1e8   : > { %v3559_v54 = vpop.eup %3558  ;;  %v2658_v3 = vmul.f32 %v3557_v8, %v4172_v59  ;;  %v3171_v22 = vmul.f32 -1.442695, %v1480_v53  ;;  %v1472_v37 = vadd.f32 %v4140_v47, %v1471_v45  ;;  %2772 = vrot.lane.b32.xlu0 %v1480_v53, %s3686_s15  ;;  %v1856_v55 = vsub.f32 %v1824_v5, %v3557_v8  ;;  %v4221_v8 = vpop.permute.xlu0 %2356 }
 0x1e9   : > { %v4202_v24 = vpop.eup %3560  ;;  %v1668_v1 = vadd.f32 1.0, %v3559_v54  ;;  %v3426_v19 = vpop.f32.mrf.mxu1 }
 0x1ea   : > { %v3563_v51 = vpop.eup %3562  ;;  %2690 = vst.msk [vmem:[%s4193_s24 + $0x10] sm:$0xff] %vm2526_vm1, %v2658_v3  ;;  %v2656_v39 = vmul.f32 %v4202_v24, %v4164_v48  ;;  %3572 = vpow2.f32 %v3171_v22  ;;  %v3169_v57 = vmul.f32 -1.442695, %v1472_v37  ;;  %v1483_v53 = vadd.f32 %v3426_v19, %v4140_v47 }
 0x1eb   : > { %v4209_v41 = vpop.eup %3564  ;;  %3574 = vrcp.f32 %v1668_v1  ;;  %v1666_v45 = vadd.f32 1.0, %v3563_v51  ;;  %v1474_v2 = vpop.f32.mrf.mxu1 }
 0x1ec   : > { %v3567_v50 = vpop.eup %3566  ;;  %2688 = vst.msk [vmem:[%s4193_s24] sm:$0xff] %vm2526_vm1, %v2656_v39  ;;  %v2659_v54 = vmul.f32 %v4209_v41, %v4180_v63  ;;  %3576 = vpow2.f32 %v3169_v57  ;;  %2768 = vrot.lane.b32.xlu0 %v1472_v37, %s3686_s15  ;;  %v3172_v51 = vmul.f32 -1.442695, %v1483_v53  ;;  %v1475_v19 = vadd.f32 %v4140_v47, %v1474_v2  ;;  %2774 = vrot.lane.b32.xlu1 %v1483_v53, %s3686_s15  ;;  %v4227_v57 = vpop.permute.xlu1 %2371 }
 0x1ed   : > { %v4217_v3 = vpop.eup %3568  ;;  %3578 = vrcp.f32 %v1666_v45  ;;  %v1669_v22 = vadd.f32 1.0, %v3567_v50  ;;  %4983 = vst [vmem:[#allocation46_spill] sm:$0xff] %v4227_v57  ;;  %v2048_v50 = vmul.f32 %v3993_v18, %v1856_v55  ;;  %v4233_v2 = vpop.permute.xlu0 %2366 }
 0x1ee   : > { %v3571_v1 = vpop.eup %3570  ;;  %2691 = vst.msk [vmem:[%s4193_s24 + $0x18] sm:$0xff] %vm2526_vm1, %v2659_v54  ;;  %v2657_v39 = vmul.f32 %v4217_v3, %v4195_v58  ;;  %v3170_v5 = vmul.f32 -1.442695, %v1475_v19 }
 0x1ef   : > { %3580 = vrcp.f32 %v1669_v22  ;;  %v1667_v37 = vadd.f32 1.0, %v3571_v1  ;;  %v2080_v53 = vmul.f32 -0.5, %v2048_v50 }
 0x1f0   : > { %2689 = vst.msk [vmem:[%s4193_s24 + $0x8] sm:$0xff] %vm2526_vm1, %v2657_v39  ;;  %3582 = vpow2.f32 %v3172_v51  ;;  %2770 = vrot.lane.b32.xlu1 %v1475_v19, %s3686_s15  ;;  %v4235_v45 = vpop.permute.xlu1 %2381 }
 0x1f1   : > { %3584 = vrcp.f32 %v1667_v37  ;;  %4984 = vst [vmem:[#allocation47_spill] sm:$0xff] %v4235_v45  ;;  %v2112_v37 = vmul.f32 %v2080_v53, %v2048_v50 }
 0x1f2   : > { %3586 = vpow2.f32 %v3170_v5 }
 0x1f4   : > { %v4252_v49 = vpop.permute.xlu1 %2391 }
 0x1f5   : > { %v3429_v54 = vpop.f32.mrf.mxu1  ;;  %4985 = vst [vmem:[#allocation48_spill] sm:$0xff] %v4252_v49 }
 0x1f6   : > { %v4238_v13 = vadd.f32 %v3429_v54, %v4140_v47  ;;  %v4250_v54 = vpop.permute.xlu0 %2376 }
 0x1f7   : > { %v3573_v22 = vpop.eup %3572  ;;  %v1487_v1 = vpop.f32.mrf.mxu1 }
 0x1f8   : > { %v4240_v39 = vpop.eup %3574  ;;  %v1672_v51 = vadd.f32 1.0, %v3573_v22  ;;  %v3175_v18 = vmul.f32 -1.442695, %v4238_v13  ;;  %v4244_v55 = vadd.f32 %v4140_v47, %v1487_v1 }
 0x1f9   : > { %v3577_v19 = vpop.eup %3576  ;;  %v2662_v5 = vmul.f32 %v4240_v39, %v4233_v2  ;;  %v3430_v34 = vpop.f32.mrf.mxu1 }
 0x1fa   : > { %v4248_v36 = vpop.eup %3578  ;;  %3588 = vrcp.f32 %v1672_v51  ;;  %v1670_v22 = vadd.f32 1.0, %v3577_v19  ;;  %v3173_v35 = vmul.f32 -1.442695, %v4244_v55  ;;  %v1499_v1 = vadd.f32 %v3430_v34, %v4140_v47 }
 0x1fb   : > { %2694 = vst.msk [vmem:[%s4193_s24 + $0x30] sm:$0xff] %vm2526_vm1, %v2662_v5  ;;  %v2660_v50 = vmul.f32 %v4248_v36, %v4221_v8  ;;  %3590 = vpow2.f32 %v3175_v18  ;;  %v1490_v53 = vpop.f32.mrf.mxu1  ;;  %v2272_v34 = vsub.f32 %v2112_v37, %v4091_v10  ;;  %v4278_v10 = vpop.permute.xlu0 %2386 }
 0x1fc   : > { %v4260_v32 = vpop.eup %3580  ;;  %3592 = vrcp.f32 %v1670_v22  ;;  %v3176_v40 = vmul.f32 -1.442695, %v1499_v1  ;;  %v4263_v43 = vadd.f32 %v4140_v47, %v1490_v53  ;;  %2782 = vrot.lane.b32.xlu1 %v1499_v1, %s3686_s15  ;;  %v4280_v37 = vpop.permute.xlu1 %2401 }
 0x1fd   : > { %v3583_v51 = vpop.eup %3582  ;;  %2692 = vst.msk [vmem:[%s4193_s24 + $0x20] sm:$0xff] %vm2526_vm1, %v2660_v50  ;;  %v2663_v18 = vmul.f32 %v4260_v32, %v4227_v57  ;;  %3594 = vpow2.f32 %v3173_v35  ;;  %4986 = vst [vmem:[#allocation49_spill] sm:$0xff] %v4280_v37  ;;  %v3195_v35 = vadd.f32 -0.9189385, %v2272_v34 }
 0x1fe   : > { %v4271_v19 = vpop.eup %3584  ;;  %v1673_v5 = vadd.f32 1.0, %v3583_v51  ;;  %3596 = vpow2.f32 %v3176_v40  ;;  %v3174_v22 = vmul.f32 -1.442695, %v4263_v43  ;;  %v1855_v40 = vsub.f32 %v1823_v46, %v4217_v3 }
 0x1ff   : > { %v3587_v53 = vpop.eup %3586  ;;  %2695 = vst.msk [vmem:[%s4193_s24 + $0x38] sm:$0xff] %vm2526_vm1, %v2663_v18  ;;  %v2661_v1 = vmul.f32 %v4271_v19, %v4198_v28  ;;  %v2496_v51 = vmul.f32 %v3195_v35, %v4172_v59  ;;  %v4287_v62 = vpop.permute.xlu0 %2396 }
 0x200   : > { %3598 = vrcp.f32 %v1673_v5  ;;  %v1671_v50 = vadd.f32 1.0, %v3587_v53  ;;  %4987 = vst [vmem:[#allocation50_spill] sm:$0xff] %v4287_v62  ;;  %v4289_v6 = vpop.permute.xlu1 %2411  ;;  %v2047_v53 = vmul.f32 %v4101_v15, %v1855_v40 }
 0x201   : > { %2693 = vst.msk [vmem:[%s4193_s24 + $0x28] sm:$0xff] %vm2526_vm1, %v2661_v1  ;;  %3600 = vpow2.f32 %v3174_v22  ;;  %4988 = vst [vmem:[#allocation51_spill] sm:$0xff] %v4289_v6 }
 0x202   : > { %3602 = vrcp.f32 %v1671_v50  ;;  %v2079_v38 = vmul.f32 -0.5, %v2047_v53 }
 0x203   : > { %v4314_v28 = vpop.permute.xlu0 %2406 }
 0x204   : > { %4989 = vst [vmem:[#allocation52_spill] sm:$0xff] %v4314_v28 }
 0x205   : > { %v3433_v18 = vpop.f32.mrf.mxu1 }
 0x206   : > { %v4292_v21 = vadd.f32 %v3433_v18, %v4140_v47  ;;  %v2533_v18 = vsel %vm2526_vm1, %v2496_v51, 0.0  ;;  %v4316_v51 = vpop.permute.xlu1 %2421 }
 0x207   : > { %v4294_v5 = vpop.eup %3588  ;;  %v1503_v34 = vpop.f32.mrf.mxu1  ;;  %4990 = vst [vmem:[#allocation53_spill] sm:$0xff] %v4316_v51 }
 0x208   : > { %v3591_v22 = vpop.eup %3590  ;;  %v2666_v46 = vmul.f32 %v4294_v5, %v4278_v10  ;;  %v3179_v59 = vmul.f32 -1.442695, %v4292_v21  ;;  %v4301_v3 = vadd.f32 %v4140_v47, %v1503_v34 }
 0x209   : > { %v4303_v1 = vpop.eup %3592  ;;  %v1676_v50 = vadd.f32 1.0, %v3591_v22  ;;  %v3434_v35 = vpop.f32.mrf.mxu1 }
 0x20a   : > { %v3595_v25 = vpop.eup %3594  ;;  %2698 = vst.msk [vmem:[%s4193_s24 + $0x50] sm:$0xff] %vm2526_vm1, %v2666_v46  ;;  %v2664_v15 = vmul.f32 %v4303_v1, %v4250_v54  ;;  %3604 = vpow2.f32 %v3179_v59  ;;  %v3177_v40 = vmul.f32 -1.442695, %v4301_v3  ;;  %v4312_v27 = vadd.f32 %v3434_v35, %v4140_v47 }
 0x20b   : > { %v3597_v34 = vpop.eup %3596  ;;  %3606 = vrcp.f32 %v1676_v50  ;;  %v1674_v30 = vadd.f32 1.0, %v3595_v25  ;;  %v1506_v22 = vpop.f32.mrf.mxu1  ;;  %2534 = vadd.xlane.f32.xlu0 %v2533_v18 }
 0x20c   : > { %2696 = vst.msk [vmem:[%s4193_s24 + $0x40] sm:$0xff] %vm2526_vm1, %v2664_v15  ;;  %v1677_v46 = vadd.f32 1.0, %v3597_v34  ;;  %3608 = vpow2.f32 %v3177_v40  ;;  %v3180_v59 = vmul.f32 -1.442695, %v4312_v27  ;;  %v4322_v35 = vadd.f32 %v4140_v47, %v1506_v22  ;;  %v4337_v22 = vpop.permute.xlu1 %2431 }
 0x20d   : > { %v4324_v57 = vpop.eup %3598  ;;  %3610 = vrcp.f32 %v1674_v30  ;;  %v2111_v40 = vmul.f32 %v2079_v38, %v2047_v53  ;;  %v4335_v30 = vpop.permute.xlu0 %2416  ;;  %4994 = vst [vmem:[#allocation57_spill] sm:$0xff] %v4337_v22 }
 0x20e   : > { %4991 = vst [vmem:[#allocation54_spill] sm:$0xff] %v4324_v57  ;;  %v3601_v25 = vpop.eup %3600  ;;  %v2667_v50 = vmul.f32 %v4324_v57, %v4252_v49  ;;  %3612 = vrcp.f32 %v1677_v46  ;;  %v3178_v18 = vmul.f32 -1.442695, %v4322_v35  ;;  %4993 = vst [vmem:[#allocation56_spill] sm:$0xff] %v4335_v30 }
 0x20f   : > { %v4329_v16 = vpop.eup %3602  ;;  %v1675_v15 = vadd.f32 1.0, %v3601_v25  ;;  %3614 = vpow2.f32 %v3180_v59  ;;  %v2271_v46 = vsub.f32 %v2111_v40, %v4087_v7 }
 0x210   : > { %4992 = vst [vmem:[#allocation55_spill] sm:$0xff] %v4329_v16  ;;  %2699 = vst.msk [vmem:[%s4193_s24 + $0x58] sm:$0xff] %vm2526_vm1, %v2667_v50  ;;  %v2665_v34 = vmul.f32 %v4329_v16, %v4235_v45  ;;  %3616 = vpow2.f32 %v3178_v18 }
 0x211   : > { %3618 = vrcp.f32 %v1675_v15  ;;  %v3194_v59 = vadd.f32 -0.9189385, %v2271_v46  ;;  %v4347_v18 = vpop.permute.xlu0 %2426  ;;  %v4349_v15 = vpop.permute.xlu1 %2441 }
 0x212   : > { %2697 = vst.msk [vmem:[%s4193_s24 + $0x48] sm:$0xff] %vm2526_vm1, %v2665_v34  ;;  %4997 = vst [vmem:[#allocation60_spill] sm:$0xff] %v4347_v18 }
 0x215   : > { %v3437_v49 = vpop.f32.mrf.mxu1 }
 0x216   : > { %v4343_v25 = vadd.f32 %v3437_v49, %v4140_v47 }
 0x217   : > { %v3605_v38 = vpop.eup %3604  ;;  %v1519_v53 = vpop.f32.mrf.mxu1 }
 0x218   : > { %4995 = vst [vmem:[#allocation58_spill] sm:$0xff] %v4343_v25  ;;  %v4345_v50 = vpop.eup %3606  ;;  %v1680_v45 = vadd.f32 1.0, %v3605_v38  ;;  %v3183_v16 = vmul.f32 -1.442695, %v4343_v25  ;;  %v4353_v34 = vadd.f32 %v4140_v47, %v1519_v53  ;;  %v2495_v25 = vmul.f32 %v3194_v59, %v4195_v58  ;;  %v4380_v58 = vpop.permute.xlu0 %2436 }
 0x219   : > { %4996 = vst [vmem:[#allocation59_spill] sm:$0xff] %v4345_v50  ;;  %v3609_v7 = vpop.eup %3608  ;;  %v2670_v49 = vmul.f32 %v4345_v50, %v4314_v28  ;;  %v3438_v40 = vpop.f32.mrf.mxu1  ;;  %5003 = vst [vmem:[#allocation66_spill] sm:$0xff] %v4380_v58 }
 0x21a   : > { %4998 = vst [vmem:[#allocation61_spill] sm:$0xff] %v4353_v34  ;;  %v4357_v57 = vpop.eup %3610  ;;  %3620 = vrcp.f32 %v1680_v45  ;;  %v1678_v46 = vadd.f32 1.0, %v3609_v7  ;;  %v3181_v33 = vmul.f32 -1.442695, %v4353_v34  ;;  %v4361_v44 = vadd.f32 %v3438_v40, %v4140_v47  ;;  %v4382_v59 = vpop.permute.xlu1 %2451 }
 0x21b   : > { %4999 = vst [vmem:[#allocation62_spill] sm:$0xff] %v4357_v57  ;;  %v4363_v38 = vpop.eup %3612  ;;  %2702 = vst.msk [vmem:[%s4193_s24 + $0x70] sm:$0xff] %vm2526_vm1, %v2670_v49  ;;  %v2668_v53 = vmul.f32 %v4357_v57, %v4287_v62  ;;  %3622 = vpow2.f32 %v3183_v16  ;;  %v1522_v28 = vpop.f32.mrf.mxu1 }
 0x21c   : > { %5000 = vst [vmem:[#allocation63_spill] sm:$0xff] %v4363_v38  ;;  %v3615_v45 = vpop.eup %3614  ;;  %v2671_v7 = vmul.f32 %v4363_v38, %v4289_v6  ;;  %3624 = vrcp.f32 %v1678_v46  ;;  %v3184_v40 = vmul.f32 -1.442695, %v4361_v44  ;;  %v4374_v34 = vadd.f32 %v4140_v47, %v1522_v28  ;;  %v1822_v28 = vld [vmem:[%s4186_s19] sm:$0xff] }
 0x21d   : > { %v3617_v49 = vpop.eup %3616  ;;  %2700 = vst.msk [vmem:[%s4193_s24 + $0x60] sm:$0xff] %vm2526_vm1, %v2668_v53  ;;  %v1681_v62 = vadd.f32 1.0, %v3615_v45  ;;  %3626 = vpow2.f32 %v3181_v33  ;;  %v2530_v53 = vsel %vm2526_vm1, %v2495_v25, 0.0  ;;  %v1854_v33 = vsub.f32 %v1822_v28, %v4202_v24  ;;  %v4396_v45 = vpop.permute.xlu0 %2446 }
 0x21e   : > { %5001 = vst [vmem:[#allocation64_spill] sm:$0xff] %v4374_v34  ;;  %v4378_v16 = vpop.eup %3618  ;;  %2703 = vst.msk [vmem:[%s4193_s24 + $0x78] sm:$0xff] %vm2526_vm1, %v2671_v7  ;;  %v1679_v46 = vadd.f32 1.0, %v3617_v49  ;;  %3628 = vpow2.f32 %v3184_v40  ;;  %v3182_v6 = vmul.f32 -1.442695, %v4374_v34  ;;  %v4398_v7 = vpop.permute.xlu1 %2461 }
 0x21f   : > { %5002 = vst [vmem:[#allocation65_spill] sm:$0xff] %v4378_v16  ;;  %v2669_v38 = vmul.f32 %v4378_v16, %v4280_v37  ;;  %3630 = vrcp.f32 %v1681_v62  ;;  %5004 = vst [vmem:[#allocation67_spill] sm:$0xff] %v4396_v45  ;;  %v2046_v62 = vmul.f32 %v4097_v12, %v1854_v33 }
 0x220   : > { %3632 = vrcp.f32 %v1679_v46  ;;  %2531 = vadd.xlane.f32.xlu1 %v2530_v53 }
 0x221   : > { %2701 = vst.msk [vmem:[%s4193_s24 + $0x68] sm:$0xff] %vm2526_vm1, %v2669_v38  ;;  %3634 = vpow2.f32 %v3182_v6  ;;  %2780 = vrot.lane.b32.xlu0 %v4238_v13, %s3686_s15  ;;  %v2078_v33 = vmul.f32 -0.5, %v2046_v62  ;;  %v4414_v37 = vpop.permute.xlu0 %2456 }
 0x222   : > { %v4416_v16 = vpop.permute.xlu1 %2471 }
 0x225   : > { %v3441_v40 = vpop.f32.mrf.mxu1 }
 0x226   : > { %v4402_v25 = vadd.f32 %v3441_v40, %v4140_v47 }
 0x227   : > { %v4404_v49 = vpop.eup %3620  ;;  %v1535_v38 = vpop.f32.mrf.mxu1 }
 0x228   : > { %5005 = vst [vmem:[#allocation68_spill] sm:$0xff] %v4402_v25  ;;  %5006 = vst [vmem:[#allocation69_spill] sm:$0xff] %v4404_v49  ;;  %v3623_v6 = vpop.eup %3622  ;;  %v2674_v13 = vmul.f32 %v4404_v49, %v4347_v18  ;;  %v3187_v24 = vmul.f32 -1.442695, %v4402_v25  ;;  %v4410_v46 = vadd.f32 %v4140_v47, %v1535_v38 }
 0x229   : > { %v4412_v28 = vpop.eup %3624  ;;  %v1684_v53 = vadd.f32 1.0, %v3623_v6  ;;  %v3442_v12 = vpop.f32.mrf.mxu1 }
 0x22a   : > { %5007 = vst [vmem:[#allocation70_spill] sm:$0xff] %v4410_v46  ;;  %5008 = vst [vmem:[#allocation71_spill] sm:$0xff] %v4412_v28  ;;  %v3627_v40 = vpop.eup %3626  ;;  %v2672_v18 = vmul.f32 %v4412_v28, %v4335_v30  ;;  %3636 = vpow2.f32 %v3187_v24  ;;  %v3185_v38 = vmul.f32 -1.442695, %v4410_v46  ;;  %v4424_v25 = vadd.f32 %v3442_v12, %v4140_v47  ;;  %v4445_v46 = vpop.permute.xlu1 %2481 }
 0x22b   : > { %2706 = vst.msk [vmem:[%s4193_s24 + $0x90] sm:$0xff] %vm2526_vm1, %v2674_v13  ;;  %v3629_v6 = vpop.eup %3628  ;;  %3638 = vrcp.f32 %v1684_v53  ;;  %v1682_v49 = vadd.f32 1.0, %v3627_v40  ;;  %v1538_v57 = vpop.f32.mrf.mxu1  ;;  %v2110_v12 = vmul.f32 %v2078_v33, %v2046_v62  ;;  %v1828_v62 = vld [vmem:[%s4186_s19 + $0x30] sm:$0xff] }
 0x22c   : > { %v4426_v50 = vpop.eup %3630  ;;  %2704 = vst.msk [vmem:[%s4193_s24 + $0x80] sm:$0xff] %vm2526_vm1, %v2672_v18  ;;  %v1685_v34 = vadd.f32 1.0, %v3629_v6  ;;  %3640 = vpow2.f32 %v3185_v38  ;;  %v3188_v13 = vmul.f32 -1.442695, %v4424_v25  ;;  %v4432_v24 = vadd.f32 %v4140_v47, %v1538_v57  ;;  %v4443_v57 = vpop.permute.xlu0 %2466 }
 0x22d   : > { %5009 = vst [vmem:[#allocation72_spill] sm:$0xff] %v4426_v50  ;;  %v4434_v30 = vpop.eup %3632  ;;  %v2675_v53 = vmul.f32 %v4426_v50, %v4337_v22  ;;  %3642 = vrcp.f32 %v1682_v49 }
 0x22e   : > { %5010 = vst [vmem:[#allocation73_spill] sm:$0xff] %v4434_v30  ;;  %v3635_v40 = vpop.eup %3634  ;;  %v2673_v18 = vmul.f32 %v4434_v30, %v4316_v51  ;;  %3644 = vrcp.f32 %v1685_v34  ;;  %v3186_v38 = vmul.f32 -1.442695, %v4432_v24  ;;  %v2270_v34 = vsub.f32 %v2110_v12, %v4005_v52 }
 0x22f   : > { %2707 = vst.msk [vmem:[%s4193_s24 + $0x98] sm:$0xff] %vm2526_vm1, %v2675_v53  ;;  %v1683_v6 = vadd.f32 1.0, %v3635_v40  ;;  %3646 = vpow2.f32 %v3188_v13  ;;  %v4455_v13 = vpop.permute.xlu1 %2491 }
 0x230   : > { %2705 = vst.msk [vmem:[%s4193_s24 + $0x88] sm:$0xff] %vm2526_vm1, %v2673_v18  ;;  %3648 = vpow2.f32 %v3186_v38  ;;  %v3193_v33 = vadd.f32 -0.9189385, %v2270_v34  ;;  %v4453_v53 = vpop.permute.xlu0 %2476  ;;  %v1826_v34 = vld [vmem:[%s4186_s19 + $0x20] sm:$0xff] }
 0x231   : > { %3650 = vrcp.f32 %v1683_v6  ;;  %2778 = vrot.lane.b32.xlu1 %v4263_v43, %s3686_s15  ;;  %v1860_v6 = vsub.f32 %v1828_v62, %v4240_v39 }
 0x235   : > { %v3445_v49 = vpop.f32.mrf.mxu1 }
 0x236   : > { %v4458_v40 = vadd.f32 %v3445_v49, %v4140_v47 }
 0x237   : > { %v3637_v18 = vpop.eup %3636  ;;  %v1551_v38 = vpop.f32.mrf.mxu1 }
 0x238   : > { %5011 = vst [vmem:[#allocation74_spill] sm:$0xff] %v4458_v40  ;;  %v4461_v51 = vpop.eup %3638  ;;  %v1688_v43 = vadd.f32 1.0, %v3637_v18  ;;  %v3191_v52 = vmul.f32 -1.442695, %v4458_v40  ;;  %v4465_v12 = vadd.f32 %v4140_v47, %v1551_v38  ;;  %v2494_v18 = vmul.f32 %v3193_v33, %v4164_v48 }
 0x239   : > { %v3641_v49 = vpop.eup %3640  ;;  %v2678_v39 = vmul.f32 %v4461_v51, %v4396_v45  ;;  %v3446_v62 = vpop.f32.mrf.mxu1  ;;  %v2052_v33 = vmul.f32 %v4109_v23, %v1860_v6 }
 0x23a   : > { %5012 = vst [vmem:[#allocation75_spill] sm:$0xff] %v4465_v12  ;;  %v4477_v40 = vpop.eup %3642  ;;  %3652 = vrcp.f32 %v1688_v43  ;;  %v1686_v38 = vadd.f32 1.0, %v3641_v49  ;;  %v3189_v22 = vmul.f32 -1.442695, %v4465_v12  ;;  %v4481_v30 = vadd.f32 %v3446_v62, %v4140_v47  ;;  %v2757_v50 = vpop.permute.xlu1 %2756 }
 0x23b   : > { %v4483_v28 = vpop.eup %3644  ;;  %2710 = vst.msk [vmem:[%s4193_s24 + $0xb0] sm:$0xff] %vm2526_vm1, %v2678_v39  ;;  %v2676_v45 = vmul.f32 %v4477_v40, %v4380_v58  ;;  %3654 = vpow2.f32 %v3191_v52  ;;  %v1554_v48 = vpop.f32.mrf.mxu1  ;;  %v1858_v43 = vsub.f32 %v1826_v34, %v4248_v36 }
 0x23c   : > { %2850 = vst.msk [vmem:[%s4471_s26 + $0x10] sm:$0xff] %vm2623_vm2, %v2757_v50  ;;  %v3647_v49 = vpop.eup %3646  ;;  %v4493_v62 = vpop.permute.xlu0 %2486  ;;  %v2679_v12 = vmul.f32 %v4483_v28, %v4382_v59  ;;  %3656 = vrcp.f32 %v1686_v38  ;;  %v3192_v39 = vmul.f32 -1.442695, %v4481_v30  ;;  %v4499_v52 = vadd.f32 %v4140_v47, %v1554_v48 }
 0x23d   : > { %v3649_v58 = vpop.eup %3648  ;;  %2708 = vst.msk [vmem:[%s4193_s24 + $0xa0] sm:$0xff] %vm2526_vm1, %v2676_v45  ;;  %v1689_v50 = vadd.f32 1.0, %v3647_v49  ;;  %3658 = vpow2.f32 %v3189_v22  ;;  %v2527_v22 = vsel %vm2526_vm1, %v2494_v18, 0.0  ;;  %v2084_v38 = vmul.f32 -0.5, %v2052_v33 }
 0x23e   : > { %v4503_v36 = vpop.eup %3650  ;;  %2711 = vst.msk [vmem:[%s4193_s24 + $0xb8] sm:$0xff] %vm2526_vm1, %v2679_v12  ;;  %v1687_v23 = vadd.f32 1.0, %v3649_v58  ;;  %3660 = vpow2.f32 %v3192_v39  ;;  %v3190_v6 = vmul.f32 -1.442695, %v4499_v52  ;;  %v2753_v34 = vpop.permute.xlu1 %2752  ;;  %v2050_v12 = vmul.f32 %v4105_v20, %v1858_v43 }
 0x23f   : > { %v2677_v47 = vmul.f32 %v4503_v36, %v4349_v15  ;;  %3662 = vrcp.f32 %v1689_v50  ;;  %2848 = vst.msk [vmem:[%s4471_s26] sm:$0xff] %vm2623_vm2, %v2753_v34  ;;  %v2116_v48 = vmul.f32 %v2084_v38, %v2052_v33 }
 0x240   : > { %3664 = vrcp.f32 %v1687_v23  ;;  %v2755_v45 = vpop.permute.xlu0 %2754  ;;  %2528 = vadd.xlane.f32.xlu0 %v2527_v22  ;;  %v2082_v49 = vmul.f32 -0.5, %v2050_v12 }
 0x241   : > { %2709 = vst.msk [vmem:[%s4193_s24 + $0xa8] sm:$0xff] %vm2526_vm1, %v2677_v47  ;;  %3666 = vpow2.f32 %v3190_v6  ;;  %v2276_v20 = vsub.f32 %v2116_v48, %v4099_v14 }
 0x242   : > { %2849 = vst.msk [vmem:[%s4471_s26 + $0x8] sm:$0xff] %vm2623_vm2, %v2755_v45  ;;  %v2759_v58 = vpop.permute.xlu1 %2758  ;;  %v2114_v43 = vmul.f32 %v2082_v49, %v2050_v12 }
 0x243   : > { %2851 = vst.msk [vmem:[%s4471_s26 + $0x18] sm:$0xff] %vm2623_vm2, %v2759_v58  ;;  %v3199_v12 = vadd.f32 -0.9189385, %v2276_v20 }
 0x244   : > { %v2274_v58 = vsub.f32 %v2114_v43, %v4095_v11 }
 0x245   : > { %v2500_v11 = vmul.f32 %v3199_v12, %v4233_v2 }
 0x246   : > { %v3197_v43 = vadd.f32 -0.9189385, %v2274_v58 }
 0x247   : > { %v4520_v39 = vpop.eup %3652 }
 0x248   : > { %v3655_v18 = vpop.eup %3654  ;;  %v2682_v50 = vmul.f32 %v4520_v39, %v4443_v57 }
 0x249   : > { %v4525_v23 = vpop.eup %3656  ;;  %v1692_v6 = vadd.f32 1.0, %v3655_v18 }
 0x24a   : > { %v3659_v34 = vpop.eup %3658  ;;  %2714 = vst.msk [vmem:[%s4193_s24 + $0xd0] sm:$0xff] %vm2526_vm1, %v2682_v50  ;;  %v2680_v33 = vmul.f32 %v4525_v23, %v4414_v37  ;;  %v2765_v47 = vpop.permute.xlu0 %2764 }
 0x24b   : > { %v3661_v22 = vpop.eup %3660  ;;  %3668 = vrcp.f32 %v1692_v6  ;;  %v1690_v45 = vadd.f32 1.0, %v3659_v34  ;;  %2854 = vst.msk [vmem:[%s4471_s26 + $0x30] sm:$0xff] %vm2623_vm2, %v2765_v47  ;;  %v2545_v47 = vsel %vm2526_vm1, %v2500_v11, 0.0 }
 0x24c   : > { %v4533_v38 = vpop.eup %3662  ;;  %2712 = vst.msk [vmem:[%s4193_s24 + $0xc0] sm:$0xff] %vm2526_vm1, %v2680_v33  ;;  %v1693_v14 = vadd.f32 1.0, %v3661_v22  ;;  %v2498_v22 = vmul.f32 %v3197_v43, %v4221_v8 }
 0x24d   : > { %v4538_v48 = vpop.eup %3664  ;;  %v2683_v49 = vmul.f32 %v4533_v38, %v4416_v16  ;;  %3670 = vrcp.f32 %v1690_v45  ;;  %v1825_v45 = vld [vmem:[%s4186_s19 + $0x18] sm:$0xff] }
 0x24e   : > { %v3667_v18 = vpop.eup %3666  ;;  %v2681_v50 = vmul.f32 %v4538_v48, %v4398_v7  ;;  %3672 = vrcp.f32 %v1693_v14  ;;  %v2761_v6 = vpop.permute.xlu0 %2760  ;;  %v1852_v14 = vld [vmem:[%s4186_s19 + $0xf0] sm:$0xff]  ;;  %v1857_v2 = vsub.f32 %v1825_v45, %v4209_v41  ;;  %v2539_v12 = vsel %vm2526_vm1, %v2498_v22, 0.0 }
 0x24f   : > { %v2767_v34 = vpop.permute.xlu1 %2766  ;;  %2715 = vst.msk [vmem:[%s4193_s24 + $0xd8] sm:$0xff] %vm2526_vm1, %v2683_v49  ;;  %v1691_v20 = vadd.f32 1.0, %v3667_v18 }
 0x250   : > { %2852 = vst.msk [vmem:[%s4471_s26 + $0x20] sm:$0xff] %vm2623_vm2, %v2761_v6  ;;  %2855 = vst.msk [vmem:[%s4471_s26 + $0x38] sm:$0xff] %vm2623_vm2, %v2767_v34 }
 0x251   : > { %2713 = vst.msk [vmem:[%s4193_s24 + $0xc8] sm:$0xff] %vm2526_vm1, %v2681_v50  ;;  %3674 = vrcp.f32 %v1691_v20  ;;  %v1853_v50 = vld [vmem:[%s4186_s19 + $0xf8] sm:$0xff]  ;;  %v2049_v20 = vmul.f32 %v3996_v31, %v1857_v2 }
 0x253   : > { %v2763_v33 = vpop.permute.xlu1 %2762 }
 0x254   : > { %2853 = vst.msk [vmem:[%s4471_s26 + $0x28] sm:$0xff] %vm2623_vm2, %v2763_v33 }
 0x255   : > { %2546 = vadd.xlane.f32.xlu1 %v2545_v47 }
 0x256   : > { %2776 = vrot.lane.b32.xlu0 %v4244_v55, %s3686_s15 }
 0x258   : > { %v3669_v49 = vpop.eup %3668 }
 0x259   : > { %v2686_v58 = vmul.f32 %v3669_v49, %v4493_v62  ;;  %2540 = vadd.xlane.f32.xlu1 %v2539_v12  ;;  %v1884_v18 = vsub.f32 %v1852_v14, %v3669_v49  ;;  %v2081_v49 = vmul.f32 -0.5, %v2049_v20 }
 0x25a   : > { %v4565_v8 = vpop.eup %3670  ;;  %v2773_v6 = vpop.permute.xlu0 %2772 }
 0x25b   : > { %v3673_v34 = vpop.eup %3672  ;;  %2718 = vst.msk [vmem:[%s4193_s24 + $0xf0] sm:$0xff] %vm2526_vm1, %v2686_v58  ;;  %v2684_v55 = vmul.f32 %v4565_v8, %v4453_v53  ;;  %v2076_v41 = vmul.f32 %v4178_v60, %v1884_v18 }
 0x25c   : > { %2858 = vst.msk [vmem:[%s4471_s26 + $0x50] sm:$0xff] %vm2623_vm2, %v2773_v6  ;;  %v2687_v11 = vmul.f32 %v3673_v34, %v4455_v13  ;;  %v1885_v43 = vsub.f32 %v1853_v50, %v3673_v34  ;;  %v2113_v50 = vmul.f32 %v2081_v49, %v2049_v20 }
 0x25d   : > { %2716 = vst.msk [vmem:[%s4193_s24 + $0xe0] sm:$0xff] %vm2526_vm1, %v2684_v55  ;;  %v2108_v33 = vmul.f32 -0.5, %v2076_v41 }
 0x25e   : > { %v4578_v47 = vpop.eup %3674  ;;  %2719 = vst.msk [vmem:[%s4193_s24 + $0xf8] sm:$0xff] %vm2526_vm1, %v2687_v11  ;;  %v2769_v22 = vpop.permute.xlu0 %2768  ;;  %v2077_v45 = vmul.f32 %v4082_v61, %v1885_v43 }
 0x25f   : > { %v2685_v60 = vmul.f32 %v4578_v47, %v4445_v46  ;;  %2856 = vst.msk [vmem:[%s4471_s26 + $0x40] sm:$0xff] %vm2623_vm2, %v2769_v22  ;;  %v2775_v31 = vpop.permute.xlu1 %2774  ;;  %v2140_v14 = vmul.f32 %v2108_v33, %v2076_v41  ;;  %v2273_v41 = vsub.f32 %v2113_v50, %v4010_v4 }
 0x260   : > { %2859 = vst.msk [vmem:[%s4471_s26 + $0x58] sm:$0xff] %vm2623_vm2, %v2775_v31  ;;  %v2109_v2 = vmul.f32 -0.5, %v2077_v45 }
 0x261   : > { %2717 = vst.msk [vmem:[%s4193_s24 + $0xe8] sm:$0xff] %vm2526_vm1, %v2685_v60  ;;  %v2300_v12 = vsub.f32 %v2140_v14, %v4159_v42  ;;  %v3196_v42 = vadd.f32 -0.9189385, %v2273_v41 }
 0x262   : > { %v2141_v58 = vmul.f32 %v2109_v2, %v2077_v45 }
 0x263   : > { %v2771_v18 = vpop.permute.xlu1 %2770  ;;  %v3223_v61 = vadd.f32 -0.9189385, %v2300_v12 }
 0x264   : > { %2857 = vst.msk [vmem:[%s4471_s26 + $0x48] sm:$0xff] %vm2623_vm2, %v2771_v18  ;;  %v2301_v6 = vsub.f32 %v2141_v58, %v4093_v0  ;;  %v2497_v0 = vmul.f32 %v3196_v42, %v4180_v63  ;;  %v5013_v58 = vld [vmem:[#allocation2_spill] sm:$0xff] }
 0x265   : > { %v4596_v34 = vmul.f32 %v3223_v61, %v4493_v62  ;;  %v1832_v62 = vld [vmem:[%s4186_s19 + $0x50] sm:$0xff] }
 0x266   : > { %v3224_v55 = vadd.f32 -0.9189385, %v2301_v6  ;;  %v2536_v43 = vsel %vm2526_vm1, %v2497_v0, 0.0  ;;  %v1864_v4 = vsub.f32 %v1832_v62, %v4294_v5  ;;  %v5014_v6 = vld [vmem:[#allocation6_spill] sm:$0xff] }
 0x267   : > { %v5016_v0 = vld [vmem:[#allocation46_spill] sm:$0xff] }
 0x268   : > { %v4600_v11 = vmul.f32 %v3224_v55, %v4455_v13  ;;  %v1830_v13 = vld [vmem:[%s4186_s19 + $0x40] sm:$0xff]  ;;  %v2056_v33 = vmul.f32 %v4117_v29, %v1864_v4  ;;  %v5017_v4 = vld [vmem:[#allocation64_spill] sm:$0xff] }
 0x26a   : > { %2790 = vrot.lane.b32.xlu1 %v4312_v27, %s3686_s15  ;;  %v1862_v27 = vsub.f32 %v1830_v13, %v4303_v1  ;;  %v2088_v22 = vmul.f32 -0.5, %v2056_v33  ;;  %v1829_v1 = vld [vmem:[%s4186_s19 + $0x38] sm:$0xff] }
 0x26c   : > { %v2120_v45 = vmul.f32 %v2088_v22, %v2056_v33 }
 0x26e   : > { %2786 = vrot.lane.b32.xlu1 %v4322_v35, %s3686_s15  ;;  %v2783_v20 = vpop.permute.xlu1 %2782  ;;  %v2054_v35 = vmul.f32 %v4113_v26, %v1862_v27  ;;  %v2280_v63 = vsub.f32 %v2120_v45, %v4107_v9  ;;  %v1861_v9 = vsub.f32 %v1829_v1, %v4260_v32  ;;  %v5018_v27 = vld [vmem:[#allocation45_spill] sm:$0xff]  ;;  %v5019_v45 = vld [vmem:[#allocation59_spill] sm:$0xff]  ;;  %v5022_v1 = vld [vmem:[#allocation30_spill] sm:$0xff] }
 0x26f   : > { %2863 = vst.msk [vmem:[%s4471_s26 + $0x78] sm:$0xff] %vm2623_vm2, %v2783_v20  ;;  %v5015_v20 = vld [vmem:[#allocation4_spill] sm:$0xff] }
 0x270   : > { %v2086_v60 = vmul.f32 -0.5, %v2054_v35  ;;  %v3203_v14 = vadd.f32 -0.9189385, %v2280_v63  ;;  %v1834_v63 = vld [vmem:[%s4186_s19 + $0x60] sm:$0xff] }
 0x272   : > { %v2118_v31 = vmul.f32 %v2086_v60, %v2054_v35  ;;  %v2504_v29 = vmul.f32 %v3203_v14, %v4278_v10  ;;  %v1836_v35 = vld [vmem:[%s4186_s19 + $0x70] sm:$0xff] }
 0x273   : > { %v1868_v60 = vsub.f32 %v1836_v35, %v5019_v45  ;;  %v5032_v35 = vld [vmem:[#allocation3_spill] sm:$0xff] }
 0x274   : > { %v2278_v49 = vsub.f32 %v2118_v31, %v4103_v17  ;;  %v2557_v26 = vsel %vm2526_vm1, %v2504_v29, 0.0  ;;  %v5020_v31 = vld [vmem:[#allocation32_spill] sm:$0xff] }
 0x275   : > { %2537 = vadd.xlane.f32.xlu0 %v2536_v43  ;;  %v2060_v14 = vmul.f32 %v5020_v31, %v1868_v60  ;;  %v5033_v31 = vld [vmem:[#allocation10_spill] sm:$0xff] }
 0x276   : > { %v3201_v5 = vadd.f32 -0.9189385, %v2278_v49  ;;  %v5021_v49 = vld [vmem:[#allocation62_spill] sm:$0xff] }
 0x277   : > { %v1866_v29 = vsub.f32 %v1834_v63, %v5021_v49 }
 0x278   : > { %v2502_v2 = vmul.f32 %v3201_v5, %v4250_v54  ;;  %v2092_v5 = vmul.f32 -0.5, %v2060_v14 }
 0x27a   : > { %v2551_v10 = vsel %vm2526_vm1, %v2502_v2, 0.0  ;;  %v2124_v2 = vmul.f32 %v2092_v5, %v2060_v14 }
 0x28b   : > { %2788 = vrot.lane.b32.xlu0 %v4292_v21, %s3686_s15  ;;  %v1827_v21 = vld [vmem:[%s4186_s19 + $0x28] sm:$0xff] }
 0x28c   : > { %v1859_v12 = vsub.f32 %v1827_v21, %v4271_v19  ;;  %v5023_v21 = vld [vmem:[#allocation28_spill] sm:$0xff] }
 0x28e   : > { %v2051_v18 = vmul.f32 %v5013_v58, %v1859_v12  ;;  %v5024_v12 = vld [vmem:[#allocation27_spill] sm:$0xff] }
 0x28f   : > { %2784 = vrot.lane.b32.xlu0 %v4301_v3, %s3686_s15  ;;  %v2053_v3 = vmul.f32 %v4007_v56, %v1861_v9 }
 0x290   : > { %v2083_v50 = vmul.f32 -0.5, %v2051_v18 }
 0x291   : > { %v2085_v54 = vmul.f32 -0.5, %v2053_v3 }
 0x292   : > { %2558 = vadd.xlane.f32.xlu1 %v2557_v26  ;;  %v2115_v41 = vmul.f32 %v2083_v50, %v2051_v18  ;;  %v2058_v26 = vmul.f32 %v5022_v1, %v1866_v29  ;;  %v5026_v18 = vld [vmem:[#allocation52_spill] sm:$0xff] }
 0x293   : > { %v2117_v61 = vmul.f32 %v2085_v54, %v2053_v3  ;;  %v5025_v54 = vld [vmem:[#allocation58_spill] sm:$0xff]  ;;  %v5034_v1 = vld [vmem:[#allocation8_spill] sm:$0xff] }
 0x294   : > { %v2535_v17 = vpop.xlane.xlu0 %2534  ;;  %v2275_v56 = vsub.f32 %v2115_v41, %v5015_v20  ;;  %v2090_v9 = vmul.f32 -0.5, %v2058_v26  ;;  %v5028_v20 = vld [vmem:[#allocation50_spill] sm:$0xff] }
 0x295   : > { %2626 = vst.msk [vmem:[%s4631_s28 + $0x10] sm:$0xff] %vm2623_vm2, %v2535_v17  ;;  %v2277_v55 = vsub.f32 %v2117_v61, %v5014_v6  ;;  %v2284_v17 = vsub.f32 %v2124_v2, %v5023_v21  ;;  %v1833_v6 = vld [vmem:[%s4186_s19 + $0x58] sm:$0xff] }
 0x296   : > { %2552 = vadd.xlane.f32.xlu1 %v2551_v10  ;;  %v3198_v43 = vadd.f32 -0.9189385, %v2275_v56  ;;  %v2122_v10 = vmul.f32 %v2090_v9, %v2058_v26  ;;  %v5035_v9 = vld [vmem:[#allocation48_spill] sm:$0xff] }
 0x297   : > { %v3200_v42 = vadd.f32 -0.9189385, %v2277_v55  ;;  %v3207_v3 = vadd.f32 -0.9189385, %v2284_v17  ;;  %v5027_v55 = vld [vmem:[#allocation61_spill] sm:$0xff] }
 0x298   : > { %v2781_v32 = vpop.permute.xlu0 %2780  ;;  %v2499_v22 = vmul.f32 %v3198_v43, %v5018_v27 }
 0x299   : > { %2862 = vst.msk [vmem:[%s4471_s26 + $0x70] sm:$0xff] %vm2623_vm2, %v2781_v32  ;;  %v2501_v62 = vmul.f32 %v3200_v42, %v5016_v0  ;;  %v2282_v32 = vsub.f32 %v2122_v10, %v5024_v12  ;;  %v2508_v61 = vmul.f32 %v3207_v3, %v5026_v18  ;;  %v5036_v12 = vld [vmem:[#allocation47_spill] sm:$0xff] }
 0x29b   : > { %v2548_v33 = vsel %vm2526_vm1, %v2501_v62, 0.0  ;;  %v3205_v50 = vadd.f32 -0.9189385, %v2282_v32  ;;  %v2569_v42 = vsel %vm2526_vm1, %v2508_v61, 0.0  ;;  %v1831_v62 = vld [vmem:[%s4186_s19 + $0x48] sm:$0xff]  ;;  %v1838_v61 = vld [vmem:[%s4186_s19 + $0x80] sm:$0xff] }
 0x29d   : > { %v2506_v56 = vmul.f32 %v3205_v50, %v5028_v20  ;;  %v5038_v50 = vld [vmem:[#allocation36_spill] sm:$0xff] }
 0x29f   : > { %v2563_v43 = vsel %vm2526_vm1, %v2506_v56, 0.0 }
 0x2a7   : > { %2798 = vrot.lane.b32.xlu1 %v4361_v44, %s3686_s15  ;;  %v2542_v44 = vsel %vm2526_vm1, %v2499_v22, 0.0 }
 0x2a9   : > { %v2532_v19 = vpop.xlane.xlu1 %2531 }
 0x2aa   : > { %2625 = vst.msk [vmem:[%s4631_s28 + $0x8] sm:$0xff] %vm2623_vm2, %v2532_v19  ;;  %v5029_v19 = vld [vmem:[#allocation54_spill] sm:$0xff] }
 0x2ab   : > { %2794 = vrot.lane.b32.xlu1 %v5017_v4, %s3686_s15  ;;  %v1865_v0 = vsub.f32 %v1833_v6, %v5029_v19  ;;  %v5030_v4 = vld [vmem:[#allocation5_spill] sm:$0xff] }
 0x2ad   : > { %v2779_v13 = vpop.permute.xlu1 %2778 }
 0x2ae   : > { %2861 = vst.msk [vmem:[%s4471_s26 + $0x68] sm:$0xff] %vm2623_vm2, %v2779_v13  ;;  %2549 = vadd.xlane.f32.xlu0 %v2548_v33  ;;  %v2057_v13 = vmul.f32 %v5030_v4, %v1865_v0  ;;  %v5031_v33 = vld [vmem:[#allocation55_spill] sm:$0xff] }
 0x2af   : > { %v1863_v27 = vsub.f32 %v1831_v62, %v5031_v33  ;;  %v5041_v62 = vld [vmem:[#allocation31_spill] sm:$0xff] }
 0x2b0   : > { %v2089_v22 = vmul.f32 -0.5, %v2057_v13 }
 0x2b2   : > { %2543 = vadd.xlane.f32.xlu0 %v2542_v44  ;;  %v2055_v44 = vmul.f32 %v5032_v35, %v1863_v27  ;;  %v2121_v45 = vmul.f32 %v2089_v22, %v2057_v13  ;;  %v5042_v27 = vld [vmem:[#allocation29_spill] sm:$0xff]  ;;  %v5043_v35 = vld [vmem:[#allocation68_spill] sm:$0xff] }
 0x2b4   : > { %v2087_v60 = vmul.f32 -0.5, %v2055_v44  ;;  %v2281_v14 = vsub.f32 %v2121_v45, %v5033_v31  ;;  %v5044_v45 = vld [vmem:[#allocation60_spill] sm:$0xff]  ;;  %v1837_v31 = vld [vmem:[%s4186_s19 + $0x78] sm:$0xff] }
 0x2b6   : > { %v2119_v49 = vmul.f32 %v2087_v60, %v2055_v44  ;;  %v3204_v5 = vadd.f32 -0.9189385, %v2281_v14  ;;  %v5045_v14 = vld [vmem:[#allocation70_spill] sm:$0xff] }
 0x2b8   : > { %v2279_v26 = vsub.f32 %v2119_v49, %v5034_v1  ;;  %v2505_v21 = vmul.f32 %v3204_v5, %v5035_v9  ;;  %v5047_v1 = vld [vmem:[#allocation63_spill] sm:$0xff] }
 0x2ba   : > { %v3202_v17 = vadd.f32 -0.9189385, %v2279_v26  ;;  %v2560_v10 = vsel %vm2526_vm1, %v2505_v21, 0.0  ;;  %v1869_v26 = vsub.f32 %v1837_v31, %v5047_v1  ;;  %v5048_v21 = vld [vmem:[#allocation9_spill] sm:$0xff]  ;;  %v5056_v31 = vld [vmem:[#allocation38_spill] sm:$0xff]  ;;  %v5057_v1 = vld [vmem:[#allocation43_spill] sm:$0xff] }
 0x2bc   : > { %v2503_v32 = vmul.f32 %v3202_v17, %v5036_v12  ;;  %v2061_v17 = vmul.f32 %v5048_v21, %v1869_v26  ;;  %v5058_v21 = vld [vmem:[#allocation35_spill] sm:$0xff] }
 0x2be   : > { %v2093_v12 = vmul.f32 -0.5, %v2061_v17 }
 0x2c8   : > { %2796 = vrot.lane.b32.xlu0 %v5025_v54, %s3686_s15  ;;  %v1840_v54 = vld [vmem:[%s4186_s19 + $0x90] sm:$0xff] }
 0x2c9   : > { %v2529_v58 = vpop.xlane.xlu0 %2528 }
 0x2ca   : > { %2624 = vst.msk [vmem:[%s4631_s28] sm:$0xff] %vm2623_vm2, %v2529_v58  ;;  %v5037_v58 = vld [vmem:[#allocation69_spill] sm:$0xff] }
 0x2cb   : > { %v1872_v18 = vsub.f32 %v1840_v54, %v5037_v58 }
 0x2cc   : > { %2792 = vrot.lane.b32.xlu0 %v5027_v55, %s3686_s15 }
 0x2cd   : > { %v2777_v41 = vpop.permute.xlu0 %2776  ;;  %v2064_v6 = vmul.f32 %v5038_v50, %v1872_v18 }
 0x2ce   : > { %2860 = vst.msk [vmem:[%s4471_s26 + $0x60] sm:$0xff] %vm2623_vm2, %v2777_v41 }
 0x2cf   : > { %2570 = vadd.xlane.f32.xlu1 %v2569_v42  ;;  %v2096_v41 = vmul.f32 -0.5, %v2064_v6  ;;  %v5040_v42 = vld [vmem:[#allocation34_spill] sm:$0xff] }
 0x2d1   : > { %v2128_v56 = vmul.f32 %v2096_v41, %v2064_v6  ;;  %v5052_v41 = vld [vmem:[#allocation12_spill] sm:$0xff] }
 0x2d3   : > { %2564 = vadd.xlane.f32.xlu1 %v2563_v43  ;;  %v2288_v43 = vsub.f32 %v2128_v56, %v5041_v62  ;;  %v5053_v56 = vld [vmem:[#allocation51_spill] sm:$0xff]  ;;  %v1844_v62 = vld [vmem:[%s4186_s19 + $0xb0] sm:$0xff] }
 0x2d5   : > { %v3211_v33 = vadd.f32 -0.9189385, %v2288_v43 }
 0x2d7   : > { %v2512_v60 = vmul.f32 %v3211_v33, %v5044_v45 }
 0x2d9   : > { %v2581_v49 = vsel %vm2526_vm1, %v2512_v60, 0.0  ;;  %v1848_v60 = vld [vmem:[%s4186_s19 + $0xd0] sm:$0xff] }
 0x2de   : > { %v2547_v63 = vpop.xlane.xlu1 %2546 }
 0x2df   : > { %2630 = vst.msk [vmem:[%s4631_s28 + $0x30] sm:$0xff] %vm2623_vm2, %v2547_v63 }
 0x2e2   : > { %v2541_v29 = vpop.xlane.xlu1 %2540 }
 0x2e3   : > { %2628 = vst.msk [vmem:[%s4631_s28 + $0x20] sm:$0xff] %vm2623_vm2, %v2541_v29  ;;  %v5046_v29 = vld [vmem:[#allocation56_spill] sm:$0xff] }
 0x2e4   : > { %2806 = vrot.lane.b32.xlu1 %v4424_v25, %s3686_s15  ;;  %v2554_v25 = vsel %vm2526_vm1, %v2503_v32, 0.0  ;;  %v5050_v32 = vld [vmem:[#allocation7_spill] sm:$0xff] }
 0x2e6   : > { %v2791_v2 = vpop.permute.xlu1 %2790 }
 0x2e7   : > { %2867 = vst.msk [vmem:[%s4471_s26 + $0x98] sm:$0xff] %vm2623_vm2, %v2791_v2  ;;  %v1835_v2 = vld [vmem:[%s4186_s19 + $0x68] sm:$0xff] }
 0x2e8   : > { %2802 = vrot.lane.b32.xlu1 %v4432_v24, %s3686_s15  ;;  %v5039_v24 = vld [vmem:[#allocation71_spill] sm:$0xff] }
 0x2e9   : > { %v1870_v55 = vsub.f32 %v1838_v61, %v5039_v24  ;;  %v5051_v61 = vld [vmem:[#allocation14_spill] sm:$0xff] }
 0x2ea   : > { %v2787_v3 = vpop.permute.xlu1 %2786 }
 0x2eb   : > { %2561 = vadd.xlane.f32.xlu0 %v2560_v10  ;;  %2865 = vst.msk [vmem:[%s4471_s26 + $0x88] sm:$0xff] %vm2623_vm2, %v2787_v3  ;;  %v2062_v20 = vmul.f32 %v5040_v42, %v1870_v55  ;;  %v5049_v10 = vld [vmem:[#allocation65_spill] sm:$0xff] }
 0x2ec   : > { %v1867_v3 = vsub.f32 %v1835_v2, %v5049_v10 }
 0x2ed   : > { %v2094_v19 = vmul.f32 -0.5, %v2062_v20 }
 0x2ee   : > { %v2059_v54 = vmul.f32 %v5050_v32, %v1867_v3  ;;  %v5059_v3 = vld [vmem:[#allocation42_spill] sm:$0xff] }
 0x2ef   : > { %2555 = vadd.xlane.f32.xlu0 %v2554_v25  ;;  %v2126_v4 = vmul.f32 %v2094_v19, %v2062_v20  ;;  %v2125_v25 = vmul.f32 %v2093_v12, %v2061_v17  ;;  %v1850_v32 = vld [vmem:[%s4186_s19 + $0xe0] sm:$0xff] }
 0x2f0   : > { %v2091_v58 = vmul.f32 -0.5, %v2059_v54 }
 0x2f1   : > { %v2286_v22 = vsub.f32 %v2126_v4, %v5042_v27  ;;  %v2285_v50 = vsub.f32 %v2125_v25, %v5051_v61  ;;  %v1876_v27 = vsub.f32 %v1844_v62, %v4461_v51  ;;  %v1880_v51 = vsub.f32 %v1848_v60, %v4520_v39  ;;  %v5060_v25 = vld [vmem:[#allocation33_spill] sm:$0xff]  ;;  %v5064_v62 = vld [vmem:[#allocation75_spill] sm:$0xff] }
 0x2f2   : > { %v2123_v6 = vmul.f32 %v2091_v58, %v2059_v54  ;;  %v1882_v61 = vsub.f32 %v1850_v32, %v4565_v8  ;;  %v5065_v8 = vld [vmem:[#allocation72_spill] sm:$0xff]  ;;  %v5068_v60 = vld [vmem:[#allocation13_spill] sm:$0xff] }
 0x2f3   : > { %v3209_v63 = vadd.f32 -0.9189385, %v2286_v22  ;;  %v3208_v55 = vadd.f32 -0.9189385, %v2285_v50  ;;  %v2072_v26 = vmul.f32 %v5057_v1, %v1880_v51  ;;  %v1845_v1 = vld [vmem:[%s4186_s19 + $0xb8] sm:$0xff] }
 0x2f4   : > { %v2283_v42 = vsub.f32 %v2123_v6, %v5052_v41  ;;  %v5061_v6 = vld [vmem:[#allocation67_spill] sm:$0xff] }
 0x2f5   : > { %v2510_v5 = vmul.f32 %v3209_v63, %v5046_v29  ;;  %v2509_v19 = vmul.f32 %v3208_v55, %v5053_v56  ;;  %v2104_v10 = vmul.f32 -0.5, %v2072_v26  ;;  %v5062_v41 = vld [vmem:[#allocation39_spill] sm:$0xff]  ;;  %v5063_v56 = vld [vmem:[#allocation44_spill] sm:$0xff] }
 0x2f7   : > { %v2575_v9 = vsel %vm2526_vm1, %v2510_v5, 0.0  ;;  %v2572_v4 = vsel %vm2526_vm1, %v2509_v19, 0.0  ;;  %v2074_v19 = vmul.f32 %v5063_v56, %v1882_v61  ;;  %v5073_v61 = vld [vmem:[#allocation18_spill] sm:$0xff]  ;;  %v5075_v56 = vld [vmem:[#allocation16_spill] sm:$0xff] }
 0x2fe   : > { %v2538_v0 = vpop.xlane.xlu0 %2537 }
 0x2ff   : > { %2627 = vst.msk [vmem:[%s4631_s28 + $0x18] sm:$0xff] %vm2623_vm2, %v2538_v0  ;;  %v3206_v0 = vadd.f32 -0.9189385, %v2283_v42 }
 0x302   : > { %v2789_v13 = vpop.permute.xlu0 %2788 }
 0x303   : > { %2866 = vst.msk [vmem:[%s4471_s26 + $0x90] sm:$0xff] %vm2623_vm2, %v2789_v13  ;;  %v5054_v13 = vld [vmem:[#allocation49_spill] sm:$0xff] }
 0x304   : > { %v2507_v33 = vmul.f32 %v3206_v0, %v5054_v13  ;;  %v1841_v0 = vld [vmem:[%s4186_s19 + $0x98] sm:$0xff] }
 0x305   : > { %2804 = vrot.lane.b32.xlu0 %v5043_v35, %s3686_s15  ;;  %v5055_v35 = vld [vmem:[#allocation40_spill] sm:$0xff]  ;;  %v1873_v13 = vsub.f32 %v1841_v0, %v5065_v8  ;;  %v5076_v8 = vld [vmem:[#allocation21_spill] sm:$0xff] }
 0x306   : > { %v2785_v44 = vpop.permute.xlu0 %2784  ;;  %v2566_v22 = vsel %vm2526_vm1, %v2507_v33, 0.0  ;;  %v5066_v33 = vld [vmem:[#allocation66_spill] sm:$0xff] }
 0x307   : > { %2864 = vst.msk [vmem:[%s4471_s26 + $0x80] sm:$0xff] %vm2623_vm2, %v2785_v44  ;;  %v2068_v44 = vmul.f32 %v5055_v35, %v1876_v27 }
 0x309   : > { %2800 = vrot.lane.b32.xlu0 %v5045_v14, %s3686_s15  ;;  %v2100_v63 = vmul.f32 -0.5, %v2068_v44 }
 0x30b   : > { %v2132_v29 = vmul.f32 %v2100_v63, %v2068_v44  ;;  %v2106_v44 = vmul.f32 -0.5, %v2074_v19  ;;  %v2065_v63 = vmul.f32 %v5068_v60, %v1873_v13 }
 0x30c   : > { %2582 = vadd.xlane.f32.xlu1 %v2581_v49  ;;  %v1846_v49 = vld [vmem:[%s4186_s19 + $0xc0] sm:$0xff] }
 0x30d   : > { %v1878_v2 = vsub.f32 %v1846_v49, %v4525_v23  ;;  %v2292_v17 = vsub.f32 %v2132_v29, %v5058_v21  ;;  %v2136_v23 = vmul.f32 %v2104_v10, %v2072_v26  ;;  %v2097_v26 = vmul.f32 -0.5, %v2065_v63 }
 0x30f   : > { %v2070_v12 = vmul.f32 %v5059_v3, %v1878_v2  ;;  %v3215_v54 = vadd.f32 -0.9189385, %v2292_v17  ;;  %v2296_v42 = vsub.f32 %v2136_v23, %v5062_v41  ;;  %v5070_v2 = vld [vmem:[#allocation11_spill] sm:$0xff]  ;;  %v1877_v3 = vsub.f32 %v1845_v1, %v4483_v28 }
 0x310   : > { %2576 = vadd.xlane.f32.xlu1 %v2575_v9  ;;  %v2129_v32 = vmul.f32 %v2097_v26, %v2065_v63  ;;  %v1851_v63 = vld [vmem:[%s4186_s19 + $0xe8] sm:$0xff] }
 0x31b   : > { %v2559_v18 = vpop.xlane.xlu1 %2558 }
 0x31c   : > { %2634 = vst.msk [vmem:[%s4631_s28 + $0x50] sm:$0xff] %vm2623_vm2, %v2559_v18  ;;  %v2102_v18 = vmul.f32 -0.5, %v2070_v12 }
 0x31f   : > { %v2553_v24 = vpop.xlane.xlu1 %2552 }
 0x320   : > { %2632 = vst.msk [vmem:[%s4631_s28 + $0x40] sm:$0xff] %vm2623_vm2, %v2553_v24  ;;  %v2516_v24 = vmul.f32 %v3215_v54, %v5061_v6  ;;  %v5074_v6 = vld [vmem:[#allocation15_spill] sm:$0xff] }
 0x321   : > { %2810 = vrot.lane.b32.xlu1 %v4499_v52, %s3686_s15  ;;  %v1842_v52 = vld [vmem:[%s4186_s19 + $0xa0] sm:$0xff] }
 0x322   : > { %v1874_v45 = vsub.f32 %v1842_v52, %v4477_v40  ;;  %v3219_v52 = vadd.f32 -0.9189385, %v2296_v42  ;;  %v1847_v42 = vld [vmem:[%s4186_s19 + $0xc8] sm:$0xff] }
 0x323   : > { %v2799_v20 = vpop.permute.xlu1 %2798 }
 0x324   : > { %2871 = vst.msk [vmem:[%s4471_s26 + $0xb8] sm:$0xff] %vm2623_vm2, %v2799_v20  ;;  %v2066_v14 = vmul.f32 %v5056_v31, %v1874_v45  ;;  %v2134_v20 = vmul.f32 %v2102_v18, %v2070_v12  ;;  %v1839_v45 = vld [vmem:[%s4186_s19 + $0x88] sm:$0xff]  ;;  %v5069_v31 = vld [vmem:[#allocation73_spill] sm:$0xff]  ;;  %v2520_v49 = vmul.f32 %v3219_v52, %v4443_v57 }
 0x325   : > { %v1843_v12 = vld [vmem:[%s4186_s19 + $0xa8] sm:$0xff]  ;;  %v1849_v18 = vld [vmem:[%s4186_s19 + $0xd8] sm:$0xff] }
 0x326   : > { %v2098_v5 = vmul.f32 -0.5, %v2066_v14  ;;  %v2605_v21 = vsel %vm2526_vm1, %v2520_v49, 0.0 }
 0x327   : > { %v2795_v43 = vpop.permute.xlu1 %2794 }
 0x328   : > { %2869 = vst.msk [vmem:[%s4471_s26 + $0xa8] sm:$0xff] %vm2623_vm2, %v2795_v43  ;;  %2573 = vadd.xlane.f32.xlu0 %v2572_v4  ;;  %v2130_v40 = vmul.f32 %v2098_v5, %v2066_v14  ;;  %v2593_v4 = vsel %vm2526_vm1, %v2516_v24, 0.0  ;;  %v1871_v14 = vsub.f32 %v1839_v45, %v5069_v31  ;;  %v2138_v5 = vmul.f32 %v2106_v44, %v2074_v19  ;;  %v5079_v45 = vld [vmem:[#allocation19_spill] sm:$0xff] }
 0x329   : > { %v2617_v24 = vsel %vm2526_vm1, %v4596_v34, 0.0  ;;  %v1879_v34 = vsub.f32 %v1847_v42, %v4538_v48  ;;  %v5080_v48 = vld [vmem:[#allocation53_spill] sm:$0xff] }
 0x32a   : > { %v2290_v58 = vsub.f32 %v2130_v40, %v5060_v25  ;;  %v5071_v40 = vld [vmem:[#allocation41_spill] sm:$0xff] }
 0x32b   : > { %v2298_v10 = vsub.f32 %v2138_v5, %v5071_v40  ;;  %v2071_v60 = vmul.f32 %v5079_v45, %v1879_v34 }
 0x32c   : > { %2567 = vadd.xlane.f32.xlu0 %v2566_v22  ;;  %v3213_v55 = vadd.f32 -0.9189385, %v2290_v58  ;;  %v5067_v22 = vld [vmem:[#allocation37_spill] sm:$0xff] }
 0x32d   : > { %v2294_v35 = vsub.f32 %v2134_v20, %v5067_v22  ;;  %v3221_v25 = vadd.f32 -0.9189385, %v2298_v10  ;;  %v5072_v58 = vld [vmem:[#allocation17_spill] sm:$0xff]  ;;  %v5078_v22 = vld [vmem:[#allocation22_spill] sm:$0xff]  ;;  %v2103_v26 = vmul.f32 -0.5, %v2071_v60 }
 0x32e   : > { %v2514_v27 = vmul.f32 %v3213_v55, %v5066_v33  ;;  %v2069_v23 = vmul.f32 %v5072_v58, %v1877_v3  ;;  %v5082_v10 = vld [vmem:[#allocation25_spill] sm:$0xff] }
 0x32f   : > { %v3217_v29 = vadd.f32 -0.9189385, %v2294_v35  ;;  %v2522_v55 = vmul.f32 %v3221_v25, %v4453_v53  ;;  %v5077_v53 = vld [vmem:[#allocation57_spill] sm:$0xff]  ;;  %v5084_v25 = vld [vmem:[#allocation24_spill] sm:$0xff] }
 0x330   : > { %v2587_v51 = vsel %vm2526_vm1, %v2514_v27, 0.0  ;;  %v2101_v41 = vmul.f32 -0.5, %v2069_v23 }
 0x331   : > { %v2518_v17 = vmul.f32 %v3217_v29, %v4414_v37  ;;  %v2289_v37 = vsub.f32 %v2129_v32, %v5073_v61  ;;  %v5083_v32 = vld [vmem:[#allocation23_spill] sm:$0xff] }
 0x333   : > { %v2599_v54 = vsel %vm2526_vm1, %v2518_v17, 0.0  ;;  %v3212_v20 = vadd.f32 -0.9189385, %v2289_v37 }
 0x337   : > { %v2550_v9 = vpop.xlane.xlu0 %2549 }
 0x338   : > { %2631 = vst.msk [vmem:[%s4631_s28 + $0x38] sm:$0xff] %vm2623_vm2, %v2550_v9  ;;  %v2063_v9 = vmul.f32 %v5070_v2, %v1871_v14  ;;  %v1883_v2 = vsub.f32 %v1851_v63, %v4578_v47 }
 0x33a   : > { %v2095_v57 = vmul.f32 -0.5, %v2063_v9 }
 0x33b   : > { %v2544_v39 = vpop.xlane.xlu0 %2543 }
 0x33c   : > { %2629 = vst.msk [vmem:[%s4631_s28 + $0x28] sm:$0xff] %vm2623_vm2, %v2544_v39  ;;  %v1875_v39 = vsub.f32 %v1843_v12, %v4503_v36  ;;  %v1881_v36 = vsub.f32 %v1849_v18, %v4533_v38  ;;  %v2513_v38 = vmul.f32 %v3212_v20, %v5077_v53  ;;  %v2135_v12 = vmul.f32 %v2103_v26, %v2071_v60 }
 0x33e   : > { %v2067_v28 = vmul.f32 %v5074_v6, %v1875_v39  ;;  %v2073_v13 = vmul.f32 %v5076_v8, %v1881_v36  ;;  %v2584_v31 = vsel %vm2526_vm1, %v2513_v38, 0.0  ;;  %v2295_v58 = vsub.f32 %v2135_v12, %v5084_v25  ;;  %v5085_v6 = vld [vmem:[#allocation26_spill] sm:$0xff] }
 0x33f   : > { %v2797_v50 = vpop.permute.xlu0 %2796 }
 0x340   : > { %2870 = vst.msk [vmem:[%s4471_s26 + $0xb0] sm:$0xff] %vm2623_vm2, %v2797_v50  ;;  %v2127_v50 = vmul.f32 %v2095_v57, %v2063_v9  ;;  %v2099_v0 = vmul.f32 -0.5, %v2067_v28  ;;  %v2105_v44 = vmul.f32 -0.5, %v2073_v13  ;;  %v2075_v57 = vmul.f32 %v5083_v32, %v1883_v2 }
 0x341   : > { %v3218_v61 = vadd.f32 -0.9189385, %v2295_v58 }
 0x342   : > { %2808 = vrot.lane.b32.xlu0 %v5064_v62, %s3686_s15  ;;  %v2287_v19 = vsub.f32 %v2127_v50, %v5075_v56  ;;  %v2131_v27 = vmul.f32 %v2099_v0, %v2067_v28  ;;  %v2137_v1 = vmul.f32 %v2105_v44, %v2073_v13 }
 0x343   : > { %v2793_v43 = vpop.permute.xlu0 %2792  ;;  %v2519_v50 = vmul.f32 %v3218_v61, %v4398_v7 }
 0x344   : > { %2868 = vst.msk [vmem:[%s4471_s26 + $0xa0] sm:$0xff] %vm2623_vm2, %v2793_v43  ;;  %v2611_v43 = vsel %vm2526_vm1, %v2522_v55, 0.0  ;;  %v3210_v33 = vadd.f32 -0.9189385, %v2287_v19  ;;  %v2297_v3 = vsub.f32 %v2137_v1, %v5082_v10 }
 0x345   : > { %2594 = vadd.xlane.f32.xlu1 %v2593_v4  ;;  %v2133_v4 = vmul.f32 %v2101_v41, %v2069_v23  ;;  %v2107_v23 = vmul.f32 -0.5, %v2075_v57  ;;  %v2620_v41 = vsel %vm2526_vm1, %v4600_v11, 0.0  ;;  %v5086_v11 = vld [vmem:[#allocation74_spill] sm:$0xff] }
 0x346   : > { %v2511_v14 = vmul.f32 %v3210_v33, %v5080_v48 }
 0x347   : > { %v2293_v35 = vsub.f32 %v2133_v4, %v5078_v22  ;;  %v2139_v37 = vmul.f32 %v2107_v23, %v2075_v57 }
 0x348   : > { %v2578_v9 = vsel %vm2526_vm1, %v2511_v14, 0.0 }
 0x349   : > { %2588 = vadd.xlane.f32.xlu1 %v2587_v51  ;;  %v5081_v51 = vld [vmem:[#allocation20_spill] sm:$0xff]  ;;  %v3216_v5 = vadd.f32 -0.9189385, %v2293_v35  ;;  %v2299_v28 = vsub.f32 %v2139_v37, %v5085_v6 }
 0x34a   : > { %v2291_v49 = vsub.f32 %v2131_v27, %v5081_v51 }
 0x34b   : > { %v2517_v40 = vmul.f32 %v3216_v5, %v4382_v59  ;;  %v3222_v55 = vadd.f32 -0.9189385, %v2299_v28 }
 0x34d   : > { %2606 = vadd.xlane.f32.xlu1 %v2605_v21  ;;  %v3214_v21 = vadd.f32 -0.9189385, %v2291_v49  ;;  %v2596_v47 = vsel %vm2526_vm1, %v2517_v40, 0.0  ;;  %v2523_v7 = vmul.f32 %v3222_v55, %v4445_v46 }
 0x34f   : > { %v2515_v39 = vmul.f32 %v3214_v21, %v4349_v15  ;;  %v2614_v42 = vsel %vm2526_vm1, %v2523_v7, 0.0 }
 0x351   : > { %2600 = vadd.xlane.f32.xlu1 %v2599_v54  ;;  %v3220_v54 = vadd.f32 -0.9189385, %v2297_v3  ;;  %v2590_v59 = vsel %vm2526_vm1, %v2515_v39, 0.0 }
 0x353   : > { %v2521_v18 = vmul.f32 %v3220_v54, %v4416_v16 }
 0x355   : > { %2618 = vadd.xlane.f32.xlu1 %v2617_v24  ;;  %v2608_v15 = vsel %vm2526_vm1, %v2521_v18, 0.0 }
 0x358   : > { %v2571_v62 = vpop.xlane.xlu1 %2570 }
 0x359   : > { %2638 = vst.msk [vmem:[%s4631_s28 + $0x70] sm:$0xff] %vm2623_vm2, %v2571_v62  ;;  %2612 = vadd.xlane.f32.xlu1 %v2611_v43 }
 0x35c   : > { %v2565_v52 = vpop.xlane.xlu1 %2564 }
 0x35d   : > { %2636 = vst.msk [vmem:[%s4631_s28 + $0x60] sm:$0xff] %vm2623_vm2, %v2565_v52 }
 0x360   : > { %v2807_v29 = vpop.permute.xlu1 %2806 }
 0x361   : > { %2875 = vst.msk [vmem:[%s4471_s26 + $0xd8] sm:$0xff] %vm2623_vm2, %v2807_v29  ;;  %2585 = vadd.xlane.f32.xlu0 %v2584_v31 }
 0x364   : > { %v2803_v17 = vpop.permute.xlu1 %2802 }
 0x365   : > { %2873 = vst.msk [vmem:[%s4471_s26 + $0xc8] sm:$0xff] %vm2623_vm2, %v2803_v17  ;;  %2579 = vadd.xlane.f32.xlu0 %v2578_v9 }
 0x369   : > { %2597 = vadd.xlane.f32.xlu0 %v2596_v47 }
 0x36a   : > { %2814 = vrot.lane.b32.xlu1 %v4481_v30, %s3686_s15  ;;  %v2602_v30 = vsel %vm2526_vm1, %v2519_v50, 0.0 }
 0x36d   : > { %2591 = vadd.xlane.f32.xlu0 %v2590_v59 }
 0x371   : > { %2609 = vadd.xlane.f32.xlu0 %v2608_v15 }
 0x374   : > { %v2562_v24 = vpop.xlane.xlu0 %2561 }
 0x375   : > { %2635 = vst.msk [vmem:[%s4631_s28 + $0x58] sm:$0xff] %vm2623_vm2, %v2562_v24  ;;  %2603 = vadd.xlane.f32.xlu0 %v2602_v30 }
 0x378   : > { %v2556_v16 = vpop.xlane.xlu0 %2555 }
 0x379   : > { %2633 = vst.msk [vmem:[%s4631_s28 + $0x48] sm:$0xff] %vm2623_vm2, %v2556_v16  ;;  %2621 = vadd.xlane.f32.xlu0 %v2620_v41 }
 0x37c   : > { %v2805_v36 = vpop.permute.xlu0 %2804 }
 0x37d   : > { %2874 = vst.msk [vmem:[%s4471_s26 + $0xd0] sm:$0xff] %vm2623_vm2, %v2805_v36  ;;  %2615 = vadd.xlane.f32.xlu0 %v2614_v42 }
 0x380   : > { %v2801_v20 = vpop.permute.xlu0 %2800 }
 0x381   : > { %2872 = vst.msk [vmem:[%s4471_s26 + $0xc0] sm:$0xff] %vm2623_vm2, %v2801_v20 }
 0x393   : > { %2812 = vrot.lane.b32.xlu0 %v5086_v11, %s3686_s15 }
 0x395   : > { %v2583_v46 = vpop.xlane.xlu1 %2582 }
 0x396   : > { %2642 = vst.msk [vmem:[%s4631_s28 + $0x90] sm:$0xff] %vm2623_vm2, %v2583_v46 }
 0x399   : > { %v2577_v56 = vpop.xlane.xlu1 %2576 }
 0x39a   : > { %2640 = vst.msk [vmem:[%s4631_s28 + $0x80] sm:$0xff] %vm2623_vm2, %v2577_v56 }
 0x39d   : > { %v2811_v19 = vpop.permute.xlu1 %2810 }
 0x39e   : > { %2877 = vst.msk [vmem:[%s4471_s26 + $0xe8] sm:$0xff] %vm2623_vm2, %v2811_v19 }
 0x3b1   : > { %v2574_v0 = vpop.xlane.xlu0 %2573 }
 0x3b2   : > { %2639 = vst.msk [vmem:[%s4631_s28 + $0x78] sm:$0xff] %vm2623_vm2, %v2574_v0 }
 0x3b5   : > { %v2568_v62 = vpop.xlane.xlu0 %2567 }
 0x3b6   : > { %2637 = vst.msk [vmem:[%s4631_s28 + $0x68] sm:$0xff] %vm2623_vm2, %v2568_v62 }
 0x3b9   : > { %v2809_v43 = vpop.permute.xlu0 %2808 }
 0x3ba   : > { %2876 = vst.msk [vmem:[%s4471_s26 + $0xe0] sm:$0xff] %vm2623_vm2, %v2809_v43 }
 0x3ce   : > { %v2595_v4 = vpop.xlane.xlu1 %2594 }
 0x3cf   : > { %2646 = vst.msk [vmem:[%s4631_s28 + $0xb0] sm:$0xff] %vm2623_vm2, %v2595_v4 }
 0x3d2   : > { %v2589_v8 = vpop.xlane.xlu1 %2588 }
 0x3d3   : > { %2644 = vst.msk [vmem:[%s4631_s28 + $0xa0] sm:$0xff] %vm2623_vm2, %v2589_v8 }
 0x3d6   : > { %v2607_v13 = vpop.xlane.xlu1 %2606 }
 0x3d7   : > { %2650 = vst.msk [vmem:[%s4631_s28 + $0xd0] sm:$0xff] %vm2623_vm2, %v2607_v13 }
 0x3da   : > { %v2601_v34 = vpop.xlane.xlu1 %2600 }
 0x3db   : > { %2648 = vst.msk [vmem:[%s4631_s28 + $0xc0] sm:$0xff] %vm2623_vm2, %v2601_v34 }
 0x3de   : > { %v2619_v53 = vpop.xlane.xlu1 %2618 }
 0x3df   : > { %2654 = vst.msk [vmem:[%s4631_s28 + $0xf0] sm:$0xff] %vm2623_vm2, %v2619_v53 }
 0x3e2   : > { %v2613_v38 = vpop.xlane.xlu1 %2612 }
 0x3e3   : > { %2652 = vst.msk [vmem:[%s4631_s28 + $0xe0] sm:$0xff] %vm2623_vm2, %v2613_v38 }
 0x3e6   : > { %v2815_v33 = vpop.permute.xlu1 %2814 }
 0x3e7   : > { %2879 = vst.msk [vmem:[%s4471_s26 + $0xf8] sm:$0xff] %vm2623_vm2, %v2815_v33 }
 0x3ea   : > { %v2586_v27 = vpop.xlane.xlu0 %2585 }
 0x3eb   : > { %2643 = vst.msk [vmem:[%s4631_s28 + $0x98] sm:$0xff] %vm2623_vm2, %v2586_v27 }
 0x3ee   : > { %v2580_v52 = vpop.xlane.xlu0 %2579 }
 0x3ef   : > { %2641 = vst.msk [vmem:[%s4631_s28 + $0x88] sm:$0xff] %vm2623_vm2, %v2580_v52 }
 0x3f2   : > { %v2598_v22 = vpop.xlane.xlu0 %2597 }
 0x3f3   : > { %2647 = vst.msk [vmem:[%s4631_s28 + $0xb8] sm:$0xff] %vm2623_vm2, %v2598_v22 }
 0x3f6   : > { %v2592_v35 = vpop.xlane.xlu0 %2591 }
 0x3f7   : > { %2645 = vst.msk [vmem:[%s4631_s28 + $0xa8] sm:$0xff] %vm2623_vm2, %v2592_v35 }
 0x3fa   : > { %v2610_v44 = vpop.xlane.xlu0 %2609 }
 0x3fb   : > { %2651 = vst.msk [vmem:[%s4631_s28 + $0xd8] sm:$0xff] %vm2623_vm2, %v2610_v44 }
 0x3fe   : > { %v2604_v45 = vpop.xlane.xlu0 %2603 }
 0x3ff   : > { %2649 = vst.msk [vmem:[%s4631_s28 + $0xc8] sm:$0xff] %vm2623_vm2, %v2604_v45 }
 0x402   : > { %v2622_v60 = vpop.xlane.xlu0 %2621 }
 0x403   : > { %2655 = vst.msk [vmem:[%s4631_s28 + $0xf8] sm:$0xff] %vm2623_vm2, %v2622_v60 }
 0x406   : > { %v2616_v63 = vpop.xlane.xlu0 %2615 }
 0x407   : > { %2653 = vst.msk [vmem:[%s4631_s28 + $0xe8] sm:$0xff] %vm2623_vm2, %v2616_v63 }
 0x40a   : > { %v2813_v31 = vpop.permute.xlu0 %2812 }
 0x40b   : > { %2878 = vst.msk [vmem:[%s4471_s26 + $0xf0] sm:$0xff] %vm2623_vm2, %v2813_v31 }
 0x40c PF: > { %s21_s13 = sadd.s32 1, %s3682_s13  }
 0x40d   : > { %p18_p4 = scmp.ge.s32.totalorder %s21_s13, 16  }
 0x40f   :  { %20 = sbr.rel (!%p18_p4) target bundleno = 1 (0x1), region = 115 }

// kernel: monet_forward.35
= control target key start
LH: loop header
LB: loop body
LE: loop exit
PB: predicated region body
PF: predicated region fallthrough
CT: control target
= control target key end

     0   :  { %s377_s9 = smov 0   ;;  %s423_s0 = inlined_call_operand.vmem [shape: f32[2,7,256], index: 0, kind: input, shape index: {}]   ;;  %s424_s1 = inlined_call_operand.vmem [shape: f32[2,7,256], index: 1, kind: input, shape index: {}]   ;;  %s425_s2 = inlined_call_operand.vmem [shape: f32[2,1,1], index: 2, kind: output, shape index: {}]  }
   0x1 LB: > { %s317_s10 = sadd.s32 4294967295, %s360_s9   ;;  %p321_p0 = scmp.ge.s32.totalorder %s360_s9, 1  ;;  %s360_s9 = sphi %s377_s9, %s12_s9  }
   0x2   : > { %p122_p1 = scmp.lt.s32.totalorder %s360_s9, 3 }
   0x4   : > { %p123_p2 = pnand %p321_p0, %p122_p1 }
   0x5   : > { %p147_p3 = scmp.lt.s32.totalorder (!%p123_p2), %s317_s10, 1 }
   0x6   : > { %126 = sbr.rel (%p123_p2) target bundleno = 240 (0xf0), region = 28 }
   0xb   : > { %s427_s10 = smov (!%p147_p3, %s317_s10), 1  ;;  %vm162_vm0 = vcmask 1046528   ;;  %vm256_vm3 = vcmask 0  }
   0xc   : > { %s328_s11 = sshll.u32 %s427_s10, 4  ;;  %s159_s20 = scalar_lea.vmem %s425_s2, %s427_s10 }
   0xd   : > { %s151_s14 = scalar_lea.vmem %s423_s0, %s328_s11  ;;  %s156_s17 = scalar_lea.vmem %s424_s1, %s328_s11 }
   0xe   : > { %v160_v0 = vld [vmem:[%s151_s14] sm:$0x7f]  ;;  %v161_v1 = vld [vmem:[%s151_s14 + $0x8] sm:$0x7f] }
   0xf   : > { %v394_v2 = vld [vmem:[%s156_s17] sm:$0x7f]  ;;  %v163_v3 = vsel %vm162_vm0, %v160_v0, 0.0  ;;  %v170_v4 = vsel %vm162_vm0, %v161_v1, 0.0  ;;  %v398_v5 = vld [vmem:[%s156_s17 + $0x8] sm:$0x7f] }
  0x10   : > { %v183_v6 = vsel %vm162_vm0, %v394_v2, -inf  ;;  %v164_v7 = vrot.slane %v163_v3, 4  ;;  %v171_v8 = vrot.slane %v170_v4, 4  ;;  %v190_v10 = vsel %vm162_vm0, %v398_v5, -inf }
  0x11   : > { %v184_v9 = vrot.slane %v183_v6, 4  ;;  %v191_v11 = vrot.slane %v190_v10, 4 }
  0x12   : > { %v165_v12 = vadd.f32 %v164_v7, %v163_v3  ;;  %v172_v13 = vadd.f32 %v171_v8, %v170_v4 }
  0x13   : > { %v185_v14 = vmax.f32 %v183_v6, %v184_v9  ;;  %v192_v15 = vmax.f32 %v190_v10, %v191_v11 }
  0x14   : > { %v166_v16 = vrot.slane %v165_v12, 2  ;;  %v173_v17 = vrot.slane %v172_v13, 2 }
  0x15   : > { %v186_v18 = vrot.slane %v185_v14, 2  ;;  %v193_v19 = vrot.slane %v192_v15, 2 }
  0x16   : > { %v167_v20 = vadd.f32 %v166_v16, %v165_v12  ;;  %v174_v21 = vadd.f32 %v173_v17, %v172_v13 }
  0x17   : > { %v187_v22 = vmax.f32 %v185_v14, %v186_v18  ;;  %v194_v23 = vmax.f32 %v192_v15, %v193_v19 }
  0x18   : > { %v168_v24 = vrot.slane %v167_v20, 1  ;;  %v175_v25 = vrot.slane %v174_v21, 1 }
  0x19   : > { %v188_v26 = vrot.slane %v187_v22, 1  ;;  %v195_v27 = vrot.slane %v194_v23, 1 }
  0x1a   : > { %v169_v28 = vadd.f32 %v168_v24, %v167_v20  ;;  %v176_v30 = vadd.f32 %v175_v25, %v174_v21 }
  0x1b   : > { %v189_v29 = vmax.f32 %v187_v22, %v188_v26  ;;  %v196_v31 = vmax.f32 %v194_v23, %v195_v27 }
  0x1c   : > { %338 = vrcp.f32 %v169_v28 }
  0x1d   : > { %v197_v32 = vsub.f32 %v394_v2, %v189_v29  ;;  %v198_v33 = vsub.f32 %v398_v5, %v196_v31  ;;  %340 = vrcp.f32 %v176_v30 }
  0x1f   : > { %v199_v34 = vmul.f32 1.442695, %v197_v32  ;;  %v201_v35 = vmul.f32 1.442695, %v198_v33 }
  0x21   : > { %342 = vpow2.f32 %v199_v34 }
  0x22   : > { %344 = vpow2.f32 %v201_v35 }
  0x29   : > { %v339_v36 = vpop.eup %338 }
  0x2a   : > { %v341_v37 = vpop.eup %340  ;;  %v179_v41 = vmul.f32 %v339_v36, %v160_v0 }
  0x2b   : > { %v180_v44 = vmul.f32 %v341_v37, %v161_v1 }
  0x2c   : > { %vm225_vm1 = vcmp.gt.f32.partialorder %v179_v41, 0.0 }
  0x2d   : > { %vm226_vm2 = vcmp.gt.f32.partialorder %v180_v44, 0.0  ;;  %v227_v52 = vsel %vm225_vm1, %v179_v41, 1.0 }
  0x2e   : > { %v343_v38 = vpop.eup %342  ;;  %v228_v54 = vsel %vm226_vm2, %v180_v44, 1.0  ;;  %346 = vlog2.f32 %v227_v52 }
  0x2f   : > { %v345_v39 = vpop.eup %344  ;;  %v203_v40 = vsel %vm162_vm0, %v343_v38, 0.0  ;;  %348 = vlog2.f32 %v228_v54 }
  0x30   : > { %v204_v42 = vrot.slane %v203_v40, 4  ;;  %v210_v43 = vsel %vm162_vm0, %v345_v39, 0.0 }
  0x31   : > { %v211_v45 = vrot.slane %v210_v43, 4 }
  0x32   : > { %v205_v46 = vadd.f32 %v204_v42, %v203_v40 }
  0x33   : > { %v212_v47 = vadd.f32 %v211_v45, %v210_v43 }
  0x34   : > { %v206_v48 = vrot.slane %v205_v46, 2 }
  0x35   : > { %v213_v49 = vrot.slane %v212_v47, 2 }
  0x36   : > { %v207_v50 = vadd.f32 %v206_v48, %v205_v46 }
  0x37   : > { %v214_v51 = vadd.f32 %v213_v49, %v212_v47 }
  0x38   : > { %v208_v53 = vrot.slane %v207_v50, 1 }
  0x39   : > { %v215_v55 = vrot.slane %v214_v51, 1 }
  0x3a   : > { %v209_v56 = vadd.f32 %v208_v53, %v207_v50 }
  0x3b   : > { %v216_v57 = vadd.f32 %v215_v55, %v214_v51  ;;  %v347_v58 = vpop.eup %346 }
  0x3c   : > { %350 = vlog2.f32 %v209_v56  ;;  %v349_v59 = vpop.eup %348  ;;  %v230_v1 = vmul.f32 0.6931472, %v347_v58 }
  0x3d   : > { %352 = vlog2.f32 %v216_v57  ;;  %v232_v4 = vmul.f32 0.6931472, %v349_v59 }
  0x49   : > { %v351_v60 = vpop.eup %350 }
  0x4a   : > { %v353_v61 = vpop.eup %352  ;;  %v218_v62 = vmul.f32 0.6931472, %v351_v60 }
  0x4b   : > { %v220_v63 = vmul.f32 0.6931472, %v353_v61 }
  0x4c   : > { %v221_v0 = vadd.f32 %v218_v62, %v189_v29 }
  0x4d   : > { %v222_v3 = vadd.f32 %v220_v63, %v196_v31 }
  0x4e   : > { %v223_v6 = vsub.f32 %v394_v2, %v221_v0 }
  0x4f   : > { %v224_v7 = vsub.f32 %v398_v5, %v222_v3 }
  0x50   : > { %v233_v8 = vsub.f32 %v230_v1, %v223_v6 }
  0x51   : > { %v234_v9 = vsub.f32 %v232_v4, %v224_v7 }
  0x52   : > { %v235_v10 = vmul.f32 %v233_v8, %v179_v41 }
  0x53   : > { %v236_v11 = vmul.f32 %v234_v9, %v180_v44 }
  0x54   : > { %v237_v12 = vsel %vm225_vm1, %v235_v10, 0.0 }
  0x55   : > { %v238_v13 = vsel %vm226_vm2, %v236_v11, 0.0  ;;  %v239_v14 = vsel %vm162_vm0, %v237_v12, 0.0 }
  0x56   : > { %v240_v15 = vrot.slane %v239_v14, 4  ;;  %v246_v16 = vsel %vm162_vm0, %v238_v13, 0.0 }
  0x57   : > { %v247_v17 = vrot.slane %v246_v16, 4 }
  0x58   : > { %v241_v18 = vadd.f32 %v240_v15, %v239_v14 }
  0x59   : > { %v248_v19 = vadd.f32 %v247_v17, %v246_v16 }
  0x5a   : > { %v242_v2 = vrot.slane %v241_v18, 2 }
  0x5b   : > { %v249_v20 = vrot.slane %v248_v19, 2 }
  0x5c   : > { %v243_v5 = vadd.f32 %v242_v2, %v241_v18 }
  0x5d   : > { %v250_v21 = vadd.f32 %v249_v20, %v248_v19 }
  0x5e   : > { %v244_v22 = vrot.slane %v243_v5, 1 }
  0x5f   : > { %v251_v23 = vrot.slane %v250_v21, 1 }
  0x60   : > { %v245_v24 = vadd.f32 %v244_v22, %v243_v5 }
  0x61   : > { %v252_v25 = vadd.f32 %v251_v23, %v250_v21 }
  0x63   : > { %v253_v26 = vadd.f32 %v252_v25, %v245_v24 }
  0x65   : > { %254 = vadd.xlane.f32.xlu0 %v253_v26 }
  0xee   : > { %v255_v27 = vpop.xlane.xlu0 %254 }
  0xef   : > { %257 = vst.msk [vmem:[%s159_s20] sm:$0x1] %vm256_vm3, %v255_v27 }
  0xf0 PF: > { %s12_s9 = sadd.s32 1, %s360_s9  }
  0xf1   : > { %p9_p4 = scmp.ge.s32.totalorder %s12_s9, 4  }
  0xf3   :  { %11 = sbr.rel (!%p9_p4) target bundleno = 1 (0x1), region = 61 }

</bundles_post_ra>
